<compile_context>
chip_gen: v5e
topology: v5e:2x2
jax: 0.10.0
libtpu: 0.0.40
codegen_flags: <defaults>
</compile_context>

<pallas_src>
import math
import numpy as np
import jax
import jax.numpy as jnp
from jax.experimental import pallas as pl
from jax.experimental.pallas import tpu as pltpu


def _round_up(x, m):
    return ((x + m - 1) // m) * m


# --------------------------------------------------------------------------
# Pallas kernel: fused filter (sin-linear) + modulated linear + output linear
# Feature-major layout: N on lanes, features on sublanes.
# --------------------------------------------------------------------------
def bacon_kernel(coords_ref, z_ref, wf_ref, bf_ref, wl_ref, wo_ref, bo_ref,
                 newz_ref, out_ref):
    # coords_ref: [in_size, tile_n]   z_ref:  [hidden, tile_n]
    # wf_ref:     [hidden, in_size]   bf_ref: [hidden, 1]
    # wl_ref:     [hidden, hidden]    wo_ref: [out_size, hidden]   bo_ref: [out_size, 1]
    in_size = wf_ref.shape[1]

    # filtered = sin(Wf @ coords^T + bf).  K == in_size (3) is far too small for the
    # MXU, so do it as `in_size` broadcast multiply-adds on the VPU (keeps MXU free).
    pre = wf_ref[:, 0:1] * coords_ref[0:1, :]                       # [hidden, tile_n]
    for d in range(1, in_size):                                     # static unroll
        pre = pre + wf_ref[:, d:d + 1] * coords_ref[d:d + 1, :]
    filt = jnp.sin(pre + bf_ref[...])                               # [hidden, tile_n]

    # new_z = (Wl @ z^T) * filtered          (linear has no bias in "new" init path)
    lin = jnp.dot(wl_ref[...], z_ref[...],
                  preferred_element_type=jnp.float32)               # [hidden, tile_n]
    new_z = lin * filt

    # out = Wo @ new_z + bo                   (relu=False path)
    out = jnp.dot(wo_ref[...], new_z,
                  preferred_element_type=jnp.float32) + bo_ref[...]  # [out_size, tile_n]

    newz_ref[...] = new_z.astype(newz_ref.dtype)
    out_ref[...] = out.astype(out_ref.dtype)


def bacon_layer_pallas(coords, z, wf, bf, wl, wo, bo, *, tile_n=1024,
                       newz_dtype=jnp.float32, out_dtype=jnp.float32):
    """coords: [N, in_size], z: [N, hidden].
    Weights in PyTorch layout: wf [hidden, in_size], bf [hidden],
    wl [hidden, hidden], wo [out_size, hidden], bo [out_size].
    Returns (new_z [N, hidden], out [N, out_size])."""
    N, in_size = coords.shape
    hidden = z.shape[1]
    out_size = wo.shape[0]

    # Lane-aligned row tile; pad N up to a multiple of tile_n instead of asserting.
    tile_n = max(128, _round_up(int(tile_n), 128))
    tile_n = min(tile_n, _round_up(N, 128))
    n_pad = _round_up(N, tile_n)
    grid = (n_pad // tile_n,)

    if n_pad != N:
        coords = jnp.pad(coords, ((0, n_pad - N), (0, 0)))
        z = jnp.pad(z, ((0, n_pad - N), (0, 0)))

    # Wrapper-side layout plumbing: put N on the lane axis for the kernel.
    coords_t = coords.T                         # [in_size, n_pad]
    z_t = z.T                                   # [hidden, n_pad]
    bf_c = bf.reshape(hidden, 1).astype(jnp.float32)
    bo_c = bo.reshape(out_size, 1).astype(jnp.float32)

    newz_t, out_t = pl.pallas_call(
        bacon_kernel,
        out_shape=(jax.ShapeDtypeStruct((hidden, n_pad), newz_dtype),
                   jax.ShapeDtypeStruct((out_size, n_pad), out_dtype)),
        grid_spec=pl.GridSpec(
            grid=grid,
            in_specs=[
                pl.BlockSpec((in_size, tile_n), lambda i: (0, i)),   # coords^T tile
                pl.BlockSpec((hidden, tile_n), lambda i: (0, i)),    # z^T tile
                pl.BlockSpec((hidden, in_size), lambda i: (0, 0)),   # Wf (full)
                pl.BlockSpec((hidden, 1), lambda i: (0, 0)),         # bf
                pl.BlockSpec((hidden, hidden), lambda i: (0, 0)),    # Wl (full)
                pl.BlockSpec((out_size, hidden), lambda i: (0, 0)),  # Wo (full)
                pl.BlockSpec((out_size, 1), lambda i: (0, 0)),       # bo
            ],
            out_specs=(
                pl.BlockSpec((hidden, tile_n), lambda i: (0, i)),    # new_z^T
                pl.BlockSpec((out_size, tile_n), lambda i: (0, i)),  # out^T
            ),
        ),
        compiler_params=pltpu.CompilerParams(
            dimension_semantics=("parallel",)),
    )(coords_t, z_t, wf, bf_c, wl, wo, bo_c)

    # Back to the module's [N, features] convention (callers that can consume
    # feature-major data can skip this transpose entirely).
    return newz_t[:, :N].T, out_t[:, :N].T


# --------------------------------------------------------------------------
# Deterministic parameter initialization (mirrors the PyTorch __init__ recipes)
# Weights are returned in PyTorch layout ([out_features, in_features]).
# --------------------------------------------------------------------------
def init_bacon_params(key, in_size, hidden, out_size, band, lambdas):
    lambda1, lambda2 = lambdas
    k_idx, k_wf, k_bf, k_wl, k_wo, k_bo = jax.random.split(key, 6)

    # ContinuousCustomizedFourierLayer, in_features == 3: build direction set p
    lst = []
    for i in range(-1, 2):
        for j in range(-1, 2):
            lst.append([i, j, 1])
    for i in range(-1, 2):
        lst.append([i, 1, 0])
    lst.append([1, 0, 0])
    p = jnp.asarray(lst, dtype=jnp.float32)                       # [13, 3]

    idx = jax.random.randint(k_idx, (hidden,), 0, p.shape[0])
    r = p[idx]                                                    # [hidden, 3]

    ws = jnp.asarray(band, dtype=jnp.float32)                     # [in_size]
    u = jax.random.uniform(k_wf, (hidden, in_size))
    # per-column: (rand*2*ws - ws)*lambda1 + lambda2*ws*r[:, i]
    wf = (u * 2.0 * ws - ws) * lambda1 + lambda2 * ws * r         # [hidden, in_size]
    bf = jax.random.uniform(k_bf, (hidden,), minval=-math.pi, maxval=math.pi)

    # mfn_weights_init: uniform(-sqrt(6/fan_in), sqrt(6/fan_in))
    s_l = math.sqrt(6.0 / hidden)
    wl = jax.random.uniform(k_wl, (hidden, hidden), minval=-s_l, maxval=s_l)
    s_o = math.sqrt(6.0 / hidden)
    wo = jax.random.uniform(k_wo, (out_size, hidden), minval=-s_o, maxval=s_o)
    # out layer bias: PyTorch nn.Linear default init uniform(-1/sqrt(fan_in), ..)
    s_b = 1.0 / math.sqrt(hidden)
    bo = jax.random.uniform(k_bo, (out_size,), minval=-s_b, maxval=s_b)

    return (wf.astype(jnp.float32), bf.astype(jnp.float32),
            wl.astype(jnp.float32), wo.astype(jnp.float32),
            bo.astype(jnp.float32))


# --------------------------------------------------------------------------
# Pure-JAX reference for correctness check (row-major, PyTorch-layout weights)
# --------------------------------------------------------------------------
def bacon_ref(coords, z, wf, bf, wl, wo, bo):
    filt = jnp.sin(coords @ wf.T + bf)
    new_z = (z @ wl.T) * filt
    out = new_z @ wo.T + bo
    return new_z, out


if __name__ == "__main__":
    # Shapes consistent with BaconLayer(in_size=3, hidden_size=32, out_size=2).
    # N=2000 deliberately not a multiple of tile_n to exercise the padding path.
    N, in_size, hidden, out_size = 2000, 3, 32, 2
    band = [0.5, 0.5, 0.5]
    lambdas = (0.1, 1.0)

    key = jax.random.PRNGKey(0)
    k_c, k_z, k_p = jax.random.split(key, 3)
    coords = jax.random.uniform(k_c, (N, in_size), minval=-0.5, maxval=0.5,
                                dtype=jnp.float32)
    z = jax.random.normal(k_z, (N, hidden), dtype=jnp.float32)

    wf, bf, wl, wo, bo = init_bacon_params(
        k_p, in_size, hidden, out_size, band, lambdas)

    new_z, out = bacon_layer_pallas(coords, z, wf, bf, wl, wo, bo, tile_n=1024)
    jax.block_until_ready((new_z, out))

    new_z_ref, out_ref = bacon_ref(coords, z, wf, bf, wl, wo, bo)
    np.testing.assert_allclose(np.asarray(new_z), np.asarray(new_z_ref),
                               rtol=1e-5, atol=1e-5)
    np.testing.assert_allclose(np.asarray(out), np.asarray(out_ref),
                               rtol=1e-5, atol=1e-5)

    print("KERNEL_OK")
</pallas_src>

<mosaic_0001>
module attributes {stable_mosaic.version = 11 : i64} {
  func.func @bacon_kernel(%arg0: i32, %arg1: memref<3x1024xf32, #tpu.memory_space<vmem>>, %arg2: memref<32x1024xf32, #tpu.memory_space<vmem>>, %arg3: memref<32x3xf32, #tpu.memory_space<vmem>>, %arg4: memref<32x1xf32, #tpu.memory_space<vmem>>, %arg5: memref<32x32xf32, #tpu.memory_space<vmem>>, %arg6: memref<2x32xf32, #tpu.memory_space<vmem>>, %arg7: memref<2x1xf32, #tpu.memory_space<vmem>>, %arg8: memref<32x1024xf32, #tpu.memory_space<vmem>>, %arg9: memref<2x1024xf32, #tpu.memory_space<vmem>>) attributes {dimension_semantics = [#tpu.dimension_semantics<parallel>], iteration_bounds = array<i64: 2>, scalar_prefetch = 0 : i64, scratch_operands = 0 : i64, tpu.core_type = #tpu.core_type<tc>, window_params = [{transform_indices = @transform_0, window_bounds = array<i64: 3, 1024>}, {transform_indices = @transform_1, window_bounds = array<i64: 32, 1024>}, {pipeline_mode = #tpu.pipeline_mode<synchronous>, transform_indices = @transform_2, window_bounds = array<i64: 32, 3>}, {pipeline_mode = #tpu.pipeline_mode<synchronous>, transform_indices = @transform_3, window_bounds = array<i64: 32, 1>}, {pipeline_mode = #tpu.pipeline_mode<synchronous>, transform_indices = @transform_4, window_bounds = array<i64: 32, 32>}, {pipeline_mode = #tpu.pipeline_mode<synchronous>, transform_indices = @transform_5, window_bounds = array<i64: 2, 32>}, {pipeline_mode = #tpu.pipeline_mode<synchronous>, transform_indices = @transform_6, window_bounds = array<i64: 2, 1>}, {transform_indices = @transform_7, window_bounds = array<i64: 32, 1024>}, {transform_indices = @transform_8, window_bounds = array<i64: 2, 1024>}]} {
    %c0 = arith.constant 0 : index
    %c0_0 = arith.constant 0 : index
    %0 = vector.load %arg3[%c0, %c0_0] : memref<32x3xf32, #tpu.memory_space<vmem>>, vector<32x1xf32>
    %c0_1 = arith.constant 0 : index
    %c0_2 = arith.constant 0 : index
    %1 = vector.load %arg1[%c0_1, %c0_2] : memref<3x1024xf32, #tpu.memory_space<vmem>>, vector<1x1024xf32>
    %2 = vector.broadcast %0 : vector<32x1xf32> to vector<32x1024xf32>
    %3 = vector.broadcast %1 : vector<1x1024xf32> to vector<32x1024xf32>
    %4 = arith.mulf %2, %3 : vector<32x1024xf32>
    %c0_3 = arith.constant 0 : index
    %c1 = arith.constant 1 : index
    %5 = vector.load %arg3[%c0_3, %c1] : memref<32x3xf32, #tpu.memory_space<vmem>>, vector<32x1xf32>
    %c1_4 = arith.constant 1 : index
    %c0_5 = arith.constant 0 : index
    %6 = vector.load %arg1[%c1_4, %c0_5] : memref<3x1024xf32, #tpu.memory_space<vmem>>, vector<1x1024xf32>
    %7 = vector.broadcast %5 : vector<32x1xf32> to vector<32x1024xf32>
    %8 = vector.broadcast %6 : vector<1x1024xf32> to vector<32x1024xf32>
    %9 = arith.mulf %7, %8 : vector<32x1024xf32>
    %10 = arith.addf %4, %9 : vector<32x1024xf32>
    %c0_6 = arith.constant 0 : index
    %c2 = arith.constant 2 : index
    %11 = vector.load %arg3[%c0_6, %c2] : memref<32x3xf32, #tpu.memory_space<vmem>>, vector<32x1xf32>
    %c2_7 = arith.constant 2 : index
    %c0_8 = arith.constant 0 : index
    %12 = vector.load %arg1[%c2_7, %c0_8] : memref<3x1024xf32, #tpu.memory_space<vmem>>, vector<1x1024xf32>
    %13 = vector.broadcast %11 : vector<32x1xf32> to vector<32x1024xf32>
    %14 = vector.broadcast %12 : vector<1x1024xf32> to vector<32x1024xf32>
    %15 = arith.mulf %13, %14 : vector<32x1024xf32>
    %16 = arith.addf %10, %15 : vector<32x1024xf32>
    %c0_9 = arith.constant 0 : index
    %c0_10 = arith.constant 0 : index
    %17 = vector.load %arg4[%c0_9, %c0_10] : memref<32x1xf32, #tpu.memory_space<vmem>>, vector<32x1xf32>
    %18 = vector.broadcast %17 : vector<32x1xf32> to vector<32x1024xf32>
    %19 = arith.addf %16, %18 : vector<32x1024xf32>
    %20 = math.sin %19 : vector<32x1024xf32>
    %c0_11 = arith.constant 0 : index
    %c0_12 = arith.constant 0 : index
    %21 = vector.load %arg5[%c0_11, %c0_12] : memref<32x32xf32, #tpu.memory_space<vmem>>, vector<32x32xf32>
    %c0_13 = arith.constant 0 : index
    %c0_14 = arith.constant 0 : index
    %22 = vector.load %arg2[%c0_13, %c0_14] : memref<32x1024xf32, #tpu.memory_space<vmem>>, vector<32x1024xf32>
    %cst = arith.constant dense<0.000000e+00> : vector<32x1024xf32>
    %23 = tpu.matmul %21, %22, %cst {dimension_numbers = #tpu.dot_dimension_numbers<[1], [0], [0], [1], [0, 0, 1, 1], [], []>} : vector<32x32xf32>, vector<32x1024xf32>, vector<32x1024xf32> -> vector<32x1024xf32>
    %24 = arith.mulf %23, %20 : vector<32x1024xf32>
    %c0_15 = arith.constant 0 : index
    %c0_16 = arith.constant 0 : index
    %25 = vector.load %arg6[%c0_15, %c0_16] : memref<2x32xf32, #tpu.memory_space<vmem>>, vector<2x32xf32>
    %cst_17 = arith.constant dense<0.000000e+00> : vector<2x1024xf32>
    %26 = tpu.matmul %25, %24, %cst_17 {dimension_numbers = #tpu.dot_dimension_numbers<[1], [0], [0], [1], [0, 0, 1, 1], [], []>} : vector<2x32xf32>, vector<32x1024xf32>, vector<2x1024xf32> -> vector<2x1024xf32>
    %c0_18 = arith.constant 0 : index
    %c0_19 = arith.constant 0 : index
    %27 = vector.load %arg7[%c0_18, %c0_19] : memref<2x1xf32, #tpu.memory_space<vmem>>, vector<2x1xf32>
    %28 = vector.broadcast %27 : vector<2x1xf32> to vector<2x1024xf32>
    %29 = arith.addf %26, %28 : vector<2x1024xf32>
    %c0_20 = arith.constant 0 : index
    %c0_21 = arith.constant 0 : index
    %30 = vector.load %arg8[%c0_20, %c0_21] : memref<32x1024xf32, #tpu.memory_space<vmem>>, vector<32x1024xf32>
    tpu.vector_store %arg8[%c0_20, %c0_21], %24 {strides = array<i32>} : memref<32x1024xf32, #tpu.memory_space<vmem>>, vector<32x1024xf32>,
    %c0_22 = arith.constant 0 : index
    %c0_23 = arith.constant 0 : index
    %31 = vector.load %arg9[%c0_22, %c0_23] : memref<2x1024xf32, #tpu.memory_space<vmem>>, vector<2x1024xf32>
    tpu.vector_store %arg9[%c0_22, %c0_23], %29 {strides = array<i32>} : memref<2x1024xf32, #tpu.memory_space<vmem>>, vector<2x1024xf32>,
    return
  }
  func.func @transform_0(%arg0: i32) -> (i32, i32) {
    %c0_i32 = arith.constant 0 : i32
    %c0_i32_0 = arith.constant 0 : i32
    return %c0_i32, %arg0 : i32, i32
  }
  func.func @transform_1(%arg0: i32) -> (i32, i32) {
    %c0_i32 = arith.constant 0 : i32
    %c0_i32_0 = arith.constant 0 : i32
    return %c0_i32, %arg0 : i32, i32
  }
  func.func @transform_2(%arg0: i32) -> (i32, i32) {
    %c0_i32 = arith.constant 0 : i32
    %c0_i32_0 = arith.constant 0 : i32
    %c0_i32_1 = arith.constant 0 : i32
    return %c0_i32, %c0_i32_0 : i32, i32
  }
  func.func @transform_3(%arg0: i32) -> (i32, i32) {
    %c0_i32 = arith.constant 0 : i32
    %c0_i32_0 = arith.constant 0 : i32
    %c0_i32_1 = arith.constant 0 : i32
    return %c0_i32, %c0_i32_0 : i32, i32
  }
  func.func @transform_4(%arg0: i32) -> (i32, i32) {
    %c0_i32 = arith.constant 0 : i32
    %c0_i32_0 = arith.constant 0 : i32
    %c0_i32_1 = arith.constant 0 : i32
    return %c0_i32, %c0_i32_0 : i32, i32
  }
  func.func @transform_5(%arg0: i32) -> (i32, i32) {
    %c0_i32 = arith.constant 0 : i32
    %c0_i32_0 = arith.constant 0 : i32
    %c0_i32_1 = arith.constant 0 : i32
    return %c0_i32, %c0_i32_0 : i32, i32
  }
  func.func @transform_6(%arg0: i32) -> (i32, i32) {
    %c0_i32 = arith.constant 0 : i32
    %c0_i32_0 = arith.constant 0 : i32
    %c0_i32_1 = arith.constant 0 : i32
    return %c0_i32, %c0_i32_0 : i32, i32
  }
  func.func @transform_7(%arg0: i32) -> (i32, i32) {
    %c0_i32 = arith.constant 0 : i32
    %c0_i32_0 = arith.constant 0 : i32
    return %c0_i32, %arg0 : i32, i32
  }
  func.func @transform_8(%arg0: i32) -> (i32, i32) {
    %c0_i32 = arith.constant 0 : i32
    %c0_i32_0 = arith.constant 0 : i32
    return %c0_i32, %arg0 : i32, i32
  }
}

</mosaic_0001>

<bundles_post_ra>
// kernel: tpu_custom_call.1
= control target key start
LH: loop header
LB: loop body
LE: loop exit
PB: predicated region body
PF: predicated region fallthrough
CT: control target
= control target key end

     0   :  { %s11263_s0 = inlined_call_operand.vmem [shape: f32[3,2048], index: 0, kind: input, shape index: {}]   ;;  %s11264_s1 = inlined_call_operand.hbm [shape: f32[32,2048], index: 1, kind: input, shape index: {}]   ;;  %s11265_s2 = inlined_call_operand.vmem [shape: f32[32,3], index: 2, kind: input, shape index: {}]   ;;  %s11266_s3 = inlined_call_operand.vmem [shape: f32[32,1], index: 3, kind: input, shape index: {}]   ;;  %s11267_s4 = inlined_call_operand.hbm [shape: f32[32,32], index: 4, kind: input, shape index: {}]   ;;  %s11268_s5 = inlined_call_operand.vmem [shape: f32[2,32], index: 5, kind: input, shape index: {}]   ;;  %s11269_s6 = inlined_call_operand.vmem [shape: f32[2,1], index: 6, kind: input, shape index: {}]   ;;  %s11270_s7 = inlined_call_operand.hbm [shape: f32[32,2048], index: 7, kind: output, shape index: {0}]   ;;  %s11271_s8 = inlined_call_operand.hbm [shape: f32[2,2048], index: 8, kind: output, shape index: {1}]  }
   0x1   :  { %11296 = sst [smem:[#allocation70_spill]] %s11267_s4 }
   0x2   :  { %14 = vsyncpa [#allocation3], 0 }
   0x3   :  { %16 = vsyncpa [#allocation3 + $0x1], 0 }
   0x4   :  { %17 = vsyncpa [#allocation6], 0 }
   0x5   :  { %18 = vsyncpa [#allocation4], 0 }
   0x6   :  { %20 = vsyncpa [#allocation4 + $0x1], 0 }
   0x7   :  { %21 = vsyncpa [#allocation9], 0 }
   0x8   :  { %23 = vsyncpa [#allocation9 + $0x1], 0  ;;  %s6875_s27 = smov 0   ;;  %s6877_s28 = smov 0  }
   0x9   :  { %s6879_s29 = smov 0   ;;  %s6881_s30 = smov 0  }
   0xa LB: > { %11297 = sst [smem:[#allocation14_spill]] %s6806_s29  ;;  %s6896_s9 = sadd.s32 4294967295, %s6810_s30   ;;  %s6810_s30 = sphi %s6881_s30, %s11482_s30   ;;  %s6806_s29 = sphi %s6879_s29, %s11479_s29   ;;  %s6802_s28 = sphi %s6877_s28, %s11481_s28   ;;  %s6798_s27 = sphi %s6875_s27, %s11480_s27  }
   0xb   : > { %s6373_s10 = sadd.s32 4294967294, %s6810_s30   ;;  %p75_p0 = scmp.ne.s32.totalorder %s6802_s28, %s6798_s27 }
   0xc   : > { %p76_p1 = scmp.eq.s32.totalorder %s6896_s9, 0  ;;  %p204_p2 = scmp.eq.s32.totalorder %s6896_s9, 1 }
   0xd   : > { %p210_p3 = scmp.eq.s32.totalorder %s6373_s10, 1  ;;  %p6374_p5 = scmp.ge.s32.totalorder %s6810_s30, 1 }
   0xe   : > { %p6905_p4 = por %p76_p1, %p75_p0  ;;  %p243_p7 = scmp.lt.s32.totalorder %s6810_s30, 3 }
   0xf   : > { %p6910_p6 = por %p210_p3, %p75_p0  ;;  %s11300_s4 = sld [smem:[#allocation70_spill]] }
  0x10   : > { %p6918_p8 = pnand %p6374_p5, %p243_p7  ;;  %s6812_s17 = smov [#allocation5]  }
  0x11   : > { %s262_s18 = sshll.u32 %s6812_s17, 4  ;;  %s6928_s19 = sadd.s32 1, %s6810_s30   ;;  %s263_s18 = int_to_ptr.vmem [resolvable:$true] %s262_s18 }
  0x12   : > { %p6546_p9 = pneg %p6918_p8  ;;  %s6813_s20 = smov 128  }
  0x13   : > { %s6814_s21 = smov 8   ;;  %s59_s22 = ssub.s32 %s6810_s30, %s6928_s19 }
  0x14   : > { %p6547_p10 = pnand %p6546_p9, %p76_p1  ;;  %s62_s23 = sadd.s32 1, %s6806_s29 }
  0x15   : > { %s260_s15 = sshll.u32 %s11300_s4, 4  ;;  %p60_p12 = scmp.eq.s32.totalorder %s59_s22, 0  ;;  %s261_s15 = int_to_ptr.hbm [resolvable:$true] %s260_s15 }
  0x16   : > { %6549 = dma.hbm_to_vmem [thread:$0]  (!%p6547_p10), %s261_s15, 512, %s263_s18, [#allocation6], %s6813_s20, %s6813_s20, %s6814_s21  }
  0x17   : > { %p69_p13 = scmp.ne.s32.totalorder %s6806_s29, %s6802_s28  ;;  %p70_p0 = scmp.eq.s32.totalorder %s6810_s30, 0 }
  0x18   : > { %p6562_p3 = scmp.lt.s32.totalorder %s6810_s30, 2  ;;  %s291_s26 = sand.u32 1, %s6806_s29  }
  0x19   : > { %s6938_s24 = scalar_select %p60_p12, %s6806_s29, %s62_s23  }
  0x1a   : > { %p71_p5 = por %p70_p0, %p69_p13  ;;  %p6942_p7 = por %p204_p2, %p69_p13 }
  0x1b   : > { %11302 = sst [smem:[#allocation15_spill]] %s6938_s24  ;;  %s6533_s10 = sshll.u32 %s6810_s30, 6 }
  0x1c   : > { %s6377_s13 = sshll.u32 %s291_s26, 8  ;;  %s300_s17 = scalar_lea.hbm %s11264_s1, %s6533_s10 }
  0x1d   : > { %s301_s18 = sshll.u32 %s300_s17, 4  ;;  %s295_s20 = scalar_lea.vmem [#allocation2], %s6377_s13  ;;  %s302_s18 = int_to_ptr.hbm [resolvable:$true] %s301_s18 }
  0x1e   : > { %s303_s21 = sshll.u32 %s295_s20, 4  ;;  %p6953_p9 = pnand %p6562_p3, %p71_p5  ;;  %s304_s21 = int_to_ptr.vmem [resolvable:$true] %s303_s21 }
  0x1f   : > { %s292_s23 = scalar_lea.sflag [#allocation3], %s291_s26  ;;  %s6678_s4 = sshra.s32 %s302_s18, 4  ;;  %s6679_s4 = int_to_ptr.hbm [resolvable:$true] %s6678_s4 }
  0x20   : > { %s6680_s24 = scalar_lea.hbm %s6679_s4, 256  ;;  %p6682_p10 = pneg %p6953_p9 }
  0x21   : > { %p6681_p2 = scmp.ne.s32.totalorder %s6679_s4, %s6680_s24  ;;  %s6685_s14 = scalar_lea.hbm %s11264_s1, 512 }
  0x22   : > { %p6686_p0 = scmp.lt.s32.totalorder %s6679_s4, %s11264_s1  ;;  %p6687_p3 = scmp.lt.s32.totalorder %s6685_s14, %s6680_s24 }
  0x23   : > { %p6683_p12 = pnand %p6682_p10, %p6681_p2 }
  0x24   : > { %p6688_p5 = por %p6687_p3, %p6686_p0 }
  0x25   : > { %p6684_p13 = pneg %p6683_p12 }
  0x27   : > { %p6689_p11 = pnand %p6688_p5, %p6684_p13 }
  0x29   : > { %6692 = shalt.err (!%p6689_p11)
}
  0x2a   : > { %s6815_s26 = smov 2048   ;;  %s6816_s20 = smov 1024  }
  0x2b   : > { %s6817_s29 = smov 64   ;;  %315 = sbr.rel (%p6918_p8) target bundleno = 1629 (0x65d), region = 48 }
  0x2c   : > { %6553 = dma.hbm_to_vmem [thread:$0]  (!%p6953_p9), %s302_s18, 4096, %s304_s21, %s292_s23, %s6815_s26, %s6816_s20, %s6817_s29  }
  0x30   : > { %s6970_s10 = sand.u32 1, %s6802_s28  }
  0x31   : > { %s6381_s4 = sshll.u32 %s6970_s10, 8  ;;  %s318_s24 = scalar_lea.sflag [#allocation3], %s6970_s10 }
  0x32   : > { %s6976_s13 = scalar_lea.vmem [#allocation2], %s6381_s4 }
  0x33   : > { %6781 = dma.done.wait (%p6905_p4), %s318_s24, 4096  }
  0x34   : > { %6783 = vsyncadd (%p6905_p4), %s318_s24, 4294963200 }
  0x35   : > { %6785 = dma.done.wait (%p76_p1), [#allocation6], 512  }
  0x36   : > { %6787 = vsyncadd (%p76_p1), [#allocation6], 4294966784  ;;  %v6818_v0 = vmov 1   ;;  %v11273_v1 = vmov 0   ;;  %v6820_v2 = vmov 2   ;;  %v382_v3 = vld [vmem:[%s11265_s2 + $0x18] sm:$0xff] }
  0x37   : > { %6615 = vset.pattern.permute.xlu0 %v6818_v0  ;;  %6617 = vset.pattern.permute.xlu1 %v11273_v1  ;;  %v381_v4 = vld [vmem:[%s11265_s2 + $0x10] sm:$0xff]  ;;  %v6997_v5 = vld [vmem:[%s11265_s2 + $0x8] sm:$0xff]  ;;  %v5698_v7 = vld [vmem:[%s6976_s13 + $0xd8] sm:$0xff]  ;;  %vm5703_vm0 = vcmask 261120   ;;  %s7681_s17 = scalar_lea.vmem [#allocation7], %s6381_s4  ;;  %s6534_s20 = sshll.u32 %s6896_s9, 6 }
  0x38   : > { %6619 = vset.pattern.permute.xlu2 %v6820_v2  ;;  %468 = vperm.xlu0 %6615, %v382_v3   ;;  %v5697_v6 = vld [vmem:[%s6976_s13 + $0xd0] sm:$0xff]  ;;  %v5690_v9 = vld [vmem:[%s6976_s13 + $0x98] sm:$0xff]  ;;  %v5695_v12 = vld [vmem:[%s6976_s13 + $0xc0] sm:$0xff]  ;;  %s6226_s16 = scalar_lea.hbm %s11270_s7, %s6534_s20  ;;  %s6227_s11 = sshll.u32 %s7681_s17, 4  ;;  %s6228_s11 = int_to_ptr.vmem [resolvable:$true] %s6227_s11 }
  0x39   : > { %396 = vperm.xlu1 %6617, %v381_v4   ;;  %567 = vperm.xlu2 %6619, %v382_v3   ;;  %v5689_v8 = vld [vmem:[%s6976_s13 + $0x90] sm:$0xff]  ;;  %v5682_v11 = vld [vmem:[%s6976_s13 + $0x58] sm:$0xff]  ;;  %v5696_v13 = vld [vmem:[%s6976_s13 + $0xc8] sm:$0xff]  ;;  %s6229_s18 = sshll.u32 %s6226_s16, 4  ;;  %s6210_s21 = scalar_lea.sflag [#allocation4], %s6970_s10  ;;  %s6230_s18 = int_to_ptr.hbm [resolvable:$true] %s6229_s18 }
  0x3a   : > { %5786 = vmatpush.msra.mxu2 %v5697_v6  ;;  %5815 = vmatpush.msra.mxu3 %v5698_v7  ;;  %v5681_v10 = vld [vmem:[%s6976_s13 + $0x50] sm:$0xff]  ;;  %v7012_v14 = vld [vmem:[%s11265_s2] sm:$0xff]  ;;  %v5674_v17 = vld [vmem:[%s6976_s13 + $0x18] sm:$0xff] }
  0x3b   : > { %5728 = vmatpush.msra.mxu0 %v5695_v12  ;;  %v5687_v15 = vld [vmem:[%s6976_s13 + $0x80] sm:$0xff]  ;;  %5757 = vmatpush.msra.mxu1 %v5696_v13  ;;  %v5673_v16 = vld [vmem:[%s6976_s13 + $0x10] sm:$0xff]  ;;  %v5688_v19 = vld [vmem:[%s6976_s13 + $0x88] sm:$0xff] }
  0x3c   : > { %5787 = vmatpush.msra.mxu2 %v5689_v8  ;;  %5816 = vmatpush.msra.mxu3 %v5690_v9  ;;  %v7017_v18 = vld [vmem:[#allocation5] sm:$0xff]  ;;  %v5701_v21 = vld [vmem:[%s6976_s13 + $0xf0] sm:$0xff]  ;;  %v5702_v22 = vld [vmem:[%s6976_s13 + $0xf8] sm:$0xff] }
  0x3d   : > { %5729 = vmatpush.msra.mxu0 %v5687_v15  ;;  %v5679_v20 = vld [vmem:[%s6976_s13 + $0x40] sm:$0xff]  ;;  %v5680_v23 = vld [vmem:[%s6976_s13 + $0x48] sm:$0xff]  ;;  %5758 = vmatpush.msra.mxu1 %v5688_v19  ;;  %v5693_v25 = vld [vmem:[%s6976_s13 + $0xb0] sm:$0xff] }
  0x3e   : > { %5788 = vmatpush.msra.mxu2 %v5681_v10  ;;  %5817 = vmatpush.msra.mxu3 %v5682_v11  ;;  %v5671_v24 = vld [vmem:[%s6976_s13] sm:$0xff]  ;;  %v653_v26 = vld [vmem:[%s11266_s3 + $0x10] sm:$0xff]  ;;  %v5672_v27 = vld [vmem:[%s6976_s13 + $0x8] sm:$0xff] }
  0x3f   : > { %5730 = vmatpush.msra.mxu0 %v5679_v20  ;;  %5759 = vmatpush.msra.mxu1 %v5680_v23  ;;  %v5694_v28 = vld [vmem:[%s6976_s13 + $0xb8] sm:$0xff]  ;;  %v7039_v29 = vld [vmem:[#allocation5 + $0x8] sm:$0xff]  ;;  %v5685_v30 = vld [vmem:[%s6976_s13 + $0x70] sm:$0xff] }
  0x40   : > { %6616 = vset.pattern.permute.xlu0 %v11273_v1  ;;  %5789 = vmatpush.msra.mxu2 %v5673_v16  ;;  %v5686_v31 = vld [vmem:[%s6976_s13 + $0x78] sm:$0xff]  ;;  %v5699_v32 = vld [vmem:[%s6976_s13 + $0xe0] sm:$0xff]  ;;  %v5700_v33 = vld [vmem:[%s6976_s13 + $0xe8] sm:$0xff] }
  0x41   : > { %6618 = vset.pattern.permute.xlu1 %v6818_v0  ;;  %401 = vperm.xlu0 %6616, %v382_v3   ;;  %v5677_v34 = vld [vmem:[%s6976_s13 + $0x30] sm:$0xff]  ;;  %v5678_v35 = vld [vmem:[%s6976_s13 + $0x38] sm:$0xff]  ;;  %v5692_v36 = vld [vmem:[%s6976_s13 + $0xa8] sm:$0xff] }
  0x42   : > { %464 = vperm.xlu1 %6618, %v381_v4   ;;  %6620 = vset.pattern.permute.xlu2 %v11273_v1  ;;  %v5981_v37 = vld [vmem:[%s11269_s6] sm:$0x3]  ;;  %v654_v38 = vld [vmem:[%s11266_s3 + $0x18] sm:$0xff]  ;;  %v5669_v40 = vld [vmem:[#allocation5 + $0x10] sm:$0xff] }
  0x43   : > { %391 = vperm.xlu2 %6620, %v6997_v5   ;;  %5818 = vmatpush.msra.mxu3 %v5674_v17  ;;  %v5691_v39 = vld [vmem:[%s6976_s13 + $0xa0] sm:$0xff]  ;;  %v5684_v42 = vld [vmem:[%s6976_s13 + $0x68] sm:$0xff]  ;;  %v5670_v46 = vld [vmem:[#allocation5 + $0x18] sm:$0xff] }
  0x44   : > { %6493 = vmatmul.msk.f32.vlgmr.msra.gmra.mxu2 %vm5703_vm0, %v7017_v18  ;;  %6497 = vmatmul.msk.f32.vlgmr.msra.gmra.mxu3 %vm5703_vm0, %v7017_v18  ;;  %v5683_v41 = vld [vmem:[%s6976_s13 + $0x60] sm:$0xff]  ;;  %v5676_v44 = vld [vmem:[%s6976_s13 + $0x28] sm:$0xff] }
  0x45   : > { %5902 = vmatpush.msrb.mxu2 %v5701_v21  ;;  %5931 = vmatpush.msrb.mxu3 %v5702_v22  ;;  %v5675_v43 = vld [vmem:[%s6976_s13 + $0x20] sm:$0xff]  ;;  %v652_v45 = vld [vmem:[%s11266_s3 + $0x8] sm:$0xff]  ;;  %s6385_s13 = sshll.u32 %s6896_s9, 3 }
  0x46   : > { %5731 = vmatpush.msra.mxu0 %v5671_v24  ;;  %5760 = vmatpush.msra.mxu1 %v5672_v27  ;;  %v651_v47 = vld [vmem:[%s11266_s3] sm:$0xff]  ;;  %p371_p1 = scmp.lt.s32.totalorder %s6385_s13, 15 }
  0x47   : > { %6485 = vmatmul.msk.f32.vlgmr.msra.gmra.mxu0 %vm5703_vm0, %v7017_v18  ;;  %5903 = vmatpush.msrb.mxu2 %v5693_v25 }
  0x48   : > { %5932 = vmatpush.msrb.mxu3 %v5694_v28  ;;  %6489 = vmatmul.msk.f32.vlgmr.msra.gmra.mxu1 %vm5703_vm0, %v7017_v18  ;;  %s11484_s13 = smov (!%p371_p1, %s6385_s13), 15 }
  0x49   : > { %386 = vperm.xlu0 %6616, %v7012_v14   ;;  %5904 = vmatpush.msrb.mxu2 %v5685_v30  ;;  %s6386_s22 = sshll.u32 %s11484_s13, 2  ;;  %s6722_s13 = sshra.s32 %s6230_s18, 4  ;;  %s6723_s13 = int_to_ptr.hbm [resolvable:$true] %s6722_s13 }
  0x4a   : > { %460 = vperm.xlu1 %6618, %v6997_v5   ;;  %5933 = vmatpush.msrb.mxu3 %v5686_v31  ;;  %s7118_s15 = scalar_lea.vmem %s11263_s0, %s6386_s22  ;;  %s6724_s22 = scalar_lea.hbm %s6723_s13, 256 }
  0x4b   : > { %6621 = vset.pattern.permute.xlu2 %v6820_v2  ;;  %5844 = vmatpush.msrb.mxu0 %v5699_v32  ;;  %v383_v49 = vld [vmem:[%s7118_s15] ss:$4 sm:$0xff]  ;;  %p6725_p4 = scmp.ne.s32.totalorder %s6723_s13, %s6724_s22  ;;  %p6729_p9 = scmp.lt.s32.totalorder %s6723_s13, %s11270_s7 }
  0x4c   : > { %563 = vperm.xlu2 %6621, %v381_v4   ;;  %6494 = vmatmul.msk.f32.gmra.mxu2 %vm5703_vm0, %v7039_v29  ;;  %v7121_v50 = vperm.slane %v383_v49, 0  ;;  %v7123_v51 = vperm.slane %v383_v49, 1  ;;  %v7125_v52 = vperm.slane %v383_v49, 2  ;;  %v7127_v53 = vperm.slane %v383_v49, 3  ;;  %v6387_v4 = vld [vmem:[%s7118_s15 + $0x1] ss:$4 sm:$0xff] }
  0x4d   : > { %6498 = vmatmul.msk.f32.gmra.mxu3 %vm5703_vm0, %v7039_v29  ;;  %5873 = vmatpush.msrb.mxu1 %v5700_v33  ;;  %v7129_v54 = vperm.slane %v383_v49, 4  ;;  %v7131_v55 = vperm.slane %v383_v49, 5  ;;  %v7133_v56 = vperm.slane %v383_v49, 6  ;;  %v7135_v57 = vperm.slane %v383_v49, 7  ;;  %p6726_p8 = pnand %p6725_p4, %p6942_p7 }
  0x4e   : > { %5905 = vmatpush.msrb.mxu2 %v5677_v34  ;;  %5934 = vmatpush.msrb.mxu3 %v5678_v35  ;;  %v7164_v6 = vperm.slane %v6387_v4, 1  ;;  %v7166_v7 = vperm.slane %v6387_v4, 2  ;;  %v7168_v8 = vperm.slane %v6387_v4, 3  ;;  %v7170_v10 = vperm.slane %v6387_v4, 4 }
  0x4f   : > { %6486 = vmatmul.msk.f32.gmra.mxu0 %vm5703_vm0, %v7039_v29  ;;  %5874 = vmatpush.msrb.mxu1 %v5692_v36  ;;  %v7172_v11 = vperm.slane %v6387_v4, 5  ;;  %v7174_v12 = vperm.slane %v6387_v4, 6  ;;  %v7176_v13 = vperm.slane %v6387_v4, 7  ;;  %p6727_p11 = pneg %p6726_p8 }
  0x50   : > { %5845 = vmatpush.msrb.mxu0 %v5691_v39  ;;  %6490 = vmatmul.msk.f32.gmra.mxu1 %vm5703_vm0, %v7039_v29 }
  0x51   : > { %667 = vperm.xlu0 %6616, %v653_v26   ;;  %5875 = vmatpush.msrb.mxu1 %v5684_v42 }
  0x52   : > { %456 = vperm.xlu1 %6618, %v7012_v14   ;;  %5846 = vmatpush.msrb.mxu0 %v5683_v41 }
  0x53   : > { %5876 = vmatpush.msrb.mxu1 %v5676_v44 }
  0x54   : > { %559 = vperm.xlu2 %6621, %v6997_v5   ;;  %6495 = vmatmul.msk.f32.gmra.mxu2 %vm5703_vm0, %v5669_v40  ;;  %v7162_v5 = vperm.slane %v6387_v4, 0 }
  0x55   : > { %6499 = vmatmul.msk.f32.gmra.mxu3 %vm5703_vm0, %v5669_v40  ;;  %5847 = vmatpush.msrb.mxu0 %v5675_v43 }
  0x57   : > { %6487 = vmatmul.msk.f32.gmra.mxu0 %vm5703_vm0, %v5669_v40 }
  0x58   : > { %6491 = vmatmul.msk.f32.gmra.mxu1 %vm5703_vm0, %v5669_v40 }
  0x59   : > { %5984 = vperm.xlu0 %6616, %v5981_v37  }
  0x5a   : > { %6622 = vset.pattern.permute.xlu1 %v11273_v1 }
  0x5b   : > { %672 = vperm.xlu1 %6622, %v654_v38  }
  0x5c   : > { %555 = vperm.xlu2 %6621, %v7012_v14   ;;  %6496 = vmatmul.msk.f32.gmra.mxu2 %vm5703_vm0, %v5670_v46 }
  0x5d   : > { %6500 = vmatmul.msk.f32.gmra.mxu3 %vm5703_vm0, %v5670_v46 }
  0x5f   : > { %6488 = vmatmul.msk.f32.gmra.mxu0 %vm5703_vm0, %v5670_v46 }
  0x60   : > { %6492 = vmatmul.msk.f32.gmra.mxu1 %vm5703_vm0, %v5670_v46 }
  0x63   : > { %662 = vperm.xlu1 %6622, %v652_v45  }
  0x64   : > { %6623 = vset.pattern.permute.xlu2 %v11273_v1  ;;  %6509 = vmatmul.msk.f32.vlgmr.msrb.gmra.mxu2 %vm5703_vm0, %v7017_v18 }
  0x65   : > { %657 = vperm.xlu2 %6623, %v651_v47   ;;  %6513 = vmatmul.msk.f32.vlgmr.msrb.gmra.mxu3 %vm5703_vm0, %v7017_v18 }
  0x67   : > { %6501 = vmatmul.msk.f32.vlgmr.msrb.gmra.mxu0 %vm5703_vm0, %v7017_v18 }
  0x68   : > { %6505 = vmatmul.msk.f32.vlgmr.msrb.gmra.mxu1 %vm5703_vm0, %v7017_v18 }
  0x6c   : > { %6510 = vmatmul.msk.f32.gmra.mxu2 %vm5703_vm0, %v7039_v29 }
  0x6d   : > { %6514 = vmatmul.msk.f32.gmra.mxu3 %vm5703_vm0, %v7039_v29 }
  0x6f   : > { %6502 = vmatmul.msk.f32.gmra.mxu0 %vm5703_vm0, %v7039_v29 }
  0x70   : > { %6506 = vmatmul.msk.f32.gmra.mxu1 %vm5703_vm0, %v7039_v29 }
  0x74   : > { %6511 = vmatmul.msk.f32.gmra.mxu2 %vm5703_vm0, %v5669_v40 }
  0x75   : > { %6515 = vmatmul.msk.f32.gmra.mxu3 %vm5703_vm0, %v5669_v40 }
  0x77   : > { %6503 = vmatmul.msk.f32.gmra.mxu0 %vm5703_vm0, %v5669_v40 }
  0x78   : > { %6507 = vmatmul.msk.f32.gmra.mxu1 %vm5703_vm0, %v5669_v40 }
  0x7c   : > { %6512 = vmatmul.msk.f32.gmra.mxu2 %vm5703_vm0, %v5670_v46 }
  0x7d   : > { %6516 = vmatmul.msk.f32.gmra.mxu3 %vm5703_vm0, %v5670_v46 }
  0x7f   : > { %6504 = vmatmul.msk.f32.gmra.mxu0 %vm5703_vm0, %v5670_v46 }
  0x80   : > { %6508 = vmatmul.msk.f32.gmra.mxu1 %vm5703_vm0, %v5670_v46 }
  0x93   : > { %v7113_v48 = vpop.permute.xlu2 %567 }
  0x94   : > { %11305 = vst [vmem:[#allocation16_spill] sm:$0xff] %v7113_v48 }
  0x9d   : > { %v392_v58 = vpop.permute.xlu2 %391 }
  0x9e   : > { %v7138_v59 = vmul.f32 %v7121_v50, %v392_v58  ;;  %v7141_v60 = vmul.f32 %v7123_v51, %v392_v58  ;;  %v7144_v61 = vmul.f32 %v7125_v52, %v392_v58  ;;  %v7147_v62 = vmul.f32 %v7127_v53, %v392_v58 }
  0x9f   : > { %v7150_v63 = vmul.f32 %v7129_v54, %v392_v58  ;;  %v7153_v0 = vmul.f32 %v7131_v55, %v392_v58  ;;  %v7156_v2 = vmul.f32 %v7133_v56, %v392_v58  ;;  %v7159_v3 = vmul.f32 %v7135_v57, %v392_v58 }
  0xa0   : > { %11306 = vst [vmem:[#allocation17_spill] sm:$0xff] %v7147_v62 }
  0xa1   : > { %11307 = vst [vmem:[#allocation18_spill] sm:$0xff] %v7150_v63 }
  0xa2   : > { %11308 = vst [vmem:[#allocation19_spill] sm:$0xff] %v7153_v0 }
  0xa3   : > { %11309 = vst [vmem:[#allocation20_spill] sm:$0xff] %v7156_v2 }
  0xa4   : > { %11310 = vst [vmem:[#allocation21_spill] sm:$0xff] %v7159_v3 }
  0xa6   : > { %v7190_v19 = vpop.permute.xlu2 %563 }
  0xa7   : > { %11315 = vst [vmem:[#allocation26_spill] sm:$0xff] %v7190_v19 }
  0xaa   : > { %v469_v14 = vpop.permute.xlu0 %468 }
  0xab   : > { %v397_v9 = vpop.permute.xlu1 %396  ;;  %v7205_v24 = vmul.f32 %v7162_v5, %v469_v14  ;;  %v7208_v25 = vmul.f32 %v7164_v6, %v469_v14  ;;  %v7211_v26 = vmul.f32 %v7166_v7, %v469_v14  ;;  %v7214_v27 = vmul.f32 %v7168_v8, %v469_v14 }
  0xac   : > { %v7179_v15 = vmul.f32 %v7121_v50, %v397_v9  ;;  %v7182_v16 = vmul.f32 %v7123_v51, %v397_v9  ;;  %v7185_v17 = vmul.f32 %v7125_v52, %v397_v9  ;;  %v7188_v18 = vmul.f32 %v7127_v53, %v397_v9 }
  0xad   : > { %v7193_v20 = vmul.f32 %v7129_v54, %v397_v9  ;;  %v7196_v21 = vmul.f32 %v7131_v55, %v397_v9  ;;  %v7199_v22 = vmul.f32 %v7133_v56, %v397_v9  ;;  %v7202_v23 = vmul.f32 %v7135_v57, %v397_v9  ;;  %11320 = vst [vmem:[#allocation31_spill] sm:$0xff] %v7205_v24 }
  0xae   : > { %11311 = vst [vmem:[#allocation22_spill] sm:$0xff] %v7179_v15  ;;  %v7217_v28 = vmul.f32 %v7170_v10, %v469_v14  ;;  %v7220_v29 = vmul.f32 %v7172_v11, %v469_v14  ;;  %v7223_v30 = vmul.f32 %v7174_v12, %v469_v14  ;;  %v7226_v31 = vmul.f32 %v7176_v13, %v469_v14  ;;  %v7252_v42 = vpop.permute.xlu2 %559 }
  0xaf   : > { %11312 = vst [vmem:[#allocation23_spill] sm:$0xff] %v7182_v16 }
  0xb0   : > { %11313 = vst [vmem:[#allocation24_spill] sm:$0xff] %v7185_v17 }
  0xb1   : > { %11314 = vst [vmem:[#allocation25_spill] sm:$0xff] %v7188_v18 }
  0xb2   : > { %11316 = vst [vmem:[#allocation27_spill] sm:$0xff] %v7193_v20 }
  0xb3   : > { %11317 = vst [vmem:[#allocation28_spill] sm:$0xff] %v7196_v21  ;;  %v402_v32 = vpop.permute.xlu0 %401 }
  0xb4   : > { %11318 = vst [vmem:[#allocation29_spill] sm:$0xff] %v7199_v22  ;;  %v465_v33 = vpop.permute.xlu1 %464  ;;  %v7229_v34 = vmul.f32 %v7121_v50, %v402_v32  ;;  %v7232_v35 = vmul.f32 %v7123_v51, %v402_v32  ;;  %v7235_v36 = vmul.f32 %v7125_v52, %v402_v32  ;;  %v7238_v37 = vmul.f32 %v7127_v53, %v402_v32 }
  0xb5   : > { %11319 = vst [vmem:[#allocation30_spill] sm:$0xff] %v7202_v23  ;;  %v7241_v38 = vmul.f32 %v7129_v54, %v402_v32  ;;  %v7244_v39 = vmul.f32 %v7131_v55, %v402_v32  ;;  %v7247_v40 = vmul.f32 %v7133_v56, %v402_v32  ;;  %v7250_v41 = vmul.f32 %v7135_v57, %v402_v32 }
  0xb6   : > { %11321 = vst [vmem:[#allocation32_spill] sm:$0xff] %v7208_v25  ;;  %v7255_v43 = vmul.f32 %v7162_v5, %v465_v33  ;;  %v7258_v44 = vmul.f32 %v7164_v6, %v465_v33  ;;  %v7261_v45 = vmul.f32 %v7166_v7, %v465_v33  ;;  %v7264_v46 = vmul.f32 %v7168_v8, %v465_v33 }
  0xb7   : > { %11322 = vst [vmem:[#allocation33_spill] sm:$0xff] %v7211_v26  ;;  %v7267_v47 = vmul.f32 %v7170_v10, %v465_v33  ;;  %v7270_v49 = vmul.f32 %v7172_v11, %v465_v33  ;;  %v7273_v58 = vmul.f32 %v7174_v12, %v465_v33  ;;  %v7276_v4 = vmul.f32 %v7176_v13, %v465_v33 }
  0xb8   : > { %11323 = vst [vmem:[#allocation34_spill] sm:$0xff] %v7214_v27 }
  0xb9   : > { %11324 = vst [vmem:[#allocation35_spill] sm:$0xff] %v7217_v28  ;;  %v7306_v28 = vld [vmem:[%s7118_s15 + $0x2] ss:$4 sm:$0xff] }
  0xba   : > { %11325 = vst [vmem:[#allocation36_spill] sm:$0xff] %v7220_v29  ;;  %v7323_v22 = vperm.slane %v7306_v28, 0 }
  0xbb   : > { %11326 = vst [vmem:[#allocation37_spill] sm:$0xff] %v7223_v30  ;;  %v387_v29 = vpop.permute.xlu0 %386 }
  0xbc   : > { %11327 = vst [vmem:[#allocation38_spill] sm:$0xff] %v7226_v31  ;;  %v461_v9 = vpop.permute.xlu1 %460  ;;  %v7315_v23 = vmul.f32 %v7133_v56, %v387_v29 }
  0xbd   : > { %11328 = vst [vmem:[#allocation39_spill] sm:$0xff] %v7229_v34  ;;  %v7279_v14 = vmul.f32 %v7162_v5, %v461_v9  ;;  %v7282_v32 = vmul.f32 %v7164_v6, %v461_v9  ;;  %v7285_v1 = vmul.f32 %v7166_v7, %v461_v9  ;;  %v7288_v31 = vmul.f32 %v7168_v8, %v461_v9 }
  0xbe   : > { %11329 = vst [vmem:[#allocation40_spill] sm:$0xff] %v7232_v35  ;;  %v7294_v30 = vmul.f32 %v7172_v11, %v461_v9  ;;  %v7297_v33 = vmul.f32 %v7174_v12, %v461_v9 }
  0xbf   : > { %11330 = vst [vmem:[#allocation41_spill] sm:$0xff] %v7235_v36 }
  0xc0   : > { %11331 = vst [vmem:[#allocation42_spill] sm:$0xff] %v7238_v37 }
  0xc1   : > { %11332 = vst [vmem:[#allocation43_spill] sm:$0xff] %v7241_v38  ;;  %v7309_v38 = vmul.f32 %v7129_v54, %v387_v29  ;;  %v421_v54 = vmul.f32 %v7121_v50, %v387_v29 }
  0xc2   : > { %11333 = vst [vmem:[#allocation44_spill] sm:$0xff] %v7244_v39  ;;  %v7303_v39 = vmul.f32 %v7127_v53, %v387_v29  ;;  %v7326_v53 = vperm.slane %v7306_v28, 1 }
  0xc3   : > { %11334 = vst [vmem:[#allocation45_spill] sm:$0xff] %v7247_v40  ;;  %v7300_v40 = vmul.f32 %v7176_v13, %v461_v9 }
  0xc4   : > { %11335 = vst [vmem:[#allocation46_spill] sm:$0xff] %v7250_v41  ;;  %v7291_v41 = vmul.f32 %v7170_v10, %v461_v9  ;;  %v7320_v9 = vpop.permute.xlu2 %555  ;;  %v457_v21 = vpop.permute.xlu1 %456 }
  0xc5   : > { %11336 = vst [vmem:[#allocation47_spill] sm:$0xff] %v7255_v43  ;;  %v587_v56 = vmul.f32 %v7323_v22, %v7320_v9  ;;  %v488_v20 = vmul.f32 %v7162_v5, %v457_v21  ;;  %v490_v50 = vmul.f32 %v7166_v7, %v457_v21  ;;  %v7351_v3 = vmul.f32 %v7174_v12, %v457_v21 }
  0xc6   : > { %11337 = vst [vmem:[#allocation48_spill] sm:$0xff] %v7258_v44  ;;  %v11363_v44 = vmov 0   ;;  %v11364_v43 = vmov 920167782  }
  0xc7   : > { %11338 = vst [vmem:[#allocation49_spill] sm:$0xff] %v7261_v45  ;;  %v520_v5 = vadd.f32 %v488_v20, %v421_v54 }
  0xc8   : > { %11339 = vst [vmem:[#allocation50_spill] sm:$0xff] %v7264_v46 }
  0xc9   : > { %11340 = vst [vmem:[#allocation51_spill] sm:$0xff] %v7267_v47  ;;  %v7336_v47 = vperm.slane %v7306_v28, 2 }
  0xca   : > { %11341 = vst [vmem:[#allocation52_spill] sm:$0xff] %v7270_v49  ;;  %v422_v49 = vmul.f32 %v7123_v51, %v387_v29  ;;  %v7342_v51 = vmul.f32 %v7168_v8, %v457_v21 }
  0xcb   : > { %11342 = vst [vmem:[#allocation53_spill] sm:$0xff] %v7273_v58  ;;  %v7318_v58 = vmul.f32 %v7135_v57, %v387_v29  ;;  %v588_v57 = vmul.f32 %v7326_v53, %v7320_v9  ;;  %v589_v7 = vmul.f32 %v7336_v47, %v7320_v9 }
  0xcc   : > { %11343 = vst [vmem:[#allocation54_spill] sm:$0xff] %v7276_v4  ;;  %v7312_v4 = vmul.f32 %v7131_v55, %v387_v29  ;;  %v423_v55 = vmul.f32 %v7125_v52, %v387_v29  ;;  %v7345_v52 = vmul.f32 %v7170_v10, %v457_v21  ;;  %v7348_v29 = vmul.f32 %v7172_v11, %v457_v21  ;;  %v7358_v8 = vpop.permute.xlu2 %657 }
  0xcd   : > { %11344 = vst [vmem:[#allocation55_spill] sm:$0xff] %v7288_v31 }
  0xce   : > { %11345 = vst [vmem:[#allocation56_spill] sm:$0xff] %v7291_v41 }
  0xcf   : > { %11346 = vst [vmem:[#allocation57_spill] sm:$0xff] %v7294_v30  ;;  %v619_v30 = vadd.f32 %v587_v56, %v520_v5 }
  0xd0   : > { %11347 = vst [vmem:[#allocation58_spill] sm:$0xff] %v7297_v33  ;;  %v7354_v33 = vmul.f32 %v7176_v13, %v457_v21 }
  0xd1   : > { %11348 = vst [vmem:[#allocation59_spill] sm:$0xff] %v7300_v40  ;;  %v489_v40 = vmul.f32 %v7164_v6, %v457_v21  ;;  %v522_v6 = vadd.f32 %v490_v50, %v423_v55  ;;  %v7361_v11 = vadd.f32 %v7358_v8, %v619_v30 }
  0xd2   : > { %11349 = vst [vmem:[#allocation60_spill] sm:$0xff] %v7309_v38 }
  0xd3   : > { %11350 = vst [vmem:[#allocation61_spill] sm:$0xff] %v7312_v4  ;;  %v521_v2 = vadd.f32 %v489_v40, %v422_v49  ;;  %v621_v0 = vadd.f32 %v589_v7, %v522_v6  ;;  %v11275_v20 = vand.u32 2147483647, %v7361_v11  ;;  %v710_v21 = vand.u32 2139095040, %v7361_v11 }
  0xd4   : > { %11351 = vst [vmem:[#allocation62_spill] sm:$0xff] %v7315_v23 }
  0xd5   : > { %11352 = vst [vmem:[#allocation63_spill] sm:$0xff] %v7318_v58  ;;  %v620_v10 = vadd.f32 %v588_v57, %v521_v2  ;;  %v7367_v13 = vadd.f32 %v7358_v8, %v621_v0  ;;  %v711_v54 = vshrl.u32 %v710_v21, 23  ;;  %v714_v2 = vand.u32 8388607, %v11275_v20 }
  0xd6   : > { %11353 = vst [vmem:[#allocation64_spill] sm:$0xff] %v7326_v53 }
  0xd7   : > { %11354 = vst [vmem:[#allocation65_spill] sm:$0xff] %v7336_v47  ;;  %v7364_v12 = vadd.f32 %v7358_v8, %v620_v10  ;;  %v1020_v56 = vand.u32 2139095040, %v7367_v13  ;;  %v6389_v0 = vadd.s32 4294967169, %v711_v54  ;;  %v715_v57 = vor.u32 8388608, %v714_v2 }
  0xd8   : > { %11355 = vst [vmem:[#allocation66_spill] sm:$0xff] %v7345_v52  ;;  %v11286_v52 = vmov 1326507024  }
  0xd9   : > { %11356 = vst [vmem:[#allocation67_spill] sm:$0xff] %v7348_v29  ;;  %v11276_v40 = vand.u32 2147483647, %v7364_v12  ;;  %v865_v49 = vand.u32 2139095040, %v7364_v12  ;;  %v717_v6 = vadd.s32 1, %v6389_v0  ;;  %v1021_v10 = vshrl.u32 %v1020_v56, 23 }
  0xda   : > { %11357 = vst [vmem:[#allocation68_spill] sm:$0xff] %v7351_v3  ;;  %v7378_v41 = vshll.u32 %v715_v57, 8  ;;  %v11277_v56 = vmov 683565275   ;;  %v11279_v57 = vmov 2475754826  }
  0xdb   : > { %11358 = vst [vmem:[#allocation69_spill] sm:$0xff] %v7354_v33  ;;  %v866_v30 = vshrl.u32 %v865_v49, 23  ;;  %v869_v55 = vand.u32 8388607, %v11276_v40  ;;  %vm718_vm1 = vcmp.gt.s32.totalorder %v717_v6, 0  ;;  %v7382_v33 = vadd.s32 4294967169, %v1021_v10 }
  0xdc   : > { %v719_v21 = vsel %vm718_vm1, %v717_v6, 0  ;;  %v7385_v54 = vand.u32 65535, %v7378_v41  ;;  %v7388_v2 = vshrl.u32 %v7378_v41, 16  ;;  %v11283_v3 = vmov 2102212464  }
  0xdd   : > { %v6392_v50 = vadd.s32 4294967169, %v866_v30  ;;  %v870_v5 = vor.u32 8388608, %v869_v55  ;;  %v721_v49 = vand.u32 31, %v719_v21  ;;  %v7392_v55 = vshrl.u32 %v719_v21, 5 }
  0xde   : > { %v11288_v29 = vmov 920167782  }
  0xdf   : > { %v872_v7 = vadd.s32 1, %v6392_v50  ;;  %v7380_v63 = vshll.u32 %v870_v5, 8  ;;  %v722_v40 = vsub.s32 32, %v721_v49  ;;  %v724_v0 = vshll.u32 %v11277_v56, %v721_v49 }
  0xe0   : > { %v727_v50 = vshll.u32 %v11279_v57, %v721_v49  ;;  %v733_v23 = vshll.u32 %v11283_v3, %v721_v49  ;;  %v736_v4 = vshll.u32 %v11288_v29, %v721_v49  ;;  %vm739_vm3 = vcmp.lt.s32.totalorder %v7392_v55, 1 }
  0xe1   : > { %vm873_vm2 = vcmp.gt.s32.totalorder %v872_v7, 0  ;;  %v7397_v5 = vand.u32 65535, %v7380_v63  ;;  %v725_v6 = vshrl.u32 %v11279_v57, %v722_v40  ;;  %v731_v21 = vshrl.u32 %v11283_v3, %v722_v40 }
  0xe2   : > { %v874_v20 = vsel %vm873_vm2, %v872_v7, 0  ;;  %v11281_v7 = vmov 2131351028   ;;  %v734_v56 = vshrl.u32 %v11288_v29, %v722_v40  ;;  %v737_v38 = vshrl.u32 %v11286_v52, %v722_v40 }
  0xe3   : > { %v7390_v30 = vand.u32 31, %v874_v20  ;;  %v728_v10 = vshrl.u32 %v11281_v7, %v722_v40  ;;  %v730_v58 = vshll.u32 %v11281_v7, %v721_v49  ;;  %v726_v27 = vor.u32 %v725_v6, %v724_v0 }
  0xe4   : > { %v735_v7 = vor.u32 %v734_v56, %v733_v23  ;;  %v738_v36 = vor.u32 %v737_v38, %v736_v4  ;;  %vm740_vm4 = vcmp.lt.s32.totalorder %v7392_v55, 2  ;;  %v11359_v3 = vmov 683565275  }
  0xe5   : > { %v729_v57 = vor.u32 %v728_v10, %v727_v50  ;;  %v732_v37 = vor.u32 %v731_v21, %v730_v58  ;;  %v7408_v26 = vsub.s32 32, %v7390_v30  ;;  %v723_v48 = vshrl.u32 %v11359_v3, %v722_v40 }
  0xe6   : > { %vm742_vm5 = vcmp.lt.s32.totalorder %v7392_v55, 4  ;;  %vm741_vm6 = vcmp.lt.s32.totalorder %v7392_v55, 3  ;;  %v879_v23 = vshll.u32 %v11359_v3, %v7390_v30  ;;  %v11360_v56 = vmov 2475754826  }
  0xe7   : > { %v747_v49 = vsel %vm739_vm3, %v726_v27, %v729_v57  ;;  %v751_v0 = vsel %vm739_vm3, %v729_v57, %v732_v37  ;;  %v748_v58 = vsel %vm742_vm5, %v735_v7, 920167782  ;;  %v752_v50 = vsel %vm742_vm5, %v738_v36, 1326507024 }
  0xe8   : > { %v744_v38 = vsel %vm742_vm5, %v732_v37, 2102212464  ;;  %v749_v4 = vsel %vm741_vm6, %v732_v37, %v748_v58  ;;  %v753_v40 = vsel %vm741_vm6, %v735_v7, %v752_v50  ;;  %v880_v6 = vshrl.u32 %v11360_v56, %v7408_v26 }
  0xe9   : > { %v750_v10 = vsel %vm740_vm4, %v747_v49, %v749_v4  ;;  %v754_v21 = vsel %vm740_vm4, %v751_v0, %v753_v40  ;;  %v882_v36 = vshll.u32 %v11360_v56, %v7390_v30  ;;  %v11361_v52 = vmov 2131351028  }
  0xea   : > { %v883_v29 = vshrl.u32 %v11361_v52, %v7408_v26  ;;  %v758_v25 = vand.u32 65535, %v754_v21  ;;  %v759_v37 = vshrl.u32 %v754_v21, 16  ;;  %v780_v58 = vand.u32 65535, %v750_v10 }
  0xeb   : > { %v781_v35 = vshrl.u32 %v750_v10, 16  ;;  %v743_v7 = vsel %vm739_vm3, %v723_v48, %v726_v27  ;;  %v745_v50 = vsel %vm741_vm6, %v729_v57, %v744_v38  ;;  %v7439_v49 = vshrl.u32 %v874_v20, 5 }
  0xec   : > { %v7441_v4 = vor.u32 %v880_v6, %v879_v23  ;;  %v761_v0 = vmul.u32 %v759_v37, %v7385_v54  ;;  %v762_v40 = vmul.u32 %v758_v25, %v7388_v2  ;;  %v7445_v24 = vor.u32 %v883_v29, %v882_v36 }
  0xed   : > { %v11362_v21 = vmov 2102212464   ;;  %v760_v10 = vmul.u32 %v758_v25, %v7385_v54  ;;  %v783_v48 = vmul.u32 %v781_v35, %v7385_v54  ;;  %v784_v27 = vmul.u32 %v780_v58, %v7388_v2 }
  0xee   : > { %v886_v34 = vshrl.u32 %v11362_v21, %v7408_v26  ;;  %v885_v20 = vshll.u32 %v11361_v52, %v7390_v30  ;;  %v763_v57 = vmul.u32 %v759_v37, %v7388_v2  ;;  %v764_v23 = vshll.u32 %v761_v0, 16 }
  0xef   : > { %v782_v38 = vmul.u32 %v780_v58, %v7385_v54  ;;  %v785_v29 = vmul.u32 %v781_v35, %v7388_v2  ;;  %v765_v6 = vshrl.u32 %v761_v0, 16  ;;  %v766_v36 = vshll.u32 %v762_v40, 16 }
  0xf0   : > { %v767_v46 = vshrl.u32 %v762_v40, 16  ;;  %v786_v18 = vshll.u32 %v783_v48, 16  ;;  %vm768_vm7 = vc.u32 %v760_v10, %v764_v23  ;;  %v770_v25 = vadd.s32 %v764_v23, %v760_v10 }
  0xf1   : > { %v788_v45 = vshll.u32 %v784_v27, 16  ;;  %v887_v17 = vor.u32 %v886_v34, %v885_v20  ;;  %v769_v16 = vsel %vm768_vm7, 1, %v11363_v44  ;;  %v889_v37 = vshrl.u32 %v11364_v43, %v7408_v26 }
  0xf2   : > { %vm790_vm8 = vc.u32 %v782_v38, %v786_v18  ;;  %v792_v19 = vadd.s32 %v786_v18, %v782_v38  ;;  %v771_v15 = vadd.s32 %v769_v16, %v763_v57  ;;  %vm772_vm9 = vc.u32 %v770_v25, %v766_v36 }
  0xf3   : > { %v791_v54 = vsel %vm790_vm8, 1, %v11363_v44  ;;  %v888_v35 = vshll.u32 %v11362_v21, %v7390_v30  ;;  %v773_v2 = vsel %vm772_vm9, 1, %v11363_v44  ;;  %v891_v34 = vshll.u32 %v11364_v43, %v7390_v30 }
  0xf4   : > { %v793_v58 = vadd.s32 %v791_v54, %v785_v29  ;;  %vm794_vm10 = vc.u32 %v792_v19, %v788_v45  ;;  %v775_v0 = vadd.s32 %v773_v2, %v771_v15  ;;  %v11365_v10 = vmov 1326507024  }
  0xf5   : > { %v795_v18 = vsel %vm794_vm10, 1, %v11363_v44  ;;  %v890_v40 = vor.u32 %v889_v37, %v888_v35  ;;  %v892_v16 = vshrl.u32 %v11365_v10, %v7408_v26  ;;  %v787_v20 = vshrl.u32 %v783_v48, 16 }
  0xf6   : > { %v789_v57 = vshrl.u32 %v784_v27, 16  ;;  %v7469_v23 = vadd.s32 %v792_v19, %v788_v45  ;;  %v797_v38 = vadd.s32 %v795_v18, %v793_v58  ;;  %v776_v36 = vadd.s32 %v775_v0, %v765_v6 }
  0xf7   : > { %v893_v25 = vor.u32 %v892_v16, %v891_v34  ;;  %vm894_vm11 = vcmp.lt.s32.totalorder %v7439_v49, 1  ;;  %vm897_vm12 = vcmp.lt.s32.totalorder %v7439_v49, 4  ;;  %vm896_vm13 = vcmp.lt.s32.totalorder %v7439_v49, 3 }
  0xf8   : > { %v798_v29 = vadd.s32 %v797_v38, %v787_v20  ;;  %v902_v15 = vsel %vm894_vm11, %v7441_v4, %v7445_v24  ;;  %v903_v30 = vsel %vm897_vm12, %v890_v40, 920167782  ;;  %v7480_v19 = vadd.s32 %v776_v36, %v767_v46 }
  0xf9   : > { %vm895_vm14 = vcmp.lt.s32.totalorder %v7439_v49, 2  ;;  %v904_v45 = vsel %vm896_vm13, %v887_v17, %v903_v30  ;;  %v906_v48 = vsel %vm894_vm11, %v7445_v24, %v887_v17  ;;  %v746_v27 = vsel %vm740_vm4, %v743_v7, %v745_v50 }
  0xfa   : > { %v799_v6 = vadd.s32 %v798_v29, %v789_v57  ;;  %v905_v37 = vsel %vm895_vm14, %v902_v15, %v904_v45  ;;  %v907_v46 = vsel %vm897_vm12, %v893_v25, 1326507024  ;;  %vm802_vm15 = vc.u32 %v7480_v19, %v7469_v23 }
  0xfb   : > { %v908_v54 = vsel %vm896_vm13, %v890_v40, %v907_v46  ;;  %v912_v35 = vshrl.u32 %v7380_v63, 16  ;;  %v935_v2 = vand.u32 65535, %v905_v37  ;;  %v936_v7 = vshrl.u32 %v905_v37, 16 }
  0xfc   : > { %v803_v58 = vadd.s32 1, %v799_v6  ;;  %v909_v55 = vsel %vm895_vm14, %v906_v48, %v908_v54  ;;  %v1027_v50 = vadd.s32 1, %v7382_v33  ;;  %v800_v34 = vmul.u32 %v7378_v41, %v746_v27 }
  0xfd   : > { %v913_v0 = vand.u32 65535, %v909_v55  ;;  %v914_v18 = vshrl.u32 %v909_v55, 16  ;;  %v11291_v16 = vand.u32 2147483647, %v7367_v13  ;;  %v878_v40 = vshrl.u32 %v11359_v3, %v7408_v26 }
  0xfe   : > { %v804_v20 = vsel %vm802_vm15, %v803_v58, %v799_v6  ;;  %v938_v57 = vmul.u32 %v936_v7, %v7397_v5  ;;  %v939_v38 = vmul.u32 %v935_v2, %v912_v35  ;;  %v899_v25 = vsel %vm897_vm12, %v887_v17, 2102212464 }
  0xff   : > { %v805_v36 = vadd.s32 %v804_v20, %v800_v34  ;;  %v916_v29 = vmul.u32 %v914_v18, %v7397_v5  ;;  %v917_v33 = vmul.u32 %v913_v0, %v912_v35  ;;  %v937_v41 = vmul.u32 %v935_v2, %v7397_v5 }
 0x100   : > { %v940_v15 = vmul.u32 %v936_v7, %v912_v35  ;;  %v941_v30 = vshll.u32 %v938_v57, 16  ;;  %vm1028_vm1 = vcmp.gt.s32.totalorder %v1027_v50, 0  ;;  %v915_v48 = vmul.u32 %v913_v0, %v7397_v5 }
 0x101   : > { %v806_v45 = vadd.s32 536870912, %v805_v36  ;;  %v918_v27 = vmul.u32 %v914_v18, %v912_v35  ;;  %v919_v26 = vshll.u32 %v916_v29, 16  ;;  %v921_v6 = vshll.u32 %v917_v33, 16 }
 0x102   : > { %v943_v37 = vshll.u32 %v939_v38, 16  ;;  %vm945_vm2 = vc.u32 %v937_v41, %v941_v30  ;;  %v947_v46 = vadd.s32 %v941_v30, %v937_v41  ;;  %v1024_v7 = vand.u32 8388607, %v11291_v16 }
 0x103   : > { %v807_v54 = vshrl.u32 %v806_v45, 30  ;;  %vm923_vm3 = vc.u32 %v915_v48, %v919_v26  ;;  %v925_v17 = vadd.s32 %v919_v26, %v915_v48  ;;  %v946_v58 = vsel %vm945_vm2, 1, %v11363_v44 }
 0x104   : > { %v924_v55 = vsel %vm923_vm3, 1, %v11363_v44  ;;  %v948_v2 = vadd.s32 %v946_v58, %v940_v15  ;;  %vm949_vm4 = vc.u32 %v947_v46, %v943_v37  ;;  %v898_v5 = vsel %vm894_vm11, %v878_v40, %v7441_v4 }
 0x105   : > { %v808_v34 = vshll.u32 %v807_v54, 30  ;;  %v926_v35 = vadd.s32 %v924_v55, %v918_v27  ;;  %vm927_vm5 = vc.u32 %v925_v17, %v921_v6  ;;  %v900_v0 = vsel %vm896_vm13, %v7445_v24, %v899_v25 }
 0x106   : > { %v928_v18 = vsel %vm927_vm5, 1, %v11363_v44  ;;  %v950_v20 = vsel %vm949_vm4, 1, %v11363_v44  ;;  %v1029_v41 = vsel %vm1028_vm1, %v1027_v50, 0  ;;  %v920_v30 = vshrl.u32 %v916_v29, 16 }
 0x107   : > { %v809_v15 = vsub.s32 %v805_v36, %v808_v34  ;;  %v930_v45 = vadd.s32 %v928_v18, %v926_v35  ;;  %v952_v48 = vadd.s32 %v950_v20, %v948_v2  ;;  %v922_v26 = vshrl.u32 %v917_v33, 16 }
 0x108   : > { %v942_v58 = vshrl.u32 %v938_v57, 16  ;;  %v1025_v16 = vor.u32 8388608, %v1024_v7  ;;  %v1031_v4 = vand.u32 31, %v1029_v41  ;;  %v831_v27 = vsub.s32 4, %v807_v54 }
 0x109   : > { %vm810_vm6 = vcmp.lt.s32.totalorder %v809_v15, 0  ;;  %v811_v40 = vsub.s32 0, %v809_v15  ;;  %v931_v6 = vadd.s32 %v930_v45, %v920_v30  ;;  %v901_v24 = vsel %vm895_vm14, %v898_v5, %v900_v0 }
 0x10a   : > { %v944_v25 = vshrl.u32 %v939_v38, 16  ;;  %v953_v17 = vadd.s32 %v952_v48, %v942_v58  ;;  %v1032_v55 = vsub.s32 32, %v1031_v4  ;;  %v11366_v50 = vand.u32 2147483647, %v7361_v11 }
 0x10b   : > { %vm709_vm8 = vcmp.lt.s32.totalorder %v7361_v11, 0  ;;  %v812_v57 = vsel %vm810_vm6, %v811_v40, %v809_v15  ;;  %v7534_v29 = vadd.s32 %v931_v6, %v922_v26  ;;  %v801_v33 = vadd.s32 %v7469_v23, %v7480_v19 }
 0x10c   : > { %vm7529_vm7 = vcmp.le.f32.partialorder %v11366_v50, 0.7853982  ;;  %v813_v2 = vclz %v812_v57  ;;  %v7538_v49 = vadd.s32 %v947_v46, %v943_v37  ;;  %v954_v38 = vadd.s32 %v953_v17, %v944_v25 }
 0x10d   : > { %v832_v7 = vsel %vm709_vm8, %v831_v27, %v807_v54  ;;  %v955_v34 = vmul.u32 %v7380_v63, %v901_v24  ;;  %v7543_v5 = vshrl.u32 %v1029_v41, 5  ;;  %v7545_v35 = vshll.u32 %v1025_v16, 8 }
 0x10e   : > { %v6390_v0 = vadd.s32 4294967294, %v813_v2  ;;  %vm957_vm9 = vc.u32 %v7534_v29, %v7538_v49  ;;  %v958_v18 = vadd.s32 1, %v954_v38  ;;  %v1035_v23 = vshrl.u32 %v11360_v56, %v1032_v55 }
 0x10f   : > { %v1034_v19 = vshll.u32 %v11359_v3, %v1031_v4  ;;  %v1038_v37 = vshrl.u32 %v11361_v52, %v1032_v55  ;;  %v1041_v46 = vshrl.u32 %v11362_v21, %v1032_v55  ;;  %v1044_v54 = vshrl.u32 %v11364_v43, %v1032_v55 }
 0x110   : > { %vm6391_vm10 = vcmp.lt.s32.totalorder %v6390_v0, 0  ;;  %v959_v63 = vsel %vm957_vm9, %v958_v18, %v954_v38  ;;  %v1037_v16 = vshll.u32 %v11360_v56, %v1031_v4  ;;  %v1043_v20 = vshll.u32 %v11362_v21, %v1031_v4 }
 0x111   : > { %v816_v41 = vsel %vm6391_vm10, 0, %v6390_v0  ;;  %v960_v30 = vadd.s32 %v959_v63, %v955_v34  ;;  %v1040_v45 = vshll.u32 %v11361_v52, %v1031_v4  ;;  %v1047_v48 = vshrl.u32 %v11365_v10, %v1032_v55 }
 0x112   : > { %v817_v26 = vsub.s32 32, %v816_v41  ;;  %v821_v58 = vsub.s32 4294967266, %v816_v41  ;;  %v1036_v40 = vor.u32 %v1035_v23, %v1034_v19  ;;  %v1045_v27 = vor.u32 %v1044_v54, %v1043_v20 }
 0x113   : > { %v961_v6 = vadd.s32 536870912, %v960_v30  ;;  %v1039_v24 = vor.u32 %v1038_v37, %v1037_v16  ;;  %v1042_v25 = vor.u32 %v1041_v46, %v1040_v45  ;;  %v1046_v17 = vshll.u32 %v11364_v43, %v1031_v4 }
 0x114   : > { %v818_v50 = vshll.u32 %v809_v15, %v816_v41  ;;  %v819_v57 = vshrl.u32 %v801_v33, %v817_v26  ;;  %v822_v2 = vadd.s32 127, %v821_v58  ;;  %v834_v38 = vsel %vm7529_vm7, 0, %v832_v7 }
 0x115   : > { %v7561_v34 = vshrl.u32 %v961_v6, 30  ;;  %v1048_v0 = vor.u32 %v1047_v48, %v1046_v17  ;;  %vm1049_vm11 = vcmp.lt.s32.totalorder %v7543_v5, 1  ;;  %vm1052_vm12 = vcmp.lt.s32.totalorder %v7543_v5, 4 }
 0x116   : > { %v820_v18 = vor.u32 %v819_v57, %v818_v50  ;;  %v823_v23 = vshll.u32 %v822_v2, 23  ;;  %vm1051_vm13 = vcmp.lt.s32.totalorder %v7543_v5, 3  ;;  %v1058_v4 = vsel %vm1052_vm12, %v1045_v27, 920167782 }
 0x117   : > { %v963_v15 = vshll.u32 %v7561_v34, 30  ;;  %v1057_v33 = vsel %vm1049_vm11, %v1036_v40, %v1039_v24  ;;  %v1059_v7 = vsel %vm1051_vm13, %v1042_v25, %v1058_v4  ;;  %v851_v37 = vadd.s32 3, %v834_v38 }
 0x118   : > { %v824_v19 = vor.u32 4788187, %v823_v23  ;;  %v1061_v46 = vsel %vm1049_vm11, %v1039_v24, %v1042_v25  ;;  %v1066_v54 = vand.u32 65535, %v7545_v35  ;;  %v1033_v16 = vshrl.u32 %v11359_v3, %v1032_v55 }
 0x119   : > { %v7576_v63 = vsub.s32 %v960_v30, %v963_v15  ;;  %vm1050_vm14 = vcmp.lt.s32.totalorder %v7543_v5, 2  ;;  %v1062_v20 = vsel %vm1052_vm12, %v1048_v0, 1326507024  ;;  %v827_v45 = vcvt.s32.f32 %v820_v18 }
 0x11a   : > { %v825_v41 = vand.u32 2147483647, %v824_v19  ;;  %v1060_v48 = vsel %vm1050_vm14, %v1057_v33, %v1059_v7  ;;  %v1063_v26 = vsel %vm1051_vm13, %v1045_v27, %v1062_v20  ;;  %v1054_v55 = vsel %vm1052_vm12, %v1042_v25, 2102212464 }
 0x11b   : > { %vm965_vm15 = vcmp.lt.s32.totalorder %v7576_v63, 0  ;;  %v966_v30 = vsub.s32 0, %v7576_v63  ;;  %v1064_v58 = vsel %vm1050_vm14, %v1061_v46, %v1063_v26  ;;  %v7592_v17 = vand.u32 3, %v851_v37 }
 0x11c   : > { %v828_v6 = vmul.f32 %v827_v45, %v825_v41  ;;  %v1068_v50 = vand.u32 65535, %v1064_v58  ;;  %v1069_v57 = vshrl.u32 %v1064_v58, 16  ;;  %v1053_v27 = vsel %vm1049_vm11, %v1033_v16, %v1036_v40 }
 0x11d   : > { %v967_v2 = vsel %vm965_vm15, %v966_v30, %v7576_v63  ;;  %v1067_v38 = vshrl.u32 %v7545_v35, 16  ;;  %v1090_v0 = vand.u32 65535, %v1060_v48  ;;  %v1055_v25 = vsel %vm1051_vm13, %v1039_v24, %v1054_v55 }
 0x11e   : > { %v829_v18 = vxor.u32 2147483648, %v828_v6  ;;  %v968_v23 = vclz %v967_v2  ;;  %v1071_v4 = vmul.u32 %v1069_v57, %v1066_v54  ;;  %v956_v15 = vadd.s32 %v7538_v49, %v7534_v29 }
 0x11f   : > { %v986_v33 = vsub.s32 4, %v7561_v34  ;;  %v7603_v7 = vmul.u32 %v1068_v50, %v1067_v38  ;;  %v1091_v19 = vshrl.u32 %v1060_v48, 16  ;;  %v1070_v46 = vmul.u32 %v1068_v50, %v1066_v54 }
 0x120   : > { %v830_v40 = vsel %vm709_vm8, %v829_v18, %v828_v6  ;;  %v6393_v37 = vadd.s32 4294967294, %v968_v23  ;;  %v1074_v16 = vshll.u32 %v1071_v4, 16  ;;  %v7614_v24 = vsel %vm1050_vm14, %v1053_v27, %v1055_v25 }
 0x121   : > { %v7610_v20 = vsel %vm7529_vm7, %v7361_v11, %v830_v40  ;;  %v1073_v29 = vmul.u32 %v1069_v57, %v1067_v38  ;;  %v1092_v49 = vmul.u32 %v1090_v0, %v1066_v54  ;;  %vm864_vm1 = vcmp.lt.s32.totalorder %v7364_v12, 0 }
 0x122   : > { %v835_v41 = vmul.f32 %v7610_v20, %v7610_v20  ;;  %vm6394_vm2 = vcmp.lt.s32.totalorder %v6393_v37, 0  ;;  %vm1078_vm3 = vc.u32 %v1070_v46, %v1074_v16  ;;  %v1080_v45 = vadd.s32 %v1074_v16, %v1070_v46 }
 0x123   : > { %v971_v48 = vsel %vm6394_vm2, 0, %v6393_v37  ;;  %v1076_v26 = vshll.u32 %v7603_v7, 16  ;;  %v1079_v36 = vsel %vm1078_vm3, 1, %v11363_v44  ;;  %v1093_v30 = vmul.u32 %v1091_v19, %v1066_v54 }
 0x124   : > { %v836_v55 = vmul.f32 -0.001358992, %v835_v41  ;;  %v843_v5 = vmul.f32 -0.00019511016, %v835_v41  ;;  %v972_v58 = vsub.s32 32, %v971_v48  ;;  %v1094_v6 = vmul.u32 %v1090_v0, %v1067_v38 }
 0x125   : > { %v976_v50 = vsub.s32 4294967266, %v971_v48  ;;  %v1081_v57 = vadd.s32 %v1079_v36, %v1073_v29  ;;  %vm1082_vm4 = vc.u32 %v1080_v45, %v1076_v26  ;;  %v1096_v2 = vshll.u32 %v1093_v30, 16 }
 0x126   : > { %v837_v27 = vadd.f32 0.041655596, %v836_v55  ;;  %v844_v18 = vadd.f32 0.008332121, %v843_v5  ;;  %v974_v23 = vshrl.u32 %v956_v15, %v972_v58  ;;  %v1083_v25 = vsel %vm1082_vm4, 1, %v11363_v44 }
 0x127   : > { %v973_v40 = vshll.u32 %v7576_v63, %v971_v48  ;;  %v977_v37 = vadd.s32 127, %v976_v50  ;;  %v1075_v46 = vshrl.u32 %v1071_v4, 16  ;;  %v1085_v16 = vadd.s32 %v1083_v25, %v1081_v57 }
 0x128   : > { %v838_v47 = vmul.f32 %v837_v27, %v835_v41  ;;  %v845_v54 = vmul.f32 %v844_v18, %v835_v41  ;;  %v1095_v31 = vmul.u32 %v1091_v19, %v1067_v38  ;;  %v1098_v62 = vshll.u32 %v1094_v6, 16 }
 0x129   : > { %v975_v53 = vor.u32 %v974_v23, %v973_v40  ;;  %v978_v0 = vshll.u32 %v977_v37, 23  ;;  %vm1100_vm5 = vc.u32 %v1092_v49, %v1096_v2  ;;  %v1102_v29 = vadd.s32 %v1096_v2, %v1092_v49 }
 0x12a   : > { %v839_v45 = vadd.f32 -0.4999988, %v838_v47  ;;  %v846_v26 = vadd.f32 -0.16666654, %v845_v54  ;;  %v11369_v36 = vand.u32 2147483647, %v7364_v12  ;;  %v1086_v63 = vadd.s32 %v1085_v16, %v1075_v46 }
 0x12b   : > { %v1101_v4 = vsel %vm1100_vm5, 1, %v11363_v44  ;;  %v979_v48 = vor.u32 4788187, %v978_v0  ;;  %v987_v38 = vsel %vm864_vm1, %v986_v33, %v7561_v34  ;;  %vm1104_vm7 = vc.u32 %v1102_v29, %v1098_v62 }
 0x12c   : > { %vm7625_vm6 = vcmp.le.f32.partialorder %v11369_v36, 0.7853982  ;;  %v1103_v19 = vadd.s32 %v1101_v4, %v1095_v31  ;;  %v840_v55 = vmul.f32 %v839_v45, %v835_v41  ;;  %v847_v49 = vmul.f32 %v846_v26, %v835_v41  ;;  %v5733_v36 = vpop.f32.mrf.mxu0 }
 0x12d   : > { %vm853_vm8 = vcmp.lt.s32.totalorder %v7592_v17, 2  ;;  %v1077_v47 = vshrl.u32 %v7603_v7, 16  ;;  %v1105_v5 = vsel %vm1104_vm7, 1, %v11363_v44  ;;  %vm850_vm9 = vweird.f32 %v7361_v11 }
 0x12e   : > { %v980_v58 = vand.u32 2147483647, %v979_v48  ;;  %v982_v50 = vcvt.s32.f32 %v975_v53  ;;  %v1097_v57 = vshrl.u32 %v1093_v30, 16  ;;  %v1107_v2 = vadd.s32 %v1105_v5, %v1103_v19 }
 0x12f   : > { %v841_v27 = vadd.f32 1.0, %v840_v55  ;;  %v848_v18 = vadd.f32 1.0, %v847_v49  ;;  %v7637_v23 = vadd.s32 %v1086_v63, %v1077_v47  ;;  %v1099_v31 = vshrl.u32 %v1094_v6, 16 }
 0x130   : > { %v983_v34 = vmul.f32 %v982_v50, %v980_v58  ;;  %v1108_v33 = vadd.s32 %v1107_v2, %v1097_v57  ;;  %v523_v41 = vadd.f32 %v7342_v51, %v7303_v39  ;;  %v7642_v7 = vperm.slane %v7306_v28, 3 }
 0x131   : > { %v849_v25 = vmul.f32 %v848_v18, %v7610_v20  ;;  %v858_v40 = vxor.u32 2147483648, %v841_v27  ;;  %v7645_v37 = vadd.s32 %v1102_v29, %v1098_v62  ;;  %v7649_v53 = vadd.f32 %v7279_v14, %v7138_v59 }
 0x132   : > { %v984_v30 = vxor.u32 2147483648, %v983_v34  ;;  %v1109_v46 = vadd.s32 %v1108_v33, %v1099_v31  ;;  %v590_v6 = vmul.f32 %v7642_v7, %v7320_v9  ;;  %v7655_v39 = vadd.f32 %v7282_v32, %v7141_v60 }
 0x133   : > { %vm854_vm10 = vcmp.eq.s32.totalorder %v7592_v17, 0  ;;  %v855_v28 = vxor.u32 2147483648, %v849_v25  ;;  %vm857_vm11 = vcmp.eq.s32.totalorder %v7592_v17, 2  ;;  %vm1112_vm12 = vc.u32 %v7637_v23, %v7645_v37 }
 0x134   : > { %v985_v59 = vsel %vm864_vm1, %v984_v30, %v983_v34  ;;  %v989_v62 = vsel %vm7625_vm6, 0, %v987_v38  ;;  %v1113_v14 = vadd.s32 1, %v1109_v46  ;;  %v622_v51 = vadd.f32 %v590_v6, %v523_v41 }
 0x135   : > { %v856_v20 = vsel %vm854_vm10, %v841_v27, %v855_v28  ;;  %v859_v16 = vsel %vm857_vm11, %v858_v40, %v849_v25  ;;  %v988_v60 = vsel %vm7625_vm6, %v7364_v12, %v985_v59  ;;  %v1110_v32 = vmul.u32 %v7545_v35, %v7614_v24  ;;  %v7695_v40 = vpop.permute.xlu1 %672 }
 0x136   : > { %v860_v54 = vsel %vm853_vm8, %v856_v20, %v859_v16  ;;  %v990_v0 = vmul.f32 %v988_v60, %v988_v60  ;;  %v1114_v29 = vsel %vm1112_vm12, %v1113_v14, %v1109_v46  ;;  %v7673_v45 = vadd.f32 %v7358_v8, %v622_v51 }
 0x137   : > { %v861_v26 = vsel %vm850_vm9, nan, %v860_v54  ;;  %v1115_v63 = vadd.s32 %v1114_v29, %v1110_v32  ;;  %v1006_v38 = vadd.s32 3, %v989_v62  ;;  %v11372_v34 = vand.u32 2147483647, %v7367_v13 }
 0x138   : > { %v5948_v4 = vmul.f32 %v5733_v36, %v861_v26  ;;  %v991_v15 = vmul.f32 -0.001358992, %v990_v0  ;;  %v998_v48 = vmul.f32 -0.00019511016, %v990_v0  ;;  %v1172_v35 = vand.u32 2147483647, %v7673_v45 }
 0x139   : > { %v1116_v19 = vadd.s32 536870912, %v1115_v63  ;;  %v1175_v17 = vand.u32 2139095040, %v7673_v45  ;;  %v1007_v58 = vand.u32 3, %v1006_v38  ;;  %vm7688_vm13 = vcmp.le.f32.partialorder %v11372_v34, 0.7853982 }
 0x13a   : > { %6150 = vst [vmem:[%s7681_s17] sm:$0xff] %v5948_v4  ;;  %v992_v24 = vadd.f32 0.041655596, %v991_v15  ;;  %v999_v55 = vadd.f32 0.008332121, %v998_v48  ;;  %v1179_v2 = vand.u32 8388607, %v1172_v35  ;;  %v595_v6 = vmul.f32 %v7323_v22, %v7252_v42 }
 0x13b   : > { %v1117_v11 = vshrl.u32 %v1116_v19, 30  ;;  %v1176_v49 = vshrl.u32 %v1175_v17, 23  ;;  %vm1019_vm14 = vcmp.lt.s32.totalorder %v7367_v13, 0  ;;  %vm1008_vm15 = vcmp.lt.s32.totalorder %v1007_v58, 2 }
 0x13c   : > { %v993_v47 = vmul.f32 %v992_v24, %v990_v0  ;;  %v1000_v5 = vmul.f32 %v999_v55, %v990_v0  ;;  %vm1005_vm1 = vweird.f32 %v7364_v12  ;;  %v1180_v59 = vor.u32 8388608, %v1179_v2 }
 0x13d   : > { %v1118_v50 = vshll.u32 %v1117_v11, 30  ;;  %v6398_v57 = vadd.s32 4294967169, %v1176_v49  ;;  %v1141_v31 = vsub.s32 4, %v1117_v11  ;;  %vm1009_vm4 = vcmp.eq.s32.totalorder %v1007_v58, 0 }
 0x13e   : > { %v994_v27 = vadd.f32 -0.4999988, %v993_v47  ;;  %v1001_v18 = vadd.f32 -0.16666654, %v1000_v5  ;;  %vm1012_vm5 = vcmp.eq.s32.totalorder %v1007_v58, 2  ;;  %v1111_v29 = vadd.s32 %v7645_v37, %v7637_v23 }
 0x13f   : > { %v7693_v41 = vsub.s32 %v1115_v63, %v1118_v50  ;;  %v1182_v25 = vadd.s32 1, %v6398_v57  ;;  %v1142_v51 = vsel %vm1019_vm14, %v1141_v31, %v1117_v11  ;;  %v7709_v4 = vshll.u32 %v1180_v59, 8  ;;  %v7722_v57 = vpop.permute.xlu1 %662 }
 0x140   : > { %v995_v30 = vmul.f32 %v994_v27, %v990_v0  ;;  %v1002_v46 = vmul.f32 %v1001_v18, %v990_v0  ;;  %v1144_v36 = vsel %vm7688_vm13, 0, %v1142_v51  ;;  %v627_v15 = vadd.f32 %v595_v6, %v7649_v53  ;;  %v5762_v27 = vpop.f32.mrf.mxu1 }
 0x141   : > { %vm1120_vm2 = vcmp.lt.s32.totalorder %v7693_v41, 0  ;;  %v1121_v28 = vsub.s32 0, %v7693_v41  ;;  %vm1183_vm3 = vcmp.gt.s32.totalorder %v1182_v25, 0  ;;  %v1161_v12 = vadd.s32 3, %v1144_v36 }
 0x142   : > { %v996_v62 = vadd.f32 1.0, %v995_v30  ;;  %v1003_v14 = vadd.f32 1.0, %v1002_v46  ;;  %v1184_v20 = vsel %vm1183_vm3, %v1182_v25, 0  ;;  %v1222_v36 = vshrl.u32 %v7709_v4, 16 }
 0x143   : > { %v1122_v16 = vsel %vm1120_vm2, %v1121_v28, %v7693_v41  ;;  %v1186_v32 = vand.u32 31, %v1184_v20  ;;  %v7712_v17 = vshrl.u32 %v1184_v20, 5  ;;  %vm1160_vm3 = vweird.f32 %v7367_v13 }
 0x144   : > { %v1004_v54 = vmul.f32 %v1003_v14, %v988_v60  ;;  %v1013_v0 = vxor.u32 2147483648, %v996_v62  ;;  %v1123_v26 = vclz %v1122_v16 }
 0x145   : > { %v1187_v63 = vsub.s32 32, %v1186_v32  ;;  %v1189_v60 = vshll.u32 %v11359_v3, %v1186_v32  ;;  %v1192_v23 = vshll.u32 %v11360_v56, %v1186_v32  ;;  %v1195_v11 = vshll.u32 %v11361_v52, %v1186_v32 }
 0x146   : > { %v1010_v48 = vxor.u32 2147483648, %v1004_v54  ;;  %v1014_v38 = vsel %vm1012_vm5, %v1013_v0, %v1004_v54  ;;  %v6396_v19 = vadd.s32 4294967294, %v1123_v26  ;;  %v1198_v46 = vshll.u32 %v11362_v21, %v1186_v32 }
 0x147   : > { %v1190_v24 = vshrl.u32 %v11360_v56, %v1187_v63  ;;  %v1193_v37 = vshrl.u32 %v11361_v52, %v1187_v63  ;;  %v1196_v53 = vshrl.u32 %v11362_v21, %v1187_v63  ;;  %v1199_v58 = vshrl.u32 %v11364_v43, %v1187_v63 }
 0x148   : > { %v1011_v55 = vsel %vm1009_vm4, %v996_v62, %v1010_v48  ;;  %vm6397_vm6 = vcmp.lt.s32.totalorder %v6396_v19, 0  ;;  %v1201_v59 = vshll.u32 %v11364_v43, %v1186_v32  ;;  %v1202_v62 = vshrl.u32 %v11365_v10, %v1187_v63 }
 0x149   : > { %v1015_v49 = vsel %vm1008_vm15, %v1011_v55, %v1014_v38  ;;  %v1126_v47 = vsel %vm6397_vm6, 0, %v6396_v19  ;;  %v1191_v5 = vor.u32 %v1190_v24, %v1189_v60  ;;  %v1194_v50 = vor.u32 %v1193_v37, %v1192_v23 }
 0x14a   : > { %v1016_v2 = vsel %vm1005_vm1, nan, %v1015_v49  ;;  %v1127_v18 = vsub.s32 32, %v1126_v47  ;;  %v1128_v31 = vshll.u32 %v7693_v41, %v1126_v47  ;;  %v1131_v34 = vsub.s32 4294967266, %v1126_v47 }
 0x14b   : > { %v5949_v25 = vmul.f32 %v5762_v27, %v1016_v2  ;;  %v1197_v30 = vor.u32 %v1196_v53, %v1195_v11  ;;  %v1200_v14 = vor.u32 %v1199_v58, %v1198_v46  ;;  %vm1204_vm7 = vcmp.lt.s32.totalorder %v7712_v17, 1 }
 0x14c   : > { %v1129_v6 = vshrl.u32 %v1111_v29, %v1127_v18  ;;  %v1132_v28 = vadd.s32 127, %v1131_v34  ;;  %v7734_v41 = vadd.f32 %v7722_v57, %v627_v15  ;;  %v1203_v16 = vor.u32 %v1202_v62, %v1201_v59 }
 0x14d   : > { %6151 = vst [vmem:[%s7681_s17 + $0x8] sm:$0xff] %v5949_v25  ;;  %vm1207_vm8 = vcmp.lt.s32.totalorder %v7712_v17, 4  ;;  %vm1206_vm9 = vcmp.lt.s32.totalorder %v7712_v17, 3  ;;  %v1212_v32 = vsel %vm1204_vm7, %v1191_v5, %v1194_v50  ;;  %v1221_v0 = vand.u32 65535, %v7709_v4 }
 0x14e   : > { %v1130_v51 = vor.u32 %v1129_v6, %v1128_v31  ;;  %v1133_v20 = vshll.u32 %v1132_v28, 23  ;;  %v1213_v54 = vsel %vm1207_vm8, %v1200_v14, 920167782  ;;  %vm1205_vm10 = vcmp.lt.s32.totalorder %v7712_v17, 2 }
 0x14f   : > { %v1214_v26 = vsel %vm1206_vm9, %v1197_v30, %v1213_v54  ;;  %v1216_v38 = vsel %vm1204_vm7, %v1194_v50, %v1197_v30  ;;  %v1217_v19 = vsel %vm1207_vm8, %v1203_v16, 1326507024  ;;  %v1188_v55 = vshrl.u32 %v11359_v3, %v1187_v63 }
 0x150   : > { %v1134_v29 = vor.u32 4788187, %v1133_v20  ;;  %v1137_v15 = vcvt.s32.f32 %v1130_v51  ;;  %v1215_v48 = vsel %vm1205_vm10, %v1212_v32, %v1214_v26  ;;  %v1218_v24 = vsel %vm1206_vm9, %v1200_v14, %v1217_v19 }
 0x151   : > { %v1245_v23 = vand.u32 65535, %v1215_v48  ;;  %v1246_v37 = vshrl.u32 %v1215_v48, 16  ;;  %v1209_v11 = vsel %vm1207_vm8, %v1197_v30, 2102212464  ;;  %v1219_v53 = vsel %vm1205_vm10, %v1216_v38, %v1218_v24 }
 0x152   : > { %v1135_v60 = vand.u32 2147483647, %v1134_v29  ;;  %v1950_v49 = vand.u32 2139095040, %v7734_v41  ;;  %v1223_v2 = vand.u32 65535, %v1219_v53  ;;  %v1224_v27 = vshrl.u32 %v1219_v53, 16 }
 0x153   : > { %v1947_v18 = vand.u32 2147483647, %v7734_v41  ;;  %v7762_v31 = vand.u32 3, %v1161_v12  ;;  %v1208_v34 = vsel %vm1204_vm7, %v1188_v55, %v1191_v5  ;;  %v1248_v25 = vmul.u32 %v1246_v37, %v1221_v0 }
 0x154   : > { %v1138_v47 = vmul.f32 %v1137_v15, %v1135_v60  ;;  %v1249_v63 = vmul.u32 %v1245_v23, %v1222_v36  ;;  %v1210_v30 = vsel %vm1206_vm9, %v1194_v50, %v1209_v11  ;;  %v1226_v58 = vmul.u32 %v1224_v27, %v1221_v0 }
 0x155   : > { %v1227_v6 = vmul.u32 %v1223_v2, %v1222_v36  ;;  %v1247_v28 = vmul.u32 %v1245_v23, %v1221_v0  ;;  %v1250_v59 = vmul.u32 %v1246_v37, %v1222_v36  ;;  %v1251_v62 = vshll.u32 %v1248_v25, 16 }
 0x156   : > { %v1139_v46 = vxor.u32 2147483648, %v1138_v47  ;;  %v1951_v14 = vshrl.u32 %v1950_v49, 23  ;;  %v1225_v12 = vmul.u32 %v1223_v2, %v1221_v0  ;;  %v1228_v20 = vmul.u32 %v1224_v27, %v1222_v36 }
 0x157   : > { %v1229_v16 = vshll.u32 %v1226_v58, 16  ;;  %v1231_v32 = vshll.u32 %v1227_v6, 16  ;;  %v1253_v54 = vshll.u32 %v1249_v63, 16  ;;  %vm1255_vm11 = vc.u32 %v1247_v28, %v1251_v62 }
 0x158   : > { %v1140_v51 = vsel %vm1019_vm14, %v1139_v46, %v1138_v47  ;;  %v1256_v26 = vsel %vm1255_vm11, 1, %v11363_v44  ;;  %v1257_v48 = vadd.s32 %v1251_v62, %v1247_v28  ;;  %v6413_v19 = vadd.s32 4294967169, %v1951_v14 }
 0x159   : > { %v1143_v5 = vsel %vm7688_vm13, %v7367_v13, %v1140_v51  ;;  %vm1233_vm12 = vc.u32 %v1225_v12, %v1229_v16  ;;  %v1235_v29 = vadd.s32 %v1229_v16, %v1225_v12  ;;  %v1258_v38 = vadd.s32 %v1256_v26, %v1250_v59 }
 0x15a   : > { %v1145_v50 = vmul.f32 %v1143_v5, %v1143_v5  ;;  %v1234_v15 = vsel %vm1233_vm12, 1, %v11363_v44  ;;  %v1230_v24 = vshrl.u32 %v1226_v58, 16  ;;  %v1252_v23 = vshrl.u32 %v1248_v25, 16 }
 0x15b   : > { %v1236_v60 = vadd.s32 %v1234_v15, %v1228_v20  ;;  %vm1237_vm14 = vc.u32 %v1235_v29, %v1231_v32  ;;  %vm1259_vm13 = vc.u32 %v1257_v48, %v1253_v54  ;;  %v1232_v49 = vshrl.u32 %v1227_v6, 16 }
 0x15c   : > { %v1146_v0 = vmul.f32 -0.001358992, %v1145_v50  ;;  %v1153_v36 = vmul.f32 -0.00019511016, %v1145_v50  ;;  %v1238_v33 = vsel %vm1237_vm14, 1, %v11363_v44  ;;  %v1260_v53 = vsel %vm1259_vm13, 1, %v11363_v44 }
 0x15d   : > { %v1240_v11 = vadd.s32 %v1238_v33, %v1236_v60  ;;  %v1254_v47 = vshrl.u32 %v1249_v63, 16  ;;  %v1262_v2 = vadd.s32 %v1260_v53, %v1258_v38  ;;  %v1957_v27 = vadd.s32 1, %v6413_v19 }
 0x15e   : > { %v1147_v37 = vadd.f32 0.041655596, %v1146_v0  ;;  %v1154_v55 = vadd.f32 0.008332121, %v1153_v36  ;;  %v7777_v62 = vadd.s32 %v1257_v48, %v1253_v54  ;;  %v1954_v58 = vand.u32 8388607, %v1947_v18 }
 0x15f   : > { %v1241_v59 = vadd.s32 %v1240_v11, %v1230_v24  ;;  %v1263_v14 = vadd.s32 %v1262_v2, %v1252_v23  ;;  %vm1958_vm15 = vcmp.gt.s32.totalorder %v1957_v27, 0  ;;  %v7783_v25 = vadd.f32 %v7285_v1, %v7144_v61 }
 0x160   : > { %v1148_v46 = vmul.f32 %v1147_v37, %v1145_v50  ;;  %v1155_v28 = vmul.f32 %v1154_v55, %v1145_v50  ;;  %v1959_v63 = vsel %vm1958_vm15, %v1957_v27, 0  ;;  %v1211_v20 = vsel %vm1205_vm10, %v1208_v34, %v1210_v30 }
 0x161   : > { %v7785_v6 = vadd.s32 %v1241_v59, %v1232_v49  ;;  %v1264_v16 = vadd.s32 %v1263_v14, %v1254_v47  ;;  %v1961_v32 = vand.u32 31, %v1959_v63  ;;  %vm1163_vm1 = vcmp.lt.s32.totalorder %v7762_v31, 2 }
 0x162   : > { %v1149_v51 = vadd.f32 -0.4999988, %v1148_v46  ;;  %v1156_v12 = vadd.f32 -0.16666654, %v1155_v28  ;;  %vm1164_vm4 = vcmp.eq.s32.totalorder %v7762_v31, 0  ;;  %vm1167_vm5 = vcmp.eq.s32.totalorder %v7762_v31, 2 }
 0x163   : > { %vm1267_vm2 = vc.u32 %v7785_v6, %v7777_v62  ;;  %v1268_v1 = vadd.s32 1, %v1264_v16  ;;  %v1962_v61 = vsub.s32 32, %v1961_v32  ;;  %v1265_v34 = vmul.u32 %v7709_v4, %v1211_v20 }
 0x164   : > { %v1150_v54 = vmul.f32 %v1149_v51, %v1145_v50  ;;  %v1157_v29 = vmul.f32 %v1156_v12, %v1145_v50  ;;  %v1955_v30 = vor.u32 8388608, %v1954_v58  ;;  %v1964_v50 = vshll.u32 %v11359_v3, %v1961_v32  ;;  %v11375_v12 = vld [vmem:[#allocation64_spill] sm:$0xff] }
 0x165   : > { %v1269_v15 = vsel %vm1267_vm2, %v1268_v1, %v1264_v16  ;;  %v1965_v48 = vshrl.u32 %v11360_v56, %v1962_v61  ;;  %v1968_v38 = vshrl.u32 %v11361_v52, %v1962_v61  ;;  %v1971_v60 = vshrl.u32 %v11362_v21, %v1962_v61  ;;  %v5791_v16 = vpop.f32.mrf.mxu2 }
 0x166   : > { %v1151_v26 = vadd.f32 1.0, %v1150_v54  ;;  %v1158_v17 = vadd.f32 1.0, %v1157_v29  ;;  %v1270_v36 = vadd.s32 %v1269_v15, %v1265_v34  ;;  %v7800_v24 = vshrl.u32 %v1959_v63, 5 }
 0x167   : > { %v1967_v33 = vshll.u32 %v11360_v56, %v1961_v32  ;;  %v1973_v23 = vshll.u32 %v11362_v21, %v1961_v32  ;;  %v1974_v4 = vshrl.u32 %v11364_v43, %v1962_v61  ;;  %v1966_v11 = vor.u32 %v1965_v48, %v1964_v50 }
 0x168   : > { %v1159_v19 = vmul.f32 %v1158_v17, %v1143_v5  ;;  %v1168_v0 = vxor.u32 2147483648, %v1151_v26  ;;  %v1271_v55 = vadd.s32 536870912, %v1270_v36  ;;  %v1970_v53 = vshll.u32 %v11361_v52, %v1961_v32 }
 0x169   : > { %v7806_v49 = vor.u32 %v1968_v38, %v1967_v33  ;;  %v1975_v5 = vor.u32 %v1974_v4, %v1973_v23  ;;  %v1976_v47 = vshll.u32 %v11364_v43, %v1961_v32  ;;  %v1977_v2 = vshrl.u32 %v11365_v10, %v1962_v61 }
 0x16a   : > { %v1165_v37 = vxor.u32 2147483648, %v1159_v19  ;;  %v1169_v46 = vsel %vm1167_vm5, %v1168_v0, %v1159_v19  ;;  %v7814_v28 = vshrl.u32 %v1271_v55, 30  ;;  %v1972_v59 = vor.u32 %v1971_v60, %v1970_v53 }
 0x16b   : > { %v1978_v58 = vor.u32 %v1977_v2, %v1976_v47  ;;  %v7818_v51 = vshll.u32 %v1955_v30, 8  ;;  %v596_v63 = vmul.f32 %v11375_v12, %v7252_v42  ;;  %vm1979_vm6 = vcmp.lt.s32.totalorder %v7800_v24, 1 }
 0x16c   : > { %v1166_v27 = vsel %vm1164_vm4, %v1151_v26, %v1165_v37  ;;  %v1273_v32 = vshll.u32 %v7814_v28, 30  ;;  %vm1982_vm7 = vcmp.lt.s32.totalorder %v7800_v24, 4  ;;  %vm1981_vm8 = vcmp.lt.s32.totalorder %v7800_v24, 3 }
 0x16d   : > { %v1170_v14 = vsel %vm1163_vm1, %v1166_v27, %v1169_v46  ;;  %v1987_v31 = vsel %vm1979_vm6, %v1966_v11, %v7806_v49  ;;  %v1988_v29 = vsel %vm1982_vm7, %v1975_v5, 920167782  ;;  %vm1980_vm9 = vcmp.lt.s32.totalorder %v7800_v24, 2 }
 0x16e   : > { %v1171_v20 = vsel %vm1160_vm3, nan, %v1170_v14  ;;  %v1274_v1 = vsub.s32 %v1270_v36, %v1273_v32  ;;  %v1989_v13 = vsel %vm1981_vm8, %v1972_v59, %v1988_v29  ;;  %v1991_v26 = vsel %vm1979_vm6, %v7806_v49, %v1972_v59 }
 0x16f   : > { %v5950_v54 = vmul.f32 %v5791_v16, %v1171_v20  ;;  %v1990_v17 = vsel %vm1980_vm9, %v1987_v31, %v1989_v13  ;;  %v1992_v34 = vsel %vm1982_vm7, %v1978_v58, 1326507024  ;;  %v628_v30 = vadd.f32 %v596_v63, %v7655_v39 }
 0x170   : > { %vm1275_vm10 = vcmp.lt.s32.totalorder %v1274_v1, 0  ;;  %v1276_v15 = vsub.s32 0, %v1274_v1  ;;  %v1993_v50 = vsel %vm1981_vm8, %v1975_v5, %v1992_v34  ;;  %v1996_v48 = vand.u32 65535, %v7818_v51 }
 0x171   : > { %6152 = vst [vmem:[%s7681_s17 + $0x10] sm:$0xff] %v5950_v54  ;;  %v1963_v38 = vshrl.u32 %v11359_v3, %v1962_v61  ;;  %v1994_v19 = vsel %vm1980_vm9, %v1991_v26, %v1993_v50  ;;  %v2020_v0 = vand.u32 65535, %v1990_v17  ;;  %v2021_v36 = vshrl.u32 %v1990_v17, 16 }
 0x172   : > { %v1277_v60 = vsel %vm1275_vm10, %v1276_v15, %v1274_v1  ;;  %v1997_v33 = vshrl.u32 %v7818_v51, 16  ;;  %v1998_v23 = vand.u32 65535, %v1994_v19  ;;  %v1999_v4 = vshrl.u32 %v1994_v19, 16 }
 0x173   : > { %v1278_v39 = vclz %v1277_v60  ;;  %v2023_v37 = vmul.u32 %v2021_v36, %v1996_v48  ;;  %v1266_v55 = vadd.s32 %v7777_v62, %v7785_v6  ;;  %v1983_v53 = vsel %vm1979_vm6, %v1963_v38, %v1966_v11 }
 0x174   : > { %v2024_v5 = vmul.u32 %v2020_v0, %v1997_v33  ;;  %v7857_v61 = vadd.f32 %v7722_v57, %v628_v30  ;;  %v1984_v2 = vsel %vm1982_vm7, %v1972_v59, 2102212464  ;;  %v2001_v27 = vmul.u32 %v1999_v4, %v1996_v48 }
 0x175   : > { %v6399_v47 = vadd.s32 4294967294, %v1278_v39  ;;  %v2002_v46 = vmul.u32 %v1998_v23, %v1997_v33  ;;  %vm1174_vm11 = vcmp.lt.s32.totalorder %v7673_v45, 0  ;;  %v1296_v14 = vsub.s32 4, %v7814_v28 }
 0x176   : > { %v2000_v58 = vmul.u32 %v1998_v23, %v1996_v48  ;;  %v2022_v63 = vmul.u32 %v2020_v0, %v1996_v48  ;;  %v2026_v62 = vshll.u32 %v2023_v37, 16  ;;  %v2003_v6 = vmul.u32 %v1999_v4, %v1997_v33 }
 0x177   : > { %vm6400_vm12 = vcmp.lt.s32.totalorder %v6399_v47, 0  ;;  %v2004_v11 = vshll.u32 %v2001_v27, 16  ;;  %v2025_v20 = vmul.u32 %v2021_v36, %v1997_v33  ;;  %v2006_v32 = vshll.u32 %v2002_v46, 16 }
 0x178   : > { %v1281_v16 = vsel %vm6400_vm12, 0, %v6399_v47  ;;  %v2028_v54 = vshll.u32 %v2024_v5, 16  ;;  %vm2030_vm14 = vc.u32 %v2022_v63, %v2026_v62  ;;  %v2032_v34 = vadd.s32 %v2026_v62, %v2022_v63 }
 0x179   : > { %v1282_v31 = vsub.s32 32, %v1281_v16  ;;  %v1283_v29 = vshll.u32 %v1274_v1, %v1281_v16  ;;  %v1286_v59 = vsub.s32 4294967266, %v1281_v16  ;;  %vm2008_vm13 = vc.u32 %v2000_v58, %v2004_v11  ;;  %v11376_v16 = vld [vmem:[#allocation17_spill] sm:$0xff] }
 0x17a   : > { %v2009_v13 = vsel %vm2008_vm13, 1, %v11363_v44  ;;  %v2010_v26 = vadd.s32 %v2004_v11, %v2000_v58  ;;  %v2031_v17 = vsel %vm2030_vm14, 1, %v11363_v44  ;;  %v1985_v38 = vsel %vm1981_vm8, %v7806_v49, %v1984_v2 }
 0x17b   : > { %v1284_v30 = vshrl.u32 %v1266_v55, %v1282_v31  ;;  %v1287_v15 = vadd.s32 127, %v1286_v59  ;;  %v2011_v50 = vadd.s32 %v2009_v13, %v2003_v6  ;;  %v2033_v48 = vadd.s32 %v2031_v17, %v2025_v20  ;;  %v11380_v17 = vld [vmem:[#allocation65_spill] sm:$0xff] }
 0x17c   : > { %vm2012_vm15 = vc.u32 %v2010_v26, %v2006_v32  ;;  %vm2034_vm1 = vc.u32 %v2032_v34, %v2028_v54  ;;  %v2102_v1 = vand.u32 2147483647, %v7857_v61  ;;  %v2005_v33 = vshrl.u32 %v2001_v27, 16 }
 0x17d   : > { %v1285_v19 = vor.u32 %v1284_v30, %v1283_v29  ;;  %v1288_v0 = vshll.u32 %v1287_v15, 23  ;;  %v2013_v36 = vsel %vm2012_vm15, 1, %v11363_v44  ;;  %v2035_v60 = vsel %vm2034_vm1, 1, %v11363_v44 }
 0x17e   : > { %v2015_v23 = vadd.s32 %v2013_v36, %v2011_v50  ;;  %v2027_v4 = vshrl.u32 %v2023_v37, 16  ;;  %v2037_v39 = vadd.s32 %v2035_v60, %v2033_v48  ;;  %v1297_v47 = vsel %vm1174_vm11, %v1296_v14, %v7814_v28  ;;  %v11377_v37 = vld [vmem:[#allocation55_spill] sm:$0xff] }
 0x17f   : > { %v1289_v55 = vor.u32 4788187, %v1288_v0  ;;  %v2007_v49 = vshrl.u32 %v2002_v46, 16  ;;  %v2105_v2 = vand.u32 2139095040, %v7857_v61  ;;  %v1292_v58 = vcvt.s32.f32 %v1285_v19 }
 0x180   : > { %v2016_v63 = vadd.s32 %v2015_v23, %v2005_v33  ;;  %v2029_v62 = vshrl.u32 %v2024_v5, 16  ;;  %v2038_v6 = vadd.s32 %v2037_v39, %v2027_v4  ;;  %v2109_v27 = vand.u32 8388607, %v2102_v1 }
 0x181   : > { %v1290_v11 = vand.u32 2147483647, %v1289_v55  ;;  %v2106_v20 = vshrl.u32 %v2105_v2, 23  ;;  %v7879_v32 = vadd.f32 %v11377_v37, %v11376_v16  ;;  %v1986_v31 = vsel %vm1980_vm9, %v1983_v53, %v1985_v38 }
 0x182   : > { %v2017_v28 = vadd.s32 %v2016_v63, %v2007_v49  ;;  %v2036_v46 = vadd.s32 %v2032_v34, %v2028_v54  ;;  %v2039_v14 = vadd.s32 %v2038_v6, %v2029_v62  ;;  %vm7885_vm2 = vcmp.le.f32.partialorder %v1172_v35, 0.7853982 }
 0x183   : > { %v1293_v29 = vmul.f32 %v1292_v58, %v1290_v11  ;;  %v6416_v59 = vadd.s32 4294967169, %v2106_v20  ;;  %v1299_v13 = vsel %vm7885_vm2, 0, %v1297_v47  ;;  %v597_v24 = vmul.f32 %v11380_v17, %v7252_v42 }
 0x184   : > { %vm2042_vm3 = vc.u32 %v2017_v28, %v2036_v46  ;;  %v2043_v26 = vadd.s32 1, %v2039_v14  ;;  %v2040_v54 = vmul.u32 %v7818_v51, %v1986_v31  ;;  %v2110_v34 = vor.u32 8388608, %v2109_v27 }
 0x185   : > { %v1294_v53 = vxor.u32 2147483648, %v1293_v29  ;;  %v2112_v30 = vadd.s32 1, %v6416_v59  ;;  %v1316_v38 = vadd.s32 3, %v1299_v13  ;;  %v629_v0 = vadd.f32 %v597_v24, %v7783_v25 }
 0x186   : > { %v2044_v15 = vsel %vm2042_vm3, %v2043_v26, %v2039_v14  ;;  %v7900_v51 = vshll.u32 %v2110_v34, 8  ;;  %vm1949_vm5 = vcmp.lt.s32.totalorder %v7734_v41, 0  ;;  %v7908_v49 = vadd.s32 %v2036_v46, %v2017_v28 }
 0x187   : > { %v1295_v35 = vsel %vm1174_vm11, %v1294_v53, %v1293_v29  ;;  %v2045_v50 = vadd.s32 %v2044_v15, %v2040_v54  ;;  %vm2113_vm4 = vcmp.gt.s32.totalorder %v2112_v30, 0  ;;  %v7903_v23 = vadd.f32 %v7722_v57, %v629_v0 }
 0x188   : > { %v1298_v48 = vsel %vm7885_vm2, %v7673_v45, %v1295_v35  ;;  %v2114_v19 = vsel %vm2113_vm4, %v2112_v30, 0  ;;  %v7905_v47 = vand.u32 3, %v1316_v38  ;;  %vm7914_vm6 = vcmp.le.f32.partialorder %v1947_v18, 0.7853982 }
 0x189   : > { %v1300_v36 = vmul.f32 %v1298_v48, %v1298_v48  ;;  %v2046_v60 = vadd.s32 536870912, %v2045_v50  ;;  %v2116_v33 = vand.u32 31, %v2114_v19  ;;  %v7919_v6 = vand.u32 65535, %v7900_v51 }
 0x18a   : > { %v7922_v20 = vshrl.u32 %v7900_v51, 16  ;;  %v2257_v27 = vand.u32 2147483647, %v7903_v23  ;;  %v2260_v16 = vand.u32 2139095040, %v7903_v23  ;;  %v7928_v18 = vshrl.u32 %v2114_v19, 5 }
 0x18b   : > { %v1301_v4 = vmul.f32 -0.001358992, %v1300_v36  ;;  %v1308_v39 = vmul.f32 -0.00019511016, %v1300_v36  ;;  %v2047_v55 = vshrl.u32 %v2046_v60, 30  ;;  %v7910_v2 = vsub.s32 32, %v2116_v33 }
 0x18c   : > { %v2119_v46 = vshll.u32 %v11359_v3, %v2116_v33  ;;  %v2122_v5 = vshll.u32 %v11360_v56, %v2116_v33  ;;  %vm1322_vm7 = vcmp.eq.s32.totalorder %v7905_v47, 2  ;;  %vm1319_vm9 = vcmp.eq.s32.totalorder %v7905_v47, 0 }
 0x18d   : > { %v1302_v25 = vadd.f32 0.041655596, %v1301_v4  ;;  %v1309_v58 = vadd.f32 0.008332121, %v1308_v39  ;;  %v2048_v62 = vshll.u32 %v2047_v55, 30  ;;  %v2071_v11 = vsub.s32 4, %v2047_v55 }
 0x18e   : > { %v2120_v14 = vshrl.u32 %v11360_v56, %v7910_v2  ;;  %v2123_v29 = vshrl.u32 %v11361_v52, %v7910_v2  ;;  %v2126_v53 = vshrl.u32 %v11362_v21, %v7910_v2  ;;  %v2128_v54 = vshll.u32 %v11362_v21, %v2116_v33 }
 0x18f   : > { %v1303_v37 = vmul.f32 %v1302_v25, %v1300_v36  ;;  %v1310_v31 = vmul.f32 %v1309_v58, %v1300_v36  ;;  %v7926_v28 = vsub.s32 %v2045_v50, %v2048_v62  ;;  %v2072_v24 = vsel %vm1949_vm5, %v2071_v11, %v2047_v55 }
 0x190   : > { %v2129_v34 = vshrl.u32 %v11364_v43, %v7910_v2  ;;  %vm1318_vm10 = vcmp.lt.s32.totalorder %v7905_v47, 2  ;;  %v2132_v50 = vshrl.u32 %v11365_v10, %v7910_v2  ;;  %vm1315_vm11 = vweird.f32 %v7673_v45 }
 0x191   : > { %v1304_v59 = vadd.f32 -0.4999988, %v1303_v37  ;;  %v1311_v13 = vadd.f32 -0.16666654, %v1310_v31  ;;  %vm2050_vm8 = vcmp.lt.s32.totalorder %v7926_v28, 0  ;;  %v2051_v26 = vsub.s32 0, %v7926_v28 }
 0x192   : > { %v2121_v19 = vor.u32 %v2120_v14, %v2119_v46  ;;  %v2125_v0 = vshll.u32 %v11361_v52, %v2116_v33  ;;  %v2130_v60 = vor.u32 %v2129_v34, %v2128_v54  ;;  %v7953_v55 = vor.u32 %v2123_v29, %v2122_v5 }
 0x193   : > { %v1305_v30 = vmul.f32 %v1304_v59, %v1300_v36  ;;  %v1312_v15 = vmul.f32 %v1311_v13, %v1300_v36  ;;  %v2052_v35 = vsel %vm2050_vm8, %v2051_v26, %v7926_v28  ;;  %v2131_v36 = vshll.u32 %v11364_v43, %v2116_v33 }
 0x194   : > { %v2053_v38 = vclz %v2052_v35  ;;  %v2074_v58 = vsel %vm7914_vm6, 0, %v2072_v24  ;;  %v2127_v62 = vor.u32 %v2126_v53, %v2125_v0  ;;  %v2261_v11 = vshrl.u32 %v2260_v16, 23 }
 0x195   : > { %v1306_v4 = vadd.f32 1.0, %v1305_v30  ;;  %v1313_v39 = vadd.f32 1.0, %v1312_v15  ;;  %v2133_v59 = vor.u32 %v2132_v50, %v2131_v36  ;;  %vm2137_vm12 = vcmp.lt.s32.totalorder %v7928_v18, 4  ;;  %v5820_v50 = vpop.f32.mrf.mxu3 }
 0x196   : > { %v6414_v25 = vadd.s32 4294967294, %v2053_v38  ;;  %vm2134_vm13 = vcmp.lt.s32.totalorder %v7928_v18, 1  ;;  %vm2135_vm15 = vcmp.lt.s32.totalorder %v7928_v18, 2  ;;  %v2143_v46 = vsel %vm2137_vm12, %v2130_v60, 920167782 }
 0x197   : > { %v1314_v37 = vmul.f32 %v1313_v39, %v1298_v48  ;;  %v1323_v31 = vxor.u32 2147483648, %v1306_v4  ;;  %vm2136_vm1 = vcmp.lt.s32.totalorder %v7928_v18, 3  ;;  %v2142_v48 = vsel %vm2134_vm13, %v2121_v19, %v7953_v55 }
 0x198   : > { %vm6415_vm14 = vcmp.lt.s32.totalorder %v6414_v25, 0  ;;  %v2144_v24 = vsel %vm2136_vm1, %v2127_v62, %v2143_v46  ;;  %v2146_v53 = vsel %vm2134_vm13, %v7953_v55, %v2127_v62  ;;  %v2147_v54 = vsel %vm2137_vm12, %v2133_v59, 1326507024 }
 0x199   : > { %v1320_v33 = vxor.u32 2147483648, %v1314_v37  ;;  %v2056_v14 = vsel %vm6415_vm14, 0, %v6414_v25  ;;  %v1324_v16 = vsel %vm1322_vm7, %v1323_v31, %v1314_v37  ;;  %v2145_v15 = vsel %vm2135_vm15, %v2142_v48, %v2144_v24 }
 0x19a   : > { %v2057_v5 = vsub.s32 32, %v2056_v14  ;;  %v2058_v29 = vshll.u32 %v7926_v28, %v2056_v14  ;;  %v2061_v13 = vsub.s32 4294967266, %v2056_v14  ;;  %v2148_v38 = vsel %vm2136_vm1, %v2130_v60, %v2147_v54 }
 0x19b   : > { %v1321_v26 = vsel %vm1319_vm9, %v1306_v4, %v1320_v33  ;;  %v2175_v0 = vand.u32 65535, %v2145_v15  ;;  %v2176_v4 = vshrl.u32 %v2145_v15, 16  ;;  %v2118_v25 = vshrl.u32 %v11359_v3, %v7910_v2 }
 0x19c   : > { %v1325_v34 = vsel %vm1318_vm10, %v1321_v26, %v1324_v16  ;;  %v2059_v30 = vshrl.u32 %v7908_v49, %v2057_v5  ;;  %v2062_v28 = vadd.s32 127, %v2061_v13  ;;  %v2149_v49 = vsel %vm2135_vm15, %v2146_v53, %v2148_v38 }
 0x19d   : > { %v1326_v35 = vsel %vm1315_vm11, nan, %v1325_v34  ;;  %v2153_v37 = vand.u32 65535, %v2149_v49  ;;  %v2154_v31 = vshrl.u32 %v2149_v49, 16  ;;  %v2178_v45 = vmul.u32 %v2176_v4, %v7919_v6 }
 0x19e   : > { %v5951_v39 = vmul.f32 %v5820_v50, %v1326_v35  ;;  %v2060_v36 = vor.u32 %v2059_v30, %v2058_v29  ;;  %v2063_v47 = vshll.u32 %v2062_v28, 23  ;;  %v2091_v46 = vadd.s32 3, %v2074_v58 }
 0x19f   : > { %v2179_v60 = vmul.u32 %v2175_v0, %v7922_v20  ;;  %v6419_v33 = vadd.s32 4294967169, %v2261_v11  ;;  %v2138_v14 = vsel %vm2134_vm13, %v2118_v25, %v2121_v19  ;;  %v2139_v48 = vsel %vm2137_vm12, %v2127_v62, 2102212464 }
 0x1a0   : > { %6153 = vst [vmem:[%s7681_s17 + $0x18] sm:$0xff] %v5951_v39  ;;  %v2064_v59 = vor.u32 4788187, %v2063_v47  ;;  %v2156_v16 = vmul.u32 %v2154_v31, %v7919_v6  ;;  %v2157_v2 = vmul.u32 %v2153_v37, %v7922_v20  ;;  %v2067_v29 = vcvt.s32.f32 %v2060_v36 }
 0x1a1   : > { %v2177_v13 = vmul.u32 %v2175_v0, %v7919_v6  ;;  %v2181_v26 = vshll.u32 %v2178_v45, 16  ;;  %v2155_v58 = vmul.u32 %v2153_v37, %v7919_v6  ;;  %v2158_v24 = vmul.u32 %v2154_v31, %v7922_v20 }
 0x1a2   : > { %v2065_v5 = vand.u32 2147483647, %v2064_v59  ;;  %v2159_v11 = vshll.u32 %v2156_v16, 16  ;;  %v2180_v53 = vmul.u32 %v2176_v4, %v7922_v20  ;;  %v2183_v54 = vshll.u32 %v2179_v60, 16 }
 0x1a3   : > { %vm2185_vm2 = vc.u32 %v2177_v13, %v2181_v26  ;;  %v2187_v62 = vadd.s32 %v2181_v26, %v2177_v13  ;;  %v2161_v34 = vshll.u32 %v2157_v2, 16  ;;  %v2140_v6 = vsel %vm2136_vm1, %v7953_v55, %v2139_v48  ;;  %v11383_v13 = vld [vmem:[#allocation22_spill] sm:$0xff]  ;;  %v11384_v26 = vld [vmem:[#allocation47_spill] sm:$0xff] }
 0x1a4   : > { %v2068_v19 = vmul.f32 %v2067_v29, %v2065_v5  ;;  %vm2163_vm3 = vc.u32 %v2155_v58, %v2159_v11  ;;  %v2165_v30 = vadd.s32 %v2159_v11, %v2155_v58  ;;  %v2186_v28 = vsel %vm2185_vm2, 1, %v11363_v44 }
 0x1a5   : > { %v2164_v35 = vsel %vm2163_vm3, 1, %v11363_v44  ;;  %v2188_v50 = vadd.s32 %v2186_v28, %v2180_v53  ;;  %vm2189_vm4 = vc.u32 %v2187_v62, %v2183_v54  ;;  %v2182_v39 = vshrl.u32 %v2178_v45, 16 }
 0x1a6   : > { %v2069_v15 = vxor.u32 2147483648, %v2068_v19  ;;  %v2166_v38 = vadd.s32 %v2164_v35, %v2158_v24  ;;  %vm2167_vm7 = vc.u32 %v2165_v30, %v2161_v34  ;;  %v2190_v20 = vsel %vm2189_vm4, 1, %v11363_v44 }
 0x1a7   : > { %v2168_v4 = vsel %vm2167_vm7, 1, %v11363_v44  ;;  %v2192_v36 = vadd.s32 %v2190_v20, %v2188_v50  ;;  %v2160_v49 = vshrl.u32 %v2156_v16, 16  ;;  %v2267_v37 = vadd.s32 1, %v6419_v33 }
 0x1a8   : > { %v2070_v0 = vsel %vm1949_vm5, %v2069_v15, %v2068_v19  ;;  %v2170_v25 = vadd.s32 %v2168_v4, %v2166_v38  ;;  %v2141_v55 = vsel %vm2135_vm15, %v2138_v14, %v2140_v6  ;;  %v2184_v59 = vshrl.u32 %v2179_v60, 16 }
 0x1a9   : > { %v2073_v47 = vsel %vm7914_vm6, %v7734_v41, %v2070_v0  ;;  %v2193_v48 = vadd.s32 %v2192_v36, %v2182_v39  ;;  %v2162_v5 = vshrl.u32 %v2157_v2, 16  ;;  %vm2268_vm5 = vcmp.gt.s32.totalorder %v2267_v37, 0 }
 0x1aa   : > { %v2075_v31 = vmul.f32 %v2073_v47, %v2073_v47  ;;  %v2171_v29 = vadd.s32 %v2170_v25, %v2160_v49  ;;  %v8021_v45 = vadd.f32 %v11384_v26, %v11383_v13  ;;  %v2269_v11 = vsel %vm2268_vm5, %v2267_v37, 0 }
 0x1ab   : > { %v2194_v63 = vadd.s32 %v2193_v48, %v2184_v59  ;;  %v8025_v33 = vadd.s32 %v2187_v62, %v2183_v54  ;;  %v2264_v18 = vand.u32 8388607, %v2257_v27  ;;  %v2271_v60 = vand.u32 31, %v2269_v11 }
 0x1ac   : > { %v2076_v58 = vmul.f32 -0.001358992, %v2075_v31  ;;  %v2083_v24 = vmul.f32 -0.00019511016, %v2075_v31  ;;  %v8023_v16 = vadd.s32 %v2171_v29, %v2162_v5  ;;  %v598_v19 = vmul.f32 %v7642_v7, %v7252_v42 }
 0x1ad   : > { %v2198_v53 = vadd.s32 1, %v2194_v63  ;;  %v2092_v34 = vand.u32 3, %v2091_v46  ;;  %v2195_v30 = vmul.u32 %v7900_v51, %v2141_v55  ;;  %v8034_v28 = vsub.s32 32, %v2271_v60 }
 0x1ae   : > { %v2077_v14 = vadd.f32 0.041655596, %v2076_v58  ;;  %v2084_v2 = vadd.f32 0.008332121, %v2083_v24  ;;  %vm2197_vm6 = vc.u32 %v8023_v16, %v8025_v33  ;;  %v2265_v38 = vor.u32 8388608, %v2264_v18 }
 0x1af   : > { %v2199_v15 = vsel %vm2197_vm6, %v2198_v53, %v2194_v63  ;;  %v630_v20 = vadd.f32 %v598_v19, %v7879_v32  ;;  %vm2094_vm8 = vcmp.eq.s32.totalorder %v2092_v34, 0  ;;  %vm2097_vm9 = vcmp.eq.s32.totalorder %v2092_v34, 2 }
 0x1b0   : > { %v2078_v54 = vmul.f32 %v2077_v14, %v2075_v31  ;;  %v2085_v62 = vmul.f32 %v2084_v2, %v2075_v31  ;;  %v2200_v35 = vadd.s32 %v2199_v15, %v2195_v30  ;;  %v8037_v46 = vshrl.u32 %v2269_v11, 5 }
 0x1b1   : > { %v2275_v51 = vshrl.u32 %v11360_v56, %v8034_v28  ;;  %v2278_v4 = vshrl.u32 %v11361_v52, %v8034_v28  ;;  %vm2093_vm10 = vcmp.lt.s32.totalorder %v2092_v34, 2  ;;  %v2274_v49 = vshll.u32 %v11359_v3, %v2271_v60 }
 0x1b2   : > { %v2079_v50 = vadd.f32 -0.4999988, %v2078_v54  ;;  %v2086_v6 = vadd.f32 -0.16666654, %v2085_v62  ;;  %v2201_v0 = vadd.s32 536870912, %v2200_v35  ;;  %v2284_v25 = vshrl.u32 %v11364_v43, %v8034_v28 }
 0x1b3   : > { %vm2090_vm11 = vweird.f32 %v7734_v41  ;;  %v2277_v37 = vshll.u32 %v11360_v56, %v2271_v60  ;;  %v2281_v55 = vshrl.u32 %v11362_v21, %v8034_v28  ;;  %v2287_v59 = vshrl.u32 %v11365_v10, %v8034_v28 }
 0x1b4   : > { %v2080_v39 = vmul.f32 %v2079_v50, %v2075_v31  ;;  %v2087_v36 = vmul.f32 %v2086_v6, %v2075_v31  ;;  %v2202_v32 = vshrl.u32 %v2201_v0, 30  ;;  %v2283_v31 = vshll.u32 %v11362_v21, %v2271_v60 }
 0x1b5   : > { %v2286_v29 = vshll.u32 %v11364_v43, %v2271_v60  ;;  %v2276_v26 = vor.u32 %v2275_v51, %v2274_v49  ;;  %v8054_v58 = vor.u32 %v2278_v4, %v2277_v37  ;;  %v2280_v24 = vshll.u32 %v11361_v52, %v2271_v60  ;;  %v5736_v4 = vpop.f32.mrf.mxu0 }
 0x1b6   : > { %v2081_v48 = vadd.f32 1.0, %v2080_v39  ;;  %v2088_v5 = vadd.f32 1.0, %v2087_v36  ;;  %v2203_v13 = vshll.u32 %v2202_v32, 30  ;;  %v2285_v18 = vor.u32 %v2284_v25, %v2283_v31 }
 0x1b7   : > { %v2288_v14 = vor.u32 %v2287_v59, %v2286_v29  ;;  %v2282_v53 = vor.u32 %v2281_v55, %v2280_v24  ;;  %v8059_v19 = vshll.u32 %v2265_v38, 8  ;;  %v8062_v30 = vadd.f32 %v7722_v57, %v630_v20  ;;  %v11385_v24 = vld [vmem:[#allocation26_spill] sm:$0xff] }
 0x1b8   : > { %v2089_v63 = vmul.f32 %v2088_v5, %v2073_v47  ;;  %v2098_v11 = vxor.u32 2147483648, %v2081_v48  ;;  %v8057_v2 = vsub.s32 %v2200_v35, %v2203_v13  ;;  %vm2104_vm12 = vcmp.lt.s32.totalorder %v7857_v61, 0 }
 0x1b9   : > { %vm2289_vm14 = vcmp.lt.s32.totalorder %v8037_v46, 1  ;;  %vm2290_vm13 = vcmp.lt.s32.totalorder %v8037_v46, 2  ;;  %vm2291_vm15 = vcmp.lt.s32.totalorder %v8037_v46, 3  ;;  %vm2292_vm2 = vcmp.lt.s32.totalorder %v8037_v46, 4 }
 0x1ba   : > { %v2095_v54 = vxor.u32 2147483648, %v2089_v63  ;;  %vm2205_vm1 = vcmp.lt.s32.totalorder %v8057_v2, 0  ;;  %v2206_v47 = vsub.s32 0, %v8057_v2  ;;  %v2297_v60 = vsel %vm2289_vm14, %v2276_v26, %v8054_v58 }
 0x1bb   : > { %v2099_v15 = vsel %vm2097_vm9, %v2098_v11, %v2089_v63  ;;  %v2298_v35 = vsel %vm2292_vm2, %v2285_v18, 920167782  ;;  %v2302_v50 = vsel %vm2292_vm2, %v2288_v14, 1326507024  ;;  %v2301_v0 = vsel %vm2289_vm14, %v8054_v58, %v2282_v53 }
 0x1bc   : > { %v2096_v62 = vsel %vm2094_vm8, %v2081_v48, %v2095_v54  ;;  %v2207_v38 = vsel %vm2205_vm1, %v2206_v47, %v8057_v2  ;;  %v2299_v20 = vsel %vm2291_vm15, %v2282_v53, %v2298_v35  ;;  %v2303_v34 = vsel %vm2291_vm15, %v2285_v18, %v2302_v50 }
 0x1bd   : > { %v2100_v6 = vsel %vm2093_vm10, %v2096_v62, %v2099_v15  ;;  %v2208_v39 = vclz %v2207_v38  ;;  %v2300_v36 = vsel %vm2290_vm13, %v2297_v60, %v2299_v20  ;;  %v2226_v25 = vsub.s32 4, %v2202_v32 }
 0x1be   : > { %v2101_v51 = vsel %vm2090_vm11, nan, %v2100_v6  ;;  %v2273_v37 = vshrl.u32 %v11359_v3, %v8034_v28  ;;  %v2306_v55 = vand.u32 65535, %v8059_v19  ;;  %v2304_v41 = vsel %vm2290_vm13, %v2301_v0, %v2303_v34 }
 0x1bf   : > { %v5956_v49 = vmul.f32 %v5736_v4, %v2101_v51  ;;  %v6417_v59 = vadd.s32 4294967294, %v2208_v39  ;;  %v2330_v48 = vand.u32 65535, %v2300_v36  ;;  %v2331_v5 = vshrl.u32 %v2300_v36, 16 }
 0x1c0   : > { %v2307_v31 = vshrl.u32 %v8059_v19, 16  ;;  %v2308_v29 = vand.u32 65535, %v2304_v41  ;;  %v2309_v13 = vshrl.u32 %v2304_v41, 16  ;;  %v8102_v63 = vmul.f32 %v7323_v22, %v11385_v24 }
 0x1c1   : > { %6158 = vst [vmem:[%s7681_s17 + $0x40] sm:$0xff] %v5956_v49  ;;  %v2196_v28 = vadd.s32 %v8025_v33, %v8023_v16  ;;  %vm6418_vm3 = vcmp.lt.s32.totalorder %v6417_v59, 0  ;;  %v2293_v11 = vsel %vm2289_vm14, %v2273_v37, %v2276_v26  ;;  %v2333_v18 = vmul.u32 %v2331_v5, %v2306_v55 }
 0x1c2   : > { %v2211_v14 = vsel %vm6418_vm3, 0, %v6417_v59  ;;  %v8110_v54 = vsel %vm2104_vm12, %v2226_v25, %v2202_v32  ;;  %v2311_v47 = vmul.u32 %v2309_v13, %v2306_v55  ;;  %v2312_v60 = vmul.u32 %v2308_v29, %v2307_v31 }
 0x1c3   : > { %v2212_v62 = vsub.s32 32, %v2211_v14  ;;  %v2216_v15 = vsub.s32 4294967266, %v2211_v14  ;;  %v2294_v35 = vsel %vm2292_vm2, %v2282_v53, 2102212464  ;;  %v2334_v50 = vmul.u32 %v2330_v48, %v2307_v31 }
 0x1c4   : > { %v2213_v16 = vshll.u32 %v8057_v2, %v2211_v14  ;;  %v2310_v33 = vmul.u32 %v2308_v29, %v2306_v55  ;;  %v2314_v6 = vshll.u32 %v2311_v47, 16  ;;  %v2332_v38 = vmul.u32 %v2330_v48, %v2306_v55 }
 0x1c5   : > { %v2214_v26 = vshrl.u32 %v2196_v28, %v2212_v62  ;;  %v2217_v20 = vadd.s32 127, %v2216_v15  ;;  %v2313_v0 = vmul.u32 %v2309_v13, %v2307_v31  ;;  %v2336_v51 = vshll.u32 %v2333_v18, 16 }
 0x1c6   : > { %v2316_v4 = vshll.u32 %v2312_v60, 16  ;;  %vm2318_vm4 = vc.u32 %v2310_v33, %v2314_v6  ;;  %v2320_v32 = vadd.s32 %v2314_v6, %v2310_v33  ;;  %v2335_v39 = vmul.u32 %v2331_v5, %v2307_v31 }
 0x1c7   : > { %v2215_v36 = vor.u32 %v2214_v26, %v2213_v16  ;;  %v2218_v34 = vshll.u32 %v2217_v20, 23  ;;  %v2319_v49 = vsel %vm2318_vm4, 1, %v11363_v44  ;;  %v2338_v25 = vshll.u32 %v2334_v50, 16  ;;  %v11387_v20 = vld [vmem:[#allocation48_spill] sm:$0xff] }
 0x1c8   : > { %v2321_v53 = vadd.s32 %v2319_v49, %v2313_v0  ;;  %vm2322_vm7 = vc.u32 %v2320_v32, %v2316_v4  ;;  %vm2340_vm5 = vc.u32 %v2332_v38, %v2336_v51  ;;  %v2342_v2 = vadd.s32 %v2336_v51, %v2332_v38 }
 0x1c9   : > { %v2219_v37 = vor.u32 4788187, %v2218_v34  ;;  %v2323_v55 = vsel %vm2322_vm7, 1, %v11363_v44  ;;  %v2341_v59 = vsel %vm2340_vm5, 1, %v11363_v44  ;;  %v2412_v41 = vand.u32 2147483647, %v8062_v30 }
 0x1ca   : > { %v2315_v48 = vshrl.u32 %v2311_v47, 16  ;;  %v2325_v29 = vadd.s32 %v2323_v55, %v2321_v53  ;;  %v2343_v13 = vadd.s32 %v2341_v59, %v2335_v39  ;;  %vm2344_vm6 = vc.u32 %v2342_v2, %v2338_v25  ;;  %v11386_v47 = vld [vmem:[#allocation23_spill] sm:$0xff] }
 0x1cb   : > { %v2220_v5 = vand.u32 2147483647, %v2219_v37  ;;  %v2222_v31 = vcvt.s32.f32 %v2215_v36  ;;  %v2317_v28 = vshrl.u32 %v2312_v60, 16  ;;  %v2345_v14 = vsel %vm2344_vm6, 1, %v11363_v44  ;;  %v8130_v36 = vpop.permute.xlu0 %667 }
 0x1cc   : > { %v2326_v62 = vadd.s32 %v2325_v29, %v2315_v48  ;;  %v2337_v15 = vshrl.u32 %v2333_v18, 16  ;;  %v2347_v16 = vadd.s32 %v2345_v14, %v2343_v13  ;;  %v2415_v33 = vand.u32 2139095040, %v8062_v30 }
 0x1cd   : > { %v2223_v6 = vmul.f32 %v2222_v31, %v2220_v5  ;;  %v2295_v38 = vsel %vm2291_vm15, %v8054_v58, %v2294_v35  ;;  %v2339_v26 = vshrl.u32 %v2334_v50, 16  ;;  %v8126_v0 = vadd.f32 %v11387_v20, %v11386_v47 }
 0x1ce   : > { %v2327_v51 = vadd.s32 %v2326_v62, %v2317_v28  ;;  %v2348_v4 = vadd.s32 %v2347_v16, %v2337_v15  ;;  %v2416_v60 = vshrl.u32 %v2415_v33, 23  ;;  %v2419_v32 = vand.u32 8388607, %v2412_v41 }
 0x1cf   : > { %v2224_v18 = vxor.u32 2147483648, %v2223_v6  ;;  %v2346_v39 = vadd.s32 %v2342_v2, %v2338_v25  ;;  %vm2103_vm8 = vcmp.le.f32.partialorder %v2102_v1, 0.7853982  ;;  %v2296_v58 = vsel %vm2290_vm13, %v2293_v11, %v2295_v38 }
 0x1d0   : > { %v2349_v35 = vadd.s32 %v2348_v4, %v2339_v26  ;;  %v6422_v50 = vadd.s32 4294967169, %v2416_v60  ;;  %v2229_v49 = vsel %vm2103_vm8, 0, %v8110_v54  ;;  %v635_v53 = vadd.f32 %v8102_v63, %v8021_v45 }
 0x1d1   : > { %v2225_v34 = vsel %vm2104_vm12, %v2224_v18, %v2223_v6  ;;  %vm2352_vm9 = vc.u32 %v2327_v51, %v2346_v39  ;;  %v2420_v37 = vor.u32 8388608, %v2419_v32  ;;  %v2350_v46 = vmul.u32 %v8059_v19, %v2296_v58 }
 0x1d2   : > { %v2228_v25 = vsel %vm2103_vm8, %v7857_v61, %v2225_v34  ;;  %v2353_v2 = vadd.s32 1, %v2349_v35  ;;  %v2422_v55 = vadd.s32 1, %v6422_v50  ;;  %v8144_v11 = vadd.f32 %v8130_v36, %v635_v53 }
 0x1d3   : > { %v2230_v1 = vmul.f32 %v2228_v25, %v2228_v25  ;;  %v2246_v59 = vadd.s32 3, %v2229_v49  ;;  %v8146_v45 = vshll.u32 %v2420_v37, 8  ;;  %v8151_v38 = vadd.s32 %v2346_v39, %v2327_v51 }
 0x1d4   : > { %v2354_v48 = vsel %vm2352_vm9, %v2353_v2, %v2349_v35  ;;  %vm2423_vm10 = vcmp.gt.s32.totalorder %v2422_v55, 0  ;;  %v3190_v62 = vand.u32 2139095040, %v8144_v11  ;;  %v3187_v20 = vand.u32 2147483647, %v8144_v11 }
 0x1d5   : > { %v2231_v29 = vmul.f32 -0.001358992, %v2230_v1  ;;  %v2238_v54 = vmul.f32 -0.00019511016, %v2230_v1  ;;  %v2355_v13 = vadd.s32 %v2354_v48, %v2350_v46  ;;  %v2424_v5 = vsel %vm2423_vm10, %v2422_v55, 0 }
 0x1d6   : > { %v2426_v31 = vand.u32 31, %v2424_v5  ;;  %v2247_v15 = vand.u32 3, %v2246_v59  ;;  %v8154_v26 = vand.u32 65535, %v8146_v45  ;;  %v8157_v47 = vshrl.u32 %v8146_v45, 16 }
 0x1d7   : > { %v2232_v63 = vadd.f32 0.041655596, %v2231_v29  ;;  %v2239_v28 = vadd.f32 0.008332121, %v2238_v54  ;;  %v2356_v14 = vadd.s32 536870912, %v2355_v13  ;;  %v3191_v18 = vshrl.u32 %v3190_v62, 23 }
 0x1d8   : > { %v2427_v19 = vsub.s32 32, %v2426_v31  ;;  %vm2249_vm11 = vcmp.eq.s32.totalorder %v2247_v15, 0  ;;  %vm2252_vm12 = vcmp.eq.s32.totalorder %v2247_v15, 2  ;;  %v8161_v58 = vshrl.u32 %v2424_v5, 5 }
 0x1d9   : > { %v2233_v16 = vmul.f32 %v2232_v63, %v2230_v1  ;;  %v2240_v33 = vmul.f32 %v2239_v28, %v2230_v1  ;;  %v8149_v6 = vshrl.u32 %v2356_v14, 30  ;;  %vm2248_vm14 = vcmp.lt.s32.totalorder %v2247_v15, 2 }
 0x1da   : > { %v2430_v51 = vshrl.u32 %v11360_v56, %v2427_v19  ;;  %v2433_v39 = vshrl.u32 %v11361_v52, %v2427_v19  ;;  %v2439_v35 = vshrl.u32 %v11364_v43, %v2427_v19  ;;  %v2429_v53 = vshll.u32 %v11359_v3, %v2426_v31 }
 0x1db   : > { %v2234_v4 = vadd.f32 -0.4999988, %v2233_v16  ;;  %v2241_v60 = vadd.f32 -0.16666654, %v2240_v33  ;;  %v2358_v32 = vshll.u32 %v8149_v6, 30  ;;  %vm2245_vm13 = vweird.f32 %v7857_v61 }
 0x1dc   : > { %v2432_v2 = vshll.u32 %v11360_v56, %v2426_v31  ;;  %v2436_v37 = vshrl.u32 %v11362_v21, %v2427_v19  ;;  %v2438_v55 = vshll.u32 %v11362_v21, %v2426_v31  ;;  %v2442_v46 = vshrl.u32 %v11365_v10, %v2427_v19 }
 0x1dd   : > { %v2235_v50 = vmul.f32 %v2234_v4, %v2230_v1  ;;  %v2242_v34 = vmul.f32 %v2241_v60, %v2230_v1  ;;  %v8166_v49 = vsub.s32 %v2355_v13, %v2358_v32  ;;  %vm2259_vm15 = vcmp.lt.s32.totalorder %v7903_v23, 0 }
 0x1de   : > { %v2431_v29 = vor.u32 %v2430_v51, %v2429_v53  ;;  %v2434_v54 = vor.u32 %v2433_v39, %v2432_v2  ;;  %v2435_v13 = vshll.u32 %v11361_v52, %v2426_v31  ;;  %v2440_v5 = vor.u32 %v2439_v35, %v2438_v55 }
 0x1df   : > { %v2236_v59 = vadd.f32 1.0, %v2235_v50  ;;  %v2243_v48 = vadd.f32 1.0, %v2242_v34  ;;  %vm2360_vm1 = vcmp.lt.s32.totalorder %v8166_v49, 0  ;;  %v2361_v1 = vsub.s32 0, %v8166_v49 }
 0x1e0   : > { %v2441_v62 = vshll.u32 %v11364_v43, %v2426_v31  ;;  %vm8182_vm2 = vcmp.le.f32.partialorder %v2257_v27, 0.7853982  ;;  %v2428_v4 = vshrl.u32 %v11359_v3, %v2427_v19  ;;  %v2437_v60 = vor.u32 %v2436_v37, %v2435_v13  ;;  %v5765_v37 = vpop.f32.mrf.mxu1 }
 0x1e1   : > { %v2244_v63 = vmul.f32 %v2243_v48, %v2228_v25  ;;  %v2253_v28 = vxor.u32 2147483648, %v2236_v59  ;;  %v2362_v14 = vsel %vm2360_vm1, %v2361_v1, %v8166_v49  ;;  %v6437_v32 = vadd.s32 4294967169, %v3191_v18 }
 0x1e2   : > { %v2363_v33 = vclz %v2362_v14  ;;  %v2381_v39 = vsub.s32 4, %v8149_v6  ;;  %v2443_v25 = vor.u32 %v2442_v46, %v2441_v62  ;;  %vm2444_vm3 = vcmp.lt.s32.totalorder %v8161_v58, 1 }
 0x1e3   : > { %v2250_v51 = vxor.u32 2147483648, %v2244_v63  ;;  %vm2445_vm4 = vcmp.lt.s32.totalorder %v8161_v58, 2  ;;  %vm2447_vm7 = vcmp.lt.s32.totalorder %v8161_v58, 4  ;;  %v2452_v27 = vsel %vm2444_vm3, %v2431_v29, %v2434_v54 }
 0x1e4   : > { %v6420_v35 = vadd.s32 4294967294, %v2363_v33  ;;  %v2254_v19 = vsel %vm2252_vm12, %v2253_v28, %v2244_v63  ;;  %vm2446_vm5 = vcmp.lt.s32.totalorder %v8161_v58, 3  ;;  %v2453_v18 = vsel %vm2447_vm7, %v2440_v5, 920167782 }
 0x1e5   : > { %v2251_v31 = vsel %vm2249_vm11, %v2236_v59, %v2250_v51  ;;  %v2454_v34 = vsel %vm2446_vm5, %v2437_v60, %v2453_v18  ;;  %v2456_v53 = vsel %vm2444_vm3, %v2434_v54, %v2437_v60  ;;  %v2457_v15 = vsel %vm2447_vm7, %v2443_v25, 1326507024 }
 0x1e6   : > { %v2255_v50 = vsel %vm2248_vm14, %v2251_v31, %v2254_v19  ;;  %vm6421_vm6 = vcmp.lt.s32.totalorder %v6420_v35, 0  ;;  %v2455_v46 = vsel %vm2445_vm4, %v2452_v27, %v2454_v34  ;;  %v8212_v13 = vsel %vm2259_vm15, %v2381_v39, %v8149_v6 }
 0x1e7   : > { %v2256_v2 = vsel %vm2245_vm13, nan, %v2255_v50  ;;  %v2366_v55 = vsel %vm6421_vm6, 0, %v6420_v35  ;;  %v2449_v61 = vsel %vm2447_vm7, %v2437_v60, 2102212464  ;;  %v2458_v63 = vsel %vm2446_vm5, %v2440_v5, %v2457_v15 }
 0x1e8   : > { %v5957_v59 = vmul.f32 %v5765_v37, %v2256_v2  ;;  %v2367_v48 = vsub.s32 32, %v2366_v55  ;;  %v2371_v1 = vsub.s32 4294967266, %v2366_v55  ;;  %v2485_v28 = vand.u32 65535, %v2455_v46 }
 0x1e9   : > { %v2486_v14 = vshrl.u32 %v2455_v46, 16  ;;  %v2368_v62 = vshll.u32 %v8166_v49, %v2366_v55  ;;  %v2459_v25 = vsel %vm2445_vm4, %v2456_v53, %v2458_v63  ;;  %v2384_v6 = vsel %vm8182_vm2, 0, %v8212_v13 }
 0x1ea   : > { %6159 = vst [vmem:[%s7681_s17 + $0x48] sm:$0xff] %v5957_v59  ;;  %v2369_v33 = vshrl.u32 %v8151_v38, %v2367_v48  ;;  %v2372_v51 = vadd.s32 127, %v2371_v1  ;;  %v2463_v39 = vand.u32 65535, %v2459_v25  ;;  %v2464_v60 = vshrl.u32 %v2459_v25, 16 }
 0x1eb   : > { %v2488_v35 = vmul.u32 %v2486_v14, %v8154_v26  ;;  %v2448_v31 = vsel %vm2444_vm3, %v2428_v4, %v2431_v29  ;;  %v2489_v49 = vmul.u32 %v2485_v28, %v8157_v47  ;;  %v2450_v38 = vsel %vm2446_vm5, %v2434_v54, %v2449_v61 }
 0x1ec   : > { %v2370_v5 = vor.u32 %v2369_v33, %v2368_v62  ;;  %v2373_v27 = vshll.u32 %v2372_v51, 23  ;;  %v2466_v19 = vmul.u32 %v2464_v60, %v8154_v26  ;;  %v2467_v18 = vmul.u32 %v2463_v39, %v8157_v47 }
 0x1ed   : > { %v3197_v50 = vadd.s32 1, %v6437_v32  ;;  %v2487_v53 = vmul.u32 %v2485_v28, %v8154_v26  ;;  %v2490_v2 = vmul.u32 %v2486_v14, %v8157_v47  ;;  %v2491_v37 = vshll.u32 %v2488_v35, 16 }
 0x1ee   : > { %v2374_v34 = vor.u32 4788187, %v2373_v27  ;;  %v2377_v55 = vcvt.s32.f32 %v2370_v5  ;;  %v2465_v46 = vmul.u32 %v2463_v39, %v8154_v26  ;;  %v2468_v29 = vmul.u32 %v2464_v60, %v8157_v47 }
 0x1ef   : > { %v2469_v4 = vshll.u32 %v2466_v19, 16  ;;  %v2471_v59 = vshll.u32 %v2467_v18, 16  ;;  %v2493_v54 = vshll.u32 %v2489_v49, 16  ;;  %vm2495_vm8 = vc.u32 %v2487_v53, %v2491_v37 }
 0x1f0   : > { %v2375_v15 = vand.u32 2147483647, %v2374_v34  ;;  %v2496_v32 = vsel %vm2495_vm8, 1, %v11363_v44  ;;  %v2497_v1 = vadd.s32 %v2491_v37, %v2487_v53  ;;  %vm3198_vm10 = vcmp.gt.s32.totalorder %v3197_v50, 0 }
 0x1f1   : > { %vm2473_vm9 = vc.u32 %v2465_v46, %v2469_v4  ;;  %v2475_v48 = vadd.s32 %v2469_v4, %v2465_v46  ;;  %v2498_v63 = vadd.s32 %v2496_v32, %v2490_v2  ;;  %v2492_v26 = vshrl.u32 %v2488_v35, 16 }
 0x1f2   : > { %v2378_v13 = vmul.f32 %v2377_v55, %v2375_v15  ;;  %v2474_v61 = vsel %vm2473_vm9, 1, %v11363_v44  ;;  %vm2499_vm12 = vc.u32 %v2497_v1, %v2493_v54  ;;  %v3199_v33 = vsel %vm3198_vm10, %v3197_v50, 0 }
 0x1f3   : > { %v2476_v28 = vadd.s32 %v2474_v61, %v2468_v29  ;;  %vm2477_vm11 = vc.u32 %v2475_v48, %v2471_v59  ;;  %v2500_v62 = vsel %vm2499_vm12, 1, %v11363_v44  ;;  %v2470_v51 = vshrl.u32 %v2466_v19, 16 }
 0x1f4   : > { %v2379_v47 = vxor.u32 2147483648, %v2378_v13  ;;  %v2478_v14 = vsel %vm2477_vm11, 1, %v11363_v44  ;;  %v2502_v39 = vadd.s32 %v2500_v62, %v2498_v63  ;;  %v3201_v60 = vand.u32 31, %v3199_v33 }
 0x1f5   : > { %v2480_v25 = vadd.s32 %v2478_v14, %v2476_v28  ;;  %v2451_v27 = vsel %vm2445_vm4, %v2448_v31, %v2450_v38  ;;  %v2472_v34 = vshrl.u32 %v2467_v18, 16  ;;  %v2494_v53 = vshrl.u32 %v2489_v49, 16 }
 0x1f6   : > { %v2380_v5 = vsel %vm2259_vm15, %v2379_v47, %v2378_v13  ;;  %v2503_v37 = vadd.s32 %v2502_v39, %v2492_v26  ;;  %v8249_v55 = vsub.s32 32, %v3201_v60  ;;  %v2401_v50 = vadd.s32 3, %v2384_v6 }
 0x1f7   : > { %v2383_v35 = vsel %vm8182_vm2, %v7903_v23, %v2380_v5  ;;  %v2481_v2 = vadd.s32 %v2480_v25, %v2470_v51  ;;  %v3194_v46 = vand.u32 8388607, %v3187_v20  ;;  %v8255_v4 = vadd.s32 %v2497_v1, %v2493_v54 }
 0x1f8   : > { %v2385_v19 = vmul.f32 %v2383_v35, %v2383_v35  ;;  %v2504_v58 = vadd.s32 %v2503_v37, %v2494_v53  ;;  %v2505_v31 = vmul.u32 %v8146_v45, %v2451_v27  ;;  %v8258_v16 = vshrl.u32 %v3199_v33, 5 }
 0x1f9   : > { %v8253_v29 = vadd.s32 %v2481_v2, %v2472_v34  ;;  %v3207_v18 = vshll.u32 %v11360_v56, %v3201_v60  ;;  %v3208_v15 = vshrl.u32 %v11361_v52, %v8249_v55  ;;  %v3211_v59 = vshrl.u32 %v11362_v21, %v8249_v55 }
 0x1fa   : > { %v2386_v49 = vmul.f32 -0.001358992, %v2385_v19  ;;  %v2393_v38 = vmul.f32 -0.00019511016, %v2385_v19  ;;  %v2508_v6 = vadd.s32 1, %v2504_v58  ;;  %v3205_v45 = vshrl.u32 %v11360_v56, %v8249_v55 }
 0x1fb   : > { %vm2507_vm14 = vc.u32 %v8253_v29, %v8255_v4  ;;  %v3210_v32 = vshll.u32 %v11361_v52, %v3201_v60  ;;  %v3213_v13 = vshll.u32 %v11362_v21, %v3201_v60  ;;  %v3214_v61 = vshrl.u32 %v11364_v43, %v8249_v55 }
 0x1fc   : > { %v2387_v54 = vadd.f32 0.041655596, %v2386_v49  ;;  %v2394_v48 = vadd.f32 0.008332121, %v2393_v38  ;;  %v2509_v1 = vsel %vm2507_vm14, %v2508_v6, %v2504_v58  ;;  %v3216_v63 = vshll.u32 %v11364_v43, %v3201_v60 }
 0x1fd   : > { %v2510_v47 = vadd.s32 %v2509_v1, %v2505_v31  ;;  %v3217_v14 = vshrl.u32 %v11365_v10, %v8249_v55  ;;  %v3204_v62 = vshll.u32 %v11359_v3, %v3201_v60  ;;  %v8277_v33 = vor.u32 %v3208_v15, %v3207_v18 }
 0x1fe   : > { %v2388_v28 = vmul.f32 %v2387_v54, %v2385_v19  ;;  %v2395_v26 = vmul.f32 %v2394_v48, %v2385_v19  ;;  %v3212_v51 = vor.u32 %v3211_v59, %v3210_v32  ;;  %v3215_v25 = vor.u32 %v3214_v61, %v3213_v13 }
 0x1ff   : > { %v2511_v27 = vadd.s32 536870912, %v2510_v47  ;;  %v3218_v34 = vor.u32 %v3217_v14, %v3216_v63  ;;  %v2402_v53 = vand.u32 3, %v2401_v50  ;;  %v3195_v2 = vor.u32 8388608, %v3194_v46 }
 0x200   : > { %v2389_v39 = vadd.f32 -0.4999988, %v2388_v28  ;;  %v2396_v5 = vadd.f32 -0.16666654, %v2395_v26  ;;  %v8279_v37 = vor.u32 %v3205_v45, %v3204_v62  ;;  %vm3222_vm13 = vcmp.lt.s32.totalorder %v8258_v16, 4 }
 0x201   : > { %v8281_v31 = vshrl.u32 %v2511_v27, 30  ;;  %vm2400_vm15 = vweird.f32 %v7903_v23  ;;  %vm3219_vm1 = vcmp.lt.s32.totalorder %v8258_v16, 1  ;;  %vm3221_vm2 = vcmp.lt.s32.totalorder %v8258_v16, 3 }
 0x202   : > { %v2390_v58 = vmul.f32 %v2389_v39, %v2385_v19  ;;  %v2397_v49 = vmul.f32 %v2396_v5, %v2385_v19  ;;  %v3228_v60 = vsel %vm3222_vm13, %v3215_v25, 920167782  ;;  %v3232_v50 = vsel %vm3222_vm13, %v3218_v34, 1326507024 }
 0x203   : > { %v2513_v19 = vshll.u32 %v8281_v31, 30  ;;  %v3231_v18 = vsel %vm3219_vm1, %v8277_v33, %v3212_v51  ;;  %v3227_v6 = vsel %vm3219_vm1, %v8279_v37, %v8277_v33  ;;  %v3229_v15 = vsel %vm3221_vm2, %v3212_v51, %v3228_v60 }
 0x204   : > { %v2391_v46 = vadd.f32 1.0, %v2390_v58  ;;  %v2398_v38 = vadd.f32 1.0, %v2397_v49  ;;  %v3233_v59 = vsel %vm3221_vm2, %v3215_v25, %v3232_v50  ;;  %v8303_v54 = vshll.u32 %v3195_v2, 8  ;;  %v5794_v49 = vpop.f32.mrf.mxu2 }
 0x205   : > { %v2514_v32 = vsub.s32 %v2510_v47, %v2513_v19  ;;  %vm3220_vm3 = vcmp.lt.s32.totalorder %v8258_v16, 2  ;;  %vm2403_vm4 = vcmp.lt.s32.totalorder %v2402_v53, 2  ;;  %vm2404_vm7 = vcmp.eq.s32.totalorder %v2402_v53, 0 }
 0x206   : > { %v2399_v48 = vmul.f32 %v2398_v38, %v2383_v35  ;;  %v2408_v45 = vxor.u32 2147483648, %v2391_v46  ;;  %v3234_v1 = vsel %vm3220_vm3, %v3231_v18, %v3233_v59  ;;  %v604_v13 = vmul.f32 %v11375_v12, %v11385_v24 }
 0x207   : > { %vm2515_vm5 = vcmp.lt.s32.totalorder %v2514_v32, 0  ;;  %v2516_v63 = vsub.s32 0, %v2514_v32  ;;  %v3230_v28 = vsel %vm3220_vm3, %v3227_v6, %v3229_v15  ;;  %vm2407_vm6 = vcmp.eq.s32.totalorder %v2402_v53, 2 }
 0x208   : > { %v2405_v61 = vxor.u32 2147483648, %v2399_v48  ;;  %v3236_v35 = vand.u32 65535, %v8303_v54  ;;  %v3238_v26 = vand.u32 65535, %v3234_v1  ;;  %v3239_v47 = vshrl.u32 %v3234_v1, 16 }
 0x209   : > { %v2409_v62 = vsel %vm2407_vm6, %v2408_v45, %v2399_v48  ;;  %v2517_v25 = vsel %vm2515_vm5, %v2516_v63, %v2514_v32  ;;  %v3237_v39 = vshrl.u32 %v8303_v54, 16  ;;  %v3261_v34 = vshrl.u32 %v3230_v28, 16 }
 0x20a   : > { %v2406_v14 = vsel %vm2404_vm7, %v2391_v46, %v2405_v61  ;;  %v2518_v27 = vclz %v2517_v25  ;;  %v636_v2 = vadd.f32 %v604_v13, %v8126_v0  ;;  %v3241_v60 = vmul.u32 %v3239_v47, %v3236_v35 }
 0x20b   : > { %v2410_v5 = vsel %vm2403_vm4, %v2406_v14, %v2409_v62  ;;  %v3242_v50 = vmul.u32 %v3238_v26, %v3237_v39  ;;  %v3260_v38 = vand.u32 65535, %v3230_v28  ;;  %v3203_v18 = vshrl.u32 %v11359_v3, %v8249_v55 }
 0x20c   : > { %v2411_v58 = vsel %vm2400_vm15, nan, %v2410_v5  ;;  %v6423_v46 = vadd.s32 4294967294, %v2518_v27  ;;  %v8321_v53 = vadd.f32 %v8130_v36, %v636_v2  ;;  %v2506_v6 = vadd.s32 %v8255_v4, %v8253_v29 }
 0x20d   : > { %v5958_v19 = vmul.f32 %v5794_v49, %v2411_v58  ;;  %v3224_v0 = vsel %vm3222_vm13, %v3212_v51, 2102212464  ;;  %v3240_v23 = vmul.u32 %v3238_v26, %v3236_v35  ;;  %v3244_v15 = vshll.u32 %v3241_v60, 16 }
 0x20e   : > { %vm6424_vm8 = vcmp.lt.s32.totalorder %v6423_v46, 0  ;;  %v3243_v59 = vmul.u32 %v3239_v47, %v3237_v39  ;;  %v3246_v48 = vshll.u32 %v3242_v50, 16  ;;  %v3263_v45 = vmul.u32 %v3261_v34, %v3236_v35 }
 0x20f   : > { %6160 = vst [vmem:[%s7681_s17 + $0x50] sm:$0xff] %v5958_v19  ;;  %v2521_v1 = vsel %vm6424_vm8, 0, %v6423_v46  ;;  %vm3248_vm9 = vc.u32 %v3240_v23, %v3244_v15  ;;  %v3250_v13 = vadd.s32 %v3244_v15, %v3240_v23  ;;  %v3264_v55 = vmul.u32 %v3260_v38, %v3237_v39 }
 0x210   : > { %vm2414_vm10 = vcmp.lt.s32.totalorder %v8062_v30, 0  ;;  %v2522_v61 = vsub.s32 32, %v2521_v1  ;;  %v2526_v63 = vsub.s32 4294967266, %v2521_v1  ;;  %v3245_v28 = vshrl.u32 %v3241_v60, 16 }
 0x211   : > { %v3249_v29 = vsel %vm3248_vm9, 1, %v11363_v44  ;;  %vm3252_vm11 = vc.u32 %v3250_v13, %v3246_v48  ;;  %v3262_v51 = vmul.u32 %v3260_v38, %v3236_v35  ;;  %v3266_v26 = vshll.u32 %v3263_v45, 16 }
 0x212   : > { %v3251_v4 = vadd.s32 %v3249_v29, %v3243_v59  ;;  %v2523_v14 = vshll.u32 %v2514_v32, %v2521_v1  ;;  %v2524_v62 = vshrl.u32 %v2506_v6, %v2522_v61  ;;  %v2527_v47 = vadd.s32 127, %v2526_v63 }
 0x213   : > { %v3253_v25 = vsel %vm3252_vm11, 1, %v11363_v44  ;;  %v3265_v27 = vmul.u32 %v3261_v34, %v3237_v39  ;;  %v3268_v2 = vshll.u32 %v3264_v55, 16  ;;  %vm3270_vm12 = vc.u32 %v3262_v51, %v3266_v26 }
 0x214   : > { %v3255_v5 = vadd.s32 %v3253_v25, %v3251_v4  ;;  %v2525_v58 = vor.u32 %v2524_v62, %v2523_v14  ;;  %v2528_v49 = vshll.u32 %v2527_v47, 23  ;;  %v3271_v19 = vsel %vm3270_vm12, 1, %v11363_v44  ;;  %v11394_v62 = vld [vmem:[#allocation25_spill] sm:$0xff]  ;;  %v11395_v47 = vld [vmem:[#allocation50_spill] sm:$0xff] }
 0x215   : > { %v3272_v60 = vadd.s32 %v3266_v26, %v3262_v51  ;;  %v2536_v46 = vsub.s32 4, %v8281_v31  ;;  %v3223_v35 = vsel %vm3219_vm1, %v3203_v18, %v8279_v37  ;;  %v3273_v38 = vadd.s32 %v3271_v19, %v3265_v27  ;;  %v11390_v37 = vld [vmem:[#allocation24_spill] sm:$0xff]  ;;  %v11391_v18 = vld [vmem:[#allocation49_spill] sm:$0xff] }
 0x216   : > { %v3256_v32 = vadd.s32 %v3255_v5, %v3245_v28  ;;  %v2529_v6 = vor.u32 4788187, %v2528_v49  ;;  %v3225_v39 = vsel %vm3221_vm2, %v8277_v33, %v3224_v0  ;;  %v3342_v34 = vand.u32 2147483647, %v8321_v53 }
 0x217   : > { %vm3274_vm14 = vc.u32 %v3272_v60, %v3268_v2  ;;  %v3247_v23 = vshrl.u32 %v3242_v50, 16  ;;  %v3267_v15 = vshrl.u32 %v3263_v45, 16  ;;  %v3345_v48 = vand.u32 2139095040, %v8321_v53 }
 0x218   : > { %v3275_v59 = vsel %vm3274_vm14, 1, %v11363_v44  ;;  %v2530_v1 = vand.u32 2147483647, %v2529_v6  ;;  %v2532_v13 = vcvt.s32.f32 %v2525_v58  ;;  %v538_v63 = vadd.f32 %v11391_v18, %v11390_v37 }
 0x219   : > { %v3277_v61 = vadd.s32 %v3275_v59, %v3273_v38  ;;  %vm8346_vm13 = vcmp.le.f32.partialorder %v2412_v41, 0.7853982  ;;  %v2537_v33 = vsel %vm2414_vm10, %v2536_v46, %v8281_v31  ;;  %v3257_v50 = vadd.s32 %v3256_v32, %v3247_v23 }
 0x21a   : > { %v3346_v0 = vshrl.u32 %v3345_v48, 23  ;;  %v2533_v45 = vmul.f32 %v2532_v13, %v2530_v1  ;;  %v3226_v29 = vsel %vm3220_vm3, %v3223_v35, %v3225_v39  ;;  %v3269_v4 = vshrl.u32 %v3264_v55, 16 }
 0x21b   : > { %v3278_v51 = vadd.s32 %v3277_v61, %v3267_v15  ;;  %v3276_v26 = vadd.s32 %v3272_v60, %v3268_v2  ;;  %v3349_v41 = vand.u32 8388607, %v3342_v34  ;;  %v8359_v25 = vadd.f32 %v11395_v47, %v11394_v62 }
 0x21c   : > { %v6440_v14 = vadd.s32 4294967169, %v3346_v0  ;;  %v2534_v5 = vxor.u32 2147483648, %v2533_v45  ;;  %v2539_v31 = vsel %vm8346_vm13, 0, %v2537_v33  ;;  %v3280_v55 = vmul.u32 %v8303_v54, %v3226_v29 }
 0x21d   : > { %v3279_v27 = vadd.s32 %v3278_v51, %v3269_v4  ;;  %vm3282_vm15 = vc.u32 %v3257_v50, %v3276_v26  ;;  %v2556_v19 = vadd.s32 3, %v2539_v31  ;;  %v3350_v60 = vor.u32 8388608, %v3349_v41 }
 0x21e   : > { %v3352_v58 = vadd.s32 1, %v6440_v14  ;;  %v2535_v16 = vsel %vm2414_vm10, %v2534_v5, %v2533_v45  ;;  %v605_v15 = vmul.f32 %v11380_v17, %v11385_v24  ;;  %v8379_v33 = vadd.s32 %v3276_v26, %v3257_v50 }
 0x21f   : > { %v3283_v2 = vadd.s32 1, %v3279_v27  ;;  %v2538_v49 = vsel %vm8346_vm13, %v8062_v30, %v2535_v16  ;;  %v8371_v59 = vand.u32 3, %v2556_v19  ;;  %v8373_v48 = vshll.u32 %v3350_v60, 8 }
 0x220   : > { %vm3353_vm1 = vcmp.gt.s32.totalorder %v3352_v58, 0  ;;  %v2540_v46 = vmul.f32 %v2538_v49, %v2538_v49  ;;  %v637_v0 = vadd.f32 %v605_v15, %v538_v63  ;;  %vm2555_vm7 = vweird.f32 %v8062_v30 }
 0x221   : > { %v3284_v35 = vsel %vm3282_vm15, %v3283_v2, %v3279_v27  ;;  %v3354_v32 = vsel %vm3353_vm1, %v3352_v58, 0  ;;  %vm2562_vm2 = vcmp.eq.s32.totalorder %v8371_v59, 2  ;;  %v8387_v51 = vand.u32 65535, %v8373_v48 }
 0x222   : > { %v3285_v38 = vadd.s32 %v3284_v35, %v3280_v55  ;;  %v3356_v6 = vand.u32 31, %v3354_v32  ;;  %v2541_v39 = vmul.f32 -0.001358992, %v2540_v46  ;;  %v2548_v23 = vmul.f32 -0.00019511016, %v2540_v46 }
 0x223   : > { %v8383_v29 = vshrl.u32 %v3354_v32, 5  ;;  %vm2559_vm3 = vcmp.eq.s32.totalorder %v8371_v59, 0  ;;  %vm2558_vm4 = vcmp.lt.s32.totalorder %v8371_v59, 2  ;;  %vm3189_vm6 = vcmp.lt.s32.totalorder %v8144_v11, 0 }
 0x224   : > { %v3286_v54 = vadd.s32 536870912, %v3285_v38  ;;  %v2542_v1 = vadd.f32 0.041655596, %v2541_v39  ;;  %v2549_v13 = vadd.f32 0.008332121, %v2548_v23  ;;  %v8375_v61 = vsub.s32 32, %v3356_v6 }
 0x225   : > { %v3359_v4 = vshll.u32 %v11359_v3, %v3356_v6  ;;  %v3362_v58 = vshll.u32 %v11360_v56, %v3356_v6  ;;  %v3365_v16 = vshll.u32 %v11361_v52, %v3356_v6  ;;  %v3368_v2 = vshll.u32 %v11362_v21, %v3356_v6 }
 0x226   : > { %v8377_v37 = vshrl.u32 %v3286_v54, 30  ;;  %v2543_v18 = vmul.f32 %v2542_v1, %v2540_v46  ;;  %v2550_v28 = vmul.f32 %v2549_v13, %v2540_v46  ;;  %v3360_v62 = vshrl.u32 %v11360_v56, %v8375_v61 }
 0x227   : > { %v3363_v50 = vshrl.u32 %v11361_v52, %v8375_v61  ;;  %v3366_v26 = vshrl.u32 %v11362_v21, %v8375_v61  ;;  %v3369_v47 = vshrl.u32 %v11364_v43, %v8375_v61  ;;  %v3372_v5 = vshrl.u32 %v11365_v10, %v8375_v61 }
 0x228   : > { %v3288_v45 = vshll.u32 %v8377_v37, 30  ;;  %v2544_v14 = vadd.f32 -0.4999988, %v2543_v18  ;;  %v2551_v41 = vadd.f32 -0.16666654, %v2550_v28  ;;  %v3371_v19 = vshll.u32 %v11364_v43, %v3356_v6 }
 0x229   : > { %v8410_v32 = vor.u32 %v3360_v62, %v3359_v4  ;;  %v3367_v39 = vor.u32 %v3366_v26, %v3365_v16  ;;  %v3370_v23 = vor.u32 %v3369_v47, %v3368_v2  ;;  %v3392_v18 = vshrl.u32 %v8373_v48, 16  ;;  %v5823_v16 = vpop.f32.mrf.mxu3 }
 0x22a   : > { %v8394_v63 = vsub.s32 %v3285_v38, %v3288_v45  ;;  %v2545_v31 = vmul.f32 %v2544_v14, %v2540_v46  ;;  %v2552_v27 = vmul.f32 %v2551_v41, %v2540_v46  ;;  %v8412_v46 = vor.u32 %v3363_v50, %v3362_v58 }
 0x22b   : > { %v3373_v15 = vor.u32 %v3372_v5, %v3371_v19  ;;  %vm3374_vm8 = vcmp.lt.s32.totalorder %v8383_v29, 1  ;;  %vm3375_vm9 = vcmp.lt.s32.totalorder %v8383_v29, 2  ;;  %vm3376_vm10 = vcmp.lt.s32.totalorder %v8383_v29, 3 }
 0x22c   : > { %vm3290_vm5 = vcmp.lt.s32.totalorder %v8394_v63, 0  ;;  %v3291_v55 = vsub.s32 0, %v8394_v63  ;;  %v2546_v60 = vadd.f32 1.0, %v2545_v31  ;;  %v2553_v35 = vadd.f32 1.0, %v2552_v27 }
 0x22d   : > { %v8421_v6 = vadd.f32 %v8130_v36, %v637_v0  ;;  %vm3377_vm11 = vcmp.lt.s32.totalorder %v8383_v29, 4  ;;  %v3382_v4 = vsel %vm3374_vm8, %v8410_v32, %v8412_v46  ;;  %v3386_v0 = vsel %vm3374_vm8, %v8412_v46, %v3367_v39 }
 0x22e   : > { %v3292_v38 = vsel %vm3290_vm5, %v3291_v55, %v8394_v63  ;;  %v2554_v54 = vmul.f32 %v2553_v35, %v2538_v49  ;;  %v2563_v1 = vxor.u32 2147483648, %v2546_v60  ;;  %v3383_v14 = vsel %vm3377_vm11, %v3370_v23, 920167782 }
 0x22f   : > { %v3293_v13 = vclz %v3292_v38  ;;  %v3387_v41 = vsel %vm3377_vm11, %v3373_v15, 1326507024  ;;  %v3384_v50 = vsel %vm3376_vm10, %v3367_v39, %v3383_v14  ;;  %v3311_v19 = vsub.s32 4, %v8377_v37 }
 0x230   : > { %v2560_v28 = vxor.u32 2147483648, %v2554_v54  ;;  %v2564_v45 = vsel %vm2562_vm2, %v2563_v1, %v2554_v54  ;;  %v3388_v26 = vsel %vm3376_vm10, %v3370_v23, %v3387_v41  ;;  %v3385_v31 = vsel %vm3375_vm9, %v3382_v4, %v3384_v50 }
 0x231   : > { %v6438_v49 = vadd.s32 4294967294, %v3293_v13  ;;  %v3389_v27 = vsel %vm3375_vm9, %v3386_v0, %v3388_v26  ;;  %v3415_v54 = vand.u32 65535, %v3385_v31  ;;  %v3416_v1 = vshrl.u32 %v3385_v31, 16 }
 0x232   : > { %v2561_v62 = vsel %vm2559_vm3, %v2546_v60, %v2560_v28  ;;  %v3393_v35 = vand.u32 65535, %v3389_v27  ;;  %v3394_v38 = vshrl.u32 %v3389_v27, 16  ;;  %vm8457_vm14 = vcmp.le.f32.partialorder %v3187_v20, 0.7853982 }
 0x233   : > { %vm6439_vm12 = vcmp.lt.s32.totalorder %v6438_v49, 0  ;;  %v2565_v47 = vsel %vm2558_vm4, %v2561_v62, %v2564_v45  ;;  %v3358_v13 = vshrl.u32 %v11359_v3, %v8375_v61  ;;  %v3497_v45 = vand.u32 2147483647, %v8421_v6 }
 0x234   : > { %v3296_v5 = vsel %vm6439_vm12, 0, %v6438_v49  ;;  %v2566_v58 = vsel %vm2555_vm7, nan, %v2565_v47  ;;  %v3396_v28 = vmul.u32 %v3394_v38, %v8387_v51  ;;  %v3312_v4 = vsel %vm3189_vm6, %v3311_v19, %v8377_v37 }
 0x235   : > { %v3297_v55 = vsub.s32 32, %v3296_v5  ;;  %v3301_v2 = vsub.s32 4294967266, %v3296_v5  ;;  %v5959_v60 = vmul.f32 %v5823_v16, %v2566_v58  ;;  %v3298_v59 = vshll.u32 %v8394_v63, %v3296_v5 }
 0x236   : > { %v3397_v63 = vmul.u32 %v3393_v35, %v3392_v18  ;;  %v3418_v14 = vmul.u32 %v3416_v1, %v8387_v51  ;;  %v3379_v20 = vsel %vm3377_vm11, %v3367_v39, 2102212464  ;;  %v3395_v0 = vmul.u32 %v3393_v35, %v8387_v51 }
 0x237   : > { %v3299_v23 = vshrl.u32 %v8379_v33, %v3297_v55  ;;  %v3302_v15 = vadd.s32 127, %v3301_v2  ;;  %6161 = vst [vmem:[%s7681_s17 + $0x58] sm:$0xff] %v5959_v60  ;;  %v3398_v41 = vmul.u32 %v3394_v38, %v3392_v18  ;;  %v3399_v61 = vshll.u32 %v3396_v28, 16 }
 0x238   : > { %v3401_v50 = vshll.u32 %v3397_v63, 16  ;;  %v3417_v26 = vmul.u32 %v3415_v54, %v8387_v51  ;;  %v3419_v47 = vmul.u32 %v3415_v54, %v3392_v18  ;;  %v3421_v27 = vshll.u32 %v3418_v14, 16 }
 0x239   : > { %v3300_v49 = vor.u32 %v3299_v23, %v3298_v59  ;;  %v3303_v33 = vshll.u32 %v3302_v15, 23  ;;  %vm3403_vm13 = vc.u32 %v3395_v0, %v3399_v61  ;;  %v3405_v31 = vadd.s32 %v3399_v61, %v3395_v0 }
 0x23a   : > { %v3404_v37 = vsel %vm3403_vm13, 1, %v11363_v44  ;;  %v3420_v16 = vmul.u32 %v3416_v1, %v3392_v18  ;;  %v3423_v55 = vshll.u32 %v3419_v47, 16  ;;  %vm3425_vm1 = vc.u32 %v3417_v26, %v3421_v27 }
 0x23b   : > { %v3304_v62 = vor.u32 4788187, %v3303_v33  ;;  %v3307_v5 = vcvt.s32.f32 %v3300_v49  ;;  %v3406_v2 = vadd.s32 %v3404_v37, %v3398_v41  ;;  %vm3407_vm15 = vc.u32 %v3405_v31, %v3401_v50 }
 0x23c   : > { %v3427_v39 = vadd.s32 %v3421_v27, %v3417_v26  ;;  %v3408_v60 = vsel %vm3407_vm15, 1, %v11363_v44  ;;  %v3426_v59 = vsel %vm3425_vm1, 1, %v11363_v44  ;;  %v3500_v51 = vand.u32 2139095040, %v8421_v6 }
 0x23d   : > { %v3305_v58 = vand.u32 2147483647, %v3304_v62  ;;  %v3400_v35 = vshrl.u32 %v3396_v28, 16  ;;  %v3410_v38 = vadd.s32 %v3408_v60, %v3406_v2  ;;  %v3428_v23 = vadd.s32 %v3426_v59, %v3420_v16 }
 0x23e   : > { %vm3429_vm2 = vc.u32 %v3427_v39, %v3423_v55  ;;  %v3314_v18 = vsel %vm8457_vm14, 0, %v3312_v4  ;;  %v3501_v1 = vshrl.u32 %v3500_v51, 23  ;;  %v3402_v49 = vshrl.u32 %v3397_v63, 16  ;;  %v11398_v51 = vld [vmem:[#allocation39_spill] sm:$0xff] }
 0x23f   : > { %v3308_v19 = vmul.f32 %v3307_v5, %v3305_v58  ;;  %v3430_v54 = vsel %vm3429_vm2, 1, %v11363_v44  ;;  %v3411_v33 = vadd.s32 %v3410_v38, %v3400_v35  ;;  %v3422_v0 = vshrl.u32 %v3418_v14, 16  ;;  %v11399_v35 = vld [vmem:[#allocation31_spill] sm:$0xff] }
 0x240   : > { %v3432_v41 = vadd.s32 %v3430_v54, %v3428_v23  ;;  %v3378_v28 = vsel %vm3374_vm8, %v3358_v13, %v8410_v32  ;;  %v3380_v62 = vsel %vm3376_vm10, %v8412_v46, %v3379_v20  ;;  %v6443_v50 = vadd.s32 4294967169, %v3501_v1 }
 0x241   : > { %v3309_v15 = vxor.u32 2147483648, %v3308_v19  ;;  %v8491_v63 = vadd.s32 %v3411_v33, %v3402_v49  ;;  %v3424_v14 = vshrl.u32 %v3419_v47, 16  ;;  %v8493_v31 = vadd.s32 %v3427_v39, %v3423_v55 }
 0x242   : > { %v3433_v26 = vadd.s32 %v3432_v41, %v3422_v0  ;;  %v3507_v27 = vadd.s32 1, %v6443_v50  ;;  %v3331_v58 = vadd.s32 3, %v3314_v18  ;;  %v3381_v32 = vsel %vm3375_vm9, %v3378_v28, %v3380_v62 }
 0x243   : > { %v3310_v61 = vsel %vm3189_vm6, %v3309_v15, %v3308_v19  ;;  %v606_v46 = vmul.f32 %v7642_v7, %v11385_v24  ;;  %vm3437_vm3 = vc.u32 %v8491_v63, %v8493_v31  ;;  %v3504_v47 = vand.u32 8388607, %v3497_v45 }
 0x244   : > { %v3313_v4 = vsel %vm8457_vm14, %v8144_v11, %v3310_v61  ;;  %v3434_v13 = vadd.s32 %v3433_v26, %v3424_v14  ;;  %vm3508_vm4 = vcmp.gt.s32.totalorder %v3507_v27, 0  ;;  %v3435_v29 = vmul.u32 %v8373_v48, %v3381_v32 }
 0x245   : > { %v3315_v5 = vmul.f32 %v3313_v4, %v3313_v4  ;;  %v3509_v16 = vsel %vm3508_vm4, %v3507_v27, 0  ;;  %v3332_v19 = vand.u32 3, %v3331_v58  ;;  %v638_v59 = vadd.f32 %v606_v46, %v8359_v25 }
 0x246   : > { %v3438_v30 = vadd.s32 1, %v3434_v13  ;;  %v3511_v39 = vand.u32 31, %v3509_v16  ;;  %v8507_v38 = vadd.f32 %v11399_v35, %v11398_v51  ;;  %v3505_v0 = vor.u32 8388608, %v3504_v47 }
 0x247   : > { %v3316_v20 = vmul.f32 -0.001358992, %v3315_v5  ;;  %v3323_v37 = vmul.f32 -0.00019511016, %v3315_v5  ;;  %v8512_v1 = vadd.f32 %v8130_v36, %v638_v59  ;;  %vm3334_vm7 = vcmp.eq.s32.totalorder %v3332_v19, 0 }
 0x248   : > { %v3439_v60 = vsel %vm3437_vm3, %v3438_v30, %v3434_v13  ;;  %v8509_v54 = vsub.s32 32, %v3511_v39  ;;  %v8514_v41 = vshrl.u32 %v3509_v16, 5  ;;  %vm3333_vm5 = vcmp.lt.s32.totalorder %v3332_v19, 2 }
 0x249   : > { %v3317_v55 = vadd.f32 0.041655596, %v3316_v20  ;;  %v3324_v2 = vadd.f32 0.008332121, %v3323_v37  ;;  %v3440_v18 = vadd.s32 %v3439_v60, %v3435_v29  ;;  %vm3330_vm6 = vweird.f32 %v8144_v11 }
 0x24a   : > { %v3515_v25 = vshrl.u32 %v11360_v56, %v8509_v54  ;;  %v3518_v61 = vshrl.u32 %v11361_v52, %v8509_v54  ;;  %v3524_v28 = vshrl.u32 %v11364_v43, %v8509_v54  ;;  %v3521_v26 = vshrl.u32 %v11362_v21, %v8509_v54 }
 0x24b   : > { %v3318_v23 = vmul.f32 %v3317_v55, %v3315_v5  ;;  %v3325_v15 = vmul.f32 %v3324_v2, %v3315_v5  ;;  %v3441_v48 = vadd.s32 536870912, %v3440_v18  ;;  %v3514_v27 = vshll.u32 %v11359_v3, %v3511_v39 }
 0x24c   : > { %v3517_v58 = vshll.u32 %v11360_v56, %v3511_v39  ;;  %v3520_v32 = vshll.u32 %v11361_v52, %v3511_v39  ;;  %v3523_v13 = vshll.u32 %v11362_v21, %v3511_v39  ;;  %v3526_v37 = vshll.u32 %v11364_v43, %v3511_v39 }
 0x24d   : > { %v3319_v49 = vadd.f32 -0.4999988, %v3318_v23  ;;  %v3326_v33 = vadd.f32 -0.16666654, %v3325_v15  ;;  %v8522_v14 = vshrl.u32 %v3441_v48, 30  ;;  %v3516_v30 = vor.u32 %v3515_v25, %v3514_v27 }
 0x24e   : > { %v3519_v47 = vor.u32 %v3518_v61, %v3517_v58  ;;  %v3525_v16 = vor.u32 %v3524_v28, %v3523_v13  ;;  %v3527_v55 = vshrl.u32 %v11365_v10, %v8509_v54  ;;  %v3522_v59 = vor.u32 %v3521_v26, %v3520_v32 }
 0x24f   : > { %v3320_v62 = vmul.f32 %v3319_v49, %v3315_v5  ;;  %v3327_v50 = vmul.f32 %v3326_v33, %v3315_v5  ;;  %v3443_v5 = vshll.u32 %v8522_v14, 30  ;;  %vm3337_vm8 = vcmp.eq.s32.totalorder %v3332_v19, 2 }
 0x250   : > { %v3528_v51 = vor.u32 %v3527_v55, %v3526_v37  ;;  %vm3529_vm9 = vcmp.lt.s32.totalorder %v8514_v41, 1  ;;  %v8538_v35 = vshll.u32 %v3505_v0, 8  ;;  %vm3344_vm10 = vcmp.lt.s32.totalorder %v8321_v53, 0 }
 0x251   : > { %v3321_v46 = vadd.f32 1.0, %v3320_v62  ;;  %v3328_v20 = vadd.f32 1.0, %v3327_v50  ;;  %v8535_v60 = vsub.s32 %v3440_v18, %v3443_v5  ;;  %vm3532_vm12 = vcmp.lt.s32.totalorder %v8514_v41, 4  ;;  %v5739_v50 = vpop.f32.mrf.mxu0 }
 0x252   : > { %vm3531_vm14 = vcmp.lt.s32.totalorder %v8514_v41, 3  ;;  %v3538_v15 = vsel %vm3532_vm12, %v3525_v16, 920167782  ;;  %v3655_v18 = vand.u32 2139095040, %v8512_v1  ;;  %v3436_v61 = vadd.s32 %v8493_v31, %v8491_v63 }
 0x253   : > { %v3329_v2 = vmul.f32 %v3328_v20, %v3313_v4  ;;  %v3338_v29 = vxor.u32 2147483648, %v3321_v46  ;;  %vm3445_vm11 = vcmp.lt.s32.totalorder %v8535_v60, 0  ;;  %v3446_v39 = vsub.s32 0, %v8535_v60 }
 0x254   : > { %v3537_v4 = vsel %vm3529_vm9, %v3516_v30, %v3519_v47  ;;  %v3539_v0 = vsel %vm3531_vm14, %v3522_v59, %v3538_v15  ;;  %vm3530_vm13 = vcmp.lt.s32.totalorder %v8514_v41, 2  ;;  %v3541_v27 = vsel %vm3529_vm9, %v3519_v47, %v3522_v59 }
 0x255   : > { %v3335_v23 = vxor.u32 2147483648, %v3329_v2  ;;  %v3339_v33 = vsel %vm3337_vm8, %v3338_v29, %v3329_v2  ;;  %v3447_v48 = vsel %vm3445_vm11, %v3446_v39, %v8535_v60  ;;  %v3540_v26 = vsel %vm3530_vm13, %v3537_v4, %v3539_v0 }
 0x256   : > { %v3448_v28 = vclz %v3447_v48  ;;  %v3542_v19 = vsel %vm3532_vm12, %v3528_v51, 1326507024  ;;  %v3466_v63 = vsub.s32 4, %v8522_v14  ;;  %v3546_v31 = vand.u32 65535, %v8538_v35 }
 0x257   : > { %v3336_v49 = vsel %vm3334_vm7, %v3321_v46, %v3335_v23  ;;  %v3543_v11 = vsel %vm3531_vm14, %v3525_v16, %v3542_v19  ;;  %v3547_v13 = vshrl.u32 %v8538_v35, 16  ;;  %v3571_v46 = vshrl.u32 %v3540_v26, 16 }
 0x258   : > { %v3340_v25 = vsel %vm3333_vm5, %v3336_v49, %v3339_v33  ;;  %v6441_v32 = vadd.s32 4294967294, %v3448_v28  ;;  %v3656_v20 = vshrl.u32 %v3655_v18, 23  ;;  %v3534_v5 = vsel %vm3532_vm12, %v3522_v59, 2102212464 }
 0x259   : > { %v3341_v62 = vsel %vm3330_vm6, nan, %v3340_v25  ;;  %v3544_v37 = vsel %vm3530_vm13, %v3541_v27, %v3543_v11  ;;  %v3570_v55 = vand.u32 65535, %v3540_v26  ;;  %v3513_v29 = vshrl.u32 %v11359_v3, %v8509_v54 }
 0x25a   : > { %v5964_v58 = vmul.f32 %v5739_v50, %v3341_v62  ;;  %vm6442_vm15 = vcmp.lt.s32.totalorder %v6441_v32, 0  ;;  %v3548_v51 = vand.u32 65535, %v3544_v37  ;;  %v3549_v23 = vshrl.u32 %v3544_v37, 16 }
 0x25b   : > { %v3451_v2 = vsel %vm6442_vm15, 0, %v6441_v32  ;;  %v3467_v4 = vsel %vm3344_vm10, %v3466_v63, %v8522_v14  ;;  %v3573_v15 = vmul.u32 %v3571_v46, %v3546_v31  ;;  %v3533_v59 = vsel %vm3529_vm9, %v3513_v29, %v3516_v30 }
 0x25c   : > { %6166 = vst [vmem:[%s7681_s17 + $0x80] sm:$0xff] %v5964_v58  ;;  %v3452_v16 = vsub.s32 32, %v3451_v2  ;;  %v3456_v39 = vsub.s32 4294967266, %v3451_v2  ;;  %v3535_v18 = vsel %vm3531_vm14, %v3519_v47, %v3534_v5  ;;  %v3551_v49 = vmul.u32 %v3549_v23, %v3546_v31 }
 0x25d   : > { %v3552_v33 = vmul.u32 %v3548_v51, %v3547_v13  ;;  %v3453_v48 = vshll.u32 %v8535_v60, %v3451_v2  ;;  %v3574_v25 = vmul.u32 %v3570_v55, %v3547_v13  ;;  %vm8588_vm1 = vcmp.le.f32.partialorder %v3342_v34, 0.7853982 }
 0x25e   : > { %v3454_v54 = vshrl.u32 %v3436_v61, %v3452_v16  ;;  %v3457_v0 = vadd.s32 127, %v3456_v39  ;;  %v3550_v14 = vmul.u32 %v3548_v51, %v3546_v31  ;;  %v3554_v62 = vshll.u32 %v3551_v49, 16 }
 0x25f   : > { %v3572_v50 = vmul.u32 %v3570_v55, %v3546_v31  ;;  %v6446_v30 = vadd.s32 4294967169, %v3656_v20  ;;  %v3553_v47 = vmul.u32 %v3549_v23, %v3547_v13  ;;  %v3576_v19 = vshll.u32 %v3573_v15, 16 }
 0x260   : > { %v3455_v26 = vor.u32 %v3454_v54, %v3453_v48  ;;  %v3458_v27 = vshll.u32 %v3457_v0, 23  ;;  %v3556_v58 = vshll.u32 %v3552_v33, 16  ;;  %vm3558_vm2 = vc.u32 %v3550_v14, %v3554_v62 }
 0x261   : > { %v3560_v60 = vadd.s32 %v3554_v62, %v3550_v14  ;;  %v3575_v61 = vmul.u32 %v3571_v46, %v3547_v13  ;;  %v3559_v63 = vsel %vm3558_vm2, 1, %v11363_v44  ;;  %v3578_v11 = vshll.u32 %v3574_v25, 16 }
 0x262   : > { %v3459_v32 = vor.u32 4788187, %v3458_v27  ;;  %vm3580_vm3 = vc.u32 %v3572_v50, %v3576_v19  ;;  %v3561_v34 = vadd.s32 %v3559_v63, %v3553_v47  ;;  %v3582_v37 = vadd.s32 %v3576_v19, %v3572_v50 }
 0x263   : > { %vm3562_vm4 = vc.u32 %v3560_v60, %v3556_v58  ;;  %v3581_v5 = vsel %vm3580_vm3, 1, %v11363_v44  ;;  %v3462_v20 = vcvt.s32.f32 %v3455_v26  ;;  %v3555_v29 = vshrl.u32 %v3551_v49, 16  ;;  %v11403_v58 = vld [vmem:[#allocation32_spill] sm:$0xff] }
 0x264   : > { %v3460_v31 = vand.u32 2147483647, %v3459_v32  ;;  %v3563_v55 = vsel %vm3562_vm4, 1, %v11363_v44  ;;  %v3583_v2 = vadd.s32 %v3581_v5, %v3575_v61  ;;  %vm3584_vm7 = vc.u32 %v3582_v37, %v3578_v11 }
 0x265   : > { %v3565_v51 = vadd.s32 %v3563_v55, %v3561_v34  ;;  %v3662_v23 = vadd.s32 1, %v6446_v30  ;;  %v3557_v46 = vshrl.u32 %v3552_v33, 16  ;;  %v3585_v16 = vsel %vm3584_vm7, 1, %v11363_v44 }
 0x266   : > { %v3463_v13 = vmul.f32 %v3462_v20, %v3460_v31  ;;  %v3652_v39 = vand.u32 2147483647, %v8512_v1  ;;  %v3577_v54 = vshrl.u32 %v3573_v15, 16  ;;  %v3587_v0 = vadd.s32 %v3585_v16, %v3583_v2  ;;  %v11402_v15 = vld [vmem:[#allocation40_spill] sm:$0xff] }
 0x267   : > { %v3566_v48 = vadd.s32 %v3565_v51, %v3555_v29  ;;  %vm3663_vm5 = vcmp.gt.s32.totalorder %v3662_v23, 0  ;;  %v3469_v62 = vsel %vm8588_vm1, 0, %v3467_v4  ;;  %v3536_v49 = vsel %vm3530_vm13, %v3533_v59, %v3535_v18 }
 0x268   : > { %v3464_v14 = vxor.u32 2147483648, %v3463_v13  ;;  %v3664_v50 = vsel %vm3663_vm5, %v3662_v23, 0  ;;  %v3579_v30 = vshrl.u32 %v3574_v25, 16  ;;  %v3588_v33 = vadd.s32 %v3587_v0, %v3577_v54 }
 0x269   : > { %v8601_v26 = vadd.s32 %v3566_v48, %v3557_v46  ;;  %v3666_v27 = vand.u32 31, %v3664_v50  ;;  %v8605_v19 = vadd.s32 %v3582_v37, %v3578_v11  ;;  %v8609_v60 = vadd.f32 %v11403_v58, %v11402_v15 }
 0x26a   : > { %v3465_v47 = vsel %vm3344_vm10, %v3464_v14, %v3463_v13  ;;  %v3486_v4 = vadd.s32 3, %v3469_v62  ;;  %v3589_v59 = vadd.s32 %v3588_v33, %v3579_v30  ;;  %v3659_v18 = vand.u32 8388607, %v3652_v39 }
 0x26b   : > { %v3468_v41 = vsel %vm8588_vm1, %v8321_v53, %v3465_v47  ;;  %v3590_v61 = vmul.u32 %v8538_v35, %v3536_v49  ;;  %vm3592_vm6 = vc.u32 %v8601_v26, %v8605_v19  ;;  %v8619_v32 = vsub.s32 32, %v3666_v27 }
 0x26c   : > { %v3470_v25 = vmul.f32 %v3468_v41, %v3468_v41  ;;  %v3593_v63 = vadd.s32 1, %v3589_v59  ;;  %v8621_v11 = vshrl.u32 %v3664_v50, 5  ;;  %v3669_v34 = vshll.u32 %v11359_v3, %v3666_v27 }
 0x26d   : > { %v3672_v28 = vshll.u32 %v11360_v56, %v3666_v27  ;;  %v3670_v31 = vshrl.u32 %v11360_v56, %v8619_v32  ;;  %v3678_v20 = vshll.u32 %v11362_v21, %v3666_v27  ;;  %v3673_v55 = vshrl.u32 %v11361_v52, %v8619_v32 }
 0x26e   : > { %v3471_v5 = vmul.f32 -0.001358992, %v3470_v25  ;;  %v3478_v37 = vmul.f32 -0.00019511016, %v3470_v25  ;;  %v3594_v35 = vsel %vm3592_vm6, %v3593_v63, %v3589_v59  ;;  %v3676_v2 = vshrl.u32 %v11362_v21, %v8619_v32 }
 0x26f   : > { %v3679_v29 = vshrl.u32 %v11364_v43, %v8619_v32  ;;  %v3595_v13 = vadd.s32 %v3594_v35, %v3590_v61  ;;  %v3675_v46 = vshll.u32 %v11361_v52, %v3666_v27  ;;  %v8635_v16 = vor.u32 %v3670_v31, %v3669_v34 }
 0x270   : > { %v3472_v51 = vadd.f32 0.041655596, %v3471_v5  ;;  %v3479_v23 = vadd.f32 0.008332121, %v3478_v37  ;;  %v3681_v54 = vshll.u32 %v11364_v43, %v3666_v27  ;;  %v3682_v0 = vshrl.u32 %v11365_v10, %v8619_v32  ;;  %v11404_v37 = vld [vmem:[#allocation16_spill] sm:$0xff] }
 0x271   : > { %v3680_v48 = vor.u32 %v3679_v29, %v3678_v20  ;;  %v3596_v49 = vadd.s32 536870912, %v3595_v13  ;;  %v8640_v50 = vor.u32 %v3673_v55, %v3672_v28  ;;  %v3487_v30 = vand.u32 3, %v3486_v4 }
 0x272   : > { %v3473_v14 = vmul.f32 %v3472_v51, %v3470_v25  ;;  %v3480_v62 = vmul.f32 %v3479_v23, %v3470_v25  ;;  %v8642_v33 = vor.u32 %v3676_v2, %v3675_v46  ;;  %v3683_v47 = vor.u32 %v3682_v0, %v3681_v54 }
 0x273   : > { %v8644_v59 = vshrl.u32 %v3596_v49, 30  ;;  %vm3687_vm8 = vcmp.lt.s32.totalorder %v8621_v11, 4  ;;  %v3660_v61 = vor.u32 8388608, %v3659_v18  ;;  %vm3684_vm9 = vcmp.lt.s32.totalorder %v8621_v11, 1 }
 0x274   : > { %v3474_v15 = vadd.f32 -0.4999988, %v3473_v14  ;;  %v3481_v58 = vadd.f32 -0.16666654, %v3480_v62  ;;  %vm3686_vm10 = vcmp.lt.s32.totalorder %v8621_v11, 3  ;;  %v3692_v28 = vsel %vm3684_vm9, %v8635_v16, %v8640_v50 }
 0x275   : > { %v3693_v27 = vsel %vm3687_vm8, %v3680_v48, 920167782  ;;  %v3598_v4 = vshll.u32 %v8644_v59, 30  ;;  %vm3485_vm11 = vweird.f32 %v8321_v53  ;;  %vm3685_vm12 = vcmp.lt.s32.totalorder %v8621_v11, 2 }
 0x276   : > { %v3475_v63 = vmul.f32 %v3474_v15, %v3470_v25  ;;  %v3482_v34 = vmul.f32 %v3481_v58, %v3470_v25  ;;  %v3694_v18 = vsel %vm3686_vm10, %v8642_v33, %v3693_v27  ;;  %v3697_v5 = vsel %vm3687_vm8, %v3683_v47, 1326507024 }
 0x277   : > { %v611_v25 = vmul.f32 %v7323_v22, %v11404_v37  ;;  %v3599_v35 = vsub.s32 %v3595_v13, %v3598_v4  ;;  %v3696_v55 = vsel %vm3684_vm9, %v8640_v50, %v8642_v33  ;;  %vm3488_vm14 = vcmp.lt.s32.totalorder %v3487_v30, 2 }
 0x278   : > { %v3476_v31 = vadd.f32 1.0, %v3475_v63  ;;  %v3483_v20 = vadd.f32 1.0, %v3482_v34  ;;  %v3695_v2 = vsel %vm3685_vm12, %v3692_v28, %v3694_v18  ;;  %v3698_v29 = vsel %vm3686_vm10, %v3680_v48, %v3697_v5  ;;  %v5768_v5 = vpop.f32.mrf.mxu1 }
 0x279   : > { %v8673_v51 = vshll.u32 %v3660_v61, 8  ;;  %vm3600_vm13 = vcmp.lt.s32.totalorder %v3599_v35, 0  ;;  %v3601_v22 = vsub.s32 0, %v3599_v35  ;;  %vm3489_vm15 = vcmp.eq.s32.totalorder %v3487_v30, 0 }
 0x27a   : > { %v3484_v23 = vmul.f32 %v3483_v20, %v3468_v41  ;;  %v3493_v46 = vxor.u32 2147483648, %v3476_v31  ;;  %vm3492_vm1 = vcmp.eq.s32.totalorder %v3487_v30, 2  ;;  %v3699_v13 = vsel %vm3685_vm12, %v3696_v55, %v3698_v29 }
 0x27b   : > { %v643_v54 = vadd.f32 %v611_v25, %v8507_v38  ;;  %v3602_v14 = vsel %vm3600_vm13, %v3601_v22, %v3599_v35  ;;  %v3703_v62 = vand.u32 65535, %v3699_v13  ;;  %v3726_v49 = vshrl.u32 %v3695_v2, 16 }
 0x27c   : > { %v3490_v0 = vxor.u32 2147483648, %v3484_v23  ;;  %v3603_v47 = vclz %v3602_v14  ;;  %v3702_v48 = vshrl.u32 %v8673_v51, 16  ;;  %v3704_v15 = vshrl.u32 %v3699_v13, 16 }
 0x27d   : > { %v3725_v58 = vand.u32 65535, %v3695_v2  ;;  %v3494_v61 = vsel %vm3492_vm1, %v3493_v46, %v3484_v23  ;;  %v3701_v27 = vand.u32 65535, %v8673_v51  ;;  %v8681_v63 = vadd.f32 %v7695_v40, %v643_v54 }
 0x27e   : > { %v3491_v41 = vsel %vm3489_vm15, %v3476_v31, %v3490_v0  ;;  %v3591_v38 = vadd.s32 %v8605_v19, %v8601_v26  ;;  %v6444_v4 = vadd.s32 4294967294, %v3603_v47  ;;  %v3707_v28 = vmul.u32 %v3703_v62, %v3702_v48 }
 0x27f   : > { %v3495_v34 = vsel %vm3488_vm14, %v3491_v41, %v3494_v61  ;;  %v3668_v25 = vshrl.u32 %v11359_v3, %v8619_v32  ;;  %v3706_v31 = vmul.u32 %v3704_v15, %v3701_v27  ;;  %v3728_v20 = vmul.u32 %v3726_v49, %v3701_v27 }
 0x280   : > { %v3496_v18 = vsel %vm3485_vm11, nan, %v3495_v34  ;;  %vm6445_vm2 = vcmp.lt.s32.totalorder %v6444_v4, 0  ;;  %v3621_v30 = vsub.s32 4, %v8644_v59  ;;  %v3727_v2 = vmul.u32 %v3725_v58, %v3701_v27 }
 0x281   : > { %v5965_v55 = vmul.f32 %v5768_v5, %v3496_v18  ;;  %v3606_v29 = vsel %vm6445_vm2, 0, %v6444_v4  ;;  %v3705_v23 = vmul.u32 %v3703_v62, %v3701_v27  ;;  %v3708_v26 = vmul.u32 %v3704_v15, %v3702_v48 }
 0x282   : > { %v3709_v19 = vshll.u32 %v3706_v31, 16  ;;  %v3607_v46 = vsub.s32 32, %v3606_v29  ;;  %v3611_v22 = vsub.s32 4294967266, %v3606_v29  ;;  %v3710_v53 = vshrl.u32 %v3706_v31, 16 }
 0x283   : > { %6167 = vst [vmem:[%s7681_s17 + $0x88] sm:$0xff] %v5965_v55  ;;  %v3711_v13 = vshll.u32 %v3707_v28, 16  ;;  %v3729_v0 = vmul.u32 %v3725_v58, %v3702_v48  ;;  %v3731_v32 = vshll.u32 %v3728_v20, 16  ;;  %v3608_v14 = vshll.u32 %v3599_v35, %v3606_v29 }
 0x284   : > { %vm3713_vm3 = vc.u32 %v3705_v23, %v3709_v19  ;;  %v3715_v54 = vadd.s32 %v3709_v19, %v3705_v23  ;;  %v3609_v47 = vshrl.u32 %v3591_v38, %v3607_v46  ;;  %v3612_v41 = vadd.s32 127, %v3611_v22 }
 0x285   : > { %v3714_v61 = vsel %vm3713_vm3, 1, %v11363_v44  ;;  %v3730_v4 = vmul.u32 %v3726_v49, %v3702_v48  ;;  %vm3735_vm7 = vc.u32 %v3727_v2, %v3731_v32  ;;  %v3733_v31 = vshll.u32 %v3729_v0, 16 }
 0x286   : > { %v3716_v34 = vadd.s32 %v3714_v61, %v3708_v26  ;;  %vm3717_vm4 = vc.u32 %v3715_v54, %v3711_v13  ;;  %v3610_v62 = vor.u32 %v3609_v47, %v3608_v14  ;;  %v3613_v15 = vshll.u32 %v3612_v41, 23  ;;  %v11406_v14 = vld [vmem:[#allocation33_spill] sm:$0xff] }
 0x287   : > { %v3718_v27 = vsel %vm3717_vm4, 1, %v11363_v44  ;;  %v3736_v18 = vsel %vm3735_vm7, 1, %v11363_v44  ;;  %v3737_v55 = vadd.s32 %v3731_v32, %v3727_v2  ;;  %vm3499_vm5 = vcmp.lt.s32.totalorder %v8421_v6, 0  ;;  %v11405_v32 = vld [vmem:[#allocation41_spill] sm:$0xff] }
 0x288   : > { %v3720_v5 = vadd.s32 %v3718_v27, %v3716_v34  ;;  %v3738_v58 = vadd.s32 %v3736_v18, %v3730_v4  ;;  %v3614_v35 = vor.u32 4788187, %v3613_v15  ;;  %v3688_v38 = vsel %vm3684_vm9, %v3668_v25, %v8635_v16 }
 0x289   : > { %v3689_v49 = vsel %vm3687_vm8, %v8642_v33, 2102212464  ;;  %vm3739_vm6 = vc.u32 %v3737_v55, %v3733_v31  ;;  %v4427_v29 = vand.u32 2147483647, %v8681_v63  ;;  %v4430_v23 = vand.u32 2139095040, %v8681_v63 }
 0x28a   : > { %v3721_v48 = vadd.s32 %v3720_v5, %v3710_v53  ;;  %v3615_v26 = vand.u32 2147483647, %v3614_v35  ;;  %v3617_v2 = vcvt.s32.f32 %v3610_v62  ;;  %v3712_v19 = vshrl.u32 %v3707_v28, 16 }
 0x28b   : > { %v3740_v46 = vsel %vm3739_vm6, 1, %v11363_v44  ;;  %v3622_v22 = vsel %vm3499_vm5, %v3621_v30, %v8644_v59  ;;  %v3732_v16 = vshrl.u32 %v3728_v20, 16  ;;  %v4431_v13 = vshrl.u32 %v4430_v23, 23 }
 0x28c   : > { %v3742_v25 = vadd.s32 %v3740_v46, %v3738_v58  ;;  %v3618_v54 = vmul.f32 %v3617_v2, %v3615_v26  ;;  %v3690_v33 = vsel %vm3686_vm10, %v8640_v50, %v3689_v49  ;;  %v3722_v53 = vadd.s32 %v3721_v48, %v3712_v19 }
 0x28d   : > { %v8713_v47 = vadd.f32 %v11406_v14, %v11405_v32  ;;  %vm8717_vm8 = vcmp.le.f32.partialorder %v3497_v45, 0.7853982  ;;  %v3734_v59 = vshrl.u32 %v3729_v0, 16  ;;  %v6461_v30 = vadd.s32 4294967169, %v4431_v13 }
 0x28e   : > { %v3743_v20 = vadd.s32 %v3742_v25, %v3732_v16  ;;  %v3619_v41 = vxor.u32 2147483648, %v3618_v54  ;;  %v3624_v61 = vsel %vm8717_vm8, 0, %v3622_v22  ;;  %v3741_v34 = vadd.s32 %v3737_v55, %v3733_v31 }
 0x28f   : > { %v612_v50 = vmul.f32 %v11375_v12, %v11404_v37  ;;  %v3691_v4 = vsel %vm3685_vm12, %v3688_v38, %v3690_v33  ;;  %v4434_v45 = vand.u32 8388607, %v4427_v29  ;;  %v4437_v15 = vadd.s32 1, %v6461_v30 }
 0x290   : > { %v3744_v62 = vadd.s32 %v3743_v20, %v3734_v59  ;;  %v3620_v0 = vsel %vm3499_vm5, %v3619_v41, %v3618_v54  ;;  %vm3747_vm9 = vc.u32 %v3722_v53, %v3741_v34  ;;  %v3641_v11 = vadd.s32 3, %v3624_v61 }
 0x291   : > { %v3623_v27 = vsel %vm8717_vm8, %v8421_v6, %v3620_v0  ;;  %vm4438_vm10 = vcmp.gt.s32.totalorder %v4437_v15, 0  ;;  %v644_v12 = vadd.f32 %v612_v50, %v8609_v60  ;;  %v3745_v31 = vmul.u32 %v8673_v51, %v3691_v4 }
 0x292   : > { %v3748_v18 = vadd.s32 1, %v3744_v62  ;;  %v3625_v5 = vmul.f32 %v3623_v27, %v3623_v27  ;;  %v4439_v55 = vsel %vm4438_vm10, %v4437_v15, 0  ;;  %v4435_v35 = vor.u32 8388608, %v4434_v45 }
 0x293   : > { %v4441_v38 = vand.u32 31, %v4439_v55  ;;  %v8737_v49 = vadd.f32 %v7695_v40, %v644_v12  ;;  %v3642_v16 = vand.u32 3, %v3641_v11  ;;  %v8739_v60 = vadd.s32 %v3741_v34, %v3722_v53 }
 0x294   : > { %v3749_v58 = vsel %vm3747_vm9, %v3748_v18, %v3744_v62  ;;  %v3626_v48 = vmul.f32 -0.001358992, %v3625_v5  ;;  %v3633_v23 = vmul.f32 -0.00019511016, %v3625_v5  ;;  %v8741_v25 = vshll.u32 %v4435_v35, 8 }
 0x295   : > { %v3750_v26 = vadd.s32 %v3749_v58, %v3745_v31  ;;  %v4442_v2 = vsub.s32 32, %v4441_v38  ;;  %v4585_v51 = vand.u32 2139095040, %v8737_v49  ;;  %v8747_v14 = vshrl.u32 %v4439_v55, 5 }
 0x296   : > { %v3627_v19 = vadd.f32 0.041655596, %v3626_v48  ;;  %v3634_v46 = vadd.f32 0.008332121, %v3633_v23  ;;  %v4444_v61 = vshll.u32 %v11359_v3, %v4441_v38  ;;  %vm3644_vm11 = vcmp.eq.s32.totalorder %v3642_v16, 0 }
 0x297   : > { %v3751_v22 = vadd.s32 536870912, %v3750_v26  ;;  %v4445_v32 = vshrl.u32 %v11360_v56, %v4442_v2  ;;  %v4448_v28 = vshrl.u32 %v11361_v52, %v4442_v2  ;;  %v4451_v59 = vshrl.u32 %v11362_v21, %v4442_v2 }
 0x298   : > { %v3628_v13 = vmul.f32 %v3627_v19, %v3625_v5  ;;  %v3635_v54 = vmul.f32 %v3634_v46, %v3625_v5  ;;  %v4454_v20 = vshrl.u32 %v11364_v43, %v4442_v2  ;;  %vm3647_vm12 = vcmp.eq.s32.totalorder %v3642_v16, 2 }
 0x299   : > { %v8744_v33 = vshrl.u32 %v3751_v22, 30  ;;  %v4447_v34 = vshll.u32 %v11360_v56, %v4441_v38  ;;  %v4450_v50 = vshll.u32 %v11361_v52, %v4441_v38  ;;  %v4453_v4 = vshll.u32 %v11362_v21, %v4441_v38 }
 0x29a   : > { %v3629_v53 = vadd.f32 -0.4999988, %v3628_v13  ;;  %v3636_v30 = vadd.f32 -0.16666654, %v3635_v54  ;;  %v4457_v62 = vshrl.u32 %v11365_v10, %v4442_v2  ;;  %vm3643_vm14 = vcmp.lt.s32.totalorder %v3642_v16, 2 }
 0x29b   : > { %v3753_v41 = vshll.u32 %v8744_v33, 30  ;;  %v4446_v18 = vor.u32 %v4445_v32, %v4444_v61  ;;  %vm3640_vm13 = vweird.f32 %v8421_v6  ;;  %v4449_v12 = vor.u32 %v4448_v28, %v4447_v34 }
 0x29c   : > { %v3630_v45 = vmul.f32 %v3629_v53, %v3625_v5  ;;  %v3637_v15 = vmul.f32 %v3636_v30, %v3625_v5  ;;  %v4452_v11 = vor.u32 %v4451_v59, %v4450_v50  ;;  %v4455_v31 = vor.u32 %v4454_v20, %v4453_v4 }
 0x29d   : > { %v8758_v0 = vsub.s32 %v3750_v26, %v3753_v41  ;;  %v4456_v55 = vshll.u32 %v11364_v43, %v4441_v38  ;;  %vm4459_vm1 = vcmp.lt.s32.totalorder %v8747_v14, 1  ;;  %v4476_v5 = vand.u32 65535, %v8741_v25 }
 0x29e   : > { %v3631_v58 = vadd.f32 1.0, %v3630_v45  ;;  %v3638_v35 = vadd.f32 1.0, %v3637_v15  ;;  %v4477_v26 = vshrl.u32 %v8741_v25, 16  ;;  %vm4462_vm2 = vcmp.lt.s32.totalorder %v8747_v14, 4  ;;  %v5797_v45 = vpop.f32.mrf.mxu2 }
 0x29f   : > { %vm3755_vm15 = vcmp.lt.s32.totalorder %v8758_v0, 0  ;;  %v3756_v48 = vsub.s32 0, %v8758_v0  ;;  %v4458_v23 = vor.u32 %v4457_v62, %v4456_v55  ;;  %vm4461_vm3 = vcmp.lt.s32.totalorder %v8747_v14, 3 }
 0x2a0   : > { %v3639_v19 = vmul.f32 %v3638_v35, %v3623_v27  ;;  %v3648_v46 = vxor.u32 2147483648, %v3631_v58  ;;  %v4467_v13 = vsel %vm4459_vm1, %v4446_v18, %v4449_v12  ;;  %v4468_v54 = vsel %vm4462_vm2, %v4455_v31, 920167782 }
 0x2a1   : > { %v3757_v22 = vsel %vm3755_vm15, %v3756_v48, %v8758_v0  ;;  %v4469_v28 = vsel %vm4461_vm3, %v4452_v11, %v4468_v54  ;;  %v4582_v27 = vand.u32 2147483647, %v8737_v49  ;;  %v4586_v59 = vshrl.u32 %v4585_v51, 23 }
 0x2a2   : > { %v3758_v38 = vclz %v3757_v22  ;;  %v3645_v32 = vxor.u32 2147483648, %v3639_v19  ;;  %v4443_v53 = vshrl.u32 %v11359_v3, %v4442_v2  ;;  %vm4460_vm4 = vcmp.lt.s32.totalorder %v8747_v14, 2 }
 0x2a3   : > { %v4471_v30 = vsel %vm4459_vm1, %v4449_v12, %v4452_v11  ;;  %v3649_v61 = vsel %vm3647_vm12, %v3648_v46, %v3639_v19  ;;  %v4470_v34 = vsel %vm4460_vm4, %v4467_v13, %v4469_v28  ;;  %v4472_v50 = vsel %vm4462_vm2, %v4458_v23, 1326507024 }
 0x2a4   : > { %v6447_v20 = vadd.s32 4294967294, %v3758_v38  ;;  %v3646_v41 = vsel %vm3644_vm11, %v3631_v58, %v3645_v32  ;;  %v4473_v2 = vsel %vm4461_vm3, %v4455_v31, %v4472_v50  ;;  %v4500_v4 = vand.u32 65535, %v4470_v34 }
 0x2a5   : > { %v3650_v51 = vsel %vm3643_vm14, %v3646_v41, %v3649_v61  ;;  %v4474_v55 = vsel %vm4460_vm4, %v4471_v30, %v4473_v2  ;;  %v4501_v58 = vshrl.u32 %v4470_v34, 16  ;;  %v4464_v16 = vsel %vm4462_vm2, %v4452_v11, 2102212464 }
 0x2a6   : > { %vm6448_vm7 = vcmp.lt.s32.totalorder %v6447_v20, 0  ;;  %v3651_v62 = vsel %vm3640_vm13, nan, %v3650_v51  ;;  %v3776_v19 = vsub.s32 4, %v8744_v33  ;;  %v4478_v46 = vand.u32 65535, %v4474_v55 }
 0x2a7   : > { %v3761_v15 = vsel %vm6448_vm7, 0, %v6447_v20  ;;  %v5966_v35 = vmul.f32 %v5797_v45, %v3651_v62  ;;  %v4479_v31 = vshrl.u32 %v4474_v55, 16  ;;  %v4503_v22 = vmul.u32 %v4501_v58, %v4476_v5 }
 0x2a8   : > { %v3762_v48 = vsub.s32 32, %v3761_v15  ;;  %v3766_v23 = vsub.s32 4294967266, %v3761_v15  ;;  %v3763_v6 = vshll.u32 %v8758_v0, %v3761_v15  ;;  %v4504_v54 = vmul.u32 %v4500_v4, %v4477_v26 }
 0x2a9   : > { %6168 = vst [vmem:[%s7681_s17 + $0x90] sm:$0xff] %v5966_v35  ;;  %vm3654_vm5 = vcmp.lt.s32.totalorder %v8512_v1, 0  ;;  %v4463_v32 = vsel %vm4459_vm1, %v4443_v53, %v4446_v18  ;;  %v4465_v11 = vsel %vm4461_vm3, %v4449_v12, %v4464_v16  ;;  %v4481_v28 = vmul.u32 %v4479_v31, %v4476_v5 }
 0x2aa   : > { %v3764_v38 = vshrl.u32 %v8739_v60, %v3762_v48  ;;  %v3767_v13 = vadd.s32 127, %v3766_v23  ;;  %v4482_v20 = vmul.u32 %v4478_v46, %v4477_v26  ;;  %v4502_v61 = vmul.u32 %v4500_v4, %v4476_v5 }
 0x2ab   : > { %v4506_v34 = vshll.u32 %v4503_v22, 16  ;;  %v4480_v50 = vmul.u32 %v4478_v46, %v4476_v5  ;;  %v4483_v0 = vmul.u32 %v4479_v31, %v4477_v26  ;;  %v4484_v51 = vshll.u32 %v4481_v28, 16 }
 0x2ac   : > { %v3765_v30 = vor.u32 %v3764_v38, %v3763_v6  ;;  %v3768_v41 = vshll.u32 %v3767_v13, 23  ;;  %v4505_v60 = vmul.u32 %v4501_v58, %v4477_v26  ;;  %vm8807_vm6 = vcmp.le.f32.partialorder %v3652_v39, 0.7853982 }
 0x2ad   : > { %v4486_v62 = vshll.u32 %v4482_v20, 16  ;;  %v4508_v12 = vshll.u32 %v4504_v54, 16  ;;  %vm4488_vm8 = vc.u32 %v4480_v50, %v4484_v51  ;;  %v4490_v45 = vadd.s32 %v4484_v51, %v4480_v50 }
 0x2ae   : > { %v3769_v18 = vor.u32 4788187, %v3768_v41  ;;  %v3772_v53 = vcvt.s32.f32 %v3765_v30  ;;  %vm4510_vm9 = vc.u32 %v4502_v61, %v4506_v34  ;;  %v4512_v15 = vadd.s32 %v4506_v34, %v4502_v61  ;;  %v11411_v41 = vld [vmem:[#allocation42_spill] sm:$0xff] }
 0x2af   : > { %v4489_v5 = vsel %vm4488_vm8, 1, %v11363_v44  ;;  %v4511_v55 = vsel %vm4510_vm9, 1, %v11363_v44  ;;  %v6464_v26 = vadd.s32 4294967169, %v4586_v59  ;;  %vm4492_vm10 = vc.u32 %v4490_v45, %v4486_v62  ;;  %v11412_v61 = vld [vmem:[#allocation34_spill] sm:$0xff] }
 0x2b0   : > { %v3770_v4 = vand.u32 2147483647, %v3769_v18  ;;  %v4491_v58 = vadd.s32 %v4489_v5, %v4483_v0  ;;  %v4513_v39 = vadd.s32 %v4511_v55, %v4505_v60  ;;  %vm4514_vm11 = vc.u32 %v4512_v15, %v4508_v12 }
 0x2b1   : > { %v4493_v48 = vsel %vm4492_vm10, 1, %v11363_v44  ;;  %v4507_v23 = vshrl.u32 %v4503_v22, 16  ;;  %v4515_v16 = vsel %vm4514_vm11, 1, %v11363_v44  ;;  %v4485_v46 = vshrl.u32 %v4481_v28, 16 }
 0x2b2   : > { %v3773_v35 = vmul.f32 %v3772_v53, %v3770_v4  ;;  %v4495_v31 = vadd.s32 %v4493_v48, %v4491_v58  ;;  %v4517_v6 = vadd.s32 %v4515_v16, %v4513_v39  ;;  %v4592_v38 = vadd.s32 1, %v6464_v26 }
 0x2b3   : > { %v3777_v30 = vsel %vm3654_vm5, %v3776_v19, %v8744_v33  ;;  %v4487_v59 = vshrl.u32 %v4482_v20, 16  ;;  %v8820_v34 = vadd.f32 %v11412_v61, %v11411_v41  ;;  %v4509_v0 = vshrl.u32 %v4504_v54, 16 }
 0x2b4   : > { %v3774_v13 = vxor.u32 2147483648, %v3773_v35  ;;  %v4496_v50 = vadd.s32 %v4495_v31, %v4485_v46  ;;  %v4518_v51 = vadd.s32 %v4517_v6, %v4507_v23  ;;  %vm4593_vm12 = vcmp.gt.s32.totalorder %v4592_v38, 0 }
 0x2b5   : > { %v4466_v28 = vsel %vm4460_vm4, %v4463_v32, %v4465_v11  ;;  %v4589_v60 = vand.u32 8388607, %v4582_v27  ;;  %v4594_v18 = vsel %vm4593_vm12, %v4592_v38, 0  ;;  %v8833_v20 = vadd.s32 %v4512_v15, %v4508_v12 }
 0x2b6   : > { %v3775_v22 = vsel %vm3654_vm5, %v3774_v13, %v3773_v35  ;;  %v8831_v19 = vadd.s32 %v4496_v50, %v4487_v59  ;;  %v4519_v54 = vadd.s32 %v4518_v51, %v4509_v0  ;;  %v3779_v53 = vsel %vm8807_vm6, 0, %v3777_v30 }
 0x2b7   : > { %v3778_v33 = vsel %vm8807_vm6, %v8512_v1, %v3775_v22  ;;  %v4596_v45 = vand.u32 31, %v4594_v18  ;;  %v613_v32 = vmul.f32 %v11380_v17, %v11404_v37  ;;  %v4520_v5 = vmul.u32 %v8741_v25, %v4466_v28 }
 0x2b8   : > { %v3780_v62 = vmul.f32 %v3778_v33, %v3778_v33  ;;  %vm4522_vm14 = vc.u32 %v8831_v19, %v8833_v20  ;;  %v4523_v14 = vadd.s32 1, %v4519_v54  ;;  %v3796_v12 = vadd.s32 3, %v3779_v53 }
 0x2b9   : > { %v8842_v55 = vsub.s32 32, %v4596_v45  ;;  %v4590_v26 = vor.u32 8388608, %v4589_v60  ;;  %v8845_v2 = vadd.f32 %v613_v32, %v8713_v47  ;;  %v4608_v48 = vshll.u32 %v11362_v21, %v4596_v45 }
 0x2ba   : > { %v3781_v11 = vmul.f32 -0.001358992, %v3780_v62  ;;  %v3788_v4 = vmul.f32 -0.00019511016, %v3780_v62  ;;  %v4524_v15 = vsel %vm4522_vm14, %v4523_v14, %v4519_v54  ;;  %v8856_v6 = vshrl.u32 %v4594_v18, 5 }
 0x2bb   : > { %v4525_v35 = vadd.s32 %v4524_v15, %v4520_v5  ;;  %v4600_v17 = vshrl.u32 %v11360_v56, %v8842_v55  ;;  %v4603_v23 = vshrl.u32 %v11361_v52, %v8842_v55  ;;  %v4606_v25 = vshrl.u32 %v11362_v21, %v8842_v55 }
 0x2bc   : > { %v3782_v58 = vadd.f32 0.041655596, %v3781_v11  ;;  %v3789_v39 = vadd.f32 0.008332121, %v3788_v4  ;;  %v4609_v16 = vshrl.u32 %v11364_v43, %v8842_v55  ;;  %v4599_v38 = vshll.u32 %v11359_v3, %v4596_v45 }
 0x2bd   : > { %v4526_v31 = vadd.s32 536870912, %v4525_v35  ;;  %v4602_v13 = vshll.u32 %v11360_v56, %v4596_v45  ;;  %v4605_v30 = vshll.u32 %v11361_v52, %v4596_v45  ;;  %v4612_v0 = vshrl.u32 %v11365_v10, %v8842_v55 }
 0x2be   : > { %v3783_v46 = vmul.f32 %v3782_v58, %v3780_v62  ;;  %v3790_v47 = vmul.f32 %v3789_v39, %v3780_v62  ;;  %v4610_v59 = vor.u32 %v4609_v16, %v4608_v48  ;;  %v8865_v51 = vor.u32 %v4600_v17, %v4599_v38 }
 0x2bf   : > { %v8861_v50 = vshrl.u32 %v4526_v31, 30  ;;  %v8867_v22 = vor.u32 %v4603_v23, %v4602_v13  ;;  %v8869_v28 = vor.u32 %v4606_v25, %v4605_v30  ;;  %v4611_v60 = vshll.u32 %v11364_v43, %v4596_v45 }
 0x2c0   : > { %v3784_v41 = vadd.f32 -0.4999988, %v3783_v46  ;;  %v3791_v61 = vadd.f32 -0.16666654, %v3790_v47  ;;  %vm4617_vm13 = vcmp.lt.s32.totalorder %v8856_v6, 4  ;;  %v3797_v14 = vand.u32 3, %v3796_v12 }
 0x2c1   : > { %v4528_v53 = vshll.u32 %v8861_v50, 30  ;;  %v4613_v32 = vor.u32 %v4612_v0, %v4611_v60  ;;  %vm4614_vm15 = vcmp.lt.s32.totalorder %v8856_v6, 1  ;;  %v4623_v11 = vsel %vm4617_vm13, %v4610_v59, 920167782  ;;  %v5826_v60 = vpop.f32.mrf.mxu3 }
 0x2c2   : > { %v3785_v18 = vmul.f32 %v3784_v41, %v3780_v62  ;;  %v3792_v54 = vmul.f32 %v3791_v61, %v3780_v62  ;;  %vm4616_vm1 = vcmp.lt.s32.totalorder %v8856_v6, 3  ;;  %v4622_v62 = vsel %vm4614_vm15, %v8865_v51, %v8867_v22 }
 0x2c3   : > { %v8877_v15 = vsub.s32 %v4525_v35, %v4528_v53  ;;  %v4624_v45 = vsel %vm4616_vm1, %v8869_v28, %v4623_v11  ;;  %v4626_v12 = vsel %vm4614_vm15, %v8867_v22, %v8869_v28  ;;  %v8891_v58 = vshll.u32 %v4590_v26, 8 }
 0x2c4   : > { %v3786_v4 = vadd.f32 1.0, %v3785_v18  ;;  %v3793_v5 = vadd.f32 1.0, %v3792_v54  ;;  %vm3798_vm3 = vcmp.lt.s32.totalorder %v3797_v14, 2  ;;  %vm3799_vm4 = vcmp.eq.s32.totalorder %v3797_v14, 0 }
 0x2c5   : > { %vm4530_vm2 = vcmp.lt.s32.totalorder %v8877_v15, 0  ;;  %v4531_v48 = vsub.s32 0, %v8877_v15  ;;  %vm3802_vm7 = vcmp.eq.s32.totalorder %v3797_v14, 2  ;;  %v4627_v17 = vsel %vm4617_vm13, %v4613_v32, 1326507024 }
 0x2c6   : > { %v3794_v39 = vmul.f32 %v3793_v5, %v3778_v33  ;;  %v3803_v35 = vxor.u32 2147483648, %v3786_v4  ;;  %vm4615_vm5 = vcmp.lt.s32.totalorder %v8856_v6, 2  ;;  %v4628_v26 = vsel %vm4616_vm1, %v4610_v59, %v4627_v17 }
 0x2c7   : > { %v4532_v25 = vsel %vm4530_vm2, %v4531_v48, %v8877_v15  ;;  %v4625_v16 = vsel %vm4615_vm5, %v4622_v62, %v4624_v45  ;;  %v4629_v46 = vsel %vm4615_vm5, %v4626_v12, %v4628_v26  ;;  %v4631_v47 = vand.u32 65535, %v8891_v58 }
 0x2c8   : > { %v3800_v23 = vxor.u32 2147483648, %v3794_v39  ;;  %v4533_v33 = vclz %v4532_v25  ;;  %v3804_v38 = vsel %vm3802_vm7, %v3803_v35, %v3794_v39  ;;  %v4633_v13 = vand.u32 65535, %v4629_v46 }
 0x2c9   : > { %v4634_v30 = vshrl.u32 %v4629_v46, 16  ;;  %vm3795_vm6 = vweird.f32 %v8512_v1  ;;  %v4632_v59 = vshrl.u32 %v8891_v58, 16  ;;  %v4656_v54 = vshrl.u32 %v4625_v16, 16 }
 0x2ca   : > { %v3801_v31 = vsel %vm3799_vm4, %v3786_v4, %v3800_v23  ;;  %v6462_v61 = vadd.s32 4294967294, %v4533_v33  ;;  %v8911_v53 = vadd.f32 %v7695_v40, %v8845_v2  ;;  %v4655_v4 = vand.u32 65535, %v4625_v16 }
 0x2cb   : > { %v3805_v41 = vsel %vm3798_vm3, %v3801_v31, %v3804_v38  ;;  %v4636_v18 = vmul.u32 %v4634_v30, %v4631_v47  ;;  %v4637_v11 = vmul.u32 %v4633_v13, %v4632_v59  ;;  %v4521_v1 = vadd.s32 %v8833_v20, %v8831_v19 }
 0x2cc   : > { %v3806_v0 = vsel %vm3795_vm6, nan, %v3805_v41  ;;  %vm6463_vm8 = vcmp.lt.s32.totalorder %v6462_v61, 0  ;;  %v4635_v5 = vmul.u32 %v4633_v13, %v4631_v47  ;;  %vm4429_vm9 = vcmp.lt.s32.totalorder %v8681_v63, 0 }
 0x2cd   : > { %v5967_v32 = vmul.f32 %v5826_v60, %v3806_v0  ;;  %v4536_v14 = vsel %vm6463_vm8, 0, %v6462_v61  ;;  %v4639_v62 = vshll.u32 %v4636_v18, 16  ;;  %v4638_v35 = vmul.u32 %v4634_v30, %v4632_v59 }
 0x2ce   : > { %v4537_v45 = vsub.s32 32, %v4536_v14  ;;  %v4538_v12 = vshll.u32 %v8877_v15, %v4536_v14  ;;  %v4541_v39 = vsub.s32 4294967266, %v4536_v14  ;;  %v4641_v2 = vshll.u32 %v4637_v11, 16 }
 0x2cf   : > { %6169 = vst [vmem:[%s7681_s17 + $0x98] sm:$0xff] %v5967_v32  ;;  %vm4643_vm10 = vc.u32 %v4635_v5, %v4639_v62  ;;  %v4645_v48 = vadd.s32 %v4639_v62, %v4635_v5  ;;  %v4658_v17 = vmul.u32 %v4656_v54, %v4631_v47  ;;  %v4659_v19 = vmul.u32 %v4655_v4, %v4632_v59 }
 0x2d0   : > { %v4539_v23 = vshrl.u32 %v4521_v1, %v4537_v45  ;;  %v4542_v25 = vadd.s32 127, %v4541_v39  ;;  %v4644_v26 = vsel %vm4643_vm10, 1, %v11363_v44  ;;  %v4657_v33 = vmul.u32 %v4655_v4, %v4631_v47 }
 0x2d1   : > { %v4646_v20 = vadd.s32 %v4644_v26, %v4638_v35  ;;  %vm4647_vm11 = vc.u32 %v4645_v48, %v4641_v2  ;;  %v4661_v16 = vshll.u32 %v4658_v17, 16  ;;  %vm8921_vm12 = vcmp.le.f32.partialorder %v4427_v29, 0.7853982 }
 0x2d2   : > { %v4540_v15 = vor.u32 %v4539_v23, %v4538_v12  ;;  %v4543_v31 = vshll.u32 %v4542_v25, 23  ;;  %v4551_v38 = vsub.s32 4, %v8861_v50  ;;  %v4648_v13 = vsel %vm4647_vm11, 1, %v11363_v44 }
 0x2d3   : > { %v4640_v30 = vshrl.u32 %v4636_v18, 16  ;;  %v4650_v41 = vadd.s32 %v4648_v13, %v4646_v20  ;;  %v4660_v61 = vmul.u32 %v4656_v54, %v4632_v59  ;;  %vm4665_vm14 = vc.u32 %v4657_v33, %v4661_v16 }
 0x2d4   : > { %v4544_v0 = vor.u32 4788187, %v4543_v31  ;;  %v4663_v60 = vshll.u32 %v4659_v19, 16  ;;  %v4666_v47 = vsel %vm4665_vm14, 1, %v11363_v44  ;;  %v4667_v32 = vadd.s32 %v4661_v16, %v4657_v33 }
 0x2d5   : > { %v4619_v29 = vsel %vm4617_vm13, %v8869_v28, 2102212464  ;;  %v4651_v4 = vadd.s32 %v4650_v41, %v4640_v30  ;;  %v4668_v1 = vadd.s32 %v4666_v47, %v4660_v61  ;;  %v4737_v14 = vand.u32 2147483647, %v8911_v53 }
 0x2d6   : > { %v4545_v5 = vand.u32 2147483647, %v4544_v0  ;;  %v4547_v62 = vcvt.s32.f32 %v4540_v15  ;;  %vm4669_vm2 = vc.u32 %v4667_v32, %v4663_v60  ;;  %v4740_v18 = vand.u32 2139095040, %v8911_v53 }
 0x2d7   : > { %v4552_v59 = vsel %vm4429_vm9, %v4551_v38, %v8861_v50  ;;  %v4598_v54 = vshrl.u32 %v11359_v3, %v8842_v55  ;;  %v4642_v45 = vshrl.u32 %v4637_v11, 16  ;;  %v4670_v12 = vsel %vm4669_vm2, 1, %v11363_v44 }
 0x2d8   : > { %v4548_v28 = vmul.f32 %v4547_v62, %v4545_v5  ;;  %v4662_v39 = vshrl.u32 %v4658_v17, 16  ;;  %v4672_v35 = vadd.s32 %v4670_v12, %v4668_v1  ;;  %v4741_v2 = vshrl.u32 %v4740_v18, 23 }
 0x2d9   : > { %v4618_v48 = vsel %vm4614_vm15, %v4598_v54, %v8865_v51  ;;  %v4620_v23 = vsel %vm4616_vm1, %v8867_v22, %v4619_v29  ;;  %v4652_v25 = vadd.s32 %v4651_v4, %v4642_v45  ;;  %v4744_v50 = vand.u32 8388607, %v4737_v14 }
 0x2da   : > { %v4549_v55 = vxor.u32 2147483648, %v4548_v28  ;;  %v4664_v11 = vshrl.u32 %v4659_v19, 16  ;;  %v4673_v26 = vadd.s32 %v4672_v35, %v4662_v39  ;;  %v6467_v20 = vadd.s32 4294967169, %v4741_v2 }
 0x2db   : > { %v4554_v17 = vsel %vm8921_vm12, 0, %v4552_v59  ;;  %v4671_v33 = vadd.s32 %v4667_v32, %v4663_v60  ;;  %v614_v16 = vmul.f32 %v7642_v7, %v11404_v37  ;;  %v4621_v22 = vsel %vm4615_vm5, %v4618_v48, %v4620_v23 }
 0x2dc   : > { %v4550_v51 = vsel %vm4429_vm9, %v4549_v55, %v4548_v28  ;;  %v4674_v15 = vadd.s32 %v4673_v26, %v4664_v11  ;;  %v4747_v31 = vadd.s32 1, %v6467_v20  ;;  %v4745_v38 = vor.u32 8388608, %v4744_v50 }
 0x2dd   : > { %v4553_v19 = vsel %vm8921_vm12, %v8681_v63, %v4550_v51  ;;  %vm4677_vm13 = vc.u32 %v4652_v25, %v4671_v33  ;;  %v646_v13 = vadd.f32 %v614_v16, %v8820_v34  ;;  %v4571_v41 = vadd.s32 3, %v4554_v17 }
 0x2de   : > { %v4555_v30 = vmul.f32 %v4553_v19, %v4553_v19  ;;  %v4678_v61 = vadd.s32 1, %v4674_v15  ;;  %vm4748_vm15 = vcmp.gt.s32.totalorder %v4747_v31, 0  ;;  %v4675_v7 = vmul.u32 %v8891_v58, %v4621_v22 }
 0x2df   : > { %v4749_v0 = vsel %vm4748_vm15, %v4747_v31, 0  ;;  %v8961_v6 = vadd.f32 %v7695_v40, %v646_v13  ;;  %v8963_v4 = vshll.u32 %v4745_v38, 8  ;;  %v4572_v34 = vand.u32 3, %v4571_v41 }
 0x2e0   : > { %v4556_v60 = vmul.f32 -0.001358992, %v4555_v30  ;;  %v4563_v47 = vmul.f32 -0.00019511016, %v4555_v30  ;;  %v4679_v32 = vsel %vm4677_vm13, %v4678_v61, %v4674_v15  ;;  %v4751_v46 = vand.u32 31, %v4749_v0 }
 0x2e1   : > { %v4680_v29 = vadd.s32 %v4679_v32, %v4675_v7  ;;  %v4895_v59 = vand.u32 2139095040, %v8961_v6  ;;  %v8966_v45 = vadd.s32 %v4671_v33, %v4652_v25  ;;  %v8969_v28 = vand.u32 65535, %v8963_v4 }
 0x2e2   : > { %v4557_v1 = vadd.f32 0.041655596, %v4556_v60  ;;  %v4564_v5 = vadd.f32 0.008332121, %v4563_v47  ;;  %v4752_v18 = vsub.s32 32, %v4751_v46  ;;  %v8972_v39 = vshrl.u32 %v8963_v4, 16 }
 0x2e3   : > { %v4681_v62 = vadd.s32 536870912, %v4680_v29  ;;  %vm4577_vm1 = vcmp.eq.s32.totalorder %v4572_v34, 2  ;;  %v8974_v48 = vshrl.u32 %v4749_v0, 5  ;;  %vm4574_vm3 = vcmp.eq.s32.totalorder %v4572_v34, 0 }
 0x2e4   : > { %v4558_v54 = vmul.f32 %v4557_v1, %v4555_v30  ;;  %v4565_v58 = vmul.f32 %v4564_v5, %v4555_v30  ;;  %v4755_v23 = vshrl.u32 %v11360_v56, %v4752_v18  ;;  %v4754_v55 = vshll.u32 %v11359_v3, %v4751_v46 }
 0x2e5   : > { %v4682_v12 = vshrl.u32 %v4681_v62, 30  ;;  %v4758_v25 = vshrl.u32 %v11361_v52, %v4752_v18  ;;  %v8979_v11 = vshrl.u32 %v4895_v59, 23  ;;  %vm4573_vm4 = vcmp.lt.s32.totalorder %v4572_v34, 2 }
 0x2e6   : > { %v4559_v35 = vadd.f32 -0.4999988, %v4558_v54  ;;  %v4566_v2 = vadd.f32 -0.16666654, %v4565_v58  ;;  %vm4584_vm7 = vcmp.lt.s32.totalorder %v8737_v49, 0  ;;  %v4761_v17 = vshrl.u32 %v11362_v21, %v4752_v18 }
 0x2e7   : > { %v4683_v50 = vshll.u32 %v4682_v12, 30  ;;  %v4764_v33 = vshrl.u32 %v11364_v43, %v4752_v18  ;;  %vm4570_vm5 = vweird.f32 %v8681_v63  ;;  %v4757_v51 = vshll.u32 %v11360_v56, %v4751_v46 }
 0x2e8   : > { %v4560_v26 = vmul.f32 %v4559_v35, %v4555_v30  ;;  %v4567_v20 = vmul.f32 %v4566_v2, %v4555_v30  ;;  %v4760_v22 = vshll.u32 %v11361_v52, %v4751_v46  ;;  %v4767_v15 = vshrl.u32 %v11365_v10, %v4752_v18 }
 0x2e9   : > { %v8985_v16 = vsub.s32 %v4680_v29, %v4683_v50  ;;  %v4756_v13 = vor.u32 %v4755_v23, %v4754_v55  ;;  %v4763_v30 = vshll.u32 %v11362_v21, %v4751_v46  ;;  %v4759_v61 = vor.u32 %v4758_v25, %v4757_v51 }
 0x2ea   : > { %v4561_v31 = vadd.f32 1.0, %v4560_v26  ;;  %v4568_v38 = vadd.f32 1.0, %v4567_v20  ;;  %v4766_v7 = vshll.u32 %v11364_v43, %v4751_v46  ;;  %vm8996_vm8 = vcmp.le.f32.partialorder %v4582_v27, 0.7853982  ;;  %v5742_v20 = vpop.f32.mrf.mxu0 }
 0x2eb   : > { %vm4685_vm6 = vcmp.lt.s32.totalorder %v8985_v16, 0  ;;  %v4686_v41 = vsub.s32 0, %v8985_v16  ;;  %v4762_v32 = vor.u32 %v4761_v17, %v4760_v22  ;;  %v4765_v29 = vor.u32 %v4764_v33, %v4763_v30 }
 0x2ec   : > { %v4569_v0 = vmul.f32 %v4568_v38, %v4553_v19  ;;  %v4578_v60 = vxor.u32 2147483648, %v4561_v31  ;;  %v4706_v5 = vsub.s32 4, %v4682_v12  ;;  %v4768_v62 = vor.u32 %v4767_v15, %v4766_v7 }
 0x2ed   : > { %v4687_v1 = vsel %vm4685_vm6, %v4686_v41, %v8985_v16  ;;  %vm4769_vm9 = vcmp.lt.s32.totalorder %v8974_v48, 1  ;;  %v4753_v46 = vshrl.u32 %v11359_v3, %v4752_v18  ;;  %vm4770_vm10 = vcmp.lt.s32.totalorder %v8974_v48, 2 }
 0x2ee   : > { %v4575_v59 = vxor.u32 2147483648, %v4569_v0  ;;  %v4688_v54 = vclz %v4687_v1  ;;  %v4579_v19 = vsel %vm4577_vm1, %v4578_v60, %v4569_v0  ;;  %vm4771_vm11 = vcmp.lt.s32.totalorder %v8974_v48, 3 }
 0x2ef   : > { %vm4772_vm12 = vcmp.lt.s32.totalorder %v8974_v48, 4  ;;  %v4777_v27 = vsel %vm4769_vm9, %v4756_v13, %v4759_v61  ;;  %v4781_v18 = vsel %vm4769_vm9, %v4759_v61, %v4762_v32  ;;  %v9017_v50 = vsel %vm4584_vm7, %v4706_v5, %v4682_v12 }
 0x2f0   : > { %v4576_v58 = vsel %vm4574_vm3, %v4561_v31, %v4575_v59  ;;  %v6465_v35 = vadd.s32 4294967294, %v4688_v54  ;;  %v4778_v2 = vsel %vm4772_vm12, %v4765_v29, 920167782  ;;  %v4782_v25 = vsel %vm4772_vm12, %v4768_v62, 1326507024  ;;  %v6624_v54 = vld [vmem:[%s7681_s17 + $0x80] sm:$0xff] }
 0x2f1   : > { %v4580_v23 = vsel %vm4573_vm4, %v4576_v58, %v4579_v19  ;;  %v4779_v55 = vsel %vm4771_vm11, %v4762_v32, %v4778_v2  ;;  %v4783_v17 = vsel %vm4771_vm11, %v4765_v29, %v4782_v25  ;;  %v4774_v63 = vsel %vm4772_vm12, %v4762_v32, 2102212464 }
 0x2f2   : > { %v4581_v26 = vsel %vm4570_vm5, nan, %v4580_v23  ;;  %vm6466_vm14 = vcmp.lt.s32.totalorder %v6465_v35, 0  ;;  %v4780_v34 = vsel %vm4770_vm10, %v4777_v27, %v4779_v55  ;;  %v4784_v51 = vsel %vm4770_vm10, %v4781_v18, %v4783_v17 }
 0x2f3   : > { %v5972_v12 = vmul.f32 %v5742_v20, %v4581_v26  ;;  %v4691_v33 = vsel %vm6466_vm14, 0, %v6465_v35  ;;  %v4810_v22 = vand.u32 65535, %v4780_v34  ;;  %v4788_v38 = vand.u32 65535, %v4784_v51  ;;  %v6626_v20 = vld [vmem:[%s7681_s17] sm:$0xff] }
 0x2f4   : > { %v4692_v15 = vsub.s32 32, %v4691_v33  ;;  %v4696_v31 = vsub.s32 4294967266, %v4691_v33  ;;  %v4693_v30 = vshll.u32 %v8985_v16, %v4691_v33  ;;  %v4709_v41 = vsel %vm8996_vm8, 0, %v9017_v50 }
 0x2f5   : > { %6174 = vst [vmem:[%s7681_s17 + $0xc0] sm:$0xff] %v5972_v12  ;;  %v4789_v7 = vshrl.u32 %v4784_v51, 16  ;;  %v4811_v0 = vshrl.u32 %v4780_v34, 16  ;;  %6002 = vmatpush.msra.mxu0 %v5972_v12  ;;  %v4792_v1 = vmul.u32 %v4788_v38, %v8972_v39  ;;  %v4814_v32 = vmul.u32 %v4810_v22, %v8972_v39 }
 0x2f6   : > { %v4694_v60 = vshrl.u32 %v8966_v45, %v4692_v15  ;;  %v4697_v29 = vadd.s32 127, %v4696_v31  ;;  %v4773_v5 = vsel %vm4769_vm9, %v4753_v46, %v4756_v13  ;;  %v4775_v16 = vsel %vm4771_vm11, %v4759_v61, %v4774_v63  ;;  %v6625_v61 = vld [vmem:[%s7681_s17 + $0x40] sm:$0xff] }
 0x2f7   : > { %v4791_v62 = vmul.u32 %v4789_v7, %v8969_v28  ;;  %v4813_v59 = vmul.u32 %v4811_v0, %v8969_v28  ;;  %6003 = vmatpush.msra.mxu0 %v6624_v54  ;;  %v4790_v27 = vmul.u32 %v4788_v38, %v8969_v28  ;;  %v4812_v58 = vmul.u32 %v4810_v22, %v8969_v28  ;;  %v11417_v54 = vld [vmem:[#allocation60_spill] sm:$0xff] }
 0x2f8   : > { %v4695_v19 = vor.u32 %v4694_v60, %v4693_v30  ;;  %v4698_v45 = vshll.u32 %v4697_v29, 23  ;;  %v4793_v35 = vmul.u32 %v4789_v7, %v8972_v39  ;;  %v4815_v13 = vmul.u32 %v4811_v0, %v8972_v39 }
 0x2f9   : > { %v4794_v2 = vshll.u32 %v4791_v62, 16  ;;  %v4816_v46 = vshll.u32 %v4813_v59, 16  ;;  %6004 = vmatpush.msra.mxu0 %v6625_v61  ;;  %v4796_v50 = vshll.u32 %v4792_v1, 16  ;;  %v4818_v55 = vshll.u32 %v4814_v32, 16 }
 0x2fa   : > { %v4699_v18 = vor.u32 4788187, %v4698_v45  ;;  %v4702_v23 = vcvt.s32.f32 %v4695_v19  ;;  %v6470_v39 = vadd.s32 4294967169, %v8979_v11  ;;  %v4795_v22 = vshrl.u32 %v4791_v62, 16  ;;  %v11418_v11 = vld [vmem:[#allocation66_spill] sm:$0xff] }
 0x2fb   : > { %vm4798_vm2 = vc.u32 %v4790_v27, %v4794_v2  ;;  %v4800_v25 = vadd.s32 %v4794_v2, %v4790_v27  ;;  %vm4820_vm13 = vc.u32 %v4812_v58, %v4816_v46  ;;  %v4822_v26 = vadd.s32 %v4816_v46, %v4812_v58  ;;  %6005 = vmatpush.msra.mxu0 %v6626_v20 }
 0x2fc   : > { %v4700_v34 = vand.u32 2147483647, %v4699_v18  ;;  %v4799_v28 = vsel %vm4798_vm2, 1, %v11363_v44  ;;  %v4821_v17 = vsel %vm4820_vm13, 1, %v11363_v44  ;;  %v4817_v38 = vshrl.u32 %v4813_v59, 16 }
 0x2fd   : > { %v4801_v12 = vadd.s32 %v4799_v28, %v4793_v35  ;;  %vm4802_vm15 = vc.u32 %v4800_v25, %v4796_v50  ;;  %v4823_v33 = vadd.s32 %v4821_v17, %v4815_v13  ;;  %vm4824_vm1 = vc.u32 %v4822_v26, %v4818_v55 }
 0x2fe   : > { %v4703_v51 = vmul.f32 %v4702_v23, %v4700_v34  ;;  %v4803_v15 = vsel %vm4802_vm15, 1, %v11363_v44  ;;  %v4825_v31 = vsel %vm4824_vm1, 1, %v11363_v44  ;;  %v4902_v7 = vadd.s32 1, %v6470_v39 }
 0x2ff   : > { %v4805_v63 = vadd.s32 %v4803_v15, %v4801_v12  ;;  %v4827_v30 = vadd.s32 %v4825_v31, %v4823_v33  ;;  %v4797_v60 = vshrl.u32 %v4792_v1, 16  ;;  %v4892_v29 = vand.u32 2147483647, %v8961_v6 }
 0x300   : > { %v4704_v0 = vxor.u32 2147483648, %v4703_v51  ;;  %v9062_v19 = vadd.f32 %v11418_v11, %v11417_v54  ;;  %v4819_v27 = vshrl.u32 %v4814_v32, 16  ;;  %vm4903_vm3 = vcmp.gt.s32.totalorder %v4902_v7, 0 }
 0x301   : > { %v4806_v45 = vadd.s32 %v4805_v63, %v4795_v22  ;;  %v4828_v62 = vadd.s32 %v4827_v30, %v4817_v38  ;;  %v4726_v35 = vadd.s32 3, %v4709_v41  ;;  %v4776_v59 = vsel %vm4770_vm10, %v4773_v5, %v4775_v16  ;;  %v9080_v41 = vld [vmem:[%s7118_s15 + $0x2] ss:$4 sm:$0xff]  ;;  %s6728_s15 = scalar_lea.hbm %s11270_s7, 512 }
 0x302   : > { %v4705_v58 = vsel %vm4584_vm7, %v4704_v0, %v4703_v51  ;;  %v4904_v2 = vsel %vm4903_vm3, %v4902_v7, 0  ;;  %v9073_v46 = vadd.s32 %v4822_v26, %v4818_v55  ;;  %v4899_v18 = vand.u32 8388607, %v4892_v29  ;;  %p6730_p2 = scmp.lt.s32.totalorder %s6728_s15, %s6724_s22 }
 0x303   : > { %v4708_v1 = vsel %vm8996_vm8, %v8737_v49, %v4705_v58  ;;  %v9071_v13 = vadd.s32 %v4806_v45, %v4797_v60  ;;  %v4829_v32 = vadd.s32 %v4828_v62, %v4819_v27  ;;  %v4906_v23 = vand.u32 31, %v4904_v2 }
 0x304   : > { %v4710_v61 = vmul.f32 %v4708_v1, %v4708_v1  ;;  %v9083_v5 = vperm.slane %v9080_v41, 4  ;;  %v4830_v50 = vmul.u32 %v8963_v4, %v4776_v59  ;;  %v9088_v25 = vand.u32 3, %v4726_v35  ;;  %p6731_p10 = por %p6730_p2, %p6729_p9 }
 0x305   : > { %vm4832_vm4 = vc.u32 %v9071_v13, %v9073_v46  ;;  %v4833_v48 = vadd.s32 1, %v4829_v32  ;;  %v9086_v55 = vsub.s32 32, %v4906_v23  ;;  %v4900_v39 = vor.u32 8388608, %v4899_v18 }
 0x306   : > { %v4711_v47 = vmul.f32 -0.001358992, %v4710_v61  ;;  %v4718_v16 = vmul.f32 -0.00019511016, %v4710_v61  ;;  %v591_v20 = vmul.f32 %v9083_v5, %v7320_v9  ;;  %v9092_v12 = vshrl.u32 %v4904_v2, 5  ;;  %p6732_p12 = pnand %p6731_p10, %p6727_p11 }
 0x307   : > { %v4834_v26 = vsel %vm4832_vm4, %v4833_v48, %v4829_v32  ;;  %v4913_v33 = vshrl.u32 %v11361_v52, %v9086_v55  ;;  %v4916_v4 = vshrl.u32 %v11362_v21, %v9086_v55  ;;  %v4919_v51 = vshrl.u32 %v11364_v43, %v9086_v55 }
 0x308   : > { %v4712_v34 = vadd.f32 0.041655596, %v4711_v47  ;;  %v4719_v28 = vadd.f32 0.008332121, %v4718_v16  ;;  %v4835_v17 = vadd.s32 %v4834_v26, %v4830_v50  ;;  %v4909_v63 = vshll.u32 %v11359_v3, %v4906_v23 }
 0x309   : > { %v4910_v38 = vshrl.u32 %v11360_v56, %v9086_v55  ;;  %v4912_v30 = vshll.u32 %v11360_v56, %v4906_v23  ;;  %v4915_v7 = vshll.u32 %v11361_v52, %v4906_v23  ;;  %v4918_v0 = vshll.u32 %v11362_v21, %v4906_v23 }
 0x30a   : > { %v4713_v22 = vmul.f32 %v4712_v34, %v4710_v61  ;;  %v4720_v15 = vmul.f32 %v4719_v28, %v4710_v61  ;;  %v4836_v31 = vadd.s32 536870912, %v4835_v17  ;;  %v4922_v45 = vshrl.u32 %v11365_v10, %v9086_v55 }
 0x30b   : > { %v9110_v27 = vor.u32 %v4913_v33, %v4912_v30  ;;  %v9112_v62 = vor.u32 %v4916_v4, %v4915_v7  ;;  %v4920_v58 = vor.u32 %v4919_v51, %v4918_v0  ;;  %v4921_v35 = vshll.u32 %v11364_v43, %v4906_v23 }
 0x30c   : > { %v4714_v60 = vadd.f32 -0.4999988, %v4713_v22  ;;  %v4721_v54 = vadd.f32 -0.16666654, %v4720_v15  ;;  %v9106_v11 = vshrl.u32 %v4836_v31, 30  ;;  %vm4728_vm7 = vcmp.lt.s32.totalorder %v9088_v25, 2 }
 0x30d   : > { %vm4725_vm5 = vweird.f32 %v8737_v49  ;;  %vm4729_vm6 = vcmp.eq.s32.totalorder %v9088_v25, 0  ;;  %v9119_v18 = vor.u32 %v4910_v38, %v4909_v63  ;;  %v4923_v48 = vor.u32 %v4922_v45, %v4921_v35 }
 0x30e   : > { %v4715_v59 = vmul.f32 %v4714_v60, %v4710_v61  ;;  %v4722_v2 = vmul.f32 %v4721_v54, %v4710_v61  ;;  %v4838_v32 = vshll.u32 %v9106_v11, 30  ;;  %vm4924_vm8 = vcmp.lt.s32.totalorder %v9092_v12, 1 }
 0x30f   : > { %vm4927_vm9 = vcmp.lt.s32.totalorder %v9092_v12, 4  ;;  %vm4732_vm10 = vcmp.eq.s32.totalorder %v9088_v25, 2  ;;  %v4936_v23 = vsel %vm4924_vm8, %v9110_v27, %v9112_v62  ;;  %v9130_v26 = vshll.u32 %v4900_v39, 8 }
 0x310   : > { %v4716_v47 = vadd.f32 1.0, %v4715_v59  ;;  %v4723_v16 = vadd.f32 1.0, %v4722_v2  ;;  %v4839_v50 = vsub.s32 %v4835_v17, %v4838_v32  ;;  %v4933_v61 = vsel %vm4927_vm9, %v4920_v58, 920167782 }
 0x311   : > { %vm4925_vm12 = vcmp.lt.s32.totalorder %v9092_v12, 2  ;;  %vm4926_vm14 = vcmp.lt.s32.totalorder %v9092_v12, 3  ;;  %v4932_v17 = vsel %vm4924_vm8, %v9119_v18, %v9110_v27  ;;  %v4937_v4 = vsel %vm4927_vm9, %v4923_v48, 1326507024 }
 0x312   : > { %v4724_v34 = vmul.f32 %v4723_v16, %v4708_v1  ;;  %v4733_v28 = vxor.u32 2147483648, %v4716_v47  ;;  %vm4840_vm11 = vcmp.lt.s32.totalorder %v4839_v50, 0  ;;  %v4841_v33 = vsub.s32 0, %v4839_v50 }
 0x313   : > { %v4934_v1 = vsel %vm4926_vm14, %v9112_v62, %v4933_v61  ;;  %v4938_v39 = vsel %vm4926_vm14, %v4920_v58, %v4937_v4  ;;  %v623_v38 = vadd.f32 %v591_v20, %v9062_v19  ;;  %v4941_v7 = vand.u32 65535, %v9130_v26  ;;  %v5771_v20 = vpop.f32.mrf.mxu1 }
 0x314   : > { %v4730_v51 = vxor.u32 2147483648, %v4724_v34  ;;  %v4842_v22 = vsel %vm4840_vm11, %v4841_v33, %v4839_v50  ;;  %v4734_v15 = vsel %vm4732_vm10, %v4733_v28, %v4724_v34  ;;  %v4939_v63 = vsel %vm4925_vm12, %v4936_v23, %v4938_v39 }
 0x315   : > { %v4843_v31 = vclz %v4842_v22  ;;  %v4943_v0 = vand.u32 65535, %v4939_v63  ;;  %v4944_v60 = vshrl.u32 %v4939_v63, 16  ;;  %v4935_v58 = vsel %vm4925_vm12, %v4932_v17, %v4934_v1 }
 0x316   : > { %v4731_v30 = vsel %vm4729_vm6, %v4716_v47, %v4730_v51  ;;  %v4942_v35 = vshrl.u32 %v9130_v26, 16  ;;  %v9163_v48 = vadd.f32 %v7358_v8, %v623_v38  ;;  %v4965_v61 = vand.u32 65535, %v4935_v58 }
 0x317   : > { %v4735_v54 = vsel %vm4728_vm7, %v4731_v30, %v4734_v15  ;;  %v6468_v45 = vadd.s32 4294967294, %v4843_v31  ;;  %v4946_v59 = vmul.u32 %v4944_v60, %v4941_v7  ;;  %v4945_v47 = vmul.u32 %v4943_v0, %v4941_v7  ;;  %v6628_v15 = vld [vmem:[%s7681_s17 + $0x88] sm:$0xff] }
 0x318   : > { %v4736_v19 = vsel %vm4725_vm5, nan, %v4735_v54  ;;  %v9160_v32 = vmul.u32 %v4943_v0, %v4942_v35  ;;  %v4831_v23 = vadd.s32 %v9073_v46, %v9071_v13  ;;  %v4948_v28 = vmul.u32 %v4944_v60, %v4942_v35  ;;  %v6629_v60 = vld [vmem:[%s7681_s17 + $0x48] sm:$0xff] }
 0x319   : > { %v5973_v2 = vmul.f32 %v5771_v20, %v4736_v19  ;;  %vm6469_vm2 = vcmp.lt.s32.totalorder %v6468_v45, 0  ;;  %v4949_v16 = vshll.u32 %v4946_v59, 16  ;;  %v4966_v4 = vshrl.u32 %v4935_v58, 16 }
 0x31a   : > { %v4846_v25 = vsel %vm6469_vm2, 0, %v6468_v45  ;;  %v4951_v33 = vshll.u32 %v9160_v32, 16  ;;  %v4969_v46 = vmul.u32 %v4965_v61, %v4942_v35  ;;  %v4908_v30 = vshrl.u32 %v11359_v3, %v9086_v55 }
 0x31b   : > { %6175 = vst [vmem:[%s7681_s17 + $0xc8] sm:$0xff] %v5973_v2  ;;  %v4847_v49 = vsub.s32 32, %v4846_v25  ;;  %v4851_v34 = vsub.s32 4294967266, %v4846_v25  ;;  %6022 = vmatpush.msra.mxu1 %v5973_v2  ;;  %vm4953_vm13 = vc.u32 %v4945_v47, %v4949_v16  ;;  %v4955_v17 = vadd.s32 %v4949_v16, %v4945_v47  ;;  %v6630_v47 = vld [vmem:[%s7681_s17 + $0x8] sm:$0xff] }
 0x31c   : > { %v4848_v51 = vshll.u32 %v4839_v50, %v4846_v25  ;;  %v4954_v39 = vsel %vm4953_vm13, 1, %v11363_v44  ;;  %v4968_v13 = vmul.u32 %v4966_v4, %v4941_v7  ;;  %v4861_v50 = vsub.s32 4, %v9106_v11 }
 0x31d   : > { %v4849_v22 = vshrl.u32 %v4831_v23, %v4847_v49  ;;  %v4852_v1 = vadd.s32 127, %v4851_v34  ;;  %6023 = vmatpush.msra.mxu1 %v6628_v15  ;;  %v4956_v31 = vadd.s32 %v4954_v39, %v4948_v28  ;;  %vm4957_vm15 = vc.u32 %v4955_v17, %v4951_v33 }
 0x31e   : > { %v4958_v0 = vsel %vm4957_vm15, 1, %v11363_v44  ;;  %v4967_v45 = vmul.u32 %v4965_v61, %v4941_v7  ;;  %v4971_v58 = vshll.u32 %v4968_v13, 16  ;;  %v4929_v20 = vsel %vm4927_vm9, %v9112_v62, 2102212464 }
 0x31f   : > { %v4850_v63 = vor.u32 %v4849_v22, %v4848_v51  ;;  %v4853_v38 = vshll.u32 %v4852_v1, 23  ;;  %6024 = vmatpush.msra.mxu1 %v6629_v60  ;;  %v4960_v54 = vadd.s32 %v4958_v0, %v4956_v31  ;;  %v4950_v2 = vshrl.u32 %v4946_v59, 16  ;;  %v11419_v31 = vld [vmem:[#allocation61_spill] sm:$0xff] }
 0x320   : > { %v4970_v25 = vmul.u32 %v4966_v4, %v4942_v35  ;;  %v4973_v55 = vshll.u32 %v4969_v46, 16  ;;  %vm4975_vm1 = vc.u32 %v4967_v45, %v4971_v58  ;;  %v4977_v23 = vadd.s32 %v4971_v58, %v4967_v45 }
 0x321   : > { %v4854_v19 = vor.u32 4788187, %v4853_v38  ;;  %6025 = vmatpush.msra.mxu1 %v6630_v47  ;;  %v4857_v16 = vcvt.s32.f32 %v4850_v63  ;;  %v4961_v34 = vadd.s32 %v4960_v54, %v4950_v2  ;;  %v4976_v28 = vsel %vm4975_vm1, 1, %v11363_v44  ;;  %v11420_v63 = vld [vmem:[#allocation67_spill] sm:$0xff] }
 0x322   : > { %v1330_v7 = vand.u32 2139095040, %v9163_v48  ;;  %vm4739_vm3 = vcmp.lt.s32.totalorder %v8911_v53, 0  ;;  %v4928_v62 = vsel %vm4924_vm8, %v4908_v30, %v9119_v18  ;;  %v4978_v59 = vadd.s32 %v4976_v28, %v4970_v25 }
 0x323   : > { %v4855_v49 = vand.u32 2147483647, %v4854_v19  ;;  %vm4979_vm4 = vc.u32 %v4977_v23, %v4973_v55  ;;  %v4952_v61 = vshrl.u32 %v9160_v32, 16  ;;  %v4862_v4 = vsel %vm4739_vm3, %v4861_v50, %v9106_v11 }
 0x324   : > { %v4980_v33 = vsel %vm4979_vm4, 1, %v11363_v44  ;;  %v1331_v17 = vshrl.u32 %v1330_v7, 23  ;;  %v4930_v51 = vsel %vm4926_vm14, %v9110_v27, %v4929_v20  ;;  %v4972_v22 = vshrl.u32 %v4968_v13, 16 }
 0x325   : > { %v4858_v35 = vmul.f32 %v4857_v16, %v4855_v49  ;;  %v4982_v1 = vadd.s32 %v4980_v33, %v4978_v59  ;;  %v9194_v18 = vadd.s32 %v4961_v34, %v4952_v61  ;;  %v9198_v32 = vadd.f32 %v11420_v63, %v11419_v31 }
 0x326   : > { %v6401_v15 = vadd.s32 4294967169, %v1331_v17  ;;  %vm4738_vm7 = vcmp.le.f32.partialorder %v4737_v14, 0.7853982  ;;  %v4974_v38 = vshrl.u32 %v4969_v46, 16  ;;  %v1327_v11 = vand.u32 2147483647, %v9163_v48 }
 0x327   : > { %v4859_v39 = vxor.u32 2147483648, %v4858_v35  ;;  %v4983_v30 = vadd.s32 %v4982_v1, %v4972_v22  ;;  %v4864_v13 = vsel %vm4738_vm7, 0, %v4862_v4  ;;  %v9205_v0 = vadd.s32 %v4977_v23, %v4973_v55 }
 0x328   : > { %v1337_v60 = vadd.s32 1, %v6401_v15  ;;  %v4931_v54 = vsel %vm4925_vm12, %v4928_v62, %v4930_v51  ;;  %v4881_v14 = vadd.s32 3, %v4864_v13  ;;  %v1334_v19 = vand.u32 8388607, %v1327_v11 }
 0x329   : > { %v4860_v27 = vsel %vm4739_vm3, %v4859_v39, %v4858_v35  ;;  %v4984_v45 = vadd.s32 %v4983_v30, %v4974_v38  ;;  %vm4987_vm5 = vc.u32 %v9194_v18, %v9205_v0  ;;  %v4985_v47 = vmul.u32 %v9130_v26, %v4931_v54 }
 0x32a   : > { %v4863_v50 = vsel %vm4738_vm7, %v8911_v53, %v4860_v27  ;;  %vm1338_vm6 = vcmp.gt.s32.totalorder %v1337_v60, 0  ;;  %v4882_v28 = vand.u32 3, %v4881_v14  ;;  %v9218_v7 = vperm.slane %v9080_v41, 5 }
 0x32b   : > { %v4865_v58 = vmul.f32 %v4863_v50, %v4863_v50  ;;  %v4988_v46 = vadd.s32 1, %v4984_v45  ;;  %v1339_v20 = vsel %vm1338_vm6, %v1337_v60, 0  ;;  %v1335_v61 = vor.u32 8388608, %v1334_v19 }
 0x32c   : > { %v1341_v16 = vand.u32 31, %v1339_v20  ;;  %v9220_v33 = vshrl.u32 %v1339_v20, 5  ;;  %vm4884_vm8 = vcmp.eq.s32.totalorder %v4882_v28, 0  ;;  %vm4883_vm9 = vcmp.lt.s32.totalorder %v4882_v28, 2 }
 0x32d   : > { %v4866_v2 = vmul.f32 -0.001358992, %v4865_v58  ;;  %v4873_v25 = vmul.f32 -0.00019511016, %v4865_v58  ;;  %v4989_v55 = vsel %vm4987_vm5, %v4988_v46, %v4984_v45  ;;  %vm4880_vm10 = vweird.f32 %v8911_v53 }
 0x32e   : > { %v4990_v49 = vadd.s32 %v4989_v55, %v4985_v47  ;;  %v9215_v34 = vsub.s32 32, %v1341_v16  ;;  %v1344_v39 = vshll.u32 %v11359_v3, %v1341_v16  ;;  %v1347_v15 = vshll.u32 %v11360_v56, %v1341_v16 }
 0x32f   : > { %v4867_v12 = vadd.f32 0.041655596, %v4866_v2  ;;  %v4874_v23 = vadd.f32 0.008332121, %v4873_v25  ;;  %v1350_v31 = vshll.u32 %v11361_v52, %v1341_v16  ;;  %v1353_v38 = vshll.u32 %v11362_v21, %v1341_v16 }
 0x330   : > { %v4991_v35 = vadd.s32 536870912, %v4990_v49  ;;  %v1345_v26 = vshrl.u32 %v11360_v56, %v9215_v34  ;;  %v1348_v17 = vshrl.u32 %v11361_v52, %v9215_v34  ;;  %v1354_v4 = vshrl.u32 %v11364_v43, %v9215_v34 }
 0x331   : > { %v4868_v62 = vmul.f32 %v4867_v12, %v4865_v58  ;;  %v4875_v59 = vmul.f32 %v4874_v23, %v4865_v58  ;;  %v1351_v63 = vshrl.u32 %v11362_v21, %v9215_v34  ;;  %v1356_v60 = vshll.u32 %v11364_v43, %v1341_v16 }
 0x332   : > { %v9228_v1 = vshrl.u32 %v4991_v35, 30  ;;  %v9239_v54 = vor.u32 %v1345_v26, %v1344_v39  ;;  %v9241_v45 = vor.u32 %v1348_v17, %v1347_v15  ;;  %v1355_v14 = vor.u32 %v1354_v4, %v1353_v38  ;;  %v5800_v38 = vpop.f32.mrf.mxu2 }
 0x333   : > { %v4869_v51 = vadd.f32 -0.4999988, %v4868_v62  ;;  %v4876_v22 = vadd.f32 -0.16666654, %v4875_v59  ;;  %v1357_v46 = vshrl.u32 %v11365_v10, %v9215_v34  ;;  %vm4887_vm11 = vcmp.eq.s32.totalorder %v4882_v28, 2 }
 0x334   : > { %v4993_v13 = vshll.u32 %v9228_v1, 30  ;;  %vm1359_vm12 = vcmp.lt.s32.totalorder %v9220_v33, 1  ;;  %vm1362_vm14 = vcmp.lt.s32.totalorder %v9220_v33, 4  ;;  %vm4894_vm13 = vcmp.lt.s32.totalorder %v8961_v6, 0 }
 0x335   : > { %v4870_v30 = vmul.f32 %v4869_v51, %v4865_v58  ;;  %v4877_v27 = vmul.f32 %v4876_v22, %v4865_v58  ;;  %v1352_v58 = vor.u32 %v1351_v63, %v1350_v31  ;;  %v1358_v25 = vor.u32 %v1357_v46, %v1356_v60 }
 0x336   : > { %v9245_v2 = vsub.s32 %v4990_v49, %v4993_v13  ;;  %v4986_v12 = vadd.s32 %v9205_v0, %v9194_v18  ;;  %v1367_v23 = vsel %vm1359_vm12, %v9239_v54, %v9241_v45  ;;  %v1368_v49 = vsel %vm1362_vm14, %v1355_v14, 920167782 }
 0x337   : > { %v4871_v19 = vadd.f32 1.0, %v4870_v30  ;;  %v4878_v20 = vadd.f32 1.0, %v4877_v27  ;;  %v9260_v62 = vshll.u32 %v1335_v61, 8  ;;  %vm1361_vm15 = vcmp.lt.s32.totalorder %v9220_v33, 3 }
 0x338   : > { %vm4995_vm2 = vcmp.lt.s32.totalorder %v9245_v2, 0  ;;  %v4996_v55 = vsub.s32 0, %v9245_v2  ;;  %v592_v35 = vmul.f32 %v9218_v7, %v7320_v9  ;;  %vm1360_vm1 = vcmp.lt.s32.totalorder %v9220_v33, 2 }
 0x339   : > { %v4879_v47 = vmul.f32 %v4878_v20, %v4863_v50  ;;  %v4888_v16 = vxor.u32 2147483648, %v4871_v19  ;;  %v1369_v26 = vsel %vm1361_vm15, %v1352_v58, %v1368_v49  ;;  %v1371_v4 = vsel %vm1359_vm12, %v9241_v45, %v1352_v58 }
 0x33a   : > { %v4997_v59 = vsel %vm4995_vm2, %v4996_v55, %v9245_v2  ;;  %v1370_v61 = vsel %vm1360_vm1, %v1367_v23, %v1369_v26  ;;  %v1372_v51 = vsel %vm1362_vm14, %v1358_v25, 1326507024  ;;  %v1376_v15 = vand.u32 65535, %v9260_v62  ;;  %v6631_v26 = vld [vmem:[%s7681_s17 + $0x90] sm:$0xff] }
 0x33b   : > { %v4885_v50 = vxor.u32 2147483648, %v4879_v47  ;;  %v4889_v18 = vsel %vm4887_vm11, %v4888_v16, %v4879_v47  ;;  %v4998_v0 = vclz %v4997_v59  ;;  %v624_v31 = vadd.f32 %v592_v35, %v9198_v32 }
 0x33c   : > { %v5016_v30 = vsub.s32 4, %v9228_v1  ;;  %v1373_v27 = vsel %vm1361_vm15, %v1355_v14, %v1372_v51  ;;  %v1400_v13 = vand.u32 65535, %v1370_v61  ;;  %v1401_v46 = vshrl.u32 %v1370_v61, 16 }
 0x33d   : > { %v4886_v17 = vsel %vm4884_vm8, %v4871_v19, %v4885_v50  ;;  %v6471_v39 = vadd.s32 4294967294, %v4998_v0  ;;  %v1374_v28 = vsel %vm1360_vm1, %v1371_v4, %v1373_v27  ;;  %v1377_v20 = vshrl.u32 %v9260_v62, 16 }
 0x33e   : > { %v4890_v22 = vsel %vm4883_vm9, %v4886_v17, %v4889_v18  ;;  %v1378_v32 = vand.u32 65535, %v1374_v28  ;;  %v1379_v53 = vshrl.u32 %v1374_v28, 16  ;;  %v1403_v16 = vmul.u32 %v1401_v46, %v1376_v15 }
 0x33f   : > { %v4891_v63 = vsel %vm4880_vm10, nan, %v4890_v22  ;;  %vm6472_vm3 = vcmp.lt.s32.totalorder %v6471_v39, 0  ;;  %v9291_v55 = vadd.f32 %v7358_v8, %v624_v31  ;;  %v9296_v14 = vsel %vm4894_vm13, %v5016_v30, %v9228_v1  ;;  %v6632_v31 = vld [vmem:[%s7681_s17 + $0x50] sm:$0xff] }
 0x340   : > { %v5974_v60 = vmul.f32 %v5800_v38, %v4891_v63  ;;  %v5001_v19 = vsel %vm6472_vm3, 0, %v6471_v39  ;;  %v1343_v23 = vshrl.u32 %v11359_v3, %v9215_v34  ;;  %v1381_v49 = vmul.u32 %v1379_v53, %v1376_v15 }
 0x341   : > { %v5002_v25 = vsub.s32 32, %v5001_v19  ;;  %v5006_v47 = vsub.s32 4294967266, %v5001_v19  ;;  %v1382_v50 = vmul.u32 %v1378_v32, %v1377_v20  ;;  %v5003_v59 = vshll.u32 %v9245_v2, %v5001_v19 }
 0x342   : > { %6176 = vst [vmem:[%s7681_s17 + $0xd0] sm:$0xff] %v5974_v60  ;;  %6042 = vmatpush.msra.mxu2 %v5974_v60  ;;  %v1404_v0 = vmul.u32 %v1400_v13, %v1377_v20  ;;  %v1364_v17 = vsel %vm1362_vm14, %v1352_v58, 2102212464  ;;  %v1380_v61 = vmul.u32 %v1378_v32, %v1376_v15  ;;  %v1384_v4 = vshll.u32 %v1381_v49, 16  ;;  %v6633_v58 = vld [vmem:[%s7681_s17 + $0x10] sm:$0xff] }
 0x343   : > { %v5004_v35 = vshrl.u32 %v4986_v12, %v5002_v25  ;;  %v5007_v18 = vadd.s32 127, %v5006_v47  ;;  %v1402_v1 = vmul.u32 %v1400_v13, %v1376_v15  ;;  %v1383_v34 = vmul.u32 %v1379_v53, %v1377_v20 }
 0x344   : > { %6043 = vmatpush.msra.mxu2 %v6631_v26  ;;  %v1406_v39 = vshll.u32 %v1403_v16, 16  ;;  %v1386_v63 = vshll.u32 %v1382_v50, 16  ;;  %vm1388_vm4 = vc.u32 %v1380_v61, %v1384_v4  ;;  %v1390_v2 = vadd.s32 %v1384_v4, %v1380_v61 }
 0x345   : > { %v5005_v51 = vor.u32 %v5004_v35, %v5003_v59  ;;  %v5008_v22 = vshll.u32 %v5007_v18, 23  ;;  %v1405_v12 = vmul.u32 %v1401_v46, %v1377_v20  ;;  %v1389_v30 = vsel %vm1388_vm4, 1, %v11363_v44 }
 0x346   : > { %6044 = vmatpush.msra.mxu2 %v6632_v31  ;;  %v1408_v27 = vshll.u32 %v1404_v0, 16  ;;  %vm1410_vm7 = vc.u32 %v1402_v1, %v1406_v39  ;;  %v1391_v60 = vadd.s32 %v1389_v30, %v1383_v34  ;;  %vm1392_vm5 = vc.u32 %v1390_v2, %v1386_v63 }
 0x347   : > { %v5009_v38 = vor.u32 4788187, %v5008_v22  ;;  %v1411_v15 = vsel %vm1410_vm7, 1, %v11363_v44  ;;  %v1412_v13 = vadd.s32 %v1406_v39, %v1402_v1  ;;  %v5012_v19 = vcvt.s32.f32 %v5005_v51 }
 0x348   : > { %6045 = vmatpush.msra.mxu2 %v6633_v58  ;;  %v1393_v32 = vsel %vm1392_vm5, 1, %v11363_v44  ;;  %v1413_v53 = vadd.s32 %v1411_v15, %v1405_v12  ;;  %v1363_v46 = vsel %vm1359_vm12, %v1343_v23, %v9239_v54  ;;  %v1385_v20 = vshrl.u32 %v1381_v49, 16  ;;  %v11421_v23 = vld [vmem:[#allocation62_spill] sm:$0xff]  ;;  %v11422_v49 = vld [vmem:[#allocation68_spill] sm:$0xff] }
 0x349   : > { %v5010_v28 = vand.u32 2147483647, %v5009_v38  ;;  %v1395_v25 = vadd.s32 %v1393_v32, %v1391_v60  ;;  %vm1414_vm6 = vc.u32 %v1412_v13, %v1408_v27  ;;  %v1365_v59 = vsel %vm1361_vm15, %v9241_v45, %v1364_v17 }
 0x34a   : > { %v1415_v35 = vsel %vm1414_vm6, 1, %v11363_v44  ;;  %v1485_v18 = vand.u32 2139095040, %v9291_v55  ;;  %v1387_v26 = vshrl.u32 %v1382_v50, 16  ;;  %v1407_v4 = vshrl.u32 %v1403_v16, 16 }
 0x34b   : > { %v5013_v47 = vmul.f32 %v5012_v19, %v5010_v28  ;;  %v1396_v61 = vadd.s32 %v1395_v25, %v1385_v20  ;;  %v1417_v1 = vadd.s32 %v1415_v35, %v1413_v53  ;;  %v1482_v22 = vand.u32 2147483647, %v9291_v55 }
 0x34c   : > { %v1486_v54 = vshrl.u32 %v1485_v18, 23  ;;  %v526_v34 = vadd.f32 %v11422_v49, %v11421_v23  ;;  %vm4893_vm8 = vcmp.le.f32.partialorder %v4892_v29, 0.7853982  ;;  %v1409_v45 = vshrl.u32 %v1404_v0, 16 }
 0x34d   : > { %v5014_v51 = vxor.u32 2147483648, %v5013_v47  ;;  %v9322_v39 = vadd.s32 %v1396_v61, %v1387_v26  ;;  %v1418_v17 = vadd.s32 %v1417_v1, %v1407_v4  ;;  %v5019_v16 = vsel %vm4893_vm8, 0, %v9296_v14 }
 0x34e   : > { %v1416_v31 = vadd.s32 %v1412_v13, %v1408_v27  ;;  %v6404_v63 = vadd.s32 4294967169, %v1486_v54  ;;  %v1366_v12 = vsel %vm1360_vm1, %v1363_v46, %v1365_v59  ;;  %v1489_v29 = vand.u32 8388607, %v1482_v22 }
 0x34f   : > { %v5015_v50 = vsel %vm4894_vm13, %v5014_v51, %v5013_v47  ;;  %v1419_v38 = vadd.s32 %v1418_v17, %v1409_v45  ;;  %v5036_v58 = vadd.s32 3, %v5019_v16  ;;  %v1420_v14 = vmul.u32 %v9260_v62, %v1366_v12 }
 0x350   : > { %v5018_v2 = vsel %vm4893_vm8, %v8961_v6, %v5015_v50  ;;  %vm1422_vm9 = vc.u32 %v9322_v39, %v1416_v31  ;;  %v1492_v0 = vadd.s32 1, %v6404_v63  ;;  %v1490_v53 = vor.u32 8388608, %v1489_v29 }
 0x351   : > { %v5020_v30 = vmul.f32 %v5018_v2, %v5018_v2  ;;  %v1423_v60 = vadd.s32 1, %v1419_v38  ;;  %v5037_v46 = vand.u32 3, %v5036_v58  ;;  %v9335_v25 = vperm.slane %v9080_v41, 6 }
 0x352   : > { %vm1493_vm10 = vcmp.gt.s32.totalorder %v1492_v0, 0  ;;  %v9343_v1 = vshll.u32 %v1490_v53, 8  ;;  %vm5035_vm14 = vweird.f32 %v8961_v6  ;;  %vm1329_vm3 = vcmp.lt.s32.totalorder %v9163_v48, 0 }
 0x353   : > { %v5021_v15 = vmul.f32 -0.001358992, %v5020_v30  ;;  %v5028_v28 = vmul.f32 -0.00019511016, %v5020_v30  ;;  %v1424_v27 = vsel %vm1422_vm9, %v1423_v60, %v1419_v38  ;;  %v1494_v13 = vsel %vm1493_vm10, %v1492_v0, 0 }
 0x354   : > { %v1425_v32 = vadd.s32 %v1424_v27, %v1420_v14  ;;  %v1496_v20 = vand.u32 31, %v1494_v13  ;;  %v593_v62 = vmul.f32 %v9335_v25, %v7320_v9  ;;  %vm5039_vm11 = vcmp.eq.s32.totalorder %v5037_v46, 0 }
 0x355   : > { %v5022_v19 = vadd.f32 0.041655596, %v5021_v15  ;;  %v5029_v33 = vadd.f32 0.008332121, %v5028_v28  ;;  %v9345_v51 = vshrl.u32 %v1494_v13, 5  ;;  %vm5038_vm12 = vcmp.lt.s32.totalorder %v5037_v46, 2 }
 0x356   : > { %v1426_v35 = vadd.s32 536870912, %v1425_v32  ;;  %v9337_v18 = vsub.s32 32, %v1496_v20  ;;  %v625_v49 = vadd.f32 %v593_v62, %v526_v34  ;;  %v1499_v16 = vshll.u32 %v11359_v3, %v1496_v20 }
 0x357   : > { %v5023_v47 = vmul.f32 %v5022_v19, %v5020_v30  ;;  %v5030_v59 = vmul.f32 %v5029_v33, %v5020_v30  ;;  %v1502_v63 = vshll.u32 %v11360_v56, %v1496_v20  ;;  %v1505_v12 = vshll.u32 %v11361_v52, %v1496_v20 }
 0x358   : > { %v9341_v4 = vshrl.u32 %v1426_v35, 30  ;;  %v1500_v54 = vshrl.u32 %v11360_v56, %v9337_v18  ;;  %v1503_v23 = vshrl.u32 %v11361_v52, %v9337_v18  ;;  %v1508_v38 = vshll.u32 %v11362_v21, %v1496_v20 }
 0x359   : > { %v5024_v26 = vadd.f32 -0.4999988, %v5023_v47  ;;  %v5031_v61 = vadd.f32 -0.16666654, %v5030_v59  ;;  %v1509_v29 = vshrl.u32 %v11364_v43, %v9337_v18  ;;  %v1512_v14 = vshrl.u32 %v11365_v10, %v9337_v18 }
 0x35a   : > { %v1428_v50 = vshll.u32 %v9341_v4, 30  ;;  %v9363_v60 = vor.u32 %v1500_v54, %v1499_v16  ;;  %v9365_v15 = vor.u32 %v1503_v23, %v1502_v63  ;;  %vm5042_vm13 = vcmp.eq.s32.totalorder %v5037_v46, 2 }
 0x35b   : > { %v5025_v45 = vmul.f32 %v5024_v26, %v5020_v30  ;;  %v5032_v17 = vmul.f32 %v5031_v61, %v5020_v30  ;;  %v1506_v30 = vshrl.u32 %v11362_v21, %v9337_v18  ;;  %v1510_v28 = vor.u32 %v1509_v29, %v1508_v38 }
 0x35c   : > { %v9359_v58 = vsub.s32 %v1425_v32, %v1428_v50  ;;  %v1421_v33 = vadd.s32 %v1416_v31, %v9322_v39  ;;  %v1511_v32 = vshll.u32 %v11364_v43, %v1496_v20  ;;  %v9374_v53 = vand.u32 65535, %v9343_v1 }
 0x35d   : > { %v5026_v0 = vadd.f32 1.0, %v5025_v45  ;;  %v5033_v34 = vadd.f32 1.0, %v5032_v17  ;;  %v9377_v35 = vor.u32 %v1506_v30, %v1505_v12  ;;  %vm1514_vm15 = vcmp.lt.s32.totalorder %v9345_v51, 1  ;;  %v5829_v17 = vpop.f32.mrf.mxu3 }
 0x35e   : > { %vm1430_vm2 = vcmp.lt.s32.totalorder %v9359_v58, 0  ;;  %v1431_v19 = vsub.s32 0, %v9359_v58  ;;  %v1513_v26 = vor.u32 %v1512_v14, %v1511_v32  ;;  %vm1517_vm1 = vcmp.lt.s32.totalorder %v9345_v51, 4 }
 0x35f   : > { %v5034_v27 = vmul.f32 %v5033_v34, %v5018_v2  ;;  %v5043_v13 = vxor.u32 2147483648, %v5026_v0  ;;  %v9380_v2 = vadd.f32 %v7358_v8, %v625_v49  ;;  %v1522_v20 = vsel %vm1514_vm15, %v9363_v60, %v9365_v15 }
 0x360   : > { %v1432_v59 = vsel %vm1430_vm2, %v1431_v19, %v9359_v58  ;;  %v1523_v61 = vsel %vm1517_vm1, %v1510_v28, 920167782  ;;  %vm1516_vm4 = vcmp.lt.s32.totalorder %v9345_v51, 3  ;;  %v1532_v49 = vshrl.u32 %v9343_v1, 16 }
 0x361   : > { %v5040_v47 = vxor.u32 2147483648, %v5034_v27  ;;  %v1433_v62 = vclz %v1432_v59  ;;  %v5044_v31 = vsel %vm5042_vm13, %v5043_v13, %v5034_v27  ;;  %vm1515_vm7 = vcmp.lt.s32.totalorder %v9345_v51, 2 }
 0x362   : > { %v1524_v50 = vsel %vm1516_vm4, %v9377_v35, %v1523_v61  ;;  %v1637_v16 = vand.u32 2147483647, %v9380_v2  ;;  %v1526_v6 = vsel %vm1514_vm15, %v9365_v15, %v9377_v35  ;;  %v1527_v38 = vsel %vm1517_vm1, %v1513_v26, 1326507024 }
 0x363   : > { %v5041_v39 = vsel %vm5039_vm11, %v5026_v0, %v5040_v47  ;;  %v6402_v23 = vadd.s32 4294967294, %v1433_v62  ;;  %v1525_v63 = vsel %vm1515_vm7, %v1522_v20, %v1524_v50  ;;  %v1451_v14 = vsub.s32 4, %v9341_v4 }
 0x364   : > { %v5045_v54 = vsel %vm5038_vm12, %v5041_v39, %v5044_v31  ;;  %v1555_v29 = vand.u32 65535, %v1525_v63  ;;  %v1556_v0 = vshrl.u32 %v1525_v63, 16  ;;  %v1528_v27 = vsel %vm1516_vm4, %v1510_v28, %v1527_v38  ;;  %v6634_v31 = vld [vmem:[%s7681_s17 + $0x98] sm:$0xff] }
 0x365   : > { %v5046_v45 = vsel %vm5035_vm14, nan, %v5045_v54  ;;  %vm6403_vm5 = vcmp.lt.s32.totalorder %v6402_v23, 0  ;;  %v1529_v19 = vsel %vm1515_vm7, %v1526_v6, %v1528_v27  ;;  %v1498_v28 = vshrl.u32 %v11359_v3, %v9337_v18 }
 0x366   : > { %v5975_v46 = vmul.f32 %v5829_v17, %v5046_v45  ;;  %v1436_v12 = vsel %vm6403_vm5, 0, %v6402_v23  ;;  %v1558_v32 = vmul.u32 %v1556_v0, %v9374_v53  ;;  %v9418_v47 = vmul.u32 %v1555_v29, %v1532_v49  ;;  %v6635_v17 = vld [vmem:[%s7681_s17 + $0x58] sm:$0xff] }
 0x367   : > { %v1437_v34 = vsub.s32 32, %v1436_v12  ;;  %v1441_v30 = vsub.s32 4294967266, %v1436_v12  ;;  %v1438_v13 = vshll.u32 %v9359_v58, %v1436_v12  ;;  %v1533_v26 = vand.u32 65535, %v1529_v19 }
 0x368   : > { %6177 = vst [vmem:[%s7681_s17 + $0xd8] sm:$0xff] %v5975_v46  ;;  %6062 = vmatpush.msra.mxu3 %v5975_v46  ;;  %v1534_v39 = vshrl.u32 %v1529_v19, 16  ;;  %v1557_v20 = vmul.u32 %v1555_v29, %v9374_v53  ;;  %v1561_v58 = vshll.u32 %v1558_v32, 16  ;;  %v1640_v61 = vand.u32 2139095040, %v9380_v2  ;;  %v6636_v29 = vld [vmem:[%s7681_s17 + $0x18] sm:$0xff] }
 0x369   : > { %v1439_v59 = vshrl.u32 %v1421_v33, %v1437_v34  ;;  %v1442_v62 = vadd.s32 127, %v1441_v30  ;;  %v1452_v33 = vsel %vm1329_vm3, %v1451_v14, %v9341_v4  ;;  %vm9432_vm6 = vcmp.le.f32.partialorder %v1327_v11, 0.7853982 }
 0x36a   : > { %6063 = vmatpush.msra.mxu3 %v6634_v31  ;;  %v1536_v45 = vmul.u32 %v1534_v39, %v9374_v53  ;;  %v1537_v50 = vmul.u32 %v1533_v26, %v1532_v49  ;;  %v1560_v46 = vmul.u32 %v1556_v0, %v1532_v49  ;;  %v1563_v63 = vshll.u32 %v9418_v47, 16 }
 0x36b   : > { %v1440_v54 = vor.u32 %v1439_v59, %v1438_v13  ;;  %v1443_v23 = vshll.u32 %v1442_v62, 23  ;;  %vm1565_vm8 = vc.u32 %v1557_v20, %v1561_v58  ;;  %v1535_v12 = vmul.u32 %v1533_v26, %v9374_v53 }
 0x36c   : > { %6064 = vmatpush.msra.mxu3 %v6635_v17  ;;  %v1538_v38 = vmul.u32 %v1534_v39, %v1532_v49  ;;  %v1539_v4 = vshll.u32 %v1536_v45, 16  ;;  %v1541_v30 = vshll.u32 %v1537_v50, 16  ;;  %v1566_v14 = vsel %vm1565_vm8, 1, %v11363_v44 }
 0x36d   : > { %v1444_v6 = vor.u32 4788187, %v1443_v23  ;;  %v1447_v34 = vcvt.s32.f32 %v1440_v54  ;;  %v1567_v11 = vadd.s32 %v1561_v58, %v1557_v20  ;;  %v1568_v19 = vadd.s32 %v1566_v14, %v1560_v46 }
 0x36e   : > { %6065 = vmatpush.msra.mxu3 %v6636_v29  ;;  %vm1543_vm9 = vc.u32 %v1535_v12, %v1539_v4  ;;  %v1545_v13 = vadd.s32 %v1539_v4, %v1535_v12  ;;  %v1518_v0 = vsel %vm1514_vm15, %v1498_v28, %v9363_v60  ;;  %v1519_v53 = vsel %vm1517_vm1, %v9377_v35, 2102212464  ;;  %v11426_v12 = vld [vmem:[#allocation69_spill] sm:$0xff] }
 0x36f   : > { %v1445_v27 = vand.u32 2147483647, %v1444_v6  ;;  %v1544_v49 = vsel %vm1543_vm9, 1, %v11363_v44  ;;  %vm1569_vm10 = vc.u32 %v1567_v11, %v1563_v63  ;;  %v1562_v31 = vshrl.u32 %v1558_v32, 16  ;;  %v11425_v6 = vld [vmem:[#allocation63_spill] sm:$0xff] }
 0x370   : > { %v1546_v62 = vadd.s32 %v1544_v49, %v1538_v38  ;;  %vm1547_vm11 = vc.u32 %v1545_v13, %v1541_v30  ;;  %v1570_v26 = vsel %vm1569_vm10, 1, %v11363_v44  ;;  %v1641_v58 = vshrl.u32 %v1640_v61, 23 }
 0x371   : > { %v1448_v59 = vmul.f32 %v1447_v34, %v1445_v27  ;;  %v1548_v39 = vsel %vm1547_vm11, 1, %v11363_v44  ;;  %v1572_v20 = vadd.s32 %v1570_v26, %v1568_v19  ;;  %v1520_v60 = vsel %vm1516_vm4, %v9365_v15, %v1519_v53 }
 0x372   : > { %v1540_v28 = vshrl.u32 %v1536_v45, 16  ;;  %v1550_v35 = vadd.s32 %v1548_v39, %v1546_v62  ;;  %v1564_v23 = vshrl.u32 %v9418_v47, 16  ;;  %v6407_v46 = vadd.s32 4294967169, %v1641_v58 }
 0x373   : > { %v1449_v54 = vxor.u32 2147483648, %v1448_v59  ;;  %v1573_v17 = vadd.s32 %v1572_v20, %v1562_v31  ;;  %v527_v38 = vadd.f32 %v11426_v12, %v11425_v6  ;;  %v1454_v32 = vsel %vm9432_vm6, 0, %v1452_v33 }
 0x374   : > { %v1542_v61 = vshrl.u32 %v1537_v50, 16  ;;  %v1551_v29 = vadd.s32 %v1550_v35, %v1540_v28  ;;  %v1521_v47 = vsel %vm1515_vm7, %v1518_v0, %v1520_v60  ;;  %v1647_v34 = vadd.s32 1, %v6407_v46 }
 0x375   : > { %v1450_v4 = vsel %vm1329_vm3, %v1449_v54, %v1448_v59  ;;  %v1574_v45 = vadd.s32 %v1573_v17, %v1564_v23  ;;  %v1571_v27 = vadd.s32 %v1567_v11, %v1563_v63  ;;  %v1471_v13 = vadd.s32 3, %v1454_v32 }
 0x376   : > { %v1453_v15 = vsel %vm9432_vm6, %v9163_v48, %v1450_v4  ;;  %v1552_v14 = vadd.s32 %v1551_v29, %v1542_v61  ;;  %v1644_v53 = vand.u32 8388607, %v1637_v16  ;;  %vm1648_vm12 = vcmp.gt.s32.totalorder %v1647_v34, 0 }
 0x377   : > { %v1455_v30 = vmul.f32 %v1453_v15, %v1453_v15  ;;  %v1578_v19 = vadd.s32 1, %v1574_v45  ;;  %v1575_v49 = vmul.u32 %v9343_v1, %v1521_v47  ;;  %v1649_v59 = vsel %vm1648_vm12, %v1647_v34, 0 }
 0x378   : > { %vm1577_vm14 = vc.u32 %v1552_v14, %v1571_v27  ;;  %v9468_v26 = vperm.slane %v9080_v41, 7  ;;  %v1472_v63 = vand.u32 3, %v1471_v13  ;;  %v1645_v11 = vor.u32 8388608, %v1644_v53 }
 0x379   : > { %v1456_v33 = vmul.f32 -0.001358992, %v1455_v30  ;;  %v1463_v50 = vmul.f32 -0.00019511016, %v1455_v30  ;;  %v1579_v18 = vsel %vm1577_vm14, %v1578_v19, %v1574_v45  ;;  %v1651_v39 = vand.u32 31, %v1649_v59 }
 0x37a   : > { %v1580_v62 = vadd.s32 %v1579_v18, %v1575_v49  ;;  %v594_v54 = vmul.f32 %v9468_v26, %v7320_v9  ;;  %vm1474_vm2 = vcmp.eq.s32.totalorder %v1472_v63, 0  ;;  %vm1477_vm13 = vcmp.eq.s32.totalorder %v1472_v63, 2 }
 0x37b   : > { %v1457_v51 = vadd.f32 0.041655596, %v1456_v33  ;;  %v1464_v0 = vadd.f32 0.008332121, %v1463_v50  ;;  %v9472_v60 = vsub.s32 32, %v1651_v39  ;;  %v9476_v41 = vshrl.u32 %v1649_v59, 5 }
 0x37c   : > { %v1581_v58 = vadd.s32 536870912, %v1580_v62  ;;  %v626_v23 = vadd.f32 %v594_v54, %v527_v38  ;;  %v9482_v6 = vshll.u32 %v1645_v11, 8  ;;  %vm1473_vm15 = vcmp.lt.s32.totalorder %v1472_v63, 2 }
 0x37d   : > { %v1458_v31 = vmul.f32 %v1457_v51, %v1455_v30  ;;  %v1465_v20 = vmul.f32 %v1464_v0, %v1455_v30  ;;  %v1655_v17 = vshrl.u32 %v11360_v56, %v9472_v60  ;;  %v1658_v46 = vshrl.u32 %v11361_v52, %v9472_v60 }
 0x37e   : > { %v9474_v35 = vshrl.u32 %v1581_v58, 30  ;;  %v1654_v32 = vshll.u32 %v11359_v3, %v1651_v39  ;;  %vm1470_vm1 = vweird.f32 %v9163_v48  ;;  %v1657_v38 = vshll.u32 %v11360_v56, %v1651_v39 }
 0x37f   : > { %v1459_v1 = vadd.f32 -0.4999988, %v1458_v31  ;;  %v1466_v28 = vadd.f32 -0.16666654, %v1465_v20  ;;  %v1660_v61 = vshll.u32 %v11361_v52, %v1651_v39  ;;  %v1663_v29 = vshll.u32 %v11362_v21, %v1651_v39 }
 0x380   : > { %v1583_v4 = vshll.u32 %v9474_v35, 30  ;;  %v1664_v47 = vshrl.u32 %v11364_v43, %v9472_v60  ;;  %v9496_v19 = vor.u32 %v1655_v17, %v1654_v32  ;;  %v9498_v53 = vor.u32 %v1658_v46, %v1657_v38 }
 0x381   : > { %v1460_v9 = vmul.f32 %v1459_v1, %v1455_v30  ;;  %v1467_v12 = vmul.f32 %v1466_v28, %v1455_v30  ;;  %v1661_v30 = vshrl.u32 %v11362_v21, %v9472_v60  ;;  %v1667_v50 = vshrl.u32 %v11365_v10, %v9472_v60 }
 0x382   : > { %v9492_v13 = vsub.s32 %v1580_v62, %v1583_v4  ;;  %v1665_v33 = vor.u32 %v1664_v47, %v1663_v29  ;;  %vm1484_vm3 = vcmp.lt.s32.totalorder %v9291_v55, 0  ;;  %v1576_v51 = vadd.s32 %v1571_v27, %v1552_v14 }
 0x383   : > { %v1461_v45 = vadd.f32 1.0, %v1460_v9  ;;  %v1468_v34 = vadd.f32 1.0, %v1467_v12  ;;  %v1666_v0 = vshll.u32 %v11364_v43, %v1651_v39  ;;  %v1686_v62 = vand.u32 65535, %v9482_v6  ;;  %v5849_v9 = vpop.f32.mrf.mxu0 }
 0x384   : > { %vm1585_vm4 = vcmp.lt.s32.totalorder %v9492_v13, 0  ;;  %v1586_v59 = vsub.s32 0, %v9492_v13  ;;  %v9508_v11 = vadd.f32 %v7358_v8, %v626_v23  ;;  %v9511_v58 = vor.u32 %v1661_v30, %v1660_v61 }
 0x385   : > { %v1469_v49 = vmul.f32 %v1468_v34, %v1453_v15  ;;  %v1478_v18 = vxor.u32 2147483648, %v1461_v45  ;;  %v1687_v15 = vshrl.u32 %v9482_v6, 16  ;;  %v1668_v1 = vor.u32 %v1667_v50, %v1666_v0 }
 0x386   : > { %v1587_v20 = vsel %vm1585_vm4, %v1586_v59, %v9492_v13  ;;  %vm1669_vm7 = vcmp.lt.s32.totalorder %v9476_v41, 1  ;;  %vm1672_vm5 = vcmp.lt.s32.totalorder %v9476_v41, 4  ;;  %vm9520_vm6 = vcmp.le.f32.partialorder %v1482_v22, 0.7853982 }
 0x387   : > { %v1475_v31 = vxor.u32 2147483648, %v1469_v49  ;;  %v1588_v54 = vclz %v1587_v20  ;;  %v1479_v27 = vsel %vm1477_vm13, %v1478_v18, %v1469_v49  ;;  %v1677_v39 = vsel %vm1669_vm7, %v9496_v19, %v9498_v53 }
 0x388   : > { %v1678_v28 = vsel %vm1672_vm5, %v1665_v33, 920167782  ;;  %v1606_v46 = vsub.s32 4, %v9474_v35  ;;  %vm1671_vm8 = vcmp.lt.s32.totalorder %v9476_v41, 3  ;;  %vm1670_vm9 = vcmp.lt.s32.totalorder %v9476_v41, 2 }
 0x389   : > { %v1476_v14 = vsel %vm1474_vm2, %v1461_v45, %v1475_v31  ;;  %v6405_v17 = vadd.s32 4294967294, %v1588_v54  ;;  %v1679_v12 = vsel %vm1671_vm8, %v9511_v58, %v1678_v28  ;;  %v1792_v4 = vand.u32 2147483647, %v9508_v11 }
 0x38a   : > { %v1480_v23 = vsel %vm1473_vm15, %v1476_v14, %v1479_v27  ;;  %v1680_v32 = vsel %vm1670_vm9, %v1677_v39, %v1679_v12  ;;  %v1681_v48 = vsel %vm1669_vm7, %v9498_v53, %v9511_v58  ;;  %v1682_v61 = vsel %vm1672_vm5, %v1668_v1, 1326507024 }
 0x38b   : > { %v1481_v22 = vsel %vm1470_vm1, nan, %v1480_v23  ;;  %vm6406_vm10 = vcmp.lt.s32.totalorder %v6405_v17, 0  ;;  %v1710_v29 = vand.u32 65535, %v1680_v32  ;;  %v1711_v47 = vshrl.u32 %v1680_v32, 16 }
 0x38c   : > { %v5952_v63 = vmul.f32 %v5849_v9, %v1481_v22  ;;  %v1591_v38 = vsel %vm6406_vm10, 0, %v6405_v17  ;;  %v9552_v30 = vsel %vm1484_vm3, %v1606_v46, %v9474_v35  ;;  %v1683_v50 = vsel %vm1671_vm8, %v1665_v33, %v1682_v61 }
 0x38d   : > { %v1592_v45 = vsub.s32 32, %v1591_v38  ;;  %v1596_v34 = vsub.s32 4294967266, %v1591_v38  ;;  %v1593_v49 = vshll.u32 %v9492_v13, %v1591_v38  ;;  %v1684_v18 = vsel %vm1670_vm9, %v1681_v48, %v1683_v50 }
 0x38e   : > { %6154 = vst [vmem:[%s7681_s17 + $0x20] sm:$0xff] %v5952_v63  ;;  %v1713_v59 = vmul.u32 %v1711_v47, %v1686_v62  ;;  %v1714_v0 = vmul.u32 %v1710_v29, %v1687_v15  ;;  %v1688_v54 = vand.u32 65535, %v1684_v18  ;;  %v1689_v1 = vshrl.u32 %v1684_v18, 16 }
 0x38f   : > { %v1594_v31 = vshrl.u32 %v1576_v51, %v1592_v45  ;;  %v1597_v20 = vadd.s32 127, %v1596_v34  ;;  %v1653_v14 = vshrl.u32 %v11359_v3, %v9472_v60  ;;  %v1712_v27 = vmul.u32 %v1710_v29, %v1686_v62 }
 0x390   : > { %v1716_v35 = vshll.u32 %v1713_v59, 16  ;;  %v1795_v39 = vand.u32 2139095040, %v9508_v11  ;;  %v1609_v13 = vsel %vm9520_vm6, 0, %v9552_v30  ;;  %v1691_v23 = vmul.u32 %v1689_v1, %v1686_v62 }
 0x391   : > { %v1595_v28 = vor.u32 %v1594_v31, %v1593_v49  ;;  %v1598_v33 = vshll.u32 %v1597_v20, 23  ;;  %v1692_v17 = vmul.u32 %v1688_v54, %v1687_v15  ;;  %v1715_v46 = vmul.u32 %v1711_v47, %v1687_v15 }
 0x392   : > { %v1718_v51 = vshll.u32 %v1714_v0, 16  ;;  %vm1720_vm11 = vc.u32 %v1712_v27, %v1716_v35  ;;  %v1690_v9 = vmul.u32 %v1688_v54, %v1686_v62  ;;  %v1693_v12 = vmul.u32 %v1689_v1, %v1687_v15 }
 0x393   : > { %v1599_v22 = vor.u32 4788187, %v1598_v33  ;;  %v1694_v63 = vshll.u32 %v1691_v23, 16  ;;  %v1602_v60 = vcvt.s32.f32 %v1595_v28  ;;  %v1696_v32 = vshll.u32 %v1692_v17, 16  ;;  %v11429_v28 = vld [vmem:[#allocation18_spill] sm:$0xff]  ;;  %v11430_v33 = vld [vmem:[#allocation56_spill] sm:$0xff] }
 0x394   : > { %v1721_v48 = vsel %vm1720_vm11, 1, %v11363_v44  ;;  %v1722_v38 = vadd.s32 %v1716_v35, %v1712_v27  ;;  %v1673_v34 = vsel %vm1669_vm7, %v1653_v14, %v9496_v19  ;;  %v1674_v47 = vsel %vm1672_vm5, %v9511_v58, 2102212464 }
 0x395   : > { %v1600_v61 = vand.u32 2147483647, %v1599_v22  ;;  %vm1698_vm12 = vc.u32 %v1690_v9, %v1694_v63  ;;  %v1700_v29 = vadd.s32 %v1694_v63, %v1690_v9  ;;  %v1723_v45 = vadd.s32 %v1721_v48, %v1715_v46 }
 0x396   : > { %v1699_v62 = vsel %vm1698_vm12, 1, %v11363_v44  ;;  %vm1724_vm14 = vc.u32 %v1722_v38, %v1718_v51  ;;  %v1717_v18 = vshrl.u32 %v1713_v59, 16  ;;  %v1796_v20 = vshrl.u32 %v1795_v39, 23  ;;  %v11432_v39 = vld [vmem:[#allocation57_spill] sm:$0xff] }
 0x397   : > { %v1603_v15 = vmul.f32 %v1602_v60, %v1600_v61  ;;  %v1701_v30 = vadd.s32 %v1699_v62, %v1693_v12  ;;  %vm1702_vm2 = vc.u32 %v1700_v29, %v1696_v32  ;;  %v1725_v50 = vsel %vm1724_vm14, 1, %v11363_v44  ;;  %v11431_v12 = vld [vmem:[#allocation19_spill] sm:$0xff] }
 0x398   : > { %v1703_v49 = vsel %vm1702_vm2, 1, %v11363_v44  ;;  %v1727_v31 = vadd.s32 %v1725_v50, %v1723_v45  ;;  %v1675_v19 = vsel %vm1671_vm8, %v9498_v53, %v1674_v47  ;;  %v1695_v1 = vshrl.u32 %v1691_v23, 16 }
 0x399   : > { %v1604_v54 = vxor.u32 2147483648, %v1603_v15  ;;  %v1705_v58 = vadd.s32 %v1703_v49, %v1701_v30  ;;  %v1719_v14 = vshrl.u32 %v1714_v0, 16  ;;  %v6410_v35 = vadd.s32 4294967169, %v1796_v20 }
 0x39a   : > { %v1728_v27 = vadd.s32 %v1727_v31, %v1717_v18  ;;  %v532_v46 = vadd.f32 %v11430_v33, %v11429_v28  ;;  %v1697_v9 = vshrl.u32 %v1692_v17, 16  ;;  %v9584_v63 = vadd.f32 %v11432_v39, %v11431_v12 }
 0x39b   : > { %v1605_v22 = vsel %vm1484_vm3, %v1604_v54, %v1603_v15  ;;  %v1706_v59 = vadd.s32 %v1705_v58, %v1695_v1  ;;  %v1676_v0 = vsel %vm1670_vm9, %v1673_v34, %v1675_v19  ;;  %v1802_v60 = vadd.s32 1, %v6410_v35 }
 0x39c   : > { %v1608_v53 = vsel %vm9520_vm6, %v9291_v55, %v1605_v22  ;;  %v1729_v23 = vadd.s32 %v1728_v27, %v1719_v14  ;;  %v1726_v61 = vadd.s32 %v1722_v38, %v1718_v51  ;;  %v1626_v29 = vadd.s32 3, %v1609_v13 }
 0x39d   : > { %v1610_v32 = vmul.f32 %v1608_v53, %v1608_v53  ;;  %v1707_v48 = vadd.s32 %v1706_v59, %v1697_v9  ;;  %v1799_v17 = vand.u32 8388607, %v1792_v4  ;;  %vm1803_vm13 = vcmp.gt.s32.totalorder %v1802_v60, 0 }
 0x39e   : > { %v1733_v45 = vadd.s32 1, %v1729_v23  ;;  %v1730_v15 = vmul.u32 %v9482_v6, %v1676_v0  ;;  %v1804_v30 = vsel %vm1803_vm13, %v1802_v60, 0  ;;  %v599_v49 = vmul.f32 %v9083_v5, %v7252_v42 }
 0x39f   : > { %v1611_v47 = vmul.f32 -0.001358992, %v1610_v32  ;;  %v1618_v62 = vmul.f32 -0.00019511016, %v1610_v32  ;;  %vm1732_vm15 = vc.u32 %v1707_v48, %v1726_v61  ;;  %v1627_v51 = vand.u32 3, %v1626_v29 }
 0x3a0   : > { %v1734_v8 = vsel %vm1732_vm15, %v1733_v45, %v1729_v23  ;;  %v1800_v13 = vor.u32 8388608, %v1799_v17  ;;  %v1806_v38 = vand.u32 31, %v1804_v30  ;;  %v631_v58 = vadd.f32 %v599_v49, %v532_v46 }
 0x3a1   : > { %v1612_v41 = vadd.f32 0.041655596, %v1611_v47  ;;  %v1619_v34 = vadd.f32 0.008332121, %v1618_v62  ;;  %v1735_v50 = vadd.s32 %v1734_v8, %v1730_v15  ;;  %vm1629_vm1 = vcmp.eq.s32.totalorder %v1627_v51, 0 }
 0x3a2   : > { %v9596_v54 = vsub.s32 32, %v1806_v38  ;;  %v9600_v14 = vshrl.u32 %v1804_v30, 5  ;;  %v9606_v28 = vshll.u32 %v1800_v13, 8  ;;  %vm1628_vm3 = vcmp.lt.s32.totalorder %v1627_v51, 2 }
 0x3a3   : > { %v1613_v18 = vmul.f32 %v1612_v41, %v1610_v32  ;;  %v1620_v31 = vmul.f32 %v1619_v34, %v1610_v32  ;;  %v1736_v20 = vadd.s32 536870912, %v1735_v50  ;;  %v1809_v59 = vshll.u32 %v11359_v3, %v1806_v38 }
 0x3a4   : > { %v1810_v27 = vshrl.u32 %v11360_v56, %v9596_v54  ;;  %v1813_v35 = vshrl.u32 %v11361_v52, %v9596_v54  ;;  %vm1625_vm4 = vweird.f32 %v9291_v55  ;;  %v1812_v46 = vshll.u32 %v11360_v56, %v1806_v38 }
 0x3a5   : > { %v1614_v19 = vadd.f32 -0.4999988, %v1613_v18  ;;  %v1621_v1 = vadd.f32 -0.16666654, %v1620_v31  ;;  %v9598_v6 = vshrl.u32 %v1736_v20, 30  ;;  %v1815_v12 = vshll.u32 %v11361_v52, %v1806_v38 }
 0x3a6   : > { %v1818_v39 = vshll.u32 %v11362_v21, %v1806_v38  ;;  %v1819_v0 = vshrl.u32 %v11364_v43, %v9596_v54  ;;  %v9618_v45 = vor.u32 %v1810_v27, %v1809_v59  ;;  %v9620_v17 = vor.u32 %v1813_v35, %v1812_v46 }
 0x3a7   : > { %v1615_v33 = vmul.f32 %v1614_v19, %v1610_v32  ;;  %v1622_v22 = vmul.f32 %v1621_v1, %v1610_v32  ;;  %v1738_v9 = vshll.u32 %v9598_v6, 30  ;;  %v1816_v32 = vshrl.u32 %v11362_v21, %v9596_v54 }
 0x3a8   : > { %v1820_v47 = vor.u32 %v1819_v0, %v1818_v39  ;;  %v1822_v62 = vshrl.u32 %v11365_v10, %v9596_v54  ;;  %vm1632_vm5 = vcmp.eq.s32.totalorder %v1627_v51, 2  ;;  %v1731_v41 = vadd.s32 %v1726_v61, %v1707_v48 }
 0x3a9   : > { %v1616_v23 = vadd.f32 1.0, %v1615_v33  ;;  %v1623_v60 = vadd.f32 1.0, %v1622_v22  ;;  %v1739_v29 = vsub.s32 %v1735_v50, %v1738_v9  ;;  %v1821_v34 = vshll.u32 %v11364_v43, %v1806_v38  ;;  %v5878_v33 = vpop.f32.mrf.mxu1 }
 0x3aa   : > { %v9626_v50 = vadd.f32 %v7722_v57, %v631_v58  ;;  %v9628_v18 = vor.u32 %v1816_v32, %v1815_v12  ;;  %v1841_v31 = vand.u32 65535, %v9606_v28  ;;  %vm1824_vm6 = vcmp.lt.s32.totalorder %v9600_v14, 1 }
 0x3ab   : > { %v1624_v15 = vmul.f32 %v1623_v60, %v1608_v53  ;;  %v1633_v8 = vxor.u32 2147483648, %v1616_v23  ;;  %vm1740_vm7 = vcmp.lt.s32.totalorder %v1739_v29, 0  ;;  %v1741_v30 = vsub.s32 0, %v1739_v29 }
 0x3ac   : > { %v1823_v19 = vor.u32 %v1822_v62, %v1821_v34  ;;  %vm1827_vm8 = vcmp.lt.s32.totalorder %v9600_v14, 4  ;;  %vm1639_vm9 = vcmp.lt.s32.totalorder %v9380_v2, 0  ;;  %v1832_v61 = vsel %vm1824_vm6, %v9618_v45, %v9620_v17 }
 0x3ad   : > { %v1630_v49 = vxor.u32 2147483648, %v1624_v15  ;;  %v1742_v13 = vsel %vm1740_vm7, %v1741_v30, %v1739_v29  ;;  %v1634_v48 = vsel %vm1632_vm5, %v1633_v8, %v1624_v15  ;;  %v1833_v38 = vsel %vm1827_vm8, %v1820_v47, 920167782 }
 0x3ae   : > { %v1743_v20 = vclz %v1742_v13  ;;  %vm1826_vm10 = vcmp.lt.s32.totalorder %v9600_v14, 3  ;;  %v1842_v27 = vshrl.u32 %v9606_v28, 16  ;;  %vm1825_vm11 = vcmp.lt.s32.totalorder %v9600_v14, 2 }
 0x3af   : > { %v1631_v53 = vsel %vm1629_vm1, %v1616_v23, %v1630_v49  ;;  %v1834_v22 = vsel %vm1826_vm10, %v9628_v18, %v1833_v38  ;;  %v2567_v9 = vand.u32 2147483647, %v9626_v50  ;;  %v1836_v55 = vsel %vm1824_vm6, %v9620_v17, %v9628_v18 }
 0x3b0   : > { %v1635_v1 = vsel %vm1628_vm3, %v1631_v53, %v1634_v48  ;;  %v6408_v58 = vadd.s32 4294967294, %v1743_v20  ;;  %v1835_v59 = vsel %vm1825_vm11, %v1832_v61, %v1834_v22  ;;  %v1837_v12 = vsel %vm1827_vm8, %v1823_v19, 1326507024 }
 0x3b1   : > { %v1636_v35 = vsel %vm1625_vm4, nan, %v1635_v1  ;;  %v1865_v39 = vand.u32 65535, %v1835_v59  ;;  %v1866_v0 = vshrl.u32 %v1835_v59, 16  ;;  %v1761_v32 = vsub.s32 4, %v9598_v6 }
 0x3b2   : > { %v5953_v51 = vmul.f32 %v5878_v33, %v1636_v35  ;;  %vm6409_vm12 = vcmp.lt.s32.totalorder %v6408_v58, 0  ;;  %v1838_v62 = vsel %vm1826_vm10, %v1820_v47, %v1837_v12  ;;  %v1808_v53 = vshrl.u32 %v11359_v3, %v9596_v54 }
 0x3b3   : > { %v1746_v46 = vsel %vm6409_vm12, 0, %v6408_v58  ;;  %v1839_v8 = vsel %vm1825_vm11, %v1836_v55, %v1838_v62  ;;  %v1868_v30 = vmul.u32 %v1866_v0, %v1841_v31  ;;  %v1869_v34 = vmul.u32 %v1865_v39, %v1842_v27 }
 0x3b4   : > { %6155 = vst [vmem:[%s7681_s17 + $0x28] sm:$0xff] %v5953_v51  ;;  %v1747_v23 = vsub.s32 32, %v1746_v46  ;;  %v1751_v60 = vsub.s32 4294967266, %v1746_v46  ;;  %v1748_v15 = vshll.u32 %v1739_v29, %v1746_v46  ;;  %v1843_v20 = vand.u32 65535, %v1839_v8 }
 0x3b5   : > { %v1844_v19 = vshrl.u32 %v1839_v8, 16  ;;  %v1867_v48 = vmul.u32 %v1865_v39, %v1841_v31  ;;  %v1871_v61 = vshll.u32 %v1868_v30, 16  ;;  %v2570_v38 = vand.u32 2139095040, %v9626_v50 }
 0x3b6   : > { %v1749_v49 = vshrl.u32 %v1731_v41, %v1747_v23  ;;  %v1752_v13 = vadd.s32 127, %v1751_v60  ;;  %v1762_v29 = vsel %vm1639_vm9, %v1761_v32, %v9598_v6  ;;  %vm9673_vm14 = vcmp.le.f32.partialorder %v1637_v16, 0.7853982 }
 0x3b7   : > { %v1846_v47 = vmul.u32 %v1844_v19, %v1841_v31  ;;  %v1847_v35 = vmul.u32 %v1843_v20, %v1842_v27  ;;  %v1870_v33 = vmul.u32 %v1866_v0, %v1842_v27  ;;  %v1873_v54 = vshll.u32 %v1869_v34, 16 }
 0x3b8   : > { %v1750_v1 = vor.u32 %v1749_v49, %v1748_v15  ;;  %v1753_v58 = vshll.u32 %v1752_v13, 23  ;;  %vm1875_vm2 = vc.u32 %v1867_v48, %v1871_v61  ;;  %v1845_v51 = vmul.u32 %v1843_v20, %v1841_v31 }
 0x3b9   : > { %v1848_v59 = vmul.u32 %v1844_v19, %v1842_v27  ;;  %v1849_v55 = vshll.u32 %v1846_v47, 16  ;;  %v1851_v12 = vshll.u32 %v1847_v35, 16  ;;  %v1876_v39 = vsel %vm1875_vm2, 1, %v11363_v44 }
 0x3ba   : > { %v1754_v22 = vor.u32 4788187, %v1753_v58  ;;  %v1757_v46 = vcvt.s32.f32 %v1750_v1  ;;  %v1877_v6 = vadd.s32 %v1871_v61, %v1867_v48  ;;  %v1878_v16 = vadd.s32 %v1876_v39, %v1870_v33  ;;  %v11435_v58 = vld [vmem:[#allocation20_spill] sm:$0xff]  ;;  %v11436_v33 = vld [vmem:[#allocation58_spill] sm:$0xff] }
 0x3bb   : > { %vm1853_vm13 = vc.u32 %v1845_v51, %v1849_v55  ;;  %v1855_v60 = vadd.s32 %v1849_v55, %v1845_v51  ;;  %v1828_v32 = vsel %vm1824_vm6, %v1808_v53, %v9618_v45  ;;  %v1829_v0 = vsel %vm1827_vm8, %v9628_v18, 2102212464 }
 0x3bc   : > { %v1755_v23 = vand.u32 2147483647, %v1754_v22  ;;  %v1854_v31 = vsel %vm1853_vm13, 1, %v11363_v44  ;;  %vm1879_vm15 = vc.u32 %v1877_v6, %v1873_v54  ;;  %v1872_v49 = vshrl.u32 %v1868_v30, 16 }
 0x3bd   : > { %v1856_v62 = vadd.s32 %v1854_v31, %v1848_v59  ;;  %vm1857_vm1 = vc.u32 %v1855_v60, %v1851_v12  ;;  %v1880_v15 = vsel %vm1879_vm15, 1, %v11363_v44  ;;  %v2571_v20 = vshrl.u32 %v2570_v38, 23 }
 0x3be   : > { %v1758_v27 = vmul.f32 %v1757_v46, %v1755_v23  ;;  %v1858_v8 = vsel %vm1857_vm1, 1, %v11363_v44  ;;  %v1882_v13 = vadd.s32 %v1880_v15, %v1878_v16  ;;  %v1830_v45 = vsel %vm1826_vm10, %v9620_v17, %v1829_v0 }
 0x3bf   : > { %v1850_v53 = vshrl.u32 %v1846_v47, 16  ;;  %v1860_v18 = vadd.s32 %v1858_v8, %v1856_v62  ;;  %v1874_v48 = vshrl.u32 %v1869_v34, 16  ;;  %v6425_v1 = vadd.s32 4294967169, %v2571_v20 }
 0x3c0   : > { %v1759_v19 = vxor.u32 2147483648, %v1758_v27  ;;  %v1883_v61 = vadd.s32 %v1882_v13, %v1872_v49  ;;  %v9692_v22 = vadd.f32 %v11436_v33, %v11435_v58  ;;  %v1764_v30 = vsel %vm9673_vm14, 0, %v1762_v29 }
 0x3c1   : > { %v1852_v38 = vshrl.u32 %v1847_v35, 16  ;;  %v1861_v59 = vadd.s32 %v1860_v18, %v1850_v53  ;;  %v1831_v34 = vsel %vm1825_vm11, %v1828_v32, %v1830_v45  ;;  %v2577_v55 = vadd.s32 1, %v6425_v1 }
 0x3c2   : > { %v1760_v51 = vsel %vm1639_vm9, %v1759_v19, %v1758_v27  ;;  %v1884_v47 = vadd.s32 %v1883_v61, %v1874_v48  ;;  %v1881_v39 = vadd.s32 %v1877_v6, %v1873_v54  ;;  %v600_v23 = vmul.f32 %v9218_v7, %v7252_v42 }
 0x3c3   : > { %v1763_v17 = vsel %vm9673_vm14, %v9380_v2, %v1760_v51  ;;  %v1862_v12 = vadd.s32 %v1861_v59, %v1852_v38  ;;  %v1781_v60 = vadd.s32 3, %v1764_v30  ;;  %v2574_v29 = vand.u32 8388607, %v2567_v9 }
 0x3c4   : > { %v1765_v46 = vmul.f32 %v1763_v17, %v1763_v17  ;;  %v1888_v16 = vadd.s32 1, %v1884_v47  ;;  %vm2578_vm3 = vcmp.gt.s32.totalorder %v2577_v55, 0  ;;  %v1885_v0 = vmul.u32 %v9606_v28, %v1831_v34 }
 0x3c5   : > { %vm1887_vm4 = vc.u32 %v1862_v12, %v1881_v39  ;;  %v2579_v32 = vsel %vm2578_vm3, %v2577_v55, 0  ;;  %v1782_v54 = vand.u32 3, %v1781_v60  ;;  %v2575_v6 = vor.u32 8388608, %v2574_v29 }
 0x3c6   : > { %v1766_v35 = vmul.f32 -0.001358992, %v1765_v46  ;;  %v1773_v41 = vmul.f32 -0.00019511016, %v1765_v46  ;;  %v1889_v14 = vsel %vm1887_vm4, %v1888_v16, %v1884_v47  ;;  %v2581_v15 = vand.u32 31, %v2579_v32 }
 0x3c7   : > { %v1890_v62 = vadd.s32 %v1889_v14, %v1885_v0  ;;  %v632_v20 = vadd.f32 %v600_v23, %v9584_v63  ;;  %vm1784_vm7 = vcmp.eq.s32.totalorder %v1782_v54, 0  ;;  %vm1787_vm5 = vcmp.eq.s32.totalorder %v1782_v54, 2 }
 0x3c8   : > { %v1767_v31 = vadd.f32 0.041655596, %v1766_v35  ;;  %v1774_v27 = vadd.f32 0.008332121, %v1773_v41  ;;  %v9709_v19 = vsub.s32 32, %v2581_v15  ;;  %v9716_v48 = vshrl.u32 %v2579_v32, 5 }
 0x3c9   : > { %v1891_v13 = vadd.s32 536870912, %v1890_v62  ;;  %v9714_v28 = vadd.f32 %v7722_v57, %v632_v20  ;;  %v9722_v63 = vshll.u32 %v2575_v6, 8  ;;  %vm1783_vm6 = vcmp.lt.s32.totalorder %v1782_v54, 2 }
 0x3ca   : > { %v1768_v8 = vmul.f32 %v1767_v31, %v1765_v46  ;;  %v1775_v49 = vmul.f32 %v1774_v27, %v1765_v46  ;;  %v2585_v61 = vshrl.u32 %v11360_v56, %v9709_v19  ;;  %v2588_v1 = vshrl.u32 %v11361_v52, %v9709_v19 }
 0x3cb   : > { %v9711_v18 = vshrl.u32 %v1891_v13, 30  ;;  %v2584_v30 = vshll.u32 %v11359_v3, %v2581_v15  ;;  %vm1780_vm8 = vweird.f32 %v9380_v2  ;;  %v2587_v38 = vshll.u32 %v11360_v56, %v2581_v15 }
 0x3cc   : > { %v1769_v45 = vadd.f32 -0.4999988, %v1768_v8  ;;  %v1776_v53 = vadd.f32 -0.16666654, %v1775_v49  ;;  %v2590_v59 = vshll.u32 %v11361_v52, %v2581_v15  ;;  %v2593_v34 = vshll.u32 %v11362_v21, %v2581_v15 }
 0x3cd   : > { %v1893_v51 = vshll.u32 %v9711_v18, 30  ;;  %v2594_v47 = vshrl.u32 %v11364_v43, %v9709_v19  ;;  %v9734_v16 = vor.u32 %v2585_v61, %v2584_v30  ;;  %v9736_v29 = vor.u32 %v2588_v1, %v2587_v38 }
 0x3ce   : > { %v1770_v58 = vmul.f32 %v1769_v45, %v1765_v46  ;;  %v1777_v33 = vmul.f32 %v1776_v53, %v1765_v46  ;;  %v2591_v46 = vshrl.u32 %v11362_v21, %v9709_v19  ;;  %v2597_v41 = vshrl.u32 %v11365_v10, %v9709_v19 }
 0x3cf   : > { %v1894_v60 = vsub.s32 %v1890_v62, %v1893_v51  ;;  %v2595_v35 = vor.u32 %v2594_v47, %v2593_v34  ;;  %v1886_v31 = vadd.s32 %v1881_v39, %v1862_v12  ;;  %v2596_v27 = vshll.u32 %v11364_v43, %v2581_v15  ;;  %v5907_v51 = vpop.f32.mrf.mxu2 }
 0x3d0   : > { %v1771_v55 = vadd.f32 1.0, %v1770_v58  ;;  %v1778_v23 = vadd.f32 1.0, %v1777_v33  ;;  %v2722_v62 = vand.u32 2147483647, %v9714_v28  ;;  %v9744_v6 = vmul.f32 %v9335_v25, %v7252_v42 }
 0x3d1   : > { %vm1895_vm9 = vcmp.lt.s32.totalorder %v1894_v60, 0  ;;  %v1896_v32 = vsub.s32 0, %v1894_v60  ;;  %v9746_v13 = vor.u32 %v2591_v46, %v2590_v59  ;;  %v2616_v20 = vand.u32 65535, %v9722_v63 }
 0x3d2   : > { %v1779_v0 = vmul.f32 %v1778_v23, %v1763_v17  ;;  %v1788_v14 = vxor.u32 2147483648, %v1771_v55  ;;  %v2598_v17 = vor.u32 %v2597_v41, %v2596_v27  ;;  %vm2599_vm10 = vcmp.lt.s32.totalorder %v9716_v48, 1 }
 0x3d3   : > { %v1897_v49 = vsel %vm1895_vm9, %v1896_v32, %v1894_v60  ;;  %vm2602_vm11 = vcmp.lt.s32.totalorder %v9716_v48, 4  ;;  %vm1794_vm12 = vcmp.lt.s32.totalorder %v9508_v11, 0  ;;  %v2607_v15 = vsel %vm2599_vm10, %v9734_v16, %v9736_v29 }
 0x3d4   : > { %v1785_v8 = vxor.u32 2147483648, %v1779_v0  ;;  %v1898_v45 = vclz %v1897_v49  ;;  %v1789_v39 = vsel %vm1787_vm5, %v1788_v14, %v1779_v0  ;;  %v2608_v53 = vsel %vm2602_vm11, %v2595_v35, 920167782 }
 0x3d5   : > { %vm2601_vm14 = vcmp.lt.s32.totalorder %v9716_v48, 3  ;;  %v2617_v58 = vshrl.u32 %v9722_v63, 16  ;;  %vm2600_vm2 = vcmp.lt.s32.totalorder %v9716_v48, 2  ;;  %v2725_v38 = vand.u32 2139095040, %v9714_v28 }
 0x3d6   : > { %v1786_v12 = vsel %vm1784_vm7, %v1771_v55, %v1785_v8  ;;  %v6411_v1 = vadd.s32 4294967294, %v1898_v45  ;;  %v2609_v30 = vsel %vm2601_vm14, %v9746_v13, %v2608_v53  ;;  %v2611_v2 = vsel %vm2599_vm10, %v9736_v29, %v9746_v13 }
 0x3d7   : > { %v1790_v61 = vsel %vm1783_vm6, %v1786_v12, %v1789_v39  ;;  %v2610_v59 = vsel %vm2600_vm2, %v2607_v15, %v2609_v30  ;;  %v2612_v47 = vsel %vm2602_vm11, %v2598_v17, 1326507024  ;;  %v1916_v0 = vsub.s32 4, %v9711_v18 }
 0x3d8   : > { %v1791_v33 = vsel %vm1780_vm8, nan, %v1790_v61  ;;  %vm6412_vm13 = vcmp.lt.s32.totalorder %v6411_v1, 0  ;;  %v2640_v55 = vand.u32 65535, %v2610_v59  ;;  %v2641_v23 = vshrl.u32 %v2610_v59, 16 }
 0x3d9   : > { %v5954_v54 = vmul.f32 %v5907_v51, %v1791_v33  ;;  %v1901_v34 = vsel %vm6412_vm13, 0, %v6411_v1  ;;  %v2613_v14 = vsel %vm2601_vm14, %v2595_v35, %v2612_v47  ;;  %v2583_v15 = vshrl.u32 %v11359_v3, %v9709_v19 }
 0x3da   : > { %v1902_v46 = vsub.s32 32, %v1901_v34  ;;  %v1906_v41 = vsub.s32 4294967266, %v1901_v34  ;;  %v1903_v32 = vshll.u32 %v1894_v60, %v1901_v34  ;;  %v2614_v27 = vsel %vm2600_vm2, %v2611_v2, %v2613_v14 }
 0x3db   : > { %6156 = vst [vmem:[%s7681_s17 + $0x30] sm:$0xff] %v5954_v54  ;;  %v2643_v8 = vmul.u32 %v2641_v23, %v2616_v20  ;;  %v2644_v49 = vmul.u32 %v2640_v55, %v2617_v58  ;;  %v2618_v39 = vand.u32 65535, %v2614_v27  ;;  %v2619_v17 = vshrl.u32 %v2614_v27, 16 }
 0x3dc   : > { %v1904_v45 = vshrl.u32 %v1886_v31, %v1902_v46  ;;  %v1907_v12 = vadd.s32 127, %v1906_v41  ;;  %v2642_v53 = vmul.u32 %v2640_v55, %v2616_v20  ;;  %v9788_v1 = vand.u32 8388607, %v2722_v62 }
 0x3dd   : > { %v2646_v61 = vshll.u32 %v2643_v8, 16  ;;  %v1917_v33 = vsel %vm1794_vm12, %v1916_v0, %v9711_v18  ;;  %v2621_v51 = vmul.u32 %v2619_v17, %v2616_v20  ;;  %vm9795_vm15 = vcmp.le.f32.partialorder %v1792_v4, 0.7853982 }
 0x3de   : > { %v1905_v35 = vor.u32 %v1904_v45, %v1903_v32  ;;  %v1908_v60 = vshll.u32 %v1907_v12, 23  ;;  %v2622_v19 = vmul.u32 %v2618_v39, %v2617_v58  ;;  %v2645_v30 = vmul.u32 %v2641_v23, %v2617_v58 }
 0x3df   : > { %v2648_v54 = vshll.u32 %v2644_v49, 16  ;;  %vm2650_vm1 = vc.u32 %v2642_v53, %v2646_v61  ;;  %v2620_v2 = vmul.u32 %v2618_v39, %v2616_v20  ;;  %v2623_v34 = vmul.u32 %v2619_v17, %v2617_v58 }
 0x3e0   : > { %v1909_v59 = vor.u32 4788187, %v1908_v60  ;;  %v2624_v47 = vshll.u32 %v2621_v51, 16  ;;  %v1912_v55 = vcvt.s32.f32 %v1905_v35  ;;  %v2626_v46 = vshll.u32 %v2622_v19, 16 }
 0x3e1   : > { %v2651_v41 = vsel %vm2650_vm1, 1, %v11363_v44  ;;  %v2652_v18 = vadd.s32 %v2646_v61, %v2642_v53  ;;  %v2603_v32 = vsel %vm2599_vm10, %v2583_v15, %v9734_v16  ;;  %v2604_v23 = vsel %vm2602_vm11, %v9746_v13, 2102212464 }
 0x3e2   : > { %v1910_v0 = vand.u32 2147483647, %v1909_v59  ;;  %vm2628_vm3 = vc.u32 %v2620_v2, %v2624_v47  ;;  %v2630_v14 = vadd.s32 %v2624_v47, %v2620_v2  ;;  %v2653_v4 = vadd.s32 %v2651_v41, %v2645_v30  ;;  %v11439_v59 = vld [vmem:[#allocation21_spill] sm:$0xff]  ;;  %v11440_v2 = vld [vmem:[#allocation59_spill] sm:$0xff] }
 0x3e3   : > { %v2629_v20 = vsel %vm2628_vm3, 1, %v11363_v44  ;;  %vm2654_vm4 = vc.u32 %v2652_v18, %v2648_v54  ;;  %v2647_v39 = vshrl.u32 %v2643_v8, 16  ;;  %v2726_v53 = vshrl.u32 %v2725_v38, 23 }
 0x3e4   : > { %v1913_v58 = vmul.f32 %v1912_v55, %v1910_v0  ;;  %v2631_v27 = vadd.s32 %v2629_v20, %v2623_v34  ;;  %vm2632_vm7 = vc.u32 %v2630_v14, %v2626_v46  ;;  %v2655_v45 = vsel %vm2654_vm4, 1, %v11363_v44 }
 0x3e5   : > { %v2633_v12 = vsel %vm2632_vm7, 1, %v11363_v44  ;;  %v2657_v17 = vadd.s32 %v2655_v45, %v2653_v4  ;;  %v2605_v16 = vsel %vm2601_vm14, %v9736_v29, %v2604_v23  ;;  %v2625_v15 = vshrl.u32 %v2621_v51, 16 }
 0x3e6   : > { %v1914_v61 = vxor.u32 2147483648, %v1913_v58  ;;  %v2635_v13 = vadd.s32 %v2633_v12, %v2631_v27  ;;  %v2649_v35 = vshrl.u32 %v2644_v49, 16  ;;  %v6428_v30 = vadd.s32 4294967169, %v2726_v53 }
 0x3e7   : > { %v2658_v60 = vadd.s32 %v2657_v17, %v2647_v39  ;;  %v9814_v34 = vadd.f32 %v11440_v2, %v11439_v59  ;;  %v1919_v38 = vsel %vm9795_vm15, 0, %v1917_v33  ;;  %v2627_v8 = vshrl.u32 %v2622_v19, 16 }
 0x3e8   : > { %v1915_v47 = vsel %vm1794_vm12, %v1914_v61, %v1913_v58  ;;  %v2636_v55 = vadd.s32 %v2635_v13, %v2625_v15  ;;  %v2606_v49 = vsel %vm2600_vm2, %v2603_v32, %v2605_v16  ;;  %v2732_v46 = vadd.s32 1, %v6428_v30 }
 0x3e9   : > { %v1918_v29 = vsel %vm9795_vm15, %v9508_v11, %v1915_v47  ;;  %v2659_v51 = vadd.s32 %v2658_v60, %v2649_v35  ;;  %v2656_v14 = vadd.s32 %v2652_v18, %v2648_v54  ;;  %v633_v4 = vadd.f32 %v9744_v6, %v9692_v22 }
 0x3ea   : > { %v1920_v41 = vmul.f32 %v1918_v29, %v1918_v29  ;;  %v2637_v0 = vadd.s32 %v2636_v55, %v2627_v8  ;;  %v1936_v23 = vadd.s32 3, %v1919_v38  ;;  %v2730_v33 = vor.u32 8388608, %v9788_v1 }
 0x3eb   : > { %v2663_v20 = vadd.s32 1, %v2659_v51  ;;  %vm2733_vm5 = vcmp.gt.s32.totalorder %v2732_v46, 0  ;;  %v2660_v31 = vmul.u32 %v9722_v63, %v2606_v49  ;;  %v9830_v27 = vadd.f32 %v7722_v57, %v633_v4 }
 0x3ec   : > { %v1921_v19 = vmul.f32 -0.001358992, %v1920_v41  ;;  %v1928_v58 = vmul.f32 -0.00019511016, %v1920_v41  ;;  %vm2662_vm6 = vc.u32 %v2637_v0, %v2656_v14  ;;  %v2734_v32 = vsel %vm2733_vm5, %v2732_v46, 0 }
 0x3ed   : > { %v2664_v48 = vsel %vm2662_vm6, %v2663_v20, %v2659_v51  ;;  %v1937_v12 = vand.u32 3, %v1936_v23  ;;  %v2736_v22 = vand.u32 31, %v2734_v32  ;;  %v9832_v6 = vshll.u32 %v2730_v33, 8 }
 0x3ee   : > { %v1922_v45 = vadd.f32 0.041655596, %v1921_v19  ;;  %v1929_v54 = vadd.f32 0.008332121, %v1928_v58  ;;  %v2665_v18 = vadd.s32 %v2664_v48, %v2660_v31  ;;  %v2877_v63 = vand.u32 2147483647, %v9830_v27 }
 0x3ef   : > { %v9834_v53 = vsub.s32 32, %v2736_v22  ;;  %vm1939_vm8 = vcmp.eq.s32.totalorder %v1937_v12, 0  ;;  %vm1942_vm9 = vcmp.eq.s32.totalorder %v1937_v12, 2  ;;  %v9839_v13 = vshrl.u32 %v2734_v32, 5 }
 0x3f0   : > { %v1923_v39 = vmul.f32 %v1922_v45, %v1920_v41  ;;  %v1930_v1 = vmul.f32 %v1929_v54, %v1920_v41  ;;  %v2666_v17 = vadd.s32 536870912, %v2665_v18  ;;  %v9846_v30 = vand.u32 65535, %v9832_v6 }
 0x3f1   : > { %v2740_v35 = vshrl.u32 %v11360_v56, %v9834_v53  ;;  %v2743_v60 = vshrl.u32 %v11361_v52, %v9834_v53  ;;  %vm1938_vm10 = vcmp.lt.s32.totalorder %v1937_v12, 2  ;;  %v2739_v38 = vshll.u32 %v11359_v3, %v2736_v22 }
 0x3f2   : > { %v1924_v61 = vadd.f32 -0.4999988, %v1923_v39  ;;  %v1931_v16 = vadd.f32 -0.16666654, %v1930_v1  ;;  %v9837_v15 = vshrl.u32 %v2666_v17, 30  ;;  %vm1935_vm11 = vweird.f32 %v9508_v11 }
 0x3f3   : > { %v2742_v8 = vshll.u32 %v11360_v56, %v2736_v22  ;;  %v2745_v55 = vshll.u32 %v11361_v52, %v2736_v22  ;;  %v2748_v49 = vshll.u32 %v11362_v21, %v2736_v22  ;;  %v2749_v51 = vshrl.u32 %v11364_v43, %v9834_v53 }
 0x3f4   : > { %v1925_v59 = vmul.f32 %v1924_v61, %v1920_v41  ;;  %v1932_v2 = vmul.f32 %v1931_v16, %v1920_v41  ;;  %v2668_v47 = vshll.u32 %v9837_v15, 30  ;;  %v2746_v41 = vshrl.u32 %v11362_v21, %v9834_v53 }
 0x3f5   : > { %v9860_v20 = vor.u32 %v2740_v35, %v2739_v38  ;;  %v9862_v33 = vor.u32 %v2743_v60, %v2742_v8  ;;  %v2750_v19 = vor.u32 %v2749_v51, %v2748_v49  ;;  %v2752_v58 = vshrl.u32 %v11365_v10, %v9834_v53  ;;  %v5936_v8 = vpop.f32.mrf.mxu3 }
 0x3f6   : > { %v1926_v46 = vadd.f32 1.0, %v1925_v59  ;;  %v1933_v4 = vadd.f32 1.0, %v1932_v2  ;;  %v9856_v23 = vsub.s32 %v2665_v18, %v2668_v47  ;;  %vm2569_vm12 = vcmp.lt.s32.totalorder %v9626_v50, 0 }
 0x3f7   : > { %v2751_v45 = vshll.u32 %v11364_v43, %v2736_v22  ;;  %v2772_v54 = vshrl.u32 %v9832_v6, 16  ;;  %v2880_v18 = vand.u32 2139095040, %v9830_v27  ;;  %v9874_v39 = vand.u32 8388607, %v2877_v63 }
 0x3f8   : > { %v1934_v31 = vmul.f32 %v1933_v4, %v1918_v29  ;;  %v1943_v48 = vxor.u32 2147483648, %v1926_v46  ;;  %vm2670_vm14 = vcmp.lt.s32.totalorder %v9856_v23, 0  ;;  %v2671_v32 = vsub.s32 0, %v9856_v23 }
 0x3f9   : > { %v2661_v17 = vadd.s32 %v2656_v14, %v2637_v0  ;;  %v9877_v61 = vor.u32 %v2746_v41, %v2745_v55  ;;  %v2753_v35 = vor.u32 %v2752_v58, %v2751_v45  ;;  %vm2754_vm2 = vcmp.lt.s32.totalorder %v9839_v13, 1 }
 0x3fa   : > { %v1940_v1 = vxor.u32 2147483648, %v1934_v31  ;;  %v2672_v29 = vsel %vm2670_vm14, %v2671_v32, %v9856_v23  ;;  %vm2757_vm13 = vcmp.lt.s32.totalorder %v9839_v13, 4  ;;  %v1944_v60 = vsel %vm1942_vm9, %v1943_v48, %v1934_v31 }
 0x3fb   : > { %v2673_v16 = vclz %v2672_v29  ;;  %vm9885_vm15 = vcmp.le.f32.partialorder %v2567_v9, 0.7853982  ;;  %v2762_v0 = vsel %vm2754_vm2, %v9860_v20, %v9862_v33  ;;  %v2763_v14 = vsel %vm2757_vm13, %v2750_v19, 920167782 }
 0x3fc   : > { %v1941_v22 = vsel %vm1939_vm8, %v1926_v46, %v1940_v1  ;;  %v2691_v38 = vsub.s32 4, %v9837_v15  ;;  %vm2756_vm1 = vcmp.lt.s32.totalorder %v9839_v13, 3  ;;  %vm2755_vm3 = vcmp.lt.s32.totalorder %v9839_v13, 2 }
 0x3fd   : > { %v1945_v2 = vsel %vm1938_vm10, %v1941_v22, %v1944_v60  ;;  %v6426_v47 = vadd.s32 4294967294, %v2673_v16  ;;  %v2764_v55 = vsel %vm2756_vm1, %v9877_v61, %v2763_v14  ;;  %v2881_v49 = vshrl.u32 %v2880_v18, 23 }
 0x3fe   : > { %v1946_v9 = vsel %vm1935_vm11, nan, %v1945_v2  ;;  %v2765_v12 = vsel %vm2755_vm3, %v2762_v0, %v2764_v55  ;;  %v2766_v46 = vsel %vm2754_vm2, %v9862_v33, %v9877_v61  ;;  %v2767_v4 = vsel %vm2757_vm13, %v2753_v35, 1326507024 }
 0x3ff   : > { %v5955_v51 = vmul.f32 %v5936_v8, %v1946_v9  ;;  %vm6427_vm4 = vcmp.lt.s32.totalorder %v6426_v47, 0  ;;  %v2795_v41 = vand.u32 65535, %v2765_v12  ;;  %v2796_v58 = vshrl.u32 %v2765_v12, 16 }
 0x400   : > { %v2676_v11 = vsel %vm6427_vm4, 0, %v6426_v47  ;;  %v2692_v32 = vsel %vm2569_vm12, %v2691_v38, %v9837_v15  ;;  %v2768_v45 = vsel %vm2756_vm1, %v2750_v19, %v2767_v4  ;;  %v2738_v14 = vshrl.u32 %v11359_v3, %v9834_v53 }
 0x401   : > { %6157 = vst [vmem:[%s7681_s17 + $0x38] sm:$0xff] %v5955_v51  ;;  %v2677_v31 = vsub.s32 32, %v2676_v11  ;;  %v2681_v48 = vsub.s32 4294967266, %v2676_v11  ;;  %v2678_v18 = vshll.u32 %v9856_v23, %v2676_v11  ;;  %v2769_v1 = vsel %vm2755_vm3, %v2766_v46, %v2768_v45 }
 0x402   : > { %v2798_v29 = vmul.u32 %v2796_v58, %v9846_v30  ;;  %v2799_v16 = vmul.u32 %v2795_v41, %v2772_v54  ;;  %v2773_v60 = vand.u32 65535, %v2769_v1  ;;  %v2774_v0 = vshrl.u32 %v2769_v1, 16 }
 0x403   : > { %v2679_v35 = vshrl.u32 %v2661_v17, %v2677_v31  ;;  %v2682_v22 = vadd.s32 127, %v2681_v48  ;;  %v2797_v15 = vmul.u32 %v2795_v41, %v9846_v30  ;;  %v6431_v47 = vadd.s32 4294967169, %v2881_v49 }
 0x404   : > { %v2801_v2 = vshll.u32 %v2798_v29, 16  ;;  %v2694_v23 = vsel %vm9885_vm15, 0, %v2692_v32  ;;  %v2776_v9 = vmul.u32 %v2774_v0, %v9846_v30  ;;  %v2777_v8 = vmul.u32 %v2773_v60, %v2772_v54 }
 0x405   : > { %v2680_v19 = vor.u32 %v2679_v35, %v2678_v18  ;;  %v2683_v38 = vshll.u32 %v2682_v22, 23  ;;  %v2800_v55 = vmul.u32 %v2796_v58, %v2772_v54  ;;  %v2803_v17 = vshll.u32 %v2799_v16, 16 }
 0x406   : > { %vm2805_vm7 = vc.u32 %v2797_v15, %v2801_v2  ;;  %v2775_v12 = vmul.u32 %v2773_v60, %v9846_v30  ;;  %v2778_v46 = vmul.u32 %v2774_v0, %v2772_v54  ;;  %v2779_v53 = vshll.u32 %v2776_v9, 16 }
 0x407   : > { %v2684_v51 = vor.u32 4788187, %v2683_v38  ;;  %v2687_v11 = vcvt.s32.f32 %v2680_v19  ;;  %v2781_v4 = vshll.u32 %v2777_v8, 16  ;;  %v2806_v49 = vsel %vm2805_vm7, 1, %v11363_v44 }
 0x408   : > { %v2807_v41 = vadd.s32 %v2801_v2, %v2797_v15  ;;  %vm2783_vm5 = vc.u32 %v2775_v12, %v2779_v53  ;;  %v2785_v48 = vadd.s32 %v2779_v53, %v2775_v12  ;;  %v2808_v32 = vadd.s32 %v2806_v49, %v2800_v55 }
 0x409   : > { %v2685_v31 = vand.u32 2147483647, %v2684_v51  ;;  %v2758_v58 = vsel %vm2754_vm2, %v2738_v14, %v9860_v20  ;;  %v2759_v45 = vsel %vm2757_vm13, %v9877_v61, 2102212464  ;;  %v2784_v30 = vsel %vm2783_vm5, 1, %v11363_v44 }
 0x40a   : > { %vm2809_vm6 = vc.u32 %v2807_v41, %v2803_v17  ;;  %v2786_v18 = vadd.s32 %v2784_v30, %v2778_v46  ;;  %vm2787_vm8 = vc.u32 %v2785_v48, %v2781_v4  ;;  %v2802_v22 = vshrl.u32 %v2798_v29, 16 }
 0x40b   : > { %v2688_v54 = vmul.f32 %v2687_v11, %v2685_v31  ;;  %v2810_v1 = vsel %vm2809_vm6, 1, %v11363_v44  ;;  %v2788_v35 = vsel %vm2787_vm8, 1, %v11363_v44  ;;  %v2887_v0 = vadd.s32 1, %v6431_v47 }
 0x40c   : > { %v2812_v60 = vadd.s32 %v2810_v1, %v2808_v32  ;;  %v2760_v20 = vsel %vm2756_vm1, %v9862_v33, %v2759_v45  ;;  %v2780_v14 = vshrl.u32 %v2776_v9, 16  ;;  %v2790_v61 = vadd.s32 %v2788_v35, %v2786_v18 }
 0x40d   : > { %v2689_v15 = vxor.u32 2147483648, %v2688_v54  ;;  %v2711_v2 = vadd.s32 3, %v2694_v23  ;;  %v2804_v19 = vshrl.u32 %v2799_v16, 16  ;;  %vm2888_vm9 = vcmp.gt.s32.totalorder %v2887_v0, 0 }
 0x40e   : > { %v2813_v38 = vadd.s32 %v2812_v60, %v2802_v22  ;;  %v2782_v51 = vshrl.u32 %v2777_v8, 16  ;;  %v2791_v12 = vadd.s32 %v2790_v61, %v2780_v14  ;;  %v2889_v46 = vsel %vm2888_vm9, %v2887_v0, 0 }
 0x40f   : > { %v2690_v55 = vsel %vm2569_vm12, %v2689_v15, %v2688_v54  ;;  %v2761_v47 = vsel %vm2755_vm3, %v2758_v58, %v2760_v20  ;;  %v2891_v9 = vand.u32 31, %v2889_v46  ;;  %v9951_v16 = vadd.s32 %v2807_v41, %v2803_v17 }
 0x410   : > { %v2693_v29 = vsel %vm9885_vm15, %v9626_v50, %v2690_v55  ;;  %v2814_v33 = vadd.s32 %v2813_v38, %v2804_v19  ;;  %v9949_v23 = vadd.s32 %v2791_v12, %v2782_v51  ;;  %v2815_v31 = vmul.u32 %v9832_v6, %v2761_v47 }
 0x411   : > { %v2695_v53 = vmul.f32 %v2693_v29, %v2693_v29  ;;  %v9953_v4 = vsub.s32 32, %v2891_v9  ;;  %v9958_v59 = vand.u32 3, %v2711_v2  ;;  %v2885_v48 = vor.u32 8388608, %v9874_v39 }
 0x412   : > { %v2818_v11 = vadd.s32 1, %v2814_v33  ;;  %vm2817_vm10 = vc.u32 %v9949_v23, %v9951_v16  ;;  %v602_v32 = vmul.f32 %v9468_v26, %v7252_v42  ;;  %v9963_v45 = vshrl.u32 %v2889_v46, 5 }
 0x413   : > { %v2696_v8 = vmul.f32 -0.001358992, %v2695_v53  ;;  %v2703_v49 = vmul.f32 -0.00019511016, %v2695_v53  ;;  %v2895_v30 = vshrl.u32 %v11360_v56, %v9953_v4  ;;  %v2898_v6 = vshrl.u32 %v11361_v52, %v9953_v4 }
 0x414   : > { %v2819_v13 = vsel %vm2817_vm10, %v2818_v11, %v2814_v33  ;;  %v2901_v54 = vshrl.u32 %v11362_v21, %v9953_v4  ;;  %v2903_v18 = vshll.u32 %v11362_v21, %v2891_v9  ;;  %v2904_v42 = vshrl.u32 %v11364_v43, %v9953_v4 }
 0x415   : > { %v2697_v17 = vadd.f32 0.041655596, %v2696_v8  ;;  %v2704_v41 = vadd.f32 0.008332121, %v2703_v49  ;;  %v2820_v58 = vadd.s32 %v2819_v13, %v2815_v31  ;;  %v2894_v22 = vshll.u32 %v11359_v3, %v2891_v9 }
 0x416   : > { %v2897_v60 = vshll.u32 %v11360_v56, %v2891_v9  ;;  %v2900_v0 = vshll.u32 %v11361_v52, %v2891_v9  ;;  %v2907_v15 = vshrl.u32 %v11365_v10, %v9953_v4  ;;  %v2905_v2 = vor.u32 %v2904_v42, %v2903_v18 }
 0x417   : > { %v2698_v39 = vmul.f32 %v2697_v17, %v2695_v53  ;;  %v2705_v1 = vmul.f32 %v2704_v41, %v2695_v53  ;;  %v2821_v35 = vadd.s32 536870912, %v2820_v58  ;;  %vm2714_vm11 = vcmp.eq.s32.totalorder %v9958_v59, 0 }
 0x418   : > { %v9982_v19 = vor.u32 %v2895_v30, %v2894_v22  ;;  %v9984_v38 = vor.u32 %v2898_v6, %v2897_v60  ;;  %v9986_v55 = vor.u32 %v2901_v54, %v2900_v0  ;;  %v2906_v51 = vshll.u32 %v11364_v43, %v2891_v9 }
 0x419   : > { %v2699_v20 = vadd.f32 -0.4999988, %v2698_v39  ;;  %v2706_v14 = vadd.f32 -0.16666654, %v2705_v1  ;;  %v9979_v61 = vshrl.u32 %v2821_v35, 30  ;;  %vm2713_vm12 = vcmp.lt.s32.totalorder %v9958_v59, 2 }
 0x41a   : > { %vm2912_vm14 = vcmp.lt.s32.totalorder %v9963_v45, 4  ;;  %vm2710_vm2 = vweird.f32 %v9626_v50  ;;  %v2908_v33 = vor.u32 %v2907_v15, %v2906_v51  ;;  %vm2909_vm13 = vcmp.lt.s32.totalorder %v9963_v45, 1 }
 0x41b   : > { %v2700_v12 = vmul.f32 %v2699_v20, %v2695_v53  ;;  %v2707_v46 = vmul.f32 %v2706_v14, %v2695_v53  ;;  %v2823_v47 = vshll.u32 %v9979_v61, 30  ;;  %v2918_v11 = vsel %vm2912_vm14, %v2905_v2, 920167782 }
 0x41c   : > { %v9996_v8 = vshll.u32 %v2885_v48, 8  ;;  %vm2911_vm15 = vcmp.lt.s32.totalorder %v9963_v45, 3  ;;  %v2917_v53 = vsel %vm2909_vm13, %v9982_v19, %v9984_v38  ;;  %v2921_v48 = vsel %vm2909_vm13, %v9984_v38, %v9986_v55 }
 0x41d   : > { %v2701_v49 = vadd.f32 1.0, %v2700_v12  ;;  %v2708_v9 = vadd.f32 1.0, %v2707_v46  ;;  %v9998_v31 = vsub.s32 %v2820_v58, %v2823_v47  ;;  %v2919_v13 = vsel %vm2911_vm15, %v9986_v55, %v2918_v11  ;;  %v5852_v12 = vpop.f32.mrf.mxu0 }
 0x41e   : > { %v634_v17 = vadd.f32 %v602_v32, %v9814_v34  ;;  %vm2717_vm3 = vcmp.eq.s32.totalorder %v9958_v59, 2  ;;  %v2922_v6 = vsel %vm2912_vm14, %v2908_v33, 1326507024  ;;  %v2926_v54 = vand.u32 65535, %v9996_v8 }
 0x41f   : > { %v2709_v41 = vmul.f32 %v2708_v9, %v2693_v29  ;;  %v2718_v58 = vxor.u32 2147483648, %v2701_v49  ;;  %vm2825_vm1 = vcmp.lt.s32.totalorder %v9998_v31, 0  ;;  %v2826_v30 = vsub.s32 0, %v9998_v31 }
 0x420   : > { %v10020_v18 = vadd.f32 %v7722_v57, %v634_v17  ;;  %vm2910_vm4 = vcmp.lt.s32.totalorder %v9963_v45, 2  ;;  %v2923_v34 = vsel %vm2911_vm15, %v2905_v2, %v2922_v6  ;;  %v2927_v42 = vshrl.u32 %v9996_v8, 16 }
 0x421   : > { %v2715_v39 = vxor.u32 2147483648, %v2709_v41  ;;  %v2827_v1 = vsel %vm2825_vm1, %v2826_v30, %v9998_v31  ;;  %v2920_v32 = vsel %vm2910_vm4, %v2917_v53, %v2919_v13  ;;  %v2924_v35 = vsel %vm2910_vm4, %v2921_v48, %v2923_v34 }
 0x422   : > { %v2828_v29 = vclz %v2827_v1  ;;  %v2719_v22 = vsel %vm2717_vm3, %v2718_v58, %v2709_v41  ;;  %vm2724_vm7 = vcmp.lt.s32.totalorder %v9714_v28, 0  ;;  %v2928_v60 = vand.u32 65535, %v2924_v35 }
 0x423   : > { %v2716_v57 = vsel %vm2714_vm11, %v2701_v49, %v2715_v39  ;;  %v2929_v0 = vshrl.u32 %v2924_v35, 16  ;;  %v2816_v20 = vadd.s32 %v9951_v16, %v9949_v23  ;;  %v3032_v2 = vand.u32 2147483647, %v10020_v18 }
 0x424   : > { %v2720_v15 = vsel %vm2713_vm12, %v2716_v57, %v2719_v22  ;;  %v6429_v14 = vadd.s32 4294967294, %v2828_v29  ;;  %v2893_v46 = vshrl.u32 %v11359_v3, %v9953_v4  ;;  %v2951_v33 = vshrl.u32 %v2920_v32, 16 }
 0x425   : > { %v2721_v51 = vsel %vm2710_vm2, nan, %v2720_v15  ;;  %v2931_v47 = vmul.u32 %v2929_v0, %v2926_v54  ;;  %v2932_v59 = vmul.u32 %v2928_v60, %v2927_v42  ;;  %v2950_v49 = vand.u32 65535, %v2920_v32 }
 0x426   : > { %v5960_v11 = vmul.f32 %v5852_v12, %v2721_v51  ;;  %vm6430_vm5 = vcmp.lt.s32.totalorder %v6429_v14, 0  ;;  %v2846_v23 = vsub.s32 4, %v9979_v61  ;;  %v2930_v16 = vmul.u32 %v2928_v60, %v2926_v54 }
 0x427   : > { %v2831_v9 = vsel %vm6430_vm5, 0, %v6429_v14  ;;  %v2934_v53 = vshll.u32 %v2931_v47, 16  ;;  %vm10047_vm6 = vcmp.le.f32.partialorder %v2722_v62, 0.7853982  ;;  %v2933_v17 = vmul.u32 %v2929_v0, %v2927_v42 }
 0x428   : > { %6162 = vst [vmem:[%s7681_s17 + $0x60] sm:$0xff] %v5960_v11  ;;  %v2832_v13 = vsub.s32 32, %v2831_v9  ;;  %v2833_v4 = vshll.u32 %v9998_v31, %v2831_v9  ;;  %v2836_v48 = vsub.s32 4294967266, %v2831_v9  ;;  %v2936_v41 = vshll.u32 %v2932_v59, 16 }
 0x429   : > { %vm2938_vm8 = vc.u32 %v2930_v16, %v2934_v53  ;;  %v2940_v58 = vadd.s32 %v2934_v53, %v2930_v16  ;;  %v2953_v30 = vmul.u32 %v2951_v33, %v2926_v54  ;;  %v2954_v34 = vmul.u32 %v2950_v49, %v2927_v42 }
 0x42a   : > { %v2834_v6 = vshrl.u32 %v2816_v20, %v2832_v13  ;;  %v2837_v39 = vadd.s32 127, %v2836_v48  ;;  %v2939_v1 = vsel %vm2938_vm8, 1, %v11363_v44  ;;  %v2952_v62 = vmul.u32 %v2950_v49, %v2926_v54  ;;  %v11446_v48 = vld [vmem:[#allocation51_spill] sm:$0xff] }
 0x42b   : > { %v2941_v29 = vadd.s32 %v2939_v1, %v2933_v17  ;;  %vm2942_vm9 = vc.u32 %v2940_v58, %v2936_v41  ;;  %v2956_v32 = vshll.u32 %v2953_v30, 16  ;;  %v2847_v31 = vsel %vm2724_vm7, %v2846_v23, %v9979_v61 }
 0x42c   : > { %v2835_v35 = vor.u32 %v2834_v6, %v2833_v4  ;;  %v2838_v57 = vshll.u32 %v2837_v39, 23  ;;  %v2943_v22 = vsel %vm2942_vm9, 1, %v11363_v44  ;;  %v2935_v60 = vshrl.u32 %v2931_v47, 16  ;;  %v11445_v4 = vld [vmem:[#allocation27_spill] sm:$0xff] }
 0x42d   : > { %v2945_v0 = vadd.s32 %v2943_v22, %v2941_v29  ;;  %v2955_v15 = vmul.u32 %v2951_v33, %v2927_v42  ;;  %vm2960_vm10 = vc.u32 %v2952_v62, %v2956_v32  ;;  %v2958_v14 = vshll.u32 %v2954_v34, 16 }
 0x42e   : > { %v2839_v20 = vor.u32 4788187, %v2838_v57  ;;  %v2961_v51 = vsel %vm2960_vm10, 1, %v11363_v44  ;;  %v2962_v12 = vadd.s32 %v2956_v32, %v2952_v62  ;;  %v2913_v54 = vsel %vm2909_vm13, %v2893_v46, %v9982_v19 }
 0x42f   : > { %v2914_v11 = vsel %vm2912_vm14, %v9986_v55, 2102212464  ;;  %v2946_v61 = vadd.s32 %v2945_v0, %v2935_v60  ;;  %v2963_v49 = vadd.s32 %v2961_v51, %v2955_v15  ;;  %v2842_v47 = vcvt.s32.f32 %v2835_v35  ;;  %v11447_v15 = vld [vmem:[#allocation28_spill] sm:$0xff] }
 0x430   : > { %v2840_v9 = vand.u32 2147483647, %v2839_v20  ;;  %vm2964_vm11 = vc.u32 %v2962_v12, %v2958_v14  ;;  %v3035_v42 = vand.u32 2139095040, %v10020_v18  ;;  %v2849_v33 = vsel %vm10047_vm6, 0, %v2847_v31  ;;  %v11448_v20 = vld [vmem:[#allocation52_spill] sm:$0xff] }
 0x431   : > { %v2937_v23 = vshrl.u32 %v2932_v59, 16  ;;  %v2957_v16 = vshrl.u32 %v2953_v30, 16  ;;  %v2965_v53 = vsel %vm2964_vm11, 1, %v11363_v44  ;;  %v540_v55 = vadd.f32 %v11446_v48, %v11445_v4 }
 0x432   : > { %v2843_v13 = vmul.f32 %v2842_v47, %v2840_v9  ;;  %v2967_v19 = vadd.s32 %v2965_v53, %v2963_v49  ;;  %v3036_v46 = vshrl.u32 %v3035_v42, 23  ;;  %v2915_v17 = vsel %vm2911_vm15, %v9984_v38, %v2914_v11 }
 0x433   : > { %v2947_v41 = vadd.s32 %v2946_v61, %v2937_v23  ;;  %v3039_v58 = vand.u32 8388607, %v3032_v2  ;;  %v607_v59 = vmul.f32 %v9083_v5, %v11385_v24  ;;  %v2959_v6 = vshrl.u32 %v2954_v34, 16 }
 0x434   : > { %v2844_v30 = vxor.u32 2147483648, %v2843_v13  ;;  %v2968_v39 = vadd.s32 %v2967_v19, %v2957_v16  ;;  %v6434_v1 = vadd.s32 4294967169, %v3036_v46  ;;  %v2866_v29 = vadd.s32 3, %v2849_v33 }
 0x435   : > { %v2966_v62 = vadd.s32 %v2962_v12, %v2958_v14  ;;  %v2916_v35 = vsel %vm2910_vm4, %v2913_v54, %v2915_v17  ;;  %v3040_v22 = vor.u32 8388608, %v3039_v58  ;;  %v639_v60 = vadd.f32 %v607_v59, %v540_v55 }
 0x436   : > { %v2845_v32 = vsel %vm2724_vm7, %v2844_v30, %v2843_v13  ;;  %v2969_v38 = vadd.s32 %v2968_v39, %v2959_v6  ;;  %v3042_v57 = vadd.s32 1, %v6434_v1  ;;  %v10086_v14 = vadd.f32 %v11448_v20, %v11447_v15 }
 0x437   : > { %v2848_v31 = vsel %vm10047_vm6, %v9714_v28, %v2845_v32  ;;  %vm2972_vm12 = vc.u32 %v2947_v41, %v2966_v62  ;;  %v2970_v51 = vmul.u32 %v9996_v8, %v2916_v35  ;;  %v10090_v12 = vadd.f32 %v8130_v36, %v639_v60 }
 0x438   : > { %v2850_v34 = vmul.f32 %v2848_v31, %v2848_v31  ;;  %v2973_v0 = vadd.s32 1, %v2969_v38  ;;  %vm3043_vm14 = vcmp.gt.s32.totalorder %v3042_v57, 0  ;;  %v10092_v9 = vshll.u32 %v3040_v22, 8 }
 0x439   : > { %v3044_v45 = vsel %vm3043_vm14, %v3042_v57, 0  ;;  %v2867_v33 = vand.u32 3, %v2866_v29  ;;  %v3810_v53 = vand.u32 2139095040, %v10090_v12  ;;  %v10095_v19 = vadd.s32 %v2966_v62, %v2947_v41 }
 0x43a   : > { %v2851_v54 = vmul.f32 -0.001358992, %v2850_v34  ;;  %v2858_v11 = vmul.f32 -0.00019511016, %v2850_v34  ;;  %v2974_v50 = vsel %vm2972_vm12, %v2973_v0, %v2969_v38  ;;  %v3046_v49 = vand.u32 31, %v3044_v45 }
 0x43b   : > { %v2975_v61 = vadd.s32 %v2974_v50, %v2970_v51  ;;  %v10098_v4 = vand.u32 65535, %v10092_v9  ;;  %v10101_v48 = vshrl.u32 %v10092_v9, 16  ;;  %vm2872_vm2 = vcmp.eq.s32.totalorder %v2867_v33, 2 }
 0x43c   : > { %v2852_v47 = vadd.f32 0.041655596, %v2851_v54  ;;  %v2859_v42 = vadd.f32 0.008332121, %v2858_v11  ;;  %v3047_v16 = vsub.s32 32, %v3046_v49  ;;  %v10103_v58 = vshrl.u32 %v3044_v45, 5 }
 0x43d   : > { %v2976_v23 = vadd.s32 536870912, %v2975_v61  ;;  %vm2869_vm13 = vcmp.eq.s32.totalorder %v2867_v33, 0  ;;  %v3049_v6 = vshll.u32 %v11359_v3, %v3046_v49  ;;  %v10108_v39 = vshrl.u32 %v3810_v53, 23 }
 0x43e   : > { %v2853_v13 = vmul.f32 %v2852_v47, %v2850_v34  ;;  %v2860_v8 = vmul.f32 %v2859_v42, %v2850_v34  ;;  %v3050_v59 = vshrl.u32 %v11360_v56, %v3047_v16  ;;  %v3053_v41 = vshrl.u32 %v11361_v52, %v3047_v16 }
 0x43f   : > { %v2977_v46 = vshrl.u32 %v2976_v23, 30  ;;  %vm2868_vm15 = vcmp.lt.s32.totalorder %v2867_v33, 2  ;;  %vm2879_vm1 = vcmp.lt.s32.totalorder %v9830_v27, 0  ;;  %v3056_v62 = vshrl.u32 %v11362_v21, %v3047_v16 }
 0x440   : > { %v2854_v55 = vadd.f32 -0.4999988, %v2853_v13  ;;  %v2861_v17 = vadd.f32 -0.16666654, %v2860_v8  ;;  %v3059_v32 = vshrl.u32 %v11364_v43, %v3047_v16  ;;  %vm2865_vm3 = vweird.f32 %v9714_v28 }
 0x441   : > { %v2978_v30 = vshll.u32 %v2977_v46, 30  ;;  %v3052_v38 = vshll.u32 %v11360_v56, %v3046_v49  ;;  %v3055_v57 = vshll.u32 %v11361_v52, %v3046_v49  ;;  %v3062_v22 = vshrl.u32 %v11365_v10, %v3047_v16 }
 0x442   : > { %v2855_v1 = vmul.f32 %v2854_v55, %v2850_v34  ;;  %v2862_v29 = vmul.f32 %v2861_v17, %v2850_v34  ;;  %v3051_v34 = vor.u32 %v3050_v59, %v3049_v6  ;;  %v3058_v15 = vshll.u32 %v11362_v21, %v3046_v49 }
 0x443   : > { %v10114_v35 = vsub.s32 %v2975_v61, %v2978_v30  ;;  %v3054_v51 = vor.u32 %v3053_v41, %v3052_v38  ;;  %v3061_v45 = vshll.u32 %v11364_v43, %v3046_v49  ;;  %vm10125_vm7 = vcmp.le.f32.partialorder %v2877_v63, 0.7853982 }
 0x444   : > { %v2856_v60 = vadd.f32 1.0, %v2855_v1  ;;  %v2863_v0 = vadd.f32 1.0, %v2862_v29  ;;  %v3057_v61 = vor.u32 %v3056_v62, %v3055_v57  ;;  %v3060_v47 = vor.u32 %v3059_v32, %v3058_v15  ;;  %v5881_v62 = vpop.f32.mrf.mxu1 }
 0x445   : > { %vm2980_vm4 = vcmp.lt.s32.totalorder %v10114_v35, 0  ;;  %v2981_v20 = vsub.s32 0, %v10114_v35  ;;  %v3001_v23 = vsub.s32 4, %v2977_v46  ;;  %v3063_v53 = vor.u32 %v3062_v22, %v3061_v45 }
 0x446   : > { %v2864_v54 = vmul.f32 %v2863_v0, %v2848_v31  ;;  %v2873_v11 = vxor.u32 2147483648, %v2856_v60  ;;  %vm3064_vm5 = vcmp.lt.s32.totalorder %v10103_v58, 1  ;;  %v3048_v49 = vshrl.u32 %v11359_v3, %v3047_v16 }
 0x447   : > { %v2982_v42 = vsel %vm2980_vm4, %v2981_v20, %v10114_v35  ;;  %vm3065_vm6 = vcmp.lt.s32.totalorder %v10103_v58, 2  ;;  %vm3066_vm8 = vcmp.lt.s32.totalorder %v10103_v58, 3  ;;  %vm3067_vm9 = vcmp.lt.s32.totalorder %v10103_v58, 4 }
 0x448   : > { %v2870_v13 = vxor.u32 2147483648, %v2864_v54  ;;  %v2983_v8 = vclz %v2982_v42  ;;  %v2874_v31 = vsel %vm2872_vm2, %v2873_v11, %v2864_v54  ;;  %v3072_v63 = vsel %vm3064_vm5, %v3051_v34, %v3054_v51 }
 0x449   : > { %v3073_v59 = vsel %vm3067_vm9, %v3060_v47, 920167782  ;;  %v3076_v16 = vsel %vm3064_vm5, %v3054_v51, %v3057_v61  ;;  %v10146_v6 = vsel %vm2879_vm1, %v3001_v23, %v2977_v46  ;;  %v3077_v1 = vsel %vm3067_vm9, %v3063_v53, 1326507024 }
 0x44a   : > { %v2871_v55 = vsel %vm2869_vm13, %v2856_v60, %v2870_v13  ;;  %v6432_v17 = vadd.s32 4294967294, %v2983_v8  ;;  %v3074_v41 = vsel %vm3066_vm8, %v3057_v61, %v3073_v59  ;;  %v3078_v32 = vsel %vm3066_vm8, %v3060_v47, %v3077_v1 }
 0x44b   : > { %v2875_v30 = vsel %vm2868_vm15, %v2871_v55, %v2874_v31  ;;  %v3075_v33 = vsel %vm3065_vm6, %v3072_v63, %v3074_v41  ;;  %v3079_v57 = vsel %vm3065_vm6, %v3076_v16, %v3078_v32  ;;  %v3069_v28 = vsel %vm3067_vm9, %v3057_v61, 2102212464 }
 0x44c   : > { %v2876_v29 = vsel %vm2865_vm3, nan, %v2875_v30  ;;  %vm6433_vm10 = vcmp.lt.s32.totalorder %v6432_v17, 0  ;;  %v3105_v22 = vand.u32 65535, %v3075_v33  ;;  %v3083_v15 = vand.u32 65535, %v3079_v57 }
 0x44d   : > { %v5961_v46 = vmul.f32 %v5881_v62, %v2876_v29  ;;  %v2986_v38 = vsel %vm6433_vm10, 0, %v6432_v17  ;;  %v3004_v45 = vsel %vm10125_vm7, 0, %v10146_v6  ;;  %v3084_v54 = vshrl.u32 %v3079_v57, 16 }
 0x44e   : > { %v2987_v60 = vsub.s32 32, %v2986_v38  ;;  %v2991_v0 = vsub.s32 4294967266, %v2986_v38  ;;  %v2988_v20 = vshll.u32 %v10114_v35, %v2986_v38  ;;  %v3106_v11 = vshrl.u32 %v3075_v33, 16 }
 0x44f   : > { %6163 = vst [vmem:[%s7681_s17 + $0x68] sm:$0xff] %v5961_v46  ;;  %v3087_v23 = vmul.u32 %v3083_v15, %v10101_v48  ;;  %v3109_v53 = vmul.u32 %v3105_v22, %v10101_v48  ;;  %v3068_v61 = vsel %vm3064_vm5, %v3048_v49, %v3051_v34  ;;  %v3070_v13 = vsel %vm3066_vm8, %v3054_v51, %v3069_v28 }
 0x450   : > { %v2989_v47 = vshrl.u32 %v10095_v19, %v2987_v60  ;;  %v2992_v42 = vadd.s32 127, %v2991_v0  ;;  %v3086_v35 = vmul.u32 %v3084_v54, %v10098_v4  ;;  %v3108_v8 = vmul.u32 %v3106_v11, %v10098_v4 }
 0x451   : > { %v3085_v55 = vmul.u32 %v3083_v15, %v10098_v4  ;;  %v3107_v19 = vmul.u32 %v3105_v22, %v10098_v4  ;;  %v3088_v17 = vmul.u32 %v3084_v54, %v10101_v48  ;;  %v3110_v16 = vmul.u32 %v3106_v11, %v10101_v48 }
 0x452   : > { %v2990_v31 = vor.u32 %v2989_v47, %v2988_v20  ;;  %v2993_v63 = vshll.u32 %v2992_v42, 23  ;;  %v3089_v59 = vshll.u32 %v3086_v35, 16  ;;  %v3111_v30 = vshll.u32 %v3108_v8, 16 }
 0x453   : > { %v3091_v6 = vshll.u32 %v3087_v23, 16  ;;  %v3113_v51 = vshll.u32 %v3109_v53, 16  ;;  %v6449_v4 = vadd.s32 4294967169, %v10108_v39  ;;  %v3090_v38 = vshrl.u32 %v3086_v35, 16 }
 0x454   : > { %v2994_v34 = vor.u32 4788187, %v2993_v63  ;;  %v2997_v49 = vcvt.s32.f32 %v2990_v31  ;;  %vm3093_vm11 = vc.u32 %v3085_v55, %v3089_v59  ;;  %v3095_v41 = vadd.s32 %v3089_v59, %v3085_v55 }
 0x455   : > { %vm3115_vm12 = vc.u32 %v3107_v19, %v3111_v30  ;;  %v3117_v1 = vadd.s32 %v3111_v30, %v3107_v19  ;;  %v3094_v62 = vsel %vm3093_vm11, 1, %v11363_v44  ;;  %v3112_v0 = vshrl.u32 %v3108_v8, 16 }
 0x456   : > { %v2995_v29 = vand.u32 2147483647, %v2994_v34  ;;  %v3116_v33 = vsel %vm3115_vm12, 1, %v11363_v44  ;;  %v3096_v32 = vadd.s32 %v3094_v62, %v3088_v17  ;;  %vm3097_vm14 = vc.u32 %v3095_v41, %v3091_v6 }
 0x457   : > { %v3118_v46 = vadd.s32 %v3116_v33, %v3110_v16  ;;  %vm3119_vm2 = vc.u32 %v3117_v1, %v3113_v51  ;;  %v3098_v57 = vsel %vm3097_vm14, 1, %v11363_v44  ;;  %v3817_v15 = vadd.s32 1, %v6449_v4 }
 0x458   : > { %v2998_v48 = vmul.f32 %v2997_v49, %v2995_v29  ;;  %v3120_v22 = vsel %vm3119_vm2, 1, %v11363_v44  ;;  %v3100_v60 = vadd.s32 %v3098_v57, %v3096_v32  ;;  %v3092_v54 = vshrl.u32 %v3087_v23, 16 }
 0x459   : > { %v3122_v28 = vadd.s32 %v3120_v22, %v3118_v46  ;;  %v3807_v11 = vand.u32 2147483647, %v10090_v12  ;;  %v3114_v39 = vshrl.u32 %v3109_v53, 16  ;;  %vm3818_vm13 = vcmp.gt.s32.totalorder %v3817_v15, 0 }
 0x45a   : > { %v2999_v20 = vxor.u32 2147483648, %v2998_v48  ;;  %v3101_v47 = vadd.s32 %v3100_v60, %v3090_v38  ;;  %v3021_v35 = vadd.s32 3, %v3004_v45  ;;  %v3071_v63 = vsel %vm3065_vm6, %v3068_v61, %v3070_v13 }
 0x45b   : > { %v3123_v42 = vadd.s32 %v3122_v28, %v3112_v0  ;;  %v3819_v55 = vsel %vm3818_vm13, %v3817_v15, 0  ;;  %v10195_v23 = vadd.s32 %v3117_v1, %v3113_v51  ;;  %v3814_v59 = vand.u32 8388607, %v3807_v11 }
 0x45c   : > { %v3000_v31 = vsel %vm2879_vm1, %v2999_v20, %v2998_v48  ;;  %v10193_v19 = vadd.s32 %v3101_v47, %v3092_v54  ;;  %v3821_v16 = vand.u32 31, %v3819_v55  ;;  %v3125_v13 = vmul.u32 %v10092_v9, %v3071_v63 }
 0x45d   : > { %v3003_v8 = vsel %vm10125_vm7, %v9830_v27, %v3000_v31  ;;  %v3124_v17 = vadd.s32 %v3123_v42, %v3114_v39  ;;  %v10204_v30 = vand.u32 3, %v3021_v35  ;;  %v3815_v41 = vor.u32 8388608, %v3814_v59 }
 0x45e   : > { %v3005_v53 = vmul.f32 %v3003_v8, %v3003_v8  ;;  %vm3127_vm15 = vc.u32 %v10193_v19, %v10195_v23  ;;  %v10202_v50 = vsub.s32 32, %v3821_v16  ;;  %v10206_v1 = vshrl.u32 %v3819_v55, 5 }
 0x45f   : > { %v3128_v58 = vadd.s32 1, %v3124_v17  ;;  %v3824_v46 = vshll.u32 %v11359_v3, %v3821_v16  ;;  %v3827_v38 = vshll.u32 %v11360_v56, %v3821_v16  ;;  %v3830_v57 = vshll.u32 %v11361_v52, %v3821_v16 }
 0x460   : > { %v3006_v45 = vmul.f32 -0.001358992, %v3005_v53  ;;  %v3013_v61 = vmul.f32 -0.00019511016, %v3005_v53  ;;  %v3828_v29 = vshrl.u32 %v11361_v52, %v10202_v50  ;;  %v3831_v62 = vshrl.u32 %v11362_v21, %v10202_v50 }
 0x461   : > { %v3129_v34 = vsel %vm3127_vm15, %v3128_v58, %v3124_v17  ;;  %v3834_v9 = vshrl.u32 %v11364_v43, %v10202_v50  ;;  %v3825_v48 = vshrl.u32 %v11360_v56, %v10202_v50  ;;  %v3833_v22 = vshll.u32 %v11362_v21, %v3821_v16 }
 0x462   : > { %v3007_v49 = vadd.f32 0.041655596, %v3006_v45  ;;  %v3014_v6 = vadd.f32 0.008332121, %v3013_v61  ;;  %v3130_v51 = vadd.s32 %v3129_v34, %v3125_v13  ;;  %v3837_v15 = vshrl.u32 %v11365_v10, %v10202_v50 }
 0x463   : > { %v10224_v20 = vor.u32 %v3828_v29, %v3827_v38  ;;  %v10226_v54 = vor.u32 %v3831_v62, %v3830_v57  ;;  %v3835_v47 = vor.u32 %v3834_v9, %v3833_v22  ;;  %v3836_v39 = vshll.u32 %v11364_v43, %v3821_v16 }
 0x464   : > { %v3008_v33 = vmul.f32 %v3007_v49, %v3005_v53  ;;  %v3015_v4 = vmul.f32 %v3014_v6, %v3005_v53  ;;  %v3131_v32 = vadd.s32 536870912, %v3130_v51  ;;  %vm3023_vm1 = vcmp.lt.s32.totalorder %v10204_v30, 2 }
 0x465   : > { %vm3024_vm3 = vcmp.eq.s32.totalorder %v10204_v30, 0  ;;  %vm3020_vm4 = vweird.f32 %v9830_v27  ;;  %vm3027_vm7 = vcmp.eq.s32.totalorder %v10204_v30, 2  ;;  %v10234_v63 = vor.u32 %v3825_v48, %v3824_v46 }
 0x466   : > { %v3009_v60 = vadd.f32 -0.4999988, %v3008_v33  ;;  %v3016_v0 = vadd.f32 -0.16666654, %v3015_v4  ;;  %v10220_v28 = vshrl.u32 %v3131_v32, 30  ;;  %v3838_v55 = vor.u32 %v3837_v15, %v3836_v39 }
 0x467   : > { %vm3839_vm5 = vcmp.lt.s32.totalorder %v10206_v1, 1  ;;  %vm3842_vm6 = vcmp.lt.s32.totalorder %v10206_v1, 4  ;;  %v10244_v45 = vshll.u32 %v3815_v41, 8  ;;  %v608_v61 = vmul.f32 %v9218_v7, %v11385_v24 }
 0x468   : > { %v3010_v42 = vmul.f32 %v3009_v60, %v3005_v53  ;;  %v3017_v31 = vmul.f32 %v3016_v0, %v3005_v53  ;;  %v3133_v35 = vshll.u32 %v10220_v28, 30  ;;  %v3848_v53 = vsel %vm3842_vm6, %v3835_v47, 920167782 }
 0x469   : > { %v3851_v58 = vsel %vm3839_vm5, %v10224_v20, %v10226_v54  ;;  %vm3840_vm9 = vcmp.lt.s32.totalorder %v10206_v1, 2  ;;  %vm3841_vm10 = vcmp.lt.s32.totalorder %v10206_v1, 3  ;;  %v3847_v6 = vsel %vm3839_vm5, %v10234_v63, %v10224_v20  ;;  %v11454_v1 = vld [vmem:[#allocation54_spill] sm:$0xff] }
 0x46a   : > { %v3011_v17 = vadd.f32 1.0, %v3010_v42  ;;  %v3018_v59 = vadd.f32 1.0, %v3017_v31  ;;  %v3134_v16 = vsub.s32 %v3130_v51, %v3133_v35  ;;  %v3852_v51 = vsel %vm3842_vm6, %v3838_v55, 1326507024 }
 0x46b   : > { %v3853_v62 = vsel %vm3841_vm10, %v3835_v47, %v3852_v51  ;;  %v640_v32 = vadd.f32 %v608_v61, %v10086_v14  ;;  %v3856_v48 = vand.u32 65535, %v10244_v45  ;;  %v3857_v15 = vshrl.u32 %v10244_v45, 16  ;;  %v5910_v47 = vpop.f32.mrf.mxu2 }
 0x46c   : > { %v3019_v13 = vmul.f32 %v3018_v59, %v3003_v8  ;;  %v3028_v34 = vxor.u32 2147483648, %v3011_v17  ;;  %vm3135_vm8 = vcmp.lt.s32.totalorder %v3134_v16, 0  ;;  %v3136_v49 = vsub.s32 0, %v3134_v16 }
 0x46d   : > { %v3849_v8 = vsel %vm3841_vm10, %v10226_v54, %v3848_v53  ;;  %v3854_v4 = vsel %vm3840_vm9, %v3851_v58, %v3853_v62  ;;  %v10277_v35 = vadd.f32 %v8130_v36, %v640_v32  ;;  %v3126_v53 = vadd.s32 %v10195_v23, %v10193_v19 }
 0x46e   : > { %v3025_v41 = vxor.u32 2147483648, %v3019_v13  ;;  %v3137_v29 = vsel %vm3135_vm8, %v3136_v49, %v3134_v16  ;;  %v3029_v9 = vsel %vm3027_vm7, %v3028_v34, %v3019_v13  ;;  %v3858_v38 = vand.u32 65535, %v3854_v4 }
 0x46f   : > { %v3138_v33 = vclz %v3137_v29  ;;  %v3859_v57 = vshrl.u32 %v3854_v4, 16  ;;  %v3850_v0 = vsel %vm3840_vm9, %v3847_v6, %v3849_v8  ;;  %v3823_v19 = vshrl.u32 %v11359_v3, %v10202_v50 }
 0x470   : > { %v3026_v46 = vsel %vm3024_vm3, %v3011_v17, %v3025_v41  ;;  %v3862_v31 = vmul.u32 %v3858_v38, %v3857_v15  ;;  %v3860_v55 = vmul.u32 %v3858_v38, %v3856_v48  ;;  %v3880_v59 = vand.u32 65535, %v3850_v0 }
 0x471   : > { %v3030_v22 = vsel %vm3023_vm1, %v3026_v46, %v3029_v9  ;;  %v6435_v60 = vadd.s32 4294967294, %v3138_v33  ;;  %v3861_v39 = vmul.u32 %v3859_v57, %v3856_v48  ;;  %v3863_v27 = vmul.u32 %v3859_v57, %v3857_v15 }
 0x472   : > { %v3031_v14 = vsel %vm3020_vm4, nan, %v3030_v22  ;;  %v3866_v13 = vshll.u32 %v3862_v31, 16  ;;  %v3881_v49 = vshrl.u32 %v3850_v0, 16  ;;  %v3884_v9 = vmul.u32 %v3880_v59, %v3857_v15 }
 0x473   : > { %v5962_v42 = vmul.f32 %v5910_v47, %v3031_v14  ;;  %vm6436_vm11 = vcmp.lt.s32.totalorder %v6435_v60, 0  ;;  %v3864_v17 = vshll.u32 %v3861_v39, 16  ;;  %v3156_v32 = vsub.s32 4, %v10220_v28 }
 0x474   : > { %v3141_v30 = vsel %vm6436_vm11, 0, %v6435_v60  ;;  %v3883_v62 = vmul.u32 %v3881_v49, %v3856_v48  ;;  %v3882_v38 = vmul.u32 %v3880_v59, %v3856_v48  ;;  %v3844_v22 = vsel %vm3842_vm6, %v10226_v54, 2102212464 }
 0x475   : > { %6164 = vst [vmem:[%s7681_s17 + $0x70] sm:$0xff] %v5962_v42  ;;  %v3142_v58 = vsub.s32 32, %v3141_v30  ;;  %v3146_v61 = vsub.s32 4294967266, %v3141_v30  ;;  %vm3868_vm12 = vc.u32 %v3860_v55, %v3864_v17  ;;  %v3870_v34 = vadd.s32 %v3864_v17, %v3860_v55 }
 0x476   : > { %v3143_v6 = vshll.u32 %v3134_v16, %v3141_v30  ;;  %v3869_v29 = vsel %vm3868_vm12, 1, %v11363_v44  ;;  %v3886_v16 = vshll.u32 %v3883_v62, 16  ;;  %v3865_v60 = vshrl.u32 %v3861_v39, 16 }
 0x477   : > { %v3144_v51 = vshrl.u32 %v3126_v53, %v3142_v58  ;;  %v3147_v41 = vadd.s32 127, %v3146_v61  ;;  %v3871_v8 = vadd.s32 %v3869_v29, %v3863_v27  ;;  %vm3872_vm14 = vc.u32 %v3870_v34, %v3866_v13 }
 0x478   : > { %v3873_v23 = vsel %vm3872_vm14, 1, %v11363_v44  ;;  %v3885_v0 = vmul.u32 %v3881_v49, %v3857_v15  ;;  %v3888_v47 = vshll.u32 %v3884_v9, 16  ;;  %vm3890_vm2 = vc.u32 %v3882_v38, %v3886_v16 }
 0x479   : > { %v3145_v33 = vor.u32 %v3144_v51, %v3143_v6  ;;  %v3148_v4 = vshll.u32 %v3147_v41, 23  ;;  %v3875_v46 = vadd.s32 %v3873_v23, %v3871_v8  ;;  %v3892_v42 = vadd.s32 %v3886_v16, %v3882_v38  ;;  %v11451_v6 = vld [vmem:[#allocation29_spill] sm:$0xff] }
 0x47a   : > { %v3891_v55 = vsel %vm3890_vm2, 1, %v11363_v44  ;;  %v3965_v17 = vand.u32 2139095040, %v10277_v35  ;;  %vm3034_vm13 = vcmp.lt.s32.totalorder %v10020_v18, 0  ;;  %v3843_v48 = vsel %vm3839_vm5, %v3823_v19, %v10234_v63  ;;  %v11452_v51 = vld [vmem:[#allocation53_spill] sm:$0xff] }
 0x47b   : > { %v3149_v57 = vor.u32 4788187, %v3148_v4  ;;  %v3152_v14 = vcvt.s32.f32 %v3145_v33  ;;  %v3876_v50 = vadd.s32 %v3875_v46, %v3865_v60  ;;  %v3893_v59 = vadd.s32 %v3891_v55, %v3885_v0  ;;  %v11453_v0 = vld [vmem:[#allocation30_spill] sm:$0xff] }
 0x47c   : > { %vm3894_vm15 = vc.u32 %v3892_v42, %v3888_v47  ;;  %v3867_v15 = vshrl.u32 %v3862_v31, 16  ;;  %v3966_v53 = vshrl.u32 %v3965_v17, 23  ;;  %v3157_v58 = vsel %vm3034_vm13, %v3156_v32, %v10220_v28 }
 0x47d   : > { %v3150_v30 = vand.u32 2147483647, %v3149_v57  ;;  %v3895_v39 = vsel %vm3894_vm15, 1, %v11363_v44  ;;  %v3845_v61 = vsel %vm3841_vm10, %v10224_v20, %v3844_v22  ;;  %v3887_v27 = vshrl.u32 %v3883_v62, 16 }
 0x47e   : > { %v3897_v13 = vadd.s32 %v3895_v39, %v3893_v59  ;;  %v10303_v49 = vadd.s32 %v3876_v50, %v3867_v15  ;;  %v6452_v63 = vadd.s32 4294967169, %v3966_v53  ;;  %v10307_v31 = vadd.f32 %v11452_v51, %v11451_v6 }
 0x47f   : > { %v3153_v54 = vmul.f32 %v3152_v14, %v3150_v30  ;;  %vm3033_vm1 = vcmp.le.f32.partialorder %v3032_v2, 0.7853982  ;;  %v3889_v41 = vshrl.u32 %v3884_v9, 16  ;;  %v10313_v20 = vadd.s32 %v3892_v42, %v3888_v47 }
 0x480   : > { %v3898_v29 = vadd.s32 %v3897_v13, %v3887_v27  ;;  %v3159_v8 = vsel %vm3033_vm1, 0, %v3157_v58  ;;  %v3972_v62 = vadd.s32 1, %v6452_v63  ;;  %v3846_v4 = vsel %vm3840_vm9, %v3843_v48, %v3845_v61 }
 0x481   : > { %v3154_v34 = vxor.u32 2147483648, %v3153_v54  ;;  %vm3902_vm3 = vc.u32 %v10303_v49, %v10313_v20  ;;  %v3176_v2 = vadd.s32 3, %v3159_v8  ;;  %v3962_v32 = vand.u32 2147483647, %v10277_v35 }
 0x482   : > { %v3899_v19 = vadd.s32 %v3898_v29, %v3889_v41  ;;  %vm3973_vm4 = vcmp.gt.s32.totalorder %v3972_v62, 0  ;;  %v3900_v57 = vmul.u32 %v10244_v45, %v3846_v4  ;;  %v10324_v14 = vadd.f32 %v11454_v1, %v11453_v0 }
 0x483   : > { %v3155_v28 = vsel %vm3034_vm13, %v3154_v34, %v3153_v54  ;;  %v3974_v46 = vsel %vm3973_vm4, %v3972_v62, 0  ;;  %v3177_v55 = vand.u32 3, %v3176_v2  ;;  %v3969_v54 = vand.u32 8388607, %v3962_v32 }
 0x484   : > { %v3158_v33 = vsel %vm3033_vm1, %v10020_v18, %v3155_v28  ;;  %v3903_v9 = vadd.s32 1, %v3899_v19  ;;  %v3976_v22 = vand.u32 31, %v3974_v46  ;;  %v10330_v15 = vshrl.u32 %v3974_v46, 5 }
 0x485   : > { %v3160_v23 = vmul.f32 %v3158_v33, %v3158_v33  ;;  %vm3179_vm7 = vcmp.eq.s32.totalorder %v3177_v55, 0  ;;  %vm3178_vm5 = vcmp.lt.s32.totalorder %v3177_v55, 2  ;;  %vm3182_vm10 = vcmp.eq.s32.totalorder %v3177_v55, 2 }
 0x486   : > { %v3904_v60 = vsel %vm3902_vm3, %v3903_v9, %v3899_v19  ;;  %v10326_v50 = vsub.s32 32, %v3976_v22  ;;  %v3979_v13 = vshll.u32 %v11359_v3, %v3976_v22  ;;  %v3982_v34 = vshll.u32 %v11360_v56, %v3976_v22 }
 0x487   : > { %v3161_v38 = vmul.f32 -0.001358992, %v3160_v23  ;;  %v3168_v16 = vmul.f32 -0.00019511016, %v3160_v23  ;;  %v3905_v30 = vadd.s32 %v3904_v60, %v3900_v57  ;;  %v3985_v63 = vshll.u32 %v11361_v52, %v3976_v22 }
 0x488   : > { %v3980_v45 = vshrl.u32 %v11360_v56, %v10326_v50  ;;  %v3983_v39 = vshrl.u32 %v11361_v52, %v10326_v50  ;;  %v3989_v53 = vshrl.u32 %v11364_v43, %v10326_v50  ;;  %v3986_v6 = vshrl.u32 %v11362_v21, %v10326_v50 }
 0x489   : > { %v3162_v47 = vadd.f32 0.041655596, %v3161_v38  ;;  %v3169_v42 = vadd.f32 0.008332121, %v3168_v16  ;;  %v3906_v59 = vadd.s32 536870912, %v3905_v30  ;;  %v3988_v51 = vshll.u32 %v11362_v21, %v3976_v22 }
 0x48a   : > { %v3991_v8 = vshll.u32 %v11364_v43, %v3976_v22  ;;  %v10348_v62 = vor.u32 %v3980_v45, %v3979_v13  ;;  %v10350_v4 = vor.u32 %v3983_v39, %v3982_v34  ;;  %v3992_v2 = vshrl.u32 %v11365_v10, %v10326_v50 }
 0x48b   : > { %v3163_v17 = vmul.f32 %v3162_v47, %v3160_v23  ;;  %v3170_v48 = vmul.f32 %v3169_v42, %v3160_v23  ;;  %v10338_v27 = vshrl.u32 %v3906_v59, 30  ;;  %v3990_v19 = vor.u32 %v3989_v53, %v3988_v51 }
 0x48c   : > { %v3970_v16 = vor.u32 8388608, %v3969_v54  ;;  %v10354_v57 = vor.u32 %v3986_v6, %v3985_v63  ;;  %vm3994_vm6 = vcmp.lt.s32.totalorder %v10330_v15, 1  ;;  %vm3997_vm8 = vcmp.lt.s32.totalorder %v10330_v15, 4  ;;  %v5939_v6 = vpop.f32.mrf.mxu3 }
 0x48d   : > { %v3164_v58 = vadd.f32 -0.4999988, %v3163_v17  ;;  %v3171_v61 = vadd.f32 -0.16666654, %v3170_v48  ;;  %v3908_v28 = vshll.u32 %v10338_v27, 30  ;;  %v4002_v1 = vsel %vm3994_vm6, %v10348_v62, %v10350_v4 }
 0x48e   : > { %v4003_v47 = vsel %vm3997_vm8, %v3990_v19, 920167782  ;;  %v609_v42 = vmul.f32 %v9335_v25, %v11385_v24  ;;  %vm3996_vm11 = vcmp.lt.s32.totalorder %v10330_v15, 3  ;;  %vm3995_vm12 = vcmp.lt.s32.totalorder %v10330_v15, 2 }
 0x48f   : > { %v3165_v41 = vmul.f32 %v3164_v58, %v3160_v23  ;;  %v3172_v29 = vmul.f32 %v3171_v61, %v3160_v23  ;;  %v3909_v38 = vsub.s32 %v3905_v30, %v3908_v28  ;;  %v3993_v23 = vor.u32 %v3992_v2, %v3991_v8 }
 0x490   : > { %v4004_v54 = vsel %vm3996_vm11, %v10354_v57, %v4003_v47  ;;  %v4006_v53 = vsel %vm3994_vm6, %v10350_v4, %v10354_v57  ;;  %vm3175_vm14 = vweird.f32 %v10020_v18  ;;  %v641_v34 = vadd.f32 %v609_v42, %v10307_v31 }
 0x491   : > { %v3166_v9 = vadd.f32 1.0, %v3165_v41  ;;  %v3173_v46 = vadd.f32 1.0, %v3172_v29  ;;  %vm3910_vm9 = vcmp.lt.s32.totalorder %v3909_v38, 0  ;;  %v3911_v0 = vsub.s32 0, %v3909_v38 }
 0x492   : > { %v4005_v39 = vsel %vm3995_vm12, %v4002_v1, %v4004_v54  ;;  %v4007_v58 = vsel %vm3997_vm8, %v3993_v23, 1326507024  ;;  %v3901_v31 = vadd.s32 %v10313_v20, %v10303_v49  ;;  %vm3809_vm13 = vcmp.lt.s32.totalorder %v10090_v12, 0 }
 0x493   : > { %v3174_v22 = vmul.f32 %v3173_v46, %v3158_v33  ;;  %v3183_v60 = vxor.u32 2147483648, %v3166_v9  ;;  %v3912_v17 = vsel %vm3910_vm9, %v3911_v0, %v3909_v38  ;;  %v10367_v33 = vshll.u32 %v3970_v16, 8 }
 0x494   : > { %v3913_v59 = vclz %v3912_v17  ;;  %v4008_v51 = vsel %vm3996_vm11, %v3990_v19, %v4007_v58  ;;  %v4035_v29 = vand.u32 65535, %v4005_v39  ;;  %v4036_v18 = vshrl.u32 %v4005_v39, 16 }
 0x495   : > { %v3180_v30 = vxor.u32 2147483648, %v3174_v22  ;;  %v3184_v48 = vsel %vm3182_vm10, %v3183_v60, %v3174_v22  ;;  %v4011_v41 = vand.u32 65535, %v10367_v33  ;;  %v4009_v8 = vsel %vm3995_vm12, %v4006_v53, %v4008_v51 }
 0x496   : > { %v6450_v13 = vadd.s32 4294967294, %v3913_v59  ;;  %v4012_v2 = vshrl.u32 %v10367_v33, 16  ;;  %v4014_v46 = vshrl.u32 %v4009_v8, 16  ;;  %v3978_v22 = vshrl.u32 %v11359_v3, %v10326_v50  ;;  %v11458_v50 = vld [vmem:[#allocation35_spill] sm:$0xff] }
 0x497   : > { %v3181_v45 = vsel %vm3179_vm7, %v3166_v9, %v3180_v30  ;;  %v4013_v9 = vand.u32 65535, %v4009_v8  ;;  %v4038_v23 = vmul.u32 %v4036_v18, %v4011_v41  ;;  %v10398_v1 = vadd.f32 %v8130_v36, %v641_v34 }
 0x498   : > { %v3185_v61 = vsel %vm3178_vm5, %v3181_v45, %v3184_v48  ;;  %vm6451_vm2 = vcmp.lt.s32.totalorder %v6450_v13, 0  ;;  %v4016_v60 = vmul.u32 %v4014_v46, %v4011_v41  ;;  %v4039_v17 = vmul.u32 %v4035_v29, %v4012_v2 }
 0x499   : > { %v3186_v63 = vsel %vm3175_vm14, nan, %v3185_v61  ;;  %v3916_v55 = vsel %vm6451_vm2, 0, %v6450_v13  ;;  %v4017_v0 = vmul.u32 %v4013_v9, %v4012_v2  ;;  %v3931_v48 = vsub.s32 4, %v10338_v27 }
 0x49a   : > { %v5963_v28 = vmul.f32 %v5939_v6, %v3186_v63  ;;  %v3917_v16 = vsub.s32 32, %v3916_v55  ;;  %v3921_v19 = vsub.s32 4294967266, %v3916_v55  ;;  %v3918_v47 = vshll.u32 %v3909_v38, %v3916_v55 }
 0x49b   : > { %v4015_v49 = vmul.u32 %v4013_v9, %v4011_v41  ;;  %v4019_v20 = vshll.u32 %v4016_v60, 16  ;;  %v4037_v59 = vmul.u32 %v4035_v29, %v4011_v41  ;;  %v4018_v39 = vmul.u32 %v4014_v46, %v4012_v2 }
 0x49c   : > { %6165 = vst [vmem:[%s7681_s17 + $0x78] sm:$0xff] %v5963_v28  ;;  %v3919_v42 = vshrl.u32 %v3901_v31, %v3917_v16  ;;  %v3922_v30 = vadd.s32 127, %v3921_v19  ;;  %v4041_v53 = vshll.u32 %v4038_v23, 16  ;;  %vm10403_vm15 = vcmp.le.f32.partialorder %v3807_v11, 0.7853982 }
 0x49d   : > { %v4021_v58 = vshll.u32 %v4017_v0, 16  ;;  %vm4023_vm1 = vc.u32 %v4015_v49, %v4019_v20  ;;  %v4025_v38 = vadd.s32 %v4019_v20, %v4015_v49  ;;  %v4040_v61 = vmul.u32 %v4036_v18, %v4012_v2 }
 0x49e   : > { %v3920_v54 = vor.u32 %v3919_v42, %v3918_v47  ;;  %v3923_v45 = vshll.u32 %v3922_v30, 23  ;;  %v4024_v34 = vsel %vm4023_vm1, 1, %v11363_v44  ;;  %v4043_v63 = vshll.u32 %v4039_v17, 16 }
 0x49f   : > { %vm4045_vm3 = vc.u32 %v4037_v59, %v4041_v53  ;;  %v4026_v6 = vadd.s32 %v4024_v34, %v4018_v39  ;;  %vm4027_vm4 = vc.u32 %v4025_v38, %v4021_v58  ;;  %v4047_v41 = vadd.s32 %v4041_v53, %v4037_v59  ;;  %v11457_v34 = vld [vmem:[#allocation43_spill] sm:$0xff] }
 0x4a0   : > { %v3924_v13 = vor.u32 4788187, %v3923_v45  ;;  %v4046_v51 = vsel %vm4045_vm3, 1, %v11363_v44  ;;  %v3927_v28 = vcvt.s32.f32 %v3920_v54  ;;  %v4028_v11 = vsel %vm4027_vm4, 1, %v11363_v44 }
 0x4a1   : > { %v4048_v8 = vadd.s32 %v4046_v51, %v4040_v61  ;;  %v3999_v55 = vsel %vm3997_vm8, %v10354_v57, 2102212464  ;;  %v4020_v18 = vshrl.u32 %v4016_v60, 16  ;;  %v4030_v2 = vadd.s32 %v4028_v11, %v4026_v6 }
 0x4a2   : > { %v3925_v29 = vand.u32 2147483647, %v3924_v13  ;;  %vm4049_vm7 = vc.u32 %v4047_v41, %v4043_v63  ;;  %v3932_v46 = vsel %vm3809_vm13, %v3931_v48, %v10338_v27  ;;  %v4120_v16 = vand.u32 2139095040, %v10398_v1 }
 0x4a3   : > { %v4050_v31 = vsel %vm4049_vm7, 1, %v11363_v44  ;;  %v4022_v19 = vshrl.u32 %v4017_v0, 16  ;;  %v4031_v47 = vadd.s32 %v4030_v2, %v4020_v18  ;;  %v4042_v42 = vshrl.u32 %v4038_v23, 16 }
 0x4a4   : > { %v3928_v9 = vmul.f32 %v3927_v28, %v3925_v29  ;;  %v4052_v30 = vadd.s32 %v4050_v31, %v4048_v8  ;;  %v3998_v57 = vsel %vm3994_vm6, %v3978_v22, %v10348_v62  ;;  %v4000_v60 = vsel %vm3996_vm11, %v10350_v4, %v3999_v55 }
 0x4a5   : > { %v4121_v20 = vshrl.u32 %v4120_v16, 23  ;;  %v10424_v59 = vadd.s32 %v4031_v47, %v4022_v19  ;;  %v4044_v27 = vshrl.u32 %v4039_v17, 16  ;;  %v4117_v54 = vand.u32 2147483647, %v10398_v1 }
 0x4a6   : > { %v3929_v49 = vxor.u32 2147483648, %v3928_v9  ;;  %v4053_v48 = vadd.s32 %v4052_v30, %v4042_v42  ;;  %v3934_v0 = vsel %vm10403_vm15, 0, %v3932_v46  ;;  %v10431_v45 = vadd.s32 %v4047_v41, %v4043_v63 }
 0x4a7   : > { %v6455_v62 = vadd.s32 4294967169, %v4121_v20  ;;  %v4001_v22 = vsel %vm3995_vm12, %v3998_v57, %v4000_v60  ;;  %v610_v58 = vmul.f32 %v9468_v26, %v11385_v24  ;;  %v3951_v38 = vadd.s32 3, %v3934_v0 }
 0x4a8   : > { %v3930_v23 = vsel %vm3809_vm13, %v3929_v49, %v3928_v9  ;;  %v4054_v17 = vadd.s32 %v4053_v48, %v4044_v27  ;;  %vm4057_vm5 = vc.u32 %v10424_v59, %v10431_v45  ;;  %v4124_v13 = vand.u32 8388607, %v4117_v54 }
 0x4a9   : > { %v3933_v4 = vsel %vm10403_vm15, %v10090_v12, %v3930_v23  ;;  %v4127_v53 = vadd.s32 1, %v6455_v62  ;;  %v10446_v63 = vadd.f32 %v11458_v50, %v11457_v34  ;;  %v4055_v51 = vmul.u32 %v10367_v33, %v4001_v22 }
 0x4aa   : > { %v3935_v39 = vmul.f32 %v3933_v4, %v3933_v4  ;;  %v4058_v61 = vadd.s32 1, %v4054_v17  ;;  %v3952_v24 = vand.u32 3, %v3951_v38  ;;  %v4125_v55 = vor.u32 8388608, %v4124_v13 }
 0x4ab   : > { %vm4128_vm6 = vcmp.gt.s32.totalorder %v4127_v53, 0  ;;  %v642_v31 = vadd.f32 %v610_v58, %v10324_v14  ;;  %vm3950_vm11 = vweird.f32 %v10090_v12  ;;  %vm3964_vm12 = vcmp.lt.s32.totalorder %v10277_v35, 0 }
 0x4ac   : > { %v3936_v15 = vmul.f32 -0.001358992, %v3935_v39  ;;  %v3943_v6 = vmul.f32 -0.00019511016, %v3935_v39  ;;  %v4059_v41 = vsel %vm4057_vm5, %v4058_v61, %v4054_v17  ;;  %v4129_v29 = vsel %vm4128_vm6, %v4127_v53, 0 }
 0x4ad   : > { %v4060_v8 = vadd.s32 %v4059_v41, %v4055_v51  ;;  %v4131_v18 = vand.u32 31, %v4129_v29  ;;  %v10455_v33 = vadd.f32 %v8130_v36, %v642_v31  ;;  %vm3954_vm8 = vcmp.eq.s32.totalorder %v3952_v24, 0 }
 0x4ae   : > { %v3937_v28 = vadd.f32 0.041655596, %v3936_v15  ;;  %v3944_v11 = vadd.f32 0.008332121, %v3943_v6  ;;  %vm3957_vm9 = vcmp.eq.s32.totalorder %v3952_v24, 2  ;;  %v10457_v30 = vshrl.u32 %v4129_v29, 5 }
 0x4af   : > { %v4061_v46 = vadd.s32 536870912, %v4060_v8  ;;  %v10450_v16 = vsub.s32 32, %v4131_v18  ;;  %v10463_v14 = vshll.u32 %v4125_v55, 8  ;;  %vm3953_vm10 = vcmp.lt.s32.totalorder %v3952_v24, 2 }
 0x4b0   : > { %v3938_v2 = vmul.f32 %v3937_v28, %v3935_v39  ;;  %v3945_v9 = vmul.f32 %v3944_v11, %v3935_v39  ;;  %v4134_v36 = vshll.u32 %v11359_v3, %v4131_v18  ;;  %v4137_v48 = vshll.u32 %v11360_v56, %v4131_v18 }
 0x4b1   : > { %v10452_v42 = vshrl.u32 %v4061_v46, 30  ;;  %v4135_v49 = vshrl.u32 %v11360_v56, %v10450_v16  ;;  %v4138_v57 = vshrl.u32 %v11361_v52, %v10450_v16  ;;  %v4140_v23 = vshll.u32 %v11361_v52, %v4131_v18 }
 0x4b2   : > { %v3939_v19 = vadd.f32 -0.4999988, %v3938_v2  ;;  %v3946_v47 = vadd.f32 -0.16666654, %v3945_v9  ;;  %v4143_v0 = vshll.u32 %v11362_v21, %v4131_v18  ;;  %v4144_v62 = vshrl.u32 %v11364_v43, %v10450_v16 }
 0x4b3   : > { %v4063_v27 = vshll.u32 %v10452_v42, 30  ;;  %v10477_v58 = vor.u32 %v4135_v49, %v4134_v36  ;;  %v10479_v38 = vor.u32 %v4138_v57, %v4137_v48  ;;  %v4147_v13 = vshrl.u32 %v11365_v10, %v10450_v16 }
 0x4b4   : > { %v3940_v60 = vmul.f32 %v3939_v19, %v3935_v39  ;;  %v3947_v20 = vmul.f32 %v3946_v47, %v3935_v39  ;;  %v4141_v39 = vshrl.u32 %v11362_v21, %v10450_v16  ;;  %v4145_v61 = vor.u32 %v4144_v62, %v4143_v0 }
 0x4b5   : > { %v10473_v53 = vsub.s32 %v4060_v8, %v4063_v27  ;;  %v4056_v6 = vadd.s32 %v10431_v45, %v10424_v59  ;;  %v4146_v51 = vshll.u32 %v11364_v43, %v4131_v18  ;;  %v4272_v41 = vand.u32 2147483647, %v10455_v33  ;;  %v5855_v18 = vpop.f32.mrf.mxu0 }
 0x4b6   : > { %v3941_v22 = vadd.f32 1.0, %v3940_v60  ;;  %v3948_v17 = vadd.f32 1.0, %v3947_v20  ;;  %v4275_v29 = vand.u32 2139095040, %v10455_v33  ;;  %v4166_v8 = vand.u32 65535, %v10463_v14 }
 0x4b7   : > { %vm4065_vm14 = vcmp.lt.s32.totalorder %v10473_v53, 0  ;;  %v4066_v15 = vsub.s32 0, %v10473_v53  ;;  %v4148_v2 = vor.u32 %v4147_v13, %v4146_v51  ;;  %vm4149_vm2 = vcmp.lt.s32.totalorder %v10457_v30, 1 }
 0x4b8   : > { %v3949_v34 = vmul.f32 %v3948_v17, %v3933_v4  ;;  %v3958_v50 = vxor.u32 2147483648, %v3941_v22  ;;  %v10492_v4 = vor.u32 %v4141_v39, %v4140_v23  ;;  %vm4152_vm13 = vcmp.lt.s32.totalorder %v10457_v30, 4 }
 0x4b9   : > { %v4067_v11 = vsel %vm4065_vm14, %v4066_v15, %v10473_v53  ;;  %vm10501_vm15 = vcmp.le.f32.partialorder %v3962_v32, 0.7853982  ;;  %v4157_v46 = vsel %vm4149_vm2, %v10477_v58, %v10479_v38  ;;  %v4158_v31 = vsel %vm4152_vm13, %v4145_v61, 920167782 }
 0x4ba   : > { %v3955_v28 = vxor.u32 2147483648, %v3949_v34  ;;  %v4068_v55 = vclz %v4067_v11  ;;  %v3959_v45 = vsel %vm3957_vm9, %v3958_v50, %v3949_v34  ;;  %v4086_v49 = vsub.s32 4, %v10452_v42 }
 0x4bb   : > { %vm4151_vm1 = vcmp.lt.s32.totalorder %v10457_v30, 3  ;;  %vm4150_vm3 = vcmp.lt.s32.totalorder %v10457_v30, 2  ;;  %v4167_v60 = vshrl.u32 %v10463_v14, 16  ;;  %v4161_v27 = vsel %vm4149_vm2, %v10479_v38, %v10492_v4 }
 0x4bc   : > { %v3956_v59 = vsel %vm3954_vm8, %v3941_v22, %v3955_v28  ;;  %v6453_v47 = vadd.s32 4294967294, %v4068_v55  ;;  %v4159_v57 = vsel %vm4151_vm1, %v10492_v4, %v4158_v31  ;;  %v4162_v36 = vsel %vm4152_vm13, %v4148_v2, 1326507024 }
 0x4bd   : > { %v3960_v19 = vsel %vm3953_vm10, %v3956_v59, %v3959_v45  ;;  %v4160_v24 = vsel %vm4150_vm3, %v4157_v46, %v4159_v57  ;;  %v4087_v22 = vsel %vm3964_vm12, %v4086_v49, %v10452_v42  ;;  %v4163_v17 = vsel %vm4151_vm1, %v4145_v61, %v4162_v36 }
 0x4be   : > { %v3961_v32 = vsel %vm3950_vm11, nan, %v3960_v19  ;;  %vm6454_vm4 = vcmp.lt.s32.totalorder %v6453_v47, 0  ;;  %v4190_v48 = vand.u32 65535, %v4160_v24  ;;  %v4191_v23 = vshrl.u32 %v4160_v24, 16 }
 0x4bf   : > { %v5968_v20 = vmul.f32 %v5855_v18, %v3961_v32  ;;  %v4071_v12 = vsel %vm6454_vm4, 0, %v6453_v47  ;;  %v4164_v13 = vsel %vm4150_vm3, %v4161_v27, %v4163_v17  ;;  %v4133_v55 = vshrl.u32 %v11359_v3, %v10450_v16 }
 0x4c0   : > { %v4072_v0 = vsub.s32 32, %v4071_v12  ;;  %v4076_v62 = vsub.s32 4294967266, %v4071_v12  ;;  %v4073_v39 = vshll.u32 %v10473_v53, %v4071_v12  ;;  %v4193_v34 = vmul.u32 %v4191_v23, %v4166_v8 }
 0x4c1   : > { %6170 = vst [vmem:[%s7681_s17 + $0xa0] sm:$0xff] %v5968_v20  ;;  %v4194_v50 = vmul.u32 %v4190_v48, %v4167_v60  ;;  %v4168_v28 = vand.u32 65535, %v4164_v13  ;;  %v4169_v11 = vshrl.u32 %v4164_v13, 16  ;;  %v4192_v2 = vmul.u32 %v4190_v48, %v4166_v8 }
 0x4c2   : > { %v4074_v15 = vshrl.u32 %v4056_v6, %v4072_v0  ;;  %v4077_v51 = vadd.s32 127, %v4076_v62  ;;  %v4196_v59 = vshll.u32 %v4193_v34, 16  ;;  %v4276_v42 = vshrl.u32 %v4275_v29, 23 }
 0x4c3   : > { %v4089_v53 = vsel %vm10501_vm15, 0, %v4087_v22  ;;  %v4171_v61 = vmul.u32 %v4169_v11, %v4166_v8  ;;  %v4172_v46 = vmul.u32 %v4168_v28, %v4167_v60  ;;  %v4195_v31 = vmul.u32 %v4191_v23, %v4167_v60 }
 0x4c4   : > { %v4075_v45 = vor.u32 %v4074_v15, %v4073_v39  ;;  %v4078_v18 = vshll.u32 %v4077_v51, 23  ;;  %v4198_v19 = vshll.u32 %v4194_v50, 16  ;;  %vm4200_vm7 = vc.u32 %v4192_v2, %v4196_v59 }
 0x4c5   : > { %v4170_v47 = vmul.u32 %v4168_v28, %v4166_v8  ;;  %v4173_v49 = vmul.u32 %v4169_v11, %v4167_v60  ;;  %v4174_v32 = vshll.u32 %v4171_v61, 16  ;;  %v4176_v20 = vshll.u32 %v4172_v46, 16 }
 0x4c6   : > { %v4079_v6 = vor.u32 4788187, %v4078_v18  ;;  %v4082_v57 = vcvt.s32.f32 %v4075_v45  ;;  %v4201_v16 = vsel %vm4200_vm7, 1, %v11363_v44  ;;  %v4202_v24 = vadd.s32 %v4196_v59, %v4192_v2  ;;  %v11462_v2 = vld [vmem:[#allocation36_spill] sm:$0xff] }
 0x4c7   : > { %vm4178_vm5 = vc.u32 %v4170_v47, %v4174_v32  ;;  %v4180_v27 = vadd.s32 %v4174_v32, %v4170_v47  ;;  %v4203_v12 = vadd.s32 %v4201_v16, %v4195_v31  ;;  %v4153_v36 = vsel %vm4149_vm2, %v4133_v55, %v10477_v58  ;;  %v11461_v55 = vld [vmem:[#allocation44_spill] sm:$0xff] }
 0x4c8   : > { %v4080_v29 = vand.u32 2147483647, %v4079_v6  ;;  %v4154_v48 = vsel %vm4152_vm13, %v10492_v4, 2102212464  ;;  %v4179_v8 = vsel %vm4178_vm5, 1, %v11363_v44  ;;  %vm4204_vm6 = vc.u32 %v4202_v24, %v4198_v19 }
 0x4c9   : > { %v4181_v23 = vadd.s32 %v4179_v8, %v4173_v49  ;;  %vm4182_vm8 = vc.u32 %v4180_v27, %v4176_v20  ;;  %v4205_v0 = vsel %vm4204_vm6, 1, %v11363_v44  ;;  %v4197_v22 = vshrl.u32 %v4193_v34, 16 }
 0x4ca   : > { %v4083_v60 = vmul.f32 %v4082_v57, %v4080_v29  ;;  %v4183_v62 = vsel %vm4182_vm8, 1, %v11363_v44  ;;  %v4207_v17 = vadd.s32 %v4205_v0, %v4203_v12  ;;  %v6458_v39 = vadd.s32 4294967169, %v4276_v42 }
 0x4cb   : > { %v4155_v58 = vsel %vm4151_vm1, %v10479_v38, %v4154_v48  ;;  %v4175_v15 = vshrl.u32 %v4171_v61, 16  ;;  %v4185_v4 = vadd.s32 %v4183_v62, %v4181_v23  ;;  %v4199_v51 = vshrl.u32 %v4194_v50, 16 }
 0x4cc   : > { %v4084_v13 = vxor.u32 2147483648, %v4083_v60  ;;  %v4208_v28 = vadd.s32 %v4207_v17, %v4197_v22  ;;  %v4282_v11 = vadd.s32 1, %v6458_v39  ;;  %v10557_v59 = vadd.f32 %v11462_v2, %v11461_v55 }
 0x4cd   : > { %v4106_v34 = vadd.s32 3, %v4089_v53  ;;  %v4177_v18 = vshrl.u32 %v4172_v46, 16  ;;  %v4186_v42 = vadd.s32 %v4185_v4, %v4175_v15  ;;  %v4156_v38 = vsel %vm4150_vm3, %v4153_v36, %v4155_v58 }
 0x4ce   : > { %v4085_v45 = vsel %vm3964_vm12, %v4084_v13, %v4083_v60  ;;  %v4209_v50 = vadd.s32 %v4208_v28, %v4199_v51  ;;  %vm4283_vm9 = vcmp.gt.s32.totalorder %v4282_v11, 0  ;;  %v10568_v47 = vadd.s32 %v4202_v24, %v4198_v19 }
 0x4cf   : > { %v4088_v31 = vsel %vm10501_vm15, %v10277_v35, %v4085_v45  ;;  %v10566_v6 = vadd.s32 %v4186_v42, %v4177_v18  ;;  %v4284_v49 = vsel %vm4283_vm9, %v4282_v11, 0  ;;  %v4279_v53 = vand.u32 8388607, %v4272_v41 }
 0x4d0   : > { %v4090_v61 = vmul.f32 %v4088_v31, %v4088_v31  ;;  %v4213_v32 = vadd.s32 1, %v4209_v50  ;;  %v4286_v46 = vand.u32 31, %v4284_v49  ;;  %v615_v9 = vmul.f32 %v9083_v5, %v11404_v37 }
 0x4d1   : > { %v4210_v30 = vmul.u32 %v10463_v14, %v4156_v38  ;;  %vm4212_vm10 = vc.u32 %v10566_v6, %v10568_v47  ;;  %v10580_v12 = vand.u32 3, %v4106_v34  ;;  %v4280_v48 = vor.u32 8388608, %v4279_v53 }
 0x4d2   : > { %v4091_v57 = vmul.f32 -0.001358992, %v4090_v61  ;;  %v4098_v20 = vmul.f32 -0.00019511016, %v4090_v61  ;;  %v4214_v16 = vsel %vm4212_vm10, %v4213_v32, %v4209_v50  ;;  %v10577_v29 = vsub.s32 32, %v4286_v46 }
 0x4d3   : > { %v647_v19 = vadd.f32 %v615_v9, %v10446_v63  ;;  %v4215_v36 = vadd.s32 %v4214_v16, %v4210_v30  ;;  %v10582_v8 = vshrl.u32 %v4284_v49, 5  ;;  %v4289_v62 = vshll.u32 %v11359_v3, %v4286_v46 }
 0x4d4   : > { %v4092_v24 = vadd.f32 0.041655596, %v4091_v57  ;;  %v4099_v27 = vadd.f32 0.008332121, %v4098_v20  ;;  %v4290_v5 = vshrl.u32 %v11360_v56, %v10577_v29  ;;  %v4293_v14 = vshrl.u32 %v11361_v52, %v10577_v29 }
 0x4d5   : > { %v4216_v0 = vadd.s32 536870912, %v4215_v36  ;;  %v4292_v63 = vshll.u32 %v11360_v56, %v4286_v46  ;;  %v4296_v22 = vshrl.u32 %v11362_v21, %v10577_v29  ;;  %v4298_v17 = vshll.u32 %v11362_v21, %v4286_v46 }
 0x4d6   : > { %v4093_v60 = vmul.f32 %v4092_v24, %v4090_v61  ;;  %v4100_v23 = vmul.f32 %v4099_v27, %v4090_v61  ;;  %v4299_v39 = vshrl.u32 %v11364_v43, %v10577_v29  ;;  %v4295_v4 = vshll.u32 %v11361_v52, %v4286_v46 }
 0x4d7   : > { %v10595_v15 = vshrl.u32 %v4216_v0, 30  ;;  %vm4109_vm11 = vcmp.eq.s32.totalorder %v10580_v12, 0  ;;  %v4291_v51 = vor.u32 %v4290_v5, %v4289_v62  ;;  %v10599_v28 = vor.u32 %v4293_v14, %v4292_v63  ;;  %v5884_v0 = vpop.f32.mrf.mxu1 }
 0x4d8   : > { %v4094_v13 = vadd.f32 -0.4999988, %v4093_v60  ;;  %v4101_v58 = vadd.f32 -0.16666654, %v4100_v23  ;;  %v4300_v11 = vor.u32 %v4299_v39, %v4298_v17  ;;  %v4302_v55 = vshrl.u32 %v11365_v10, %v10577_v29 }
 0x4d9   : > { %vm4108_vm12 = vcmp.lt.s32.totalorder %v10580_v12, 2  ;;  %v4218_v34 = vshll.u32 %v10595_v15, 30  ;;  %v10606_v18 = vadd.f32 %v7695_v40, %v647_v19  ;;  %vm4105_vm14 = vweird.f32 %v10277_v35 }
 0x4da   : > { %v4095_v2 = vmul.f32 %v4094_v13, %v4090_v61  ;;  %v4102_v45 = vmul.f32 %v4101_v58, %v4090_v61  ;;  %v4297_v42 = vor.u32 %v4296_v22, %v4295_v4  ;;  %v4301_v38 = vshll.u32 %v11364_v43, %v4286_v46 }
 0x4db   : > { %vm4304_vm2 = vcmp.lt.s32.totalorder %v10582_v8, 1  ;;  %v10611_v50 = vshll.u32 %v4280_v48, 8  ;;  %v10613_v53 = vsub.s32 %v4215_v36, %v4218_v34  ;;  %vm4307_vm13 = vcmp.lt.s32.totalorder %v10582_v8, 4 }
 0x4dc   : > { %v4096_v49 = vadd.f32 1.0, %v4095_v2  ;;  %v4103_v32 = vadd.f32 1.0, %v4102_v45  ;;  %v4303_v61 = vor.u32 %v4302_v55, %v4301_v38  ;;  %vm4306_vm15 = vcmp.lt.s32.totalorder %v10582_v8, 3 }
 0x4dd   : > { %v4312_v9 = vsel %vm4304_vm2, %v4291_v51, %v10599_v28  ;;  %v4313_v46 = vsel %vm4307_vm13, %v4300_v11, 920167782  ;;  %vm4119_vm1 = vcmp.lt.s32.totalorder %v10398_v1, 0  ;;  %vm4220_vm3 = vcmp.lt.s32.totalorder %v10613_v53, 0 }
 0x4de   : > { %v4104_v57 = vmul.f32 %v4103_v32, %v4088_v31  ;;  %v4113_v20 = vxor.u32 2147483648, %v4096_v49  ;;  %v4221_v30 = vsub.s32 0, %v10613_v53  ;;  %vm4112_vm4 = vcmp.eq.s32.totalorder %v10580_v12, 2 }
 0x4df   : > { %v4314_v16 = vsel %vm4306_vm15, %v4297_v42, %v4313_v46  ;;  %v4321_v19 = vand.u32 65535, %v10611_v50  ;;  %v5047_v24 = vand.u32 2147483647, %v10606_v18  ;;  %vm4305_vm7 = vcmp.lt.s32.totalorder %v10582_v8, 2 }
 0x4e0   : > { %v4110_v27 = vxor.u32 2147483648, %v4104_v57  ;;  %v4222_v36 = vsel %vm4220_vm3, %v4221_v30, %v10613_v53  ;;  %v4316_v31 = vsel %vm4304_vm2, %v10599_v28, %v4297_v42  ;;  %v4114_v48 = vsel %vm4112_vm4, %v4113_v20, %v4104_v57 }
 0x4e1   : > { %v4223_v5 = vclz %v4222_v36  ;;  %v4315_v14 = vsel %vm4305_vm7, %v4312_v9, %v4314_v16  ;;  %v4317_v60 = vsel %vm4307_vm13, %v4303_v61, 1326507024  ;;  %v4241_v13 = vsub.s32 4, %v10595_v15 }
 0x4e2   : > { %v4111_v23 = vsel %vm4109_vm11, %v4096_v49, %v4110_v27  ;;  %v4318_v62 = vsel %vm4306_vm15, %v4300_v11, %v4317_v60  ;;  %v4345_v63 = vand.u32 65535, %v4315_v14  ;;  %v4346_v22 = vshrl.u32 %v4315_v14, 16 }
 0x4e3   : > { %v4115_v17 = vsel %vm4108_vm12, %v4111_v23, %v4114_v48  ;;  %v6456_v39 = vadd.s32 4294967294, %v4223_v5  ;;  %v4322_v58 = vshrl.u32 %v10611_v50, 16  ;;  %v4211_v55 = vadd.s32 %v10568_v47, %v10566_v6 }
 0x4e4   : > { %v4116_v4 = vsel %vm4105_vm14, nan, %v4115_v17  ;;  %v4288_v11 = vshrl.u32 %v11359_v3, %v10577_v29  ;;  %v4319_v2 = vsel %vm4305_vm7, %v4316_v31, %v4318_v62  ;;  %v4348_v32 = vmul.u32 %v4346_v22, %v4321_v19 }
 0x4e5   : > { %v5969_v12 = vmul.f32 %v5884_v0, %v4116_v4  ;;  %vm6457_vm5 = vcmp.lt.s32.totalorder %v6456_v39, 0  ;;  %v4323_v45 = vand.u32 65535, %v4319_v2  ;;  %v4324_v34 = vshrl.u32 %v4319_v2, 16 }
 0x4e6   : > { %v4226_v38 = vsel %vm6457_vm5, 0, %v6456_v39  ;;  %v4308_v49 = vsel %vm4304_vm2, %v4288_v11, %v4291_v51  ;;  %v4349_v35 = vmul.u32 %v4345_v63, %v4322_v58  ;;  %v4242_v6 = vsel %vm4119_vm1, %v4241_v13, %v10595_v15 }
 0x4e7   : > { %6171 = vst [vmem:[%s7681_s17 + $0xa8] sm:$0xff] %v5969_v12  ;;  %v4227_v61 = vsub.s32 32, %v4226_v38  ;;  %v4231_v9 = vsub.s32 4294967266, %v4226_v38  ;;  %v4309_v47 = vsel %vm4307_vm13, %v4297_v42, 2102212464  ;;  %v4326_v46 = vmul.u32 %v4324_v34, %v4321_v19 }
 0x4e8   : > { %vm10665_vm6 = vcmp.le.f32.partialorder %v4117_v54, 0.7853982  ;;  %v4327_v51 = vmul.u32 %v4323_v45, %v4322_v58  ;;  %v4347_v57 = vmul.u32 %v4345_v63, %v4321_v19  ;;  %v4351_v20 = vshll.u32 %v4348_v32, 16 }
 0x4e9   : > { %v4228_v30 = vshll.u32 %v10613_v53, %v4226_v38  ;;  %v4229_v16 = vshrl.u32 %v4211_v55, %v4227_v61  ;;  %v4232_v27 = vadd.s32 127, %v4231_v9  ;;  %v4350_v36 = vmul.u32 %v4346_v22, %v4322_v58  ;;  %v11465_v38 = vld [vmem:[#allocation45_spill] sm:$0xff] }
 0x4ea   : > { %v4325_v31 = vmul.u32 %v4323_v45, %v4321_v19  ;;  %v4328_v15 = vmul.u32 %v4324_v34, %v4322_v58  ;;  %v4329_v48 = vshll.u32 %v4326_v46, 16  ;;  %v4353_v5 = vshll.u32 %v4349_v35, 16  ;;  %v11466_v61 = vld [vmem:[#allocation37_spill] sm:$0xff] }
 0x4eb   : > { %v4230_v42 = vor.u32 %v4229_v16, %v4228_v30  ;;  %v4233_v14 = vshll.u32 %v4232_v27, 23  ;;  %v4331_v60 = vshll.u32 %v4327_v51, 16  ;;  %vm4355_vm8 = vc.u32 %v4347_v57, %v4351_v20 }
 0x4ec   : > { %vm4333_vm9 = vc.u32 %v4325_v31, %v4329_v48  ;;  %v4335_v54 = vadd.s32 %v4329_v48, %v4325_v31  ;;  %v4356_v23 = vsel %vm4355_vm8, 1, %v11363_v44  ;;  %v4357_v0 = vadd.s32 %v4351_v20, %v4347_v57 }
 0x4ed   : > { %v4234_v62 = vor.u32 4788187, %v4233_v14  ;;  %v4310_v53 = vsel %vm4306_vm15, %v10599_v28, %v4309_v47  ;;  %v4334_v63 = vsel %vm4333_vm9, 1, %v11363_v44  ;;  %v4358_v19 = vadd.s32 %v4356_v23, %v4350_v36 }
 0x4ee   : > { %v4336_v22 = vadd.s32 %v4334_v63, %v4328_v15  ;;  %vm4337_vm10 = vc.u32 %v4335_v54, %v4331_v60  ;;  %v4352_v17 = vshrl.u32 %v4348_v32, 16  ;;  %vm4359_vm11 = vc.u32 %v4357_v0, %v4353_v5 }
 0x4ef   : > { %v4235_v39 = vand.u32 2147483647, %v4234_v62  ;;  %v4237_v13 = vcvt.s32.f32 %v4230_v42  ;;  %v4338_v58 = vsel %vm4337_vm10, 1, %v11363_v44  ;;  %v4360_v4 = vsel %vm4359_vm11, 1, %v11363_v44 }
 0x4f0   : > { %v4330_v55 = vshrl.u32 %v4326_v46, 16  ;;  %v4340_v11 = vadd.s32 %v4338_v58, %v4336_v22  ;;  %v4362_v2 = vadd.s32 %v4360_v4, %v4358_v19  ;;  %v5050_v12 = vand.u32 2139095040, %v10606_v18 }
 0x4f1   : > { %v4238_v45 = vmul.f32 %v4237_v13, %v4235_v39  ;;  %v4244_v28 = vsel %vm10665_vm6, 0, %v4242_v6  ;;  %v4332_v34 = vshrl.u32 %v4327_v51, 16  ;;  %v10682_v32 = vadd.f32 %v11466_v61, %v11465_v38 }
 0x4f2   : > { %v4341_v9 = vadd.s32 %v4340_v11, %v4330_v55  ;;  %v4354_v47 = vshrl.u32 %v4349_v35, 16  ;;  %v4363_v57 = vadd.s32 %v4362_v2, %v4352_v17  ;;  %v5051_v20 = vshrl.u32 %v5050_v12, 23 }
 0x4f3   : > { %v4239_v30 = vxor.u32 2147483648, %v4238_v45  ;;  %v4311_v46 = vsel %vm4305_vm7, %v4308_v49, %v4310_v53  ;;  %v4361_v16 = vadd.s32 %v4357_v0, %v4353_v5  ;;  %v5054_v27 = vand.u32 8388607, %v5047_v24 }
 0x4f4   : > { %v4342_v36 = vadd.s32 %v4341_v9, %v4332_v34  ;;  %v4364_v31 = vadd.s32 %v4363_v57, %v4354_v47  ;;  %v6473_v6 = vadd.s32 4294967169, %v5051_v20  ;;  %v616_v51 = vmul.f32 %v9218_v7, %v11404_v37 }
 0x4f5   : > { %v4240_v15 = vsel %vm4119_vm1, %v4239_v30, %v4238_v45  ;;  %v4261_v5 = vadd.s32 3, %v4244_v28  ;;  %v4365_v42 = vmul.u32 %v10611_v50, %v4311_v46  ;;  %v5055_v54 = vor.u32 8388608, %v5054_v27 }
 0x4f6   : > { %v4243_v35 = vsel %vm10665_vm6, %v10398_v1, %v4240_v15  ;;  %vm4367_vm12 = vc.u32 %v4342_v36, %v4361_v16  ;;  %v4368_v8 = vadd.s32 1, %v4364_v31  ;;  %v648_v49 = vadd.f32 %v616_v51, %v10557_v59 }
 0x4f7   : > { %v4245_v48 = vmul.f32 %v4243_v35, %v4243_v35  ;;  %v5057_v14 = vadd.s32 1, %v6473_v6  ;;  %v10700_v19 = vand.u32 3, %v4261_v5  ;;  %v10702_v17 = vshll.u32 %v5055_v54, 8 }
 0x4f8   : > { %v4369_v60 = vsel %vm4367_vm12, %v4368_v8, %v4364_v31  ;;  %v10698_v7 = vadd.f32 %v7695_v40, %v648_v49  ;;  %v10709_v12 = vadd.s32 %v4361_v16, %v4342_v36  ;;  %vm4260_vm1 = vweird.f32 %v10398_v1 }
 0x4f9   : > { %v4246_v23 = vmul.f32 -0.001358992, %v4245_v48  ;;  %v4253_v0 = vmul.f32 -0.00019511016, %v4245_v48  ;;  %v4370_v62 = vadd.s32 %v4369_v60, %v4365_v42  ;;  %vm5058_vm14 = vcmp.gt.s32.totalorder %v5057_v14, 0 }
 0x4fa   : > { %v5059_v29 = vsel %vm5058_vm14, %v5057_v14, 0  ;;  %v5202_v50 = vand.u32 2147483647, %v10698_v7  ;;  %v5205_v39 = vand.u32 2139095040, %v10698_v7  ;;  %vm4267_vm2 = vcmp.eq.s32.totalorder %v10700_v19, 2 }
 0x4fb   : > { %v4247_v53 = vadd.f32 0.041655596, %v4246_v23  ;;  %v4254_v63 = vadd.f32 0.008332121, %v4253_v0  ;;  %v4371_v59 = vadd.s32 536870912, %v4370_v62  ;;  %v5061_v22 = vand.u32 31, %v5059_v29 }
 0x4fc   : > { %vm4264_vm13 = vcmp.eq.s32.totalorder %v10700_v19, 0  ;;  %v10713_v28 = vand.u32 65535, %v10702_v17  ;;  %v10716_v34 = vshrl.u32 %v10702_v17, 16  ;;  %v5206_v38 = vshrl.u32 %v5205_v39, 23 }
 0x4fd   : > { %v4248_v13 = vmul.f32 %v4247_v53, %v4245_v48  ;;  %v4255_v58 = vmul.f32 %v4254_v63, %v4245_v48  ;;  %v4372_v4 = vshrl.u32 %v4371_v59, 30  ;;  %v10706_v55 = vsub.s32 32, %v5061_v22 }
 0x4fe   : > { %v10720_v61 = vand.u32 8388607, %v5202_v50  ;;  %vm4263_vm15 = vcmp.lt.s32.totalorder %v10700_v19, 2  ;;  %v10725_v20 = vshrl.u32 %v5059_v29, 5  ;;  %vm4274_vm3 = vcmp.lt.s32.totalorder %v10455_v33, 0 }
 0x4ff   : > { %v4249_v11 = vadd.f32 -0.4999988, %v4248_v13  ;;  %v4256_v2 = vadd.f32 -0.16666654, %v4255_v58  ;;  %v4373_v45 = vshll.u32 %v4372_v4, 30  ;;  %v5064_v30 = vshll.u32 %v11359_v3, %v5061_v22 }
 0x500   : > { %v5065_v46 = vshrl.u32 %v11360_v56, %v10706_v55  ;;  %v5068_v16 = vshrl.u32 %v11361_v52, %v10706_v55  ;;  %v5071_v27 = vshrl.u32 %v11362_v21, %v10706_v55  ;;  %v5067_v51 = vshll.u32 %v11360_v56, %v5061_v22 }
 0x501   : > { %v4250_v9 = vmul.f32 %v4249_v11, %v4245_v48  ;;  %v4257_v47 = vmul.f32 %v4256_v2, %v4245_v48  ;;  %v10723_v57 = vsub.s32 %v4370_v62, %v4373_v45  ;;  %v5070_v15 = vshll.u32 %v11361_v52, %v5061_v22  ;;  %v5913_v11 = vpop.f32.mrf.mxu2 }
 0x502   : > { %v5073_v8 = vshll.u32 %v11362_v21, %v5061_v22  ;;  %v5074_v49 = vshrl.u32 %v11364_v43, %v10706_v55  ;;  %v5077_v14 = vshrl.u32 %v11365_v10, %v10706_v55  ;;  %v5066_v54 = vor.u32 %v5065_v46, %v5064_v30 }
 0x503   : > { %v4251_v36 = vadd.f32 1.0, %v4250_v9  ;;  %v4258_v31 = vadd.f32 1.0, %v4257_v47  ;;  %vm4375_vm4 = vcmp.lt.s32.totalorder %v10723_v57, 0  ;;  %v4376_v6 = vsub.s32 0, %v10723_v57 }
 0x504   : > { %v5069_v23 = vor.u32 %v5068_v16, %v5067_v51  ;;  %v5075_v0 = vor.u32 %v5074_v49, %v5073_v8  ;;  %v4396_v29 = vsub.s32 4, %v4372_v4  ;;  %v5072_v53 = vor.u32 %v5071_v27, %v5070_v15 }
 0x505   : > { %v4259_v48 = vmul.f32 %v4258_v31, %v4243_v35  ;;  %v4268_v5 = vxor.u32 2147483648, %v4251_v36  ;;  %v4377_v42 = vsel %vm4375_vm4, %v4376_v6, %v10723_v57  ;;  %v5076_v63 = vshll.u32 %v11364_v43, %v5061_v22 }
 0x506   : > { %v4378_v60 = vclz %v4377_v42  ;;  %vm10751_vm7 = vcmp.le.f32.partialorder %v4272_v41, 0.7853982  ;;  %vm5079_vm5 = vcmp.lt.s32.totalorder %v10725_v20, 1  ;;  %v6476_v13 = vadd.s32 4294967169, %v5206_v38 }
 0x507   : > { %v4265_v62 = vxor.u32 2147483648, %v4259_v48  ;;  %v4269_v59 = vsel %vm4267_vm2, %v4268_v5, %v4259_v48  ;;  %v5078_v2 = vor.u32 %v5077_v14, %v5076_v63  ;;  %vm5081_vm6 = vcmp.lt.s32.totalorder %v10725_v20, 3 }
 0x508   : > { %v6459_v39 = vadd.s32 4294967294, %v4378_v60  ;;  %vm5082_vm8 = vcmp.lt.s32.totalorder %v10725_v20, 4  ;;  %v5087_v41 = vsel %vm5079_vm5, %v5066_v54, %v5069_v23  ;;  %v10770_v47 = vsel %vm4274_vm3, %v4396_v29, %v4372_v4 }
 0x509   : > { %v4266_v58 = vsel %vm4264_vm13, %v4251_v36, %v4265_v62  ;;  %v5088_v45 = vsel %vm5082_vm8, %v5075_v0, 920167782  ;;  %vm5080_vm10 = vcmp.lt.s32.totalorder %v10725_v20, 2  ;;  %v5091_v1 = vsel %vm5079_vm5, %v5069_v23, %v5072_v53 }
 0x50a   : > { %v4270_v22 = vsel %vm4263_vm15, %v4266_v58, %v4269_v59  ;;  %vm6460_vm9 = vcmp.lt.s32.totalorder %v6459_v39, 0  ;;  %v5089_v19 = vsel %vm5081_vm6, %v5072_v53, %v5088_v45  ;;  %v5092_v4 = vsel %vm5082_vm8, %v5078_v2, 1326507024 }
 0x50b   : > { %v4271_v38 = vsel %vm4260_vm1, nan, %v4270_v22  ;;  %v4381_v9 = vsel %vm6460_vm9, 0, %v6459_v39  ;;  %v5090_v36 = vsel %vm5080_vm10, %v5087_v41, %v5089_v19  ;;  %v5093_v51 = vsel %vm5081_vm6, %v5075_v0, %v5092_v4 }
 0x50c   : > { %v5970_v30 = vmul.f32 %v5913_v11, %v4271_v38  ;;  %v4382_v46 = vsub.s32 32, %v4381_v9  ;;  %v4386_v16 = vsub.s32 4294967266, %v4381_v9  ;;  %v4383_v27 = vshll.u32 %v10723_v57, %v4381_v9 }
 0x50d   : > { %v5120_v15 = vand.u32 65535, %v5090_v36  ;;  %v5063_v57 = vshrl.u32 %v11359_v3, %v10706_v55  ;;  %v5084_v8 = vsel %vm5082_vm8, %v5072_v53, 2102212464  ;;  %v5094_v49 = vsel %vm5080_vm10, %v5091_v1, %v5093_v51 }
 0x50e   : > { %6172 = vst [vmem:[%s7681_s17 + $0xb0] sm:$0xff] %v5970_v30  ;;  %v4384_v31 = vshrl.u32 %v10709_v12, %v4382_v46  ;;  %v4387_v6 = vadd.s32 127, %v4386_v16  ;;  %v5121_v48 = vshrl.u32 %v5090_v36, 16  ;;  %v5098_v14 = vand.u32 65535, %v5094_v49 }
 0x50f   : > { %v5099_v60 = vshrl.u32 %v5094_v49, 16  ;;  %v4399_v12 = vsel %vm10751_vm7, 0, %v10770_v47  ;;  %v5083_v0 = vsel %vm5079_vm5, %v5063_v57, %v5066_v54  ;;  %v5124_v62 = vmul.u32 %v5120_v15, %v10716_v34 }
 0x510   : > { %v4385_v5 = vor.u32 %v4384_v31, %v4383_v27  ;;  %v4388_v42 = vshll.u32 %v4387_v6, 23  ;;  %v5123_v55 = vmul.u32 %v5121_v48, %v10713_v28  ;;  %v5085_v53 = vsel %vm5081_vm6, %v5069_v23, %v5084_v8 }
 0x511   : > { %v5101_v63 = vmul.u32 %v5099_v60, %v10713_v28  ;;  %v5212_v59 = vadd.s32 1, %v6476_v13  ;;  %v5102_v39 = vmul.u32 %v5098_v14, %v10716_v34  ;;  %v5122_v58 = vmul.u32 %v5120_v15, %v10713_v28 }
 0x512   : > { %v4389_v29 = vor.u32 4788187, %v4388_v42  ;;  %v5125_v11 = vmul.u32 %v5121_v48, %v10716_v34  ;;  %v5126_v2 = vshll.u32 %v5123_v55, 16  ;;  %v4392_v54 = vcvt.s32.f32 %v4385_v5 }
 0x513   : > { %v5100_v41 = vmul.u32 %v5098_v14, %v10713_v28  ;;  %v5104_v45 = vshll.u32 %v5101_v63, 16  ;;  %v5103_v38 = vmul.u32 %v5099_v60, %v10716_v34  ;;  %v5106_v9 = vshll.u32 %v5102_v39, 16 }
 0x514   : > { %v4390_v22 = vand.u32 2147483647, %v4389_v29  ;;  %v5128_v47 = vshll.u32 %v5124_v62, 16  ;;  %vm5130_vm11 = vc.u32 %v5122_v58, %v5126_v2  ;;  %v5132_v46 = vadd.s32 %v5126_v2, %v5122_v58 }
 0x515   : > { %vm5108_vm12 = vc.u32 %v5100_v41, %v5104_v45  ;;  %v5110_v13 = vadd.s32 %v5104_v45, %v5100_v41  ;;  %v5131_v19 = vsel %vm5130_vm11, 1, %v11363_v44  ;;  %vm5213_vm14 = vcmp.gt.s32.totalorder %v5212_v59, 0 }
 0x516   : > { %v4393_v23 = vmul.f32 %v4392_v54, %v4390_v22  ;;  %v5109_v30 = vsel %vm5108_vm12, 1, %v11363_v44  ;;  %v5133_v16 = vadd.s32 %v5131_v19, %v5125_v11  ;;  %v5214_v28 = vsel %vm5213_vm14, %v5212_v59, 0 }
 0x517   : > { %v5111_v36 = vadd.s32 %v5109_v30, %v5103_v38  ;;  %vm5112_vm2 = vc.u32 %v5110_v13, %v5106_v9  ;;  %v5086_v34 = vsel %vm5080_vm10, %v5083_v0, %v5085_v53  ;;  %v5105_v1 = vshrl.u32 %v5101_v63, 16 }
 0x518   : > { %v4394_v27 = vxor.u32 2147483648, %v4393_v23  ;;  %v5113_v4 = vsel %vm5112_vm2, 1, %v11363_v44  ;;  %vm5134_vm13 = vc.u32 %v5132_v46, %v5128_v47  ;;  %v5216_v15 = vand.u32 31, %v5214_v28 }
 0x519   : > { %v5115_v6 = vadd.s32 %v5113_v4, %v5111_v36  ;;  %v5135_v51 = vsel %vm5134_vm13, 1, %v11363_v44  ;;  %v4416_v8 = vadd.s32 3, %v4399_v12  ;;  %v5127_v49 = vshrl.u32 %v5123_v55, 16 }
 0x51a   : > { %v4395_v31 = vsel %vm4274_vm3, %v4394_v27, %v4393_v23  ;;  %v5137_v48 = vadd.s32 %v5135_v51, %v5133_v16  ;;  %v5107_v5 = vshrl.u32 %v5102_v39, 16  ;;  %v10818_v14 = vsub.s32 32, %v5216_v15 }
 0x51b   : > { %v4398_v57 = vsel %vm10751_vm7, %v10455_v33, %v4395_v31  ;;  %v5116_v42 = vadd.s32 %v5115_v6, %v5105_v1  ;;  %v5129_v60 = vshrl.u32 %v5124_v62, 16  ;;  %v10820_v0 = vadd.s32 %v5132_v46, %v5128_v47 }
 0x51c   : > { %v4400_v20 = vmul.f32 %v4398_v57, %v4398_v57  ;;  %v5138_v29 = vadd.s32 %v5137_v48, %v5127_v49  ;;  %v5140_v53 = vmul.u32 %v10702_v17, %v5086_v34  ;;  %v10825_v35 = vshrl.u32 %v5214_v28, 5 }
 0x51d   : > { %v10823_v58 = vadd.s32 %v5116_v42, %v5107_v5  ;;  %v5219_v55 = vshll.u32 %v11359_v3, %v5216_v15  ;;  %v5223_v39 = vshrl.u32 %v11361_v52, %v10818_v14  ;;  %v5226_v62 = vshrl.u32 %v11362_v21, %v10818_v14 }
 0x51e   : > { %v4401_v63 = vmul.f32 -0.001358992, %v4400_v20  ;;  %v4408_v59 = vmul.f32 -0.00019511016, %v4400_v20  ;;  %v5139_v12 = vadd.s32 %v5138_v29, %v5129_v60  ;;  %v5222_v17 = vshll.u32 %v11360_v56, %v5216_v15 }
 0x51f   : > { %vm5142_vm15 = vc.u32 %v10823_v58, %v10820_v0  ;;  %v5220_v54 = vshrl.u32 %v11360_v56, %v10818_v14  ;;  %v5225_v41 = vshll.u32 %v11361_v52, %v5216_v15  ;;  %v5228_v45 = vshll.u32 %v11362_v21, %v5216_v15 }
 0x520   : > { %v4402_v11 = vadd.f32 0.041655596, %v4401_v63  ;;  %v4409_v2 = vadd.f32 0.008332121, %v4408_v59  ;;  %v5143_v22 = vadd.s32 1, %v5139_v12  ;;  %v10839_v47 = vor.u32 %v5223_v39, %v5222_v17 }
 0x521   : > { %v5229_v23 = vshrl.u32 %v11364_v43, %v10818_v14  ;;  %v10843_v19 = vor.u32 %v5226_v62, %v5225_v41  ;;  %v5231_v30 = vshll.u32 %v11364_v43, %v5216_v15  ;;  %v5232_v46 = vshrl.u32 %v11365_v10, %v10818_v14 }
 0x522   : > { %v4403_v38 = vmul.f32 %v4402_v11, %v4400_v20  ;;  %v4410_v9 = vmul.f32 %v4409_v2, %v4400_v20  ;;  %v5144_v13 = vsel %vm5142_vm15, %v5143_v22, %v5139_v12  ;;  %v4417_v34 = vand.u32 3, %v4416_v8 }
 0x523   : > { %v5145_v36 = vadd.s32 %v5144_v13, %v5140_v53  ;;  %v5230_v28 = vor.u32 %v5229_v23, %v5228_v45  ;;  %v5210_v1 = vor.u32 8388608, %v10720_v61  ;;  %v10849_v4 = vor.u32 %v5220_v54, %v5219_v55  ;;  %v5942_v45 = vpop.f32.mrf.mxu3 }
 0x524   : > { %v4404_v16 = vadd.f32 -0.4999988, %v4403_v38  ;;  %v4411_v27 = vadd.f32 -0.16666654, %v4410_v9  ;;  %v5233_v31 = vor.u32 %v5232_v46, %v5231_v30  ;;  %vm5237_vm1 = vcmp.lt.s32.totalorder %v10825_v35, 4 }
 0x525   : > { %v5146_v49 = vadd.s32 536870912, %v5145_v36  ;;  %vm5234_vm3 = vcmp.lt.s32.totalorder %v10825_v35, 1  ;;  %vm5236_vm4 = vcmp.lt.s32.totalorder %v10825_v35, 3  ;;  %v5243_v15 = vsel %vm5237_vm1, %v5230_v28, 920167782 }
 0x526   : > { %v4405_v6 = vmul.f32 %v4404_v16, %v4400_v20  ;;  %v4412_v51 = vmul.f32 %v4411_v27, %v4400_v20  ;;  %v5247_v8 = vsel %vm5237_vm1, %v5233_v31, 1326507024  ;;  %v5246_v20 = vsel %vm5234_vm3, %v10839_v47, %v10843_v19 }
 0x527   : > { %v10858_v5 = vshrl.u32 %v5146_v49, 30  ;;  %v5242_v42 = vsel %vm5234_vm3, %v10849_v4, %v10839_v47  ;;  %v5244_v60 = vsel %vm5236_vm4, %v10843_v19, %v5243_v15  ;;  %v5248_v29 = vsel %vm5236_vm4, %v5230_v28, %v5247_v8 }
 0x528   : > { %v4406_v48 = vadd.f32 1.0, %v4405_v6  ;;  %v4413_v61 = vadd.f32 1.0, %v4412_v51  ;;  %v10873_v53 = vshll.u32 %v5210_v1, 8  ;;  %vm5235_vm7 = vcmp.lt.s32.totalorder %v10825_v35, 2 }
 0x529   : > { %v5148_v12 = vshll.u32 %v10858_v5, 30  ;;  %vm4415_vm5 = vweird.f32 %v10455_v33  ;;  %vm4418_vm6 = vcmp.lt.s32.totalorder %v4417_v34, 2  ;;  %vm4419_vm8 = vcmp.eq.s32.totalorder %v4417_v34, 0 }
 0x52a   : > { %v4414_v63 = vmul.f32 %v4413_v61, %v4398_v57  ;;  %v4423_v59 = vxor.u32 2147483648, %v4406_v48  ;;  %v5249_v55 = vsel %vm5235_vm7, %v5246_v20, %v5248_v29  ;;  %vm4422_vm9 = vcmp.eq.s32.totalorder %v4417_v34, 2 }
 0x52b   : > { %v5149_v62 = vsub.s32 %v5145_v36, %v5148_v12  ;;  %v5245_v11 = vsel %vm5235_vm7, %v5242_v42, %v5244_v60  ;;  %v5251_v57 = vand.u32 65535, %v10873_v53  ;;  %v5252_v2 = vshrl.u32 %v10873_v53, 16 }
 0x52c   : > { %v4420_v39 = vxor.u32 2147483648, %v4414_v63  ;;  %v5253_v17 = vand.u32 65535, %v5249_v55  ;;  %v5254_v22 = vshrl.u32 %v5249_v55, 16  ;;  %v4424_v41 = vsel %vm4422_vm9, %v4423_v59, %v4414_v63 }
 0x52d   : > { %vm5150_vm10 = vcmp.lt.s32.totalorder %v5149_v62, 0  ;;  %v5151_v38 = vsub.s32 0, %v5149_v62  ;;  %v617_v30 = vmul.f32 %v9335_v25, %v11404_v37  ;;  %v5275_v27 = vand.u32 65535, %v5245_v11 }
 0x52e   : > { %v4421_v54 = vsel %vm4419_vm8, %v4406_v48, %v4420_v39  ;;  %v5256_v23 = vmul.u32 %v5254_v22, %v5251_v57  ;;  %v5257_v13 = vmul.u32 %v5253_v17, %v5252_v2  ;;  %v5276_v36 = vshrl.u32 %v5245_v11, 16 }
 0x52f   : > { %v4425_v9 = vsel %vm4418_vm6, %v4421_v54, %v4424_v41  ;;  %v5152_v16 = vsel %vm5150_vm10, %v5151_v38, %v5149_v62  ;;  %v5255_v31 = vmul.u32 %v5253_v17, %v5251_v57  ;;  %v5141_v34 = vadd.s32 %v10820_v0, %v10823_v58 }
 0x530   : > { %v4426_v46 = vsel %vm4415_vm5, nan, %v4425_v9  ;;  %v5153_v1 = vclz %v5152_v16  ;;  %v5259_v6 = vshll.u32 %v5256_v23, 16  ;;  %v5218_v51 = vshrl.u32 %v11359_v3, %v10818_v14 }
 0x531   : > { %v10889_v28 = vmul.f32 %v5942_v45, %v4426_v46  ;;  %v5258_v49 = vmul.u32 %v5254_v22, %v5252_v2  ;;  %v649_v25 = vadd.f32 %v617_v30, %v10682_v32  ;;  %v5261_v15 = vshll.u32 %v5257_v13, 16 }
 0x532   : > { %v6474_v33 = vadd.s32 4294967294, %v5153_v1  ;;  %vm5263_vm11 = vc.u32 %v5255_v31, %v5259_v6  ;;  %v5265_v8 = vadd.s32 %v5259_v6, %v5255_v31  ;;  %v5239_v48 = vsel %vm5237_vm1, %v10843_v19, 2102212464 }
 0x533   : > { %6173 = vst [vmem:[%s7681_s17 + $0xb8] sm:$0xff] %v10889_v28  ;;  %v5264_v61 = vsel %vm5263_vm11, 1, %v11363_v44  ;;  %v5278_v20 = vmul.u32 %v5276_v36, %v5251_v57  ;;  %v5279_v0 = vmul.u32 %v5275_v27, %v5252_v2  ;;  %v5260_v58 = vshrl.u32 %v5256_v23, 16 }
 0x534   : > { %vm6475_vm12 = vcmp.lt.s32.totalorder %v6474_v33, 0  ;;  %v5266_v14 = vadd.s32 %v5264_v61, %v5258_v49  ;;  %vm5267_vm14 = vc.u32 %v5265_v8, %v5261_v15  ;;  %v5277_v60 = vmul.u32 %v5275_v27, %v5251_v57  ;;  %v11469_v27 = vld [vmem:[#allocation46_spill] sm:$0xff] }
 0x535   : > { %v5156_v42 = vsel %vm6475_vm12, 0, %v6474_v33  ;;  %v5268_v32 = vsel %vm5267_vm14, 1, %v11363_v44  ;;  %v5281_v29 = vshll.u32 %v5278_v20, 16  ;;  %v5280_v55 = vmul.u32 %v5276_v36, %v5252_v2  ;;  %v11470_v36 = vld [vmem:[#allocation38_spill] sm:$0xff] }
 0x536   : > { %v5157_v63 = vsub.s32 32, %v5156_v42  ;;  %v5161_v59 = vsub.s32 4294967266, %v5156_v42  ;;  %v5270_v12 = vadd.s32 %v5268_v32, %v5266_v14  ;;  %vm5049_vm2 = vcmp.lt.s32.totalorder %v10606_v18, 0 }
 0x537   : > { %v5158_v19 = vshll.u32 %v5149_v62, %v5156_v42  ;;  %v5283_v39 = vshll.u32 %v5279_v0, 16  ;;  %vm5285_vm13 = vc.u32 %v5277_v60, %v5281_v29  ;;  %v5287_v11 = vadd.s32 %v5281_v29, %v5277_v60 }
 0x538   : > { %v5159_v17 = vshrl.u32 %v5141_v34, %v5157_v63  ;;  %v5162_v22 = vadd.s32 127, %v5161_v59  ;;  %v5271_v54 = vadd.s32 %v5270_v12, %v5260_v58  ;;  %v5286_v41 = vsel %vm5285_vm13, 1, %v11363_v44 }
 0x539   : > { %v5238_v57 = vsel %vm5234_vm3, %v5218_v51, %v10849_v4  ;;  %v5240_v45 = vsel %vm5236_vm4, %v10839_v47, %v5239_v48  ;;  %v5288_v2 = vadd.s32 %v5286_v41, %v5280_v55  ;;  %vm5289_vm15 = vc.u32 %v5287_v11, %v5283_v39 }
 0x53a   : > { %v5160_v38 = vor.u32 %v5159_v17, %v5158_v19  ;;  %v5163_v62 = vshll.u32 %v5162_v22, 23  ;;  %v5262_v9 = vshrl.u32 %v5257_v13, 16  ;;  %v5290_v23 = vsel %vm5289_vm15, 1, %v11363_v44 }
 0x53b   : > { %v5282_v30 = vshrl.u32 %v5278_v20, 16  ;;  %v5292_v46 = vadd.s32 %v5290_v23, %v5288_v2  ;;  %v10913_v16 = vadd.f32 %v7695_v40, %v649_v25  ;;  %v551_v1 = vadd.f32 %v11470_v36, %v11469_v27 }
 0x53c   : > { %v5164_v4 = vor.u32 4788187, %v5163_v62  ;;  %v5171_v31 = vsub.s32 4, %v10858_v5  ;;  %v5272_v6 = vadd.s32 %v5271_v54, %v5262_v9  ;;  %v618_v47 = vmul.f32 %v9468_v26, %v11404_v37 }
 0x53d   : > { %v5284_v34 = vshrl.u32 %v5279_v0, 16  ;;  %v5293_v51 = vadd.s32 %v5292_v46, %v5282_v30  ;;  %v5357_v13 = vand.u32 2147483647, %v10913_v16  ;;  %v5360_v49 = vand.u32 2139095040, %v10913_v16 }
 0x53e   : > { %v5165_v33 = vand.u32 2147483647, %v5164_v4  ;;  %v5167_v15 = vcvt.s32.f32 %v5160_v38  ;;  %v5291_v25 = vadd.s32 %v5287_v11, %v5283_v39  ;;  %v650_v8 = vadd.f32 %v618_v47, %v551_v1 }
 0x53f   : > { %v5241_v48 = vsel %vm5235_vm7, %v5238_v57, %v5240_v45  ;;  %v5294_v61 = vadd.s32 %v5293_v51, %v5284_v34  ;;  %v5361_v20 = vshrl.u32 %v5360_v49, 23  ;;  %v5364_v58 = vand.u32 8388607, %v5357_v13 }
 0x540   : > { %v5168_v14 = vmul.f32 %v5167_v15, %v5165_v33  ;;  %v5172_v37 = vsel %vm5049_vm2, %v5171_v31, %v10858_v5  ;;  %vm5297_vm1 = vc.u32 %v5272_v6, %v5291_v25  ;;  %v10930_v26 = vadd.f32 %v7695_v40, %v650_v8 }
 0x541   : > { %v5298_v0 = vadd.s32 1, %v5294_v61  ;;  %v6479_v42 = vadd.s32 4294967169, %v5361_v20  ;;  %vm5048_vm3 = vcmp.le.f32.partialorder %v5047_v24, 0.7853982  ;;  %v5295_v32 = vmul.u32 %v10873_v53, %v5241_v48 }
 0x542   : > { %v5169_v35 = vxor.u32 2147483648, %v5168_v14  ;;  %v5515_v60 = vand.u32 2139095040, %v10930_v26  ;;  %v5174_v29 = vsel %vm5048_vm3, 0, %v5172_v37  ;;  %v5365_v59 = vor.u32 8388608, %v5364_v58 }
 0x543   : > { %v5299_v63 = vsel %vm5297_vm1, %v5298_v0, %v5294_v61  ;;  %v5367_v12 = vadd.s32 1, %v6479_v42  ;;  %v5191_v11 = vadd.s32 3, %v5174_v29  ;;  %vm5204_vm7 = vcmp.lt.s32.totalorder %v10698_v7, 0 }
 0x544   : > { %v5170_v5 = vsel %vm5049_vm2, %v5169_v35, %v5168_v14  ;;  %v5300_v55 = vadd.s32 %v5299_v63, %v5295_v32  ;;  %v5516_v19 = vshrl.u32 %v5515_v60, 23  ;;  %v10939_v53 = vshll.u32 %v5365_v59, 8 }
 0x545   : > { %v5173_v40 = vsel %vm5048_vm3, %v10606_v18, %v5170_v5  ;;  %vm5368_vm4 = vcmp.gt.s32.totalorder %v5367_v12, 0  ;;  %v10941_v9 = vand.u32 3, %v5191_v11  ;;  %v10944_v30 = vadd.s32 %v5291_v25, %v5272_v6 }
 0x546   : > { %v5175_v39 = vmul.f32 %v5173_v40, %v5173_v40  ;;  %v5301_v24 = vadd.s32 536870912, %v5300_v55  ;;  %v5369_v17 = vsel %vm5368_vm4, %v5367_v12, 0  ;;  %v6482_v2 = vadd.s32 4294967169, %v5516_v19 }
 0x547   : > { %v5371_v22 = vand.u32 31, %v5369_v17  ;;  %v10947_v46 = vand.u32 65535, %v10939_v53  ;;  %v10950_v27 = vshrl.u32 %v10939_v53, 16  ;;  %v5512_v36 = vand.u32 2147483647, %v10930_v26 }
 0x548   : > { %v5176_v54 = vmul.f32 -0.001358992, %v5175_v39  ;;  %v5183_v41 = vmul.f32 -0.00019511016, %v5175_v39  ;;  %v5302_v57 = vshrl.u32 %v5301_v24, 30  ;;  %v10955_v47 = vshrl.u32 %v5369_v17, 5 }
 0x549   : > { %v5372_v45 = vsub.s32 32, %v5371_v22  ;;  %v5374_v34 = vshll.u32 %v11359_v3, %v5371_v22  ;;  %v10960_v49 = vadd.s32 1, %v6482_v2  ;;  %vm5197_vm5 = vcmp.eq.s32.totalorder %v10941_v9, 2 }
 0x54a   : > { %v5177_v38 = vadd.f32 0.041655596, %v5176_v54  ;;  %v5184_v62 = vadd.f32 0.008332121, %v5183_v41  ;;  %v5303_v23 = vshll.u32 %v5302_v57, 30  ;;  %vm5194_vm8 = vcmp.eq.s32.totalorder %v10941_v9, 0 }
 0x54b   : > { %v5375_v51 = vshrl.u32 %v11360_v56, %v5372_v45  ;;  %v5378_v6 = vshrl.u32 %v11361_v52, %v5372_v45  ;;  %v5326_v8 = vsub.s32 4, %v5302_v57  ;;  %v5377_v48 = vshll.u32 %v11360_v56, %v5371_v22 }
 0x54c   : > { %v5178_v1 = vmul.f32 %v5177_v38, %v5175_v39  ;;  %v5185_v4 = vmul.f32 %v5184_v62, %v5175_v39  ;;  %v10953_v31 = vsub.s32 %v5300_v55, %v5303_v23  ;;  %v5381_v61 = vshrl.u32 %v11362_v21, %v5372_v45  ;;  %v5858_v23 = vpop.f32.mrf.mxu0 }
 0x54d   : > { %v5384_v20 = vshrl.u32 %v11364_v43, %v5372_v45  ;;  %vm5193_vm9 = vcmp.lt.s32.totalorder %v10941_v9, 2  ;;  %v5387_v0 = vshrl.u32 %v11365_v10, %v5372_v45  ;;  %vm5190_vm10 = vweird.f32 %v10606_v18 }
 0x54e   : > { %v5179_v33 = vadd.f32 -0.4999988, %v5178_v1  ;;  %v5186_v15 = vadd.f32 -0.16666654, %v5185_v4  ;;  %vm5305_vm6 = vcmp.lt.s32.totalorder %v10953_v31, 0  ;;  %v5306_v25 = vsub.s32 0, %v10953_v31 }
 0x54f   : > { %v5376_v35 = vor.u32 %v5375_v51, %v5374_v34  ;;  %v5379_v32 = vor.u32 %v5378_v6, %v5377_v48  ;;  %v5380_v60 = vshll.u32 %v11361_v52, %v5371_v22  ;;  %v5383_v59 = vshll.u32 %v11362_v21, %v5371_v22 }
 0x550   : > { %v5180_v58 = vmul.f32 %v5179_v33, %v5175_v39  ;;  %v5187_v14 = vmul.f32 %v5186_v15, %v5175_v39  ;;  %v5307_v37 = vsel %vm5305_vm6, %v5306_v25, %v10953_v31  ;;  %v5386_v12 = vshll.u32 %v11364_v43, %v5371_v22 }
 0x551   : > { %v5308_v42 = vclz %v5307_v37  ;;  %v10978_v55 = vsel %vm5204_vm7, %v5326_v8, %v5302_v57  ;;  %v5373_v19 = vshrl.u32 %v11359_v3, %v5372_v45  ;;  %v5382_v39 = vor.u32 %v5381_v61, %v5380_v60 }
 0x552   : > { %v5181_v29 = vadd.f32 1.0, %v5180_v58  ;;  %v5188_v63 = vadd.f32 1.0, %v5187_v14  ;;  %vm10983_vm11 = vcmp.le.f32.partialorder %v5202_v50, 0.7853982  ;;  %v5385_v54 = vor.u32 %v5384_v20, %v5383_v59 }
 0x553   : > { %v6477_v5 = vadd.s32 4294967294, %v5308_v42  ;;  %v5388_v41 = vor.u32 %v5387_v0, %v5386_v12  ;;  %vm5389_vm14 = vcmp.lt.s32.totalorder %v10955_v47, 1  ;;  %vm5390_vm2 = vcmp.lt.s32.totalorder %v10955_v47, 2 }
 0x554   : > { %v5189_v11 = vmul.f32 %v5188_v63, %v5173_v40  ;;  %v5198_v24 = vxor.u32 2147483648, %v5181_v29  ;;  %vm5391_vm13 = vcmp.lt.s32.totalorder %v10955_v47, 3  ;;  %vm5392_vm15 = vcmp.lt.s32.totalorder %v10955_v47, 4 }
 0x555   : > { %vm6478_vm12 = vcmp.lt.s32.totalorder %v6477_v5, 0  ;;  %v5397_v40 = vsel %vm5389_vm14, %v5376_v35, %v5379_v32  ;;  %v5398_v1 = vsel %vm5392_vm15, %v5385_v54, 920167782  ;;  %v5401_v4 = vsel %vm5389_vm14, %v5379_v32, %v5382_v39 }
 0x556   : > { %v5195_v22 = vxor.u32 2147483648, %v5189_v11  ;;  %v5311_v57 = vsel %vm6478_vm12, 0, %v6477_v5  ;;  %v5199_v50 = vsel %vm5197_vm5, %v5198_v24, %v5189_v11  ;;  %v5402_v34 = vsel %vm5392_vm15, %v5388_v41, 1326507024  ;;  %v6637_v24 = vld [vmem:[%s7681_s17 + $0xa0] sm:$0xff] }
 0x557   : > { %v5312_v45 = vsub.s32 32, %v5311_v57  ;;  %v5313_v2 = vshll.u32 %v10953_v31, %v5311_v57  ;;  %v5316_v38 = vsub.s32 4294967266, %v5311_v57  ;;  %v5399_v33 = vsel %vm5391_vm13, %v5382_v39, %v5398_v1  ;;  %v6639_v1 = vld [vmem:[%s7681_s17 + $0x20] sm:$0xff] }
 0x558   : > { %v5196_v62 = vsel %vm5194_vm8, %v5181_v29, %v5195_v22  ;;  %v5394_v25 = vsel %vm5392_vm15, %v5382_v39, 2102212464  ;;  %v5400_v8 = vsel %vm5390_vm2, %v5397_v40, %v5399_v33  ;;  %v5403_v9 = vsel %vm5391_vm13, %v5385_v54, %v5402_v34  ;;  %v6638_v40 = vld [vmem:[%s7681_s17 + $0x60] sm:$0xff] }
 0x559   : > { %v5200_v51 = vsel %vm5193_vm9, %v5196_v62, %v5199_v50  ;;  %v5314_v31 = vshrl.u32 %v10944_v30, %v5312_v45  ;;  %v5317_v6 = vadd.s32 127, %v5316_v38  ;;  %v5404_v30 = vsel %vm5390_vm2, %v5401_v4, %v5403_v9 }
 0x55a   : > { %v5201_v15 = vsel %vm5190_vm10, nan, %v5200_v51  ;;  %v5408_v58 = vand.u32 65535, %v5404_v30  ;;  %v5409_v14 = vshrl.u32 %v5404_v30, 16  ;;  %v5430_v18 = vand.u32 65535, %v5400_v8 }
 0x55b   : > { %v5976_v48 = vmul.f32 %v5858_v23, %v5201_v15  ;;  %v5315_v61 = vor.u32 %v5314_v31, %v5313_v2  ;;  %v5318_v20 = vshll.u32 %v5317_v6, 23  ;;  %v5431_v37 = vshrl.u32 %v5400_v8, 16 }
 0x55c   : > { %v5329_v42 = vsel %vm10983_vm11, 0, %v10978_v55  ;;  %v11025_v60 = vand.u32 8388607, %v5512_v36  ;;  %v5393_v29 = vsel %vm5389_vm14, %v5373_v19, %v5376_v35  ;;  %v5395_v63 = vsel %vm5391_vm13, %v5379_v32, %v5394_v25 }
 0x55d   : > { %6178 = vst [vmem:[%s7681_s17 + $0xe0] sm:$0xff] %v5976_v48  ;;  %v5319_v0 = vor.u32 4788187, %v5318_v20  ;;  %6082 = vmatpush.msrb.mxu0 %v5976_v48  ;;  %v5411_v59 = vmul.u32 %v5409_v14, %v10947_v46  ;;  %v5412_v12 = vmul.u32 %v5408_v58, %v10950_v27  ;;  %v5322_v39 = vcvt.s32.f32 %v5315_v61 }
 0x55e   : > { %v5433_v55 = vmul.u32 %v5431_v37, %v10947_v46  ;;  %v5434_v11 = vmul.u32 %v5430_v18, %v10950_v27  ;;  %v5410_v54 = vmul.u32 %v5408_v58, %v10947_v46  ;;  %v5413_v35 = vmul.u32 %v5409_v14, %v10950_v27 }
 0x55f   : > { %v5320_v5 = vand.u32 2147483647, %v5319_v0  ;;  %6083 = vmatpush.msrb.mxu0 %v6637_v24  ;;  %v5414_v19 = vshll.u32 %v5411_v59, 16  ;;  %vm5523_vm1 = vcmp.gt.s32.totalorder %v10960_v49, 0  ;;  %v5416_v41 = vshll.u32 %v5412_v12, 16 }
 0x560   : > { %v5432_v22 = vmul.u32 %v5430_v18, %v10947_v46  ;;  %v5436_v57 = vshll.u32 %v5433_v55, 16  ;;  %v5435_v45 = vmul.u32 %v5431_v37, %v10950_v27  ;;  %v5438_v2 = vshll.u32 %v5434_v11, 16 }
 0x561   : > { %v5323_v32 = vmul.f32 %v5322_v39, %v5320_v5  ;;  %6084 = vmatpush.msrb.mxu0 %v6638_v40  ;;  %vm5418_vm3 = vc.u32 %v5410_v54, %v5414_v19  ;;  %v5420_v50 = vadd.s32 %v5414_v19, %v5410_v54  ;;  %v5524_v46 = vsel %vm5523_vm1, %v10960_v49, 0 }
 0x562   : > { %v5419_v62 = vsel %vm5418_vm3, 1, %v11363_v44  ;;  %vm5440_vm4 = vc.u32 %v5432_v22, %v5436_v57  ;;  %v5442_v23 = vadd.s32 %v5436_v57, %v5432_v22  ;;  %v5415_v33 = vshrl.u32 %v5411_v59, 16 }
 0x563   : > { %v5324_v38 = vxor.u32 2147483648, %v5323_v32  ;;  %6085 = vmatpush.msrb.mxu0 %v6639_v1  ;;  %v5421_v4 = vadd.s32 %v5419_v62, %v5413_v35  ;;  %vm5422_vm5 = vc.u32 %v5420_v50, %v5416_v41  ;;  %v5441_v34 = vsel %vm5440_vm4, 1, %v11363_v44 }
 0x564   : > { %v5423_v27 = vsel %vm5422_vm5, 1, %v11363_v44  ;;  %v5443_v31 = vadd.s32 %v5441_v34, %v5435_v45  ;;  %vm5444_vm6 = vc.u32 %v5442_v23, %v5438_v2  ;;  %v5437_v9 = vshrl.u32 %v5433_v55, 16 }
 0x565   : > { %v5325_v51 = vsel %vm5204_vm7, %v5324_v38, %v5323_v32  ;;  %v5425_v15 = vadd.s32 %v5423_v27, %v5421_v4  ;;  %v5445_v25 = vsel %vm5444_vm6, 1, %v11363_v44  ;;  %v5526_v61 = vand.u32 31, %v5524_v46 }
 0x566   : > { %v5328_v6 = vsel %vm10983_vm11, %v10698_v7, %v5325_v51  ;;  %v5447_v48 = vadd.s32 %v5445_v25, %v5443_v31  ;;  %v5396_v49 = vsel %vm5390_vm2, %v5393_v29, %v5395_v63  ;;  %v5417_v20 = vshrl.u32 %v5412_v12, 16 }
 0x567   : > { %v5330_v8 = vmul.f32 %v5328_v6, %v5328_v6  ;;  %v5426_v30 = vadd.s32 %v5425_v15, %v5415_v33  ;;  %v5439_v58 = vshrl.u32 %v5434_v11, 16  ;;  %v11057_v0 = vsub.s32 32, %v5526_v61 }
 0x568   : > { %v5448_v37 = vadd.s32 %v5447_v48, %v5437_v9  ;;  %v5346_v17 = vadd.s32 3, %v5329_v42  ;;  %v11061_v5 = vadd.s32 %v5442_v23, %v5438_v2  ;;  %v5450_v54 = vmul.u32 %v10939_v53, %v5396_v49 }
 0x569   : > { %v5331_v14 = vmul.f32 -0.001358992, %v5330_v8  ;;  %v5338_v18 = vmul.f32 -0.00019511016, %v5330_v8  ;;  %v11059_v59 = vadd.s32 %v5426_v30, %v5417_v20  ;;  %v5520_v47 = vor.u32 8388608, %v11025_v60 }
 0x56a   : > { %v5449_v24 = vadd.s32 %v5448_v37, %v5439_v58  ;;  %v11067_v29 = vshrl.u32 %v5524_v46, 5  ;;  %v5529_v63 = vshll.u32 %v11359_v3, %v5526_v61  ;;  %v5530_v35 = vshrl.u32 %v11360_v56, %v11057_v0 }
 0x56b   : > { %v5332_v39 = vadd.f32 0.041655596, %v5331_v14  ;;  %v5339_v55 = vadd.f32 0.008332121, %v5338_v18  ;;  %vm5452_vm7 = vc.u32 %v11059_v59, %v11061_v5  ;;  %v5533_v19 = vshrl.u32 %v11361_v52, %v11057_v0  ;;  %v5887_v14 = vpop.f32.mrf.mxu1 }
 0x56c   : > { %v5453_v11 = vadd.s32 1, %v5449_v24  ;;  %v5536_v53 = vshrl.u32 %v11362_v21, %v11057_v0  ;;  %v5538_v32 = vshll.u32 %v11362_v21, %v5526_v61  ;;  %v5539_v60 = vshrl.u32 %v11364_v43, %v11057_v0 }
 0x56d   : > { %v5333_v12 = vmul.f32 %v5332_v39, %v5330_v8  ;;  %v5340_v42 = vmul.f32 %v5339_v55, %v5330_v8  ;;  %v5532_v40 = vshll.u32 %v11360_v56, %v5526_v61  ;;  %v5535_v45 = vshll.u32 %v11361_v52, %v5526_v61 }
 0x56e   : > { %v5454_v57 = vsel %vm5452_vm7, %v5453_v11, %v5449_v24  ;;  %v5540_v2 = vor.u32 %v5539_v60, %v5538_v32  ;;  %v5542_v38 = vshrl.u32 %v11365_v10, %v11057_v0  ;;  %v5347_v1 = vand.u32 3, %v5346_v17 }
 0x56f   : > { %v5334_v41 = vadd.f32 -0.4999988, %v5333_v12  ;;  %v5341_v22 = vadd.f32 -0.16666654, %v5340_v42  ;;  %v5455_v50 = vadd.s32 %v5454_v57, %v5450_v54  ;;  %v5541_v21 = vshll.u32 %v11364_v43, %v5526_v61 }
 0x570   : > { %v11084_v34 = vor.u32 %v5530_v35, %v5529_v63  ;;  %v11086_v46 = vor.u32 %v5533_v19, %v5532_v40  ;;  %v11088_v51 = vor.u32 %v5536_v53, %v5535_v45  ;;  %vm5547_vm8 = vcmp.lt.s32.totalorder %v11067_v29, 4  ;;  %v6640_v45 = vld [vmem:[%s7681_s17 + $0xa8] sm:$0xff] }
 0x571   : > { %v5335_v62 = vmul.f32 %v5334_v41, %v5330_v8  ;;  %v5342_v23 = vmul.f32 %v5341_v22, %v5330_v8  ;;  %v5456_v4 = vadd.s32 536870912, %v5455_v50  ;;  %v5543_v31 = vor.u32 %v5542_v38, %v5541_v21 }
 0x572   : > { %vm5345_vm9 = vweird.f32 %v10698_v7  ;;  %v5553_v10 = vsel %vm5547_vm8, %v5540_v2, 920167782  ;;  %v11096_v43 = vshll.u32 %v5520_v47, 8  ;;  %vm5544_vm10 = vcmp.lt.s32.totalorder %v11067_v29, 1 }
 0x573   : > { %v5336_v56 = vadd.f32 1.0, %v5335_v62  ;;  %v5343_v27 = vadd.f32 1.0, %v5342_v23  ;;  %v11092_v52 = vshrl.u32 %v5456_v4, 30  ;;  %vm5546_vm11 = vcmp.lt.s32.totalorder %v11067_v29, 3  ;;  %v6641_v4 = vld [vmem:[%s7681_s17 + $0x68] sm:$0xff] }
 0x574   : > { %v5552_v8 = vsel %vm5544_vm10, %v11084_v34, %v11086_v46  ;;  %v5554_v9 = vsel %vm5546_vm11, %v11088_v51, %v5553_v10  ;;  %vm5348_vm12 = vcmp.lt.s32.totalorder %v5347_v1, 2  ;;  %vm5349_vm14 = vcmp.eq.s32.totalorder %v5347_v1, 0 }
 0x575   : > { %v5344_v33 = vmul.f32 %v5343_v27, %v5328_v6  ;;  %v5353_v15 = vxor.u32 2147483648, %v5336_v56  ;;  %v5458_v25 = vshll.u32 %v11092_v52, 30  ;;  %v5556_v6 = vsel %vm5544_vm10, %v11086_v46, %v11088_v51 }
 0x576   : > { %v5557_v61 = vsel %vm5547_vm8, %v5543_v31, 1326507024  ;;  %vm5352_vm2 = vcmp.eq.s32.totalorder %v5347_v1, 2  ;;  %vm5545_vm13 = vcmp.lt.s32.totalorder %v11067_v29, 2  ;;  %v5561_v55 = vand.u32 65535, %v11096_v43 }
 0x577   : > { %v5350_v48 = vxor.u32 2147483648, %v5344_v33  ;;  %v11114_v49 = vsub.s32 %v5455_v50, %v5458_v25  ;;  %v5558_v20 = vsel %vm5546_vm11, %v5540_v2, %v5557_v61  ;;  %v5354_v58 = vsel %vm5352_vm2, %v5353_v15, %v5344_v33  ;;  %v6642_v33 = vld [vmem:[%s7681_s17 + $0x28] sm:$0xff] }
 0x578   : > { %v5555_v18 = vsel %vm5545_vm13, %v5552_v8, %v5554_v9  ;;  %v5559_v37 = vsel %vm5545_vm13, %v5556_v6, %v5558_v20  ;;  %v5562_v54 = vshrl.u32 %v11096_v43, 16  ;;  %v5451_v22 = vadd.s32 %v11061_v5, %v11059_v59 }
 0x579   : > { %v5351_v30 = vsel %vm5349_vm14, %v5336_v56, %v5350_v48  ;;  %vm5460_vm15 = vcmp.lt.s32.totalorder %v11114_v49, 0  ;;  %v5461_v39 = vsub.s32 0, %v11114_v49  ;;  %v5563_v47 = vand.u32 65535, %v5559_v37 }
 0x57a   : > { %v5355_v17 = vsel %vm5348_vm12, %v5351_v30, %v5354_v58  ;;  %v5564_v63 = vshrl.u32 %v5559_v37, 16  ;;  %v5585_v11 = vand.u32 65535, %v5555_v18  ;;  %v5586_v35 = vshrl.u32 %v5555_v18, 16 }
 0x57b   : > { %v5356_v24 = vsel %vm5345_vm9, nan, %v5355_v17  ;;  %v5462_v42 = vsel %vm5460_vm15, %v5461_v39, %v11114_v49  ;;  %v5567_v32 = vmul.u32 %v5563_v47, %v5562_v54  ;;  %v5565_v41 = vmul.u32 %v5563_v47, %v5561_v55 }
 0x57c   : > { %v5977_v12 = vmul.f32 %v5887_v14, %v5356_v24  ;;  %v5463_v19 = vclz %v5462_v42  ;;  %v5566_v53 = vmul.u32 %v5564_v63, %v5561_v55  ;;  %v5568_v57 = vmul.u32 %v5564_v63, %v5562_v54 }
 0x57d   : > { %v5587_v40 = vmul.u32 %v5585_v11, %v5561_v55  ;;  %v5588_v50 = vmul.u32 %v5586_v35, %v5561_v55  ;;  %v5571_v2 = vshll.u32 %v5567_v32, 16  ;;  %v5589_v1 = vmul.u32 %v5585_v11, %v5562_v54 }
 0x57e   : > { %6179 = vst [vmem:[%s7681_s17 + $0xe8] sm:$0xff] %v5977_v12  ;;  %6102 = vmatpush.msrb.mxu1 %v5977_v12  ;;  %v6480_v60 = vadd.s32 4294967294, %v5463_v19  ;;  %v5569_v7 = vshll.u32 %v5566_v53, 16  ;;  %v5570_v59 = vshrl.u32 %v5566_v53, 16  ;;  %v5590_v10 = vmul.u32 %v5586_v35, %v5562_v54 }
 0x57f   : > { %v5591_v21 = vshll.u32 %v5588_v50, 16  ;;  %v5593_v48 = vshll.u32 %v5589_v1, 16  ;;  %v5549_v14 = vsel %vm5547_vm8, %v11088_v51, 2102212464  ;;  %v5572_v17 = vshrl.u32 %v5567_v32, 16 }
 0x580   : > { %6103 = vmatpush.msrb.mxu1 %v6640_v45  ;;  %vm6481_vm1 = vcmp.lt.s32.totalorder %v6480_v60, 0  ;;  %vm5573_vm3 = vc.u32 %v5565_v41, %v5569_v7  ;;  %v5575_v38 = vadd.s32 %v5569_v7, %v5565_v41  ;;  %v5592_v24 = vshrl.u32 %v5588_v50, 16 }
 0x581   : > { %v5466_v62 = vsel %vm6481_vm1, 0, %v6480_v60  ;;  %v5574_v23 = vsel %vm5573_vm3, 1, %v11363_v44  ;;  %vm5595_vm5 = vc.u32 %v5587_v40, %v5591_v21  ;;  %v5597_v61 = vadd.s32 %v5591_v21, %v5587_v40 }
 0x582   : > { %6104 = vmatpush.msrb.mxu1 %v6641_v4  ;;  %v5467_v56 = vsub.s32 32, %v5466_v62  ;;  %v5471_v27 = vsub.s32 4294967266, %v5466_v62  ;;  %v5576_v5 = vadd.s32 %v5574_v23, %v5568_v57  ;;  %v5468_v31 = vshll.u32 %v11114_v49, %v5466_v62 }
 0x583   : > { %vm5577_vm4 = vc.u32 %v5575_v38, %v5571_v2  ;;  %v5596_v9 = vsel %vm5595_vm5, 1, %v11363_v44  ;;  %v5528_v49 = vshrl.u32 %v11359_v3, %v11057_v0  ;;  %vm5599_vm6 = vc.u32 %v5597_v61, %v5593_v48 }
 0x584   : > { %6105 = vmatpush.msrb.mxu1 %v6642_v33  ;;  %v5469_v15 = vshrl.u32 %v5451_v22, %v5467_v56  ;;  %v5472_v25 = vadd.s32 127, %v5471_v27  ;;  %v5578_v8 = vsel %vm5577_vm4, 1, %v11363_v44  ;;  %v5598_v20 = vadd.s32 %v5596_v9, %v5590_v10 }
 0x585   : > { %v5580_v6 = vadd.s32 %v5578_v8, %v5576_v5  ;;  %v5600_v39 = vsel %vm5599_vm6, 1, %v11363_v44  ;;  %v5548_v55 = vsel %vm5544_vm10, %v5528_v49, %v11084_v34  ;;  %v5550_v3 = vsel %vm5546_vm11, %v11086_v46, %v5549_v14 }
 0x586   : > { %v5470_v30 = vor.u32 %v5469_v15, %v5468_v31  ;;  %v5473_v58 = vshll.u32 %v5472_v25, 23  ;;  %v5602_v54 = vadd.s32 %v5600_v39, %v5598_v20  ;;  %v5594_v51 = vshrl.u32 %v5589_v1, 16 }
 0x587   : > { %v5581_v18 = vadd.s32 %v5580_v6, %v5570_v59  ;;  %v5601_v11 = vadd.s32 %v5597_v61, %v5593_v48  ;;  %v5551_v44 = vsel %vm5545_vm13, %v5548_v55, %v5550_v3  ;;  %vm5359_vm8 = vcmp.lt.s32.totalorder %v10913_v16, 0  ;;  %v6643_v3 = vld [vmem:[%s7681_s17 + $0xb0] sm:$0xff] }
 0x588   : > { %v5474_v37 = vor.u32 4788187, %v5473_v58  ;;  %v5477_v63 = vcvt.s32.f32 %v5470_v30  ;;  %v5603_v12 = vadd.s32 %v5602_v54, %v5592_v24  ;;  %vm11157_vm9 = vcmp.le.f32.partialorder %v5357_v13, 0.7853982  ;;  %v5916_v30 = vpop.f32.mrf.mxu2 }
 0x589   : > { %v5582_v0 = vadd.s32 %v5581_v18, %v5572_v17  ;;  %v5605_v32 = vmul.u32 %v11096_v43, %v5551_v44  ;;  %v5481_v60 = vsub.s32 4, %v11092_v52  ;;  %vm5500_vm11 = vweird.f32 %v10913_v16 }
 0x58a   : > { %v5475_v47 = vand.u32 2147483647, %v5474_v37  ;;  %v5604_v35 = vadd.s32 %v5603_v12, %v5594_v51  ;;  %vm5514_vm15 = vcmp.lt.s32.totalorder %v10930_v26, 0  ;;  %vm11187_vm1 = vcmp.le.f32.partialorder %v5512_v36, 0.7853982 }
 0x58b   : > { %vm5607_vm7 = vc.u32 %v5582_v0, %v5601_v11  ;;  %v5482_v13 = vsel %vm5359_vm8, %v5481_v60, %v11092_v52  ;;  %v5606_v14 = vadd.s32 %v5601_v11, %v5582_v0  ;;  %v5980_v0 = vld [vmem:[%s11268_s5] sm:$0x3]  ;;  %v6644_v11 = vld [vmem:[%s7681_s17 + $0x70] sm:$0xff]  ;;  %vm5655_vm6 = vweird.f32 %v10930_v26 }
 0x58c   : > { %v5478_v42 = vmul.f32 %v5477_v63, %v5475_v47  ;;  %v5608_v34 = vadd.s32 1, %v5604_v35  ;;  %v5484_v43 = vsel %vm11157_vm9, 0, %v5482_v13  ;;  %6517 = vmatmul.msk.f32.vlgmr.msra.gmra.mxu0 %vm5703_vm0, %v5980_v0  ;;  %6518 = vmatmul.msk.f32.vlgmr.msra.gmra.mxu1 %vm5703_vm0, %v5980_v0 }
 0x58d   : > { %v5501_v27 = vadd.s32 3, %v5484_v43  ;;  %6519 = vmatmul.msk.f32.vlgmr.msra.gmra.mxu2 %vm5703_vm0, %v5980_v0  ;;  %6520 = vmatmul.msk.f32.vlgmr.msra.gmra.mxu3 %vm5703_vm0, %v5980_v0 }
 0x58e   : > { %v5479_v19 = vxor.u32 2147483648, %v5478_v42  ;;  %v5609_v41 = vsel %vm5607_vm7, %v5608_v34, %v5604_v35  ;;  %v6645_v35 = vld [vmem:[%s7681_s17 + $0x30] sm:$0xff] }
 0x58f   : > { %v5610_v22 = vadd.s32 %v5609_v41, %v5605_v32  ;;  %v5502_v15 = vand.u32 3, %v5501_v27 }
 0x590   : > { %v5480_v46 = vsel %vm5359_vm8, %v5479_v19, %v5478_v42 }
 0x591   : > { %v5483_v29 = vsel %vm11157_vm9, %v10913_v16, %v5480_v46  ;;  %v5611_v50 = vadd.s32 536870912, %v5610_v22  ;;  %vm5504_vm12 = vcmp.eq.s32.totalorder %v5502_v15, 0  ;;  %vm5507_vm14 = vcmp.eq.s32.totalorder %v5502_v15, 2 }
 0x592   : > { %v5485_v7 = vmul.f32 %v5483_v29, %v5483_v29  ;;  %vm5503_vm13 = vcmp.lt.s32.totalorder %v5502_v15, 2 }
 0x593   : > { %v11167_v38 = vshrl.u32 %v5611_v50, 30 }
 0x594   : > { %v5486_v57 = vmul.f32 -0.001358992, %v5485_v7  ;;  %v5493_v40 = vmul.f32 -0.00019511016, %v5485_v7  ;;  %6521 = vmatmul.msk.f32.vlgmr.msrb.gmra.mxu0 %vm5703_vm0, %v5980_v0  ;;  %6522 = vmatmul.msk.f32.vlgmr.msrb.gmra.mxu1 %vm5703_vm0, %v5980_v0 }
 0x595   : > { %v5613_v1 = vshll.u32 %v11167_v38, 30  ;;  %v5636_v53 = vsub.s32 4, %v11167_v38 }
 0x596   : > { %v5487_v45 = vadd.f32 0.041655596, %v5486_v57  ;;  %v5494_v2 = vadd.f32 0.008332121, %v5493_v40 }
 0x597   : > { %v5614_v56 = vsub.s32 %v5610_v22, %v5613_v1  ;;  %v5637_v36 = vsel %vm5514_vm15, %v5636_v53, %v11167_v38 }
 0x598   : > { %v5488_v62 = vmul.f32 %v5487_v45, %v5485_v7  ;;  %v5495_v23 = vmul.f32 %v5494_v2, %v5485_v7  ;;  %v5639_v22 = vsel %vm11187_vm1, 0, %v5637_v36 }
 0x599   : > { %vm5615_vm10 = vcmp.lt.s32.totalorder %v5614_v56, 0  ;;  %v5616_v31 = vsub.s32 0, %v5614_v56  ;;  %v5656_v45 = vadd.s32 3, %v5639_v22 }
 0x59a   : > { %v5489_v21 = vadd.f32 -0.4999988, %v5488_v62  ;;  %v5496_v4 = vadd.f32 -0.16666654, %v5495_v23 }
 0x59b   : > { %v5617_v33 = vsel %vm5615_vm10, %v5616_v31, %v5614_v56  ;;  %v5657_v1 = vand.u32 3, %v5656_v45 }
 0x59c   : > { %v5490_v59 = vmul.f32 %v5489_v21, %v5485_v7  ;;  %v5497_v5 = vmul.f32 %v5496_v4, %v5485_v7  ;;  %v5618_v25 = vclz %v5617_v33  ;;  %v6647_v33 = vld [vmem:[%s7681_s17 + $0x38] sm:$0xff] }
 0x59d   : > { %vm5659_vm3 = vcmp.eq.s32.totalorder %v5657_v1, 0  ;;  %vm5662_vm4 = vcmp.eq.s32.totalorder %v5657_v1, 2  ;;  %vm5658_vm5 = vcmp.lt.s32.totalorder %v5657_v1, 2 }
 0x59e   : > { %v5491_v52 = vadd.f32 1.0, %v5490_v59  ;;  %v5498_v10 = vadd.f32 1.0, %v5497_v5  ;;  %v6483_v6 = vadd.s32 4294967294, %v5618_v25  ;;  %v5945_v59 = vpop.f32.mrf.mxu3 }
 0x5a0   : > { %v5499_v8 = vmul.f32 %v5498_v10, %v5483_v29  ;;  %v5508_v9 = vxor.u32 2147483648, %v5491_v52  ;;  %vm6484_vm2 = vcmp.lt.s32.totalorder %v6483_v6, 0  ;;  %v6646_v10 = vld [vmem:[%s7681_s17 + $0x78] sm:$0xff] }
 0x5a1   : > { %v5621_v58 = vsel %vm6484_vm2, 0, %v6483_v6 }
 0x5a2   : > { %v5505_v48 = vxor.u32 2147483648, %v5499_v8  ;;  %v5509_v20 = vsel %vm5507_vm14, %v5508_v9, %v5499_v8  ;;  %v5622_v18 = vsub.s32 32, %v5621_v58  ;;  %v5626_v37 = vsub.s32 4294967266, %v5621_v58 }
 0x5a3   : > { %v5623_v55 = vshll.u32 %v5614_v56, %v5621_v58 }
 0x5a4   : > { %v5506_v61 = vsel %vm5504_vm12, %v5491_v52, %v5505_v48  ;;  %v5624_v24 = vshrl.u32 %v5606_v14, %v5622_v18  ;;  %v5627_v54 = vadd.s32 127, %v5626_v37 }
 0x5a5   : > { %v5510_v49 = vsel %vm5503_vm13, %v5506_v61, %v5509_v20 }
 0x5a6   : > { %v5511_v17 = vsel %vm5500_vm11, nan, %v5510_v49  ;;  %v5625_v16 = vor.u32 %v5624_v24, %v5623_v55  ;;  %v5628_v47 = vshll.u32 %v5627_v54, 23 }
 0x5a7   : > { %v5978_v39 = vmul.f32 %v5916_v30, %v5511_v17 }
 0x5a8   : > { %v5629_v63 = vor.u32 4788187, %v5628_v47  ;;  %v5632_v12 = vcvt.s32.f32 %v5625_v16 }
 0x5a9   : > { %6180 = vst [vmem:[%s7681_s17 + $0xf0] sm:$0xff] %v5978_v39  ;;  %6122 = vmatpush.msrb.mxu2 %v5978_v39 }
 0x5aa   : > { %v5630_v51 = vand.u32 2147483647, %v5629_v63 }
 0x5ab   : > { %6123 = vmatpush.msrb.mxu2 %v6643_v3 }
 0x5ac   : > { %v5633_v42 = vmul.f32 %v5632_v12, %v5630_v51 }
 0x5ad   : > { %6124 = vmatpush.msrb.mxu2 %v6644_v11 }
 0x5ae   : > { %v5634_v44 = vxor.u32 2147483648, %v5633_v42 }
 0x5af   : > { %6125 = vmatpush.msrb.mxu2 %v6645_v35 }
 0x5b0   : > { %v5635_v34 = vsel %vm5514_vm15, %v5634_v44, %v5633_v42  ;;  %6523 = vmatmul.msk.f32.vlgmr.msrb.gmra.mxu2 %vm5703_vm0, %v5980_v0 }
 0x5b1   : > { %v5638_v46 = vsel %vm11187_vm1, %v10930_v26, %v5635_v34 }
 0x5b2   : > { %v5640_v32 = vmul.f32 %v5638_v46, %v5638_v46 }
 0x5b4   : > { %v5641_v60 = vmul.f32 -0.001358992, %v5640_v32  ;;  %v5648_v29 = vmul.f32 -0.00019511016, %v5640_v32 }
 0x5b6   : > { %v5642_v41 = vadd.f32 0.041655596, %v5641_v60  ;;  %v5649_v7 = vadd.f32 0.008332121, %v5648_v29 }
 0x5b8   : > { %v5643_v57 = vmul.f32 %v5642_v41, %v5640_v32  ;;  %v5650_v40 = vmul.f32 %v5649_v7, %v5640_v32 }
 0x5ba   : > { %v5644_v50 = vadd.f32 -0.4999988, %v5643_v57  ;;  %v5651_v13 = vadd.f32 -0.16666654, %v5650_v40 }
 0x5bc   : > { %v5645_v2 = vmul.f32 %v5644_v50, %v5640_v32  ;;  %v5652_v43 = vmul.f32 %v5651_v13, %v5640_v32 }
 0x5be   : > { %v5646_v62 = vadd.f32 1.0, %v5645_v2  ;;  %v5653_v23 = vadd.f32 1.0, %v5652_v43 }
 0x5c0   : > { %v5654_v21 = vmul.f32 %v5653_v23, %v5638_v46  ;;  %v5663_v4 = vxor.u32 2147483648, %v5646_v62 }
 0x5c2   : > { %v5660_v38 = vxor.u32 2147483648, %v5654_v21  ;;  %v5664_v27 = vsel %vm5662_vm4, %v5663_v4, %v5654_v21 }
 0x5c4   : > { %v5661_v56 = vsel %vm5659_vm3, %v5646_v62, %v5660_v38 }
 0x5c5   : > { %v5665_v5 = vsel %vm5658_vm5, %v5661_v56, %v5664_v27 }
 0x5c6   : > { %v5666_v31 = vsel %vm5655_vm6, nan, %v5665_v5 }
 0x5c7   : > { %v5979_v52 = vmul.f32 %v5945_v59, %v5666_v31 }
 0x5c9   : > { %6181 = vst [vmem:[%s7681_s17 + $0xf8] sm:$0xff] %v5979_v52  ;;  %6142 = vmatpush.msrb.mxu3 %v5979_v52 }
 0x5cb   : > { %6143 = vmatpush.msrb.mxu3 %v10889_v28 }
 0x5cd   : > { %6144 = vmatpush.msrb.mxu3 %v6646_v10 }
 0x5cf   : > { %6145 = vmatpush.msrb.mxu3 %v6647_v33 }
 0x5d0   : > { %6524 = vmatmul.msk.f32.vlgmr.msrb.gmra.mxu3 %vm5703_vm0, %v5980_v0 }
 0x5d1   : > { %6735 = shalt.err (!%p6732_p12)
}
 0x5d2   : > { %s6827_s17 = smov 1024   ;;  %s6828_s20 = smov 2048   ;;  %v5985_v26 = vpop.permute.xlu0 %5984  ;;  %vm6196_vm0 = vcmask 1041408   ;;  %vm6198_vm7 = vcmask 1045508   ;;  %vm6200_vm8 = vcmask 1043456  }
 0x5d3   : > { %s6829_s24 = smov 64   ;;  %s6384_s29 = sshll.u32 %s6970_s10, 4 }
 0x5d4   : > { %6542 = dma.vmem_to_hbm [thread:$0]  (%p6942_p7), %s6228_s11, 4096, %s6230_s18, %s6210_s21, %s6827_s17, %s6828_s20, %s6829_s24  }
 0x5d5   : > { %s369_s16 = scalar_lea.vmem [#allocation8], %s6384_s29  ;;  %s6535_s11 = sshll.u32 %s6896_s9, 4 }
 0x5d6   : > { %s6243_s13 = scalar_lea.hbm %s11271_s8, %s6535_s11  ;;  %s6245_s22 = sshll.u32 %s369_s16, 4  ;;  %s6246_s22 = int_to_ptr.vmem [resolvable:$true] %s6245_s22 }
 0x5d7   : > { %s6247_s23 = sshll.u32 %s6243_s13, 4  ;;  %s6215_s9 = scalar_lea.sflag [#allocation9], %s6970_s10  ;;  %s6248_s23 = int_to_ptr.hbm [resolvable:$true] %s6247_s23 }
 0x5d8   : > { %s6750_s14 = sshra.s32 %s6248_s23, 4  ;;  %s6756_s17 = scalar_lea.hbm %s11271_s8, 32  ;;  %s6751_s14 = int_to_ptr.hbm [resolvable:$true] %s6750_s14 }
 0x5d9   : > { %s6752_s15 = scalar_lea.hbm %s6751_s14, 16  ;;  %p6757_p5 = scmp.lt.s32.totalorder %s6751_s14, %s11271_s8 }
 0x5da   : > { %p6753_p13 = scmp.ne.s32.totalorder %s6751_s14, %s6752_s15  ;;  %p6758_p1 = scmp.lt.s32.totalorder %s6756_s17, %s6752_s15 }
 0x5dc   : > { %p6754_p0 = pnand %p6753_p13, %p6942_p7  ;;  %p6759_p4 = por %p6758_p1, %p6757_p5 }
 0x5de   : > { %p6755_p3 = pneg %p6754_p0 }
 0x5e0   : > { %p6760_p8 = pnand %p6759_p4, %p6755_p3 }
 0x609   : > { %v6027_v28 = vpop.f32.mrf.mxu1  ;;  %v6007_v25 = vpop.f32.mrf.mxu0 }
 0x60a   : > { %v6028_v15 = vadd.f32 %v6027_v28, %v5985_v26  ;;  %v6008_v20 = vadd.f32 %v6007_v25, %v5985_v26 }
 0x60c   : > { %v6190_v6 = vrot.slane %v6028_v15, 6 }
 0x60e   : > { %v6197_v49 = vsel %vm6196_vm0, %v6008_v20, %v6190_v6 }
 0x610   : > { %v6047_v8 = vpop.f32.mrf.mxu2  ;;  %v6067_v9 = vpop.f32.mrf.mxu3 }
 0x611   : > { %v6048_v48 = vadd.f32 %v6047_v8, %v5985_v26  ;;  %v6068_v61 = vadd.f32 %v6067_v9, %v5985_v26  ;;  %v6107_v37 = vpop.f32.mrf.mxu1  ;;  %v6087_v24 = vpop.f32.mrf.mxu0 }
 0x612   : > { %v6108_v39 = vadd.f32 %v6107_v37, %v5985_v26  ;;  %v6088_v3 = vadd.f32 %v6087_v24, %v5985_v26 }
 0x613   : > { %v6191_v30 = vrot.slane %v6048_v48, 4  ;;  %v6192_v58 = vrot.slane %v6068_v61, 2 }
 0x614   : > { %v6193_v16 = vrot.slane %v6108_v39, 6 }
 0x615   : > { %v6199_v14 = vsel %vm6198_vm7, %v6191_v30, %v6192_v58 }
 0x616   : > { %v6201_v18 = vsel %vm6200_vm8, %v6197_v49, %v6199_v14  ;;  %v6202_v51 = vsel %vm6196_vm0, %v6088_v3, %v6193_v16 }
 0x617   : > { %6207 = vst [vmem:[%s369_s16] sm:$0xff] %v6201_v18 }
 0x633   : > { %v6127_v17 = vpop.f32.mrf.mxu2 }
 0x634   : > { %v6128_v55 = vadd.f32 %v6127_v17, %v5985_v26 }
 0x636   : > { %v6194_v47 = vrot.slane %v6128_v55, 4 }
 0x653   : > { %v6147_v54 = vpop.f32.mrf.mxu3 }
 0x654   : > { %v6148_v63 = vadd.f32 %v6147_v54, %v5985_v26 }
 0x656   : > { %v6195_v0 = vrot.slane %v6148_v63, 2 }
 0x658   : > { %v6203_v12 = vsel %vm6198_vm7, %v6194_v47, %v6195_v0 }
 0x659   : > { %v6204_v42 = vsel %vm6200_vm8, %v6202_v51, %v6203_v12 }
 0x65a   : > { %6208 = vst [vmem:[%s369_s16 + $0x8] sm:$0xff] %v6204_v42 }
 0x65b   : > { %6763 = shalt.err (!%p6760_p8)
}
 0x65c   : > { %6543 = dma.vmem_to_hbm [thread:$0]  (%p6942_p7), %s6246_s22, 256, %s6248_s23, %s6215_s9  }
 0x65d PF: > { %s6259_s10 = sand.u32 1, %s6798_s27   ;;  %p11477_p11 = scmp.ge.s32.totalorder %s6810_s30, 2 }
 0x65e   : > { %s6260_s29 = scalar_lea.sflag [#allocation4], %s6259_s10 }
 0x65f   : > { %p6555_p9 = pnand %p11477_p11, %p6910_p6 }
 0x661   : > { %p6556_p2 = pneg %p6555_p9 }
 0x663   : > { %6789 = dma.done.wait (%p6556_p2), %s6260_s29, 4096  }
 0x664   : > { %6791 = vsyncadd (%p6556_p2), %s6260_s29, 4294963200  ;;  %s6270_s16 = scalar_lea.sflag [#allocation9], %s6259_s10 }
 0x665   : > { %6793 = dma.done.wait (%p6556_p2), %s6270_s16, 256  }
 0x666   : > { %6795 = vsyncadd (%p6556_p2), %s6270_s16, 4294967040  ;;  %s11478_s11 = sld [smem:[#allocation14_spill]]  ;;  %p26_p7 = scmp.ge.s32.totalorder %s6928_s19, 4  }
 0x667   : > { %s11479_s29 = sld [smem:[#allocation15_spill]]  ;;  %s11480_s27 = smov %s6802_s28 }
 0x668   : > { %s11482_s30 = smov %s6928_s19  ;;  %28 = sbr.rel (!%p26_p7) target bundleno = 10 (0xa), region = 119 }
 0x66c   : > { %s11481_s28 = smov %s11478_s11 }
 0x66d   :  { %6276 = vsyncpa [#allocation3], 1 }
 0x66e   :  { %6278 = vsyncpa [#allocation3 + $0x1], 1 }
 0x66f   :  { %6279 = vsyncpa [#allocation6], 1 }
 0x670   :  { %6280 = vsyncpa [#allocation4], 1 }
 0x671   :  { %6282 = vsyncpa [#allocation4 + $0x1], 1 }
 0x672   :  { %6283 = vsyncpa [#allocation9], 1 }
 0x673   :  { %6285 = vsyncpa [#allocation9 + $0x1], 1 }

</bundles_post_ra>
